<compile_context>
chip_gen: v7x
topology: tpu7x:2x2x1
jax: 0.10.0
libtpu: 0.0.40
codegen_flags: <defaults>
</compile_context>

<pallas_src>
import jax
import jax.numpy as jnp
import numpy as np
from jax.experimental import pallas as pl
from jax.experimental.pallas import tpu as pltpu


def _upsample_conv_kernel(x_ref, w_ref, b_ref, o_ref, xpad_ref):
    """x_ref   : (1, Cin, H, W)    original-resolution activation (one batch element), VMEM
       w_ref   : (16*Cin*Cout,)    SMEM, phase-combined 2x2 weights, flat index
                                   ((((a*2+b)*2+dy)*2+dx)*Cin+ci)*Cout+co
       b_ref   : (Cout,)           SMEM bias
       o_ref   : (1, Cout, 2H, 2W) VMEM output
       xpad_ref: (Cin, H+2, W+2)   VMEM scratch: zero-padded copy of the input
    """
    _, Cin, H, W = x_ref.shape
    Cout = o_ref.shape[1]
    H2, W2 = 2 * H, 2 * W

    # ---- fused zero-pad ('same' on the upsampled image == 1-pixel pad of the original) ----
    xpad_ref[...] = jnp.zeros_like(xpad_ref)
    xpad_ref[:, 1:H + 1, 1:W + 1] = x_ref[0]

    # Nine shifted original-resolution views (row shift r, col shift c), each (Cin, H, W).
    sh = [[xpad_ref[:, r:r + H, c:c + W] for c in range(3)] for r in range(3)]

    # Constant 0/1 interleave matrices (built from 2-D iota; exact through the f32 matmul).
    #   column scatter S[b][j, 2j+b] = 1 : (W, 2W)
    #   row scatter    R[a][2i+a, i] = 1 : (2H, H)
    jj = jax.lax.broadcasted_iota(jnp.int32, (W, W2), 0)
    qq = jax.lax.broadcasted_iota(jnp.int32, (W, W2), 1)
    S = [(qq == 2 * jj + b).astype(jnp.float32) for b in range(2)]
    pp = jax.lax.broadcasted_iota(jnp.int32, (H2, H), 0)
    ii = jax.lax.broadcasted_iota(jnp.int32, (H2, H), 1)
    R = [(pp == 2 * ii + a).astype(jnp.float32) for a in range(2)]

    def widx(a, b, dy, dx, ci, co):
        return ((((a * 2 + b) * 2 + dy) * 2 + dx) * Cin + ci) * Cout + co

    for co in range(Cout):
        row_imgs = []
        for a in range(2):
            col_imgs = []
            for b in range(2):
                # Phase (a, b): 2x2 conv on original-resolution data, weights from SMEM
                # broadcast over the (H, W) tile (W in lanes) -> pure VPU MACs.
                acc = jnp.zeros((H, W), jnp.float32)
                for ci in range(Cin):
                    for dy in range(2):
                        for dx in range(2):
                            acc = acc + w_ref[widx(a, b, dy, dx, ci, co)] * sh[a + dy][b + dx][ci]
                col_imgs.append(acc)
            # Interleave even/odd output columns -> (H, 2W)  (exact 0/1 scatter matmul).
            row_imgs.append(
                jnp.dot(col_imgs[0], S[0], preferred_element_type=jnp.float32)
                + jnp.dot(col_imgs[1], S[1], preferred_element_type=jnp.float32))
        # Interleave even/odd output rows -> (2H, 2W), add bias, single dense store.
        y = (jnp.dot(R[0], row_imgs[0], preferred_element_type=jnp.float32)
             + jnp.dot(R[1], row_imgs[1], preferred_element_type=jnp.float32))
        o_ref[0, co, :, :] = (y + b_ref[co]).astype(o_ref.dtype)


def upsample_block_forward(x_nchw, weight, bias):
    """x_nchw: (B, Cin, H, W);  weight: (Cout, Cin, 3, 3);  bias: (Cout,)
    Returns (B, Cout, 2H, 2W), matching PyTorch UpSampleBlock.forward semantics."""
    B, Cin, H, W = x_nchw.shape
    Cout = weight.shape[0]
    H2, W2 = 2 * H, 2 * W

    # ---- tiny weight prep in plain JAX (O(9*Cin*Cout) elements) ----
    # Fold nearest-x2 into the 3x3 kernel: output phase a (rows) / b (cols) only ever sees a
    # 2x2 window of DISTINCT original pixels; sel[a, tap, k] marks which original kernel rows
    # (cols) fold into each 2x2 phase tap.
    w_hw = jnp.transpose(weight, (2, 3, 1, 0)).astype(jnp.float32)        # (3, 3, Cin, Cout)
    sel = jnp.array([[[1., 0., 0.], [0., 1., 1.]],
                     [[1., 1., 0.], [0., 0., 1.]]], dtype=jnp.float32)     # (2 phase, 2 tap, 3 k)
    wc = jnp.einsum('adk,bel,klio->abdeio', sel, sel, w_hw)                # (2,2,2,2,Cin,Cout)
    w_flat = wc.reshape(-1)
    b_flat = bias.astype(jnp.float32)

    return pl.pallas_call(
        _upsample_conv_kernel,
        out_shape=jax.ShapeDtypeStruct((B, Cout, H2, W2), x_nchw.dtype),
        grid_spec=pltpu.PrefetchScalarGridSpec(
            num_scalar_prefetch=0,
            grid=(B,),
            in_specs=[
                pl.BlockSpec((1, Cin, H, W), lambda b: (b, 0, 0, 0)),
                pl.BlockSpec(memory_space=pltpu.MemorySpace.SMEM),   # combined weights (scalars)
                pl.BlockSpec(memory_space=pltpu.MemorySpace.SMEM),   # bias (scalars)
            ],
            out_specs=pl.BlockSpec((1, Cout, H2, W2), lambda b: (b, 0, 0, 0)),
            scratch_shapes=[pltpu.VMEM((Cin, H + 2, W + 2), jnp.float32)],
        ),
        compiler_params=pltpu.CompilerParams(
            dimension_semantics=("parallel",)),
    )(x_nchw, w_flat, b_flat)


def _reference_forward(x_nchw, weight, bias):
    """Pure-JAX reference (nearest-x2 upsample + lax conv, 'same') for a sanity check."""
    up = jnp.repeat(jnp.repeat(x_nchw, 2, axis=2), 2, axis=3)
    return jax.lax.conv_general_dilated(
        up, weight, window_strides=(1, 1), padding='SAME',
        dimension_numbers=('NCHW', 'OIHW', 'NCHW'),
        precision=jax.lax.Precision.HIGHEST) + bias.reshape(1, -1, 1, 1)


if __name__ == "__main__":
    # UpSampleBlock's forward assert requires out_channels == in_channels.
    B, C, H, W = 2, 4, 16, 16
    key = jax.random.PRNGKey(0)
    kx, kw, kb = jax.random.split(key, 3)

    x = jax.random.normal(kx, (B, C, H, W), dtype=jnp.float32)
    fan_in = C * 3 * 3
    bound = 1.0 / np.sqrt(fan_in)
    weight = jax.random.uniform(kw, (C, C, 3, 3), jnp.float32, -bound, bound)
    bias = jax.random.uniform(kb, (C,), jnp.float32, -bound, bound)

    out = jax.block_until_ready(upsample_block_forward(x, weight, bias))
    assert out.shape == (B, C, 2 * H, 2 * W), out.shape

    ref = jax.block_until_ready(_reference_forward(x, weight, bias))
    np.testing.assert_allclose(np.asarray(out), np.asarray(ref), rtol=1e-4, atol=1e-4)

    print("KERNEL_OK")
</pallas_src>

<mosaic_0001>
module attributes {stable_mosaic.version = 11 : i64} {
  func.func @_upsample_conv_kernel(%arg0: i32, %arg1: memref<1x4x16x16xf32, #tpu.memory_space<vmem>>, %arg2: memref<256xf32, #tpu.memory_space<smem>>, %arg3: memref<4xf32, #tpu.memory_space<smem>>, %arg4: memref<1x4x32x32xf32, #tpu.memory_space<vmem>>, %arg5: memref<4x18x18xf32, #tpu.memory_space<vmem>>) attributes {dimension_semantics = [#tpu.dimension_semantics<parallel>], iteration_bounds = array<i64: 2>, scalar_prefetch = 0 : i64, scratch_operands = 1 : i64, tpu.core_type = #tpu.core_type<tc>, window_params = [{transform_indices = @transform_0, window_bounds = array<i64: 1, 4, 16, 16>}, {transform_indices = @transform_1, window_bounds = array<i64: 256>}, {transform_indices = @transform_2, window_bounds = array<i64: 4>}, {transform_indices = @transform_3, window_bounds = array<i64: 1, 4, 32, 32>}]} {
    %cst = arith.constant 0.000000e+00 : f32
    %0 = vector.broadcast %cst : f32 to vector<4x18x18xf32>
    %c0 = arith.constant 0 : index
    %c0_0 = arith.constant 0 : index
    %c0_1 = arith.constant 0 : index
    %1 = vector.load %arg5[%c0, %c0_0, %c0_1] : memref<4x18x18xf32, #tpu.memory_space<vmem>>, vector<4x18x18xf32>
    tpu.vector_store %arg5[%c0, %c0_0, %c0_1], %0 {strides = array<i32>} : memref<4x18x18xf32, #tpu.memory_space<vmem>>, vector<4x18x18xf32>,
    %c0_2 = arith.constant 0 : index
    %c0_3 = arith.constant 0 : index
    %c0_4 = arith.constant 0 : index
    %c0_5 = arith.constant 0 : index
    %2 = vector.load %arg1[%c0_2, %c0_3, %c0_4, %c0_5] : memref<1x4x16x16xf32, #tpu.memory_space<vmem>>, vector<1x4x16x16xf32>
    %3 = vector.shape_cast %2 : vector<1x4x16x16xf32> to vector<4x16x16xf32>
    %c0_6 = arith.constant 0 : index
    %c1 = arith.constant 1 : index
    %c1_7 = arith.constant 1 : index
    %4 = vector.load %arg5[%c0_6, %c1, %c1_7] : memref<4x18x18xf32, #tpu.memory_space<vmem>>, vector<4x16x16xf32>
    tpu.vector_store %arg5[%c0_6, %c1, %c1_7], %3 {strides = array<i32>} : memref<4x18x18xf32, #tpu.memory_space<vmem>>, vector<4x16x16xf32>,
    %c0_8 = arith.constant 0 : index
    %c0_9 = arith.constant 0 : index
    %c0_10 = arith.constant 0 : index
    %5 = vector.load %arg5[%c0_8, %c0_9, %c0_10] : memref<4x18x18xf32, #tpu.memory_space<vmem>>, vector<4x16x16xf32>
    %c0_11 = arith.constant 0 : index
    %c0_12 = arith.constant 0 : index
    %c1_13 = arith.constant 1 : index
    %6 = vector.load %arg5[%c0_11, %c0_12, %c1_13] : memref<4x18x18xf32, #tpu.memory_space<vmem>>, vector<4x16x16xf32>
    %c0_14 = arith.constant 0 : index
    %c0_15 = arith.constant 0 : index
    %c2 = arith.constant 2 : index
    %7 = vector.load %arg5[%c0_14, %c0_15, %c2] : memref<4x18x18xf32, #tpu.memory_space<vmem>>, vector<4x16x16xf32>
    %c0_16 = arith.constant 0 : index
    %c1_17 = arith.constant 1 : index
    %c0_18 = arith.constant 0 : index
    %8 = vector.load %arg5[%c0_16, %c1_17, %c0_18] : memref<4x18x18xf32, #tpu.memory_space<vmem>>, vector<4x16x16xf32>
    %c0_19 = arith.constant 0 : index
    %c1_20 = arith.constant 1 : index
    %c1_21 = arith.constant 1 : index
    %9 = vector.load %arg5[%c0_19, %c1_20, %c1_21] : memref<4x18x18xf32, #tpu.memory_space<vmem>>, vector<4x16x16xf32>
    %c0_22 = arith.constant 0 : index
    %c1_23 = arith.constant 1 : index
    %c2_24 = arith.constant 2 : index
    %10 = vector.load %arg5[%c0_22, %c1_23, %c2_24] : memref<4x18x18xf32, #tpu.memory_space<vmem>>, vector<4x16x16xf32>
    %c0_25 = arith.constant 0 : index
    %c2_26 = arith.constant 2 : index
    %c0_27 = arith.constant 0 : index
    %11 = vector.load %arg5[%c0_25, %c2_26, %c0_27] : memref<4x18x18xf32, #tpu.memory_space<vmem>>, vector<4x16x16xf32>
    %c0_28 = arith.constant 0 : index
    %c2_29 = arith.constant 2 : index
    %c1_30 = arith.constant 1 : index
    %12 = vector.load %arg5[%c0_28, %c2_29, %c1_30] : memref<4x18x18xf32, #tpu.memory_space<vmem>>, vector<4x16x16xf32>
    %c0_31 = arith.constant 0 : index
    %c2_32 = arith.constant 2 : index
    %c2_33 = arith.constant 2 : index
    %13 = vector.load %arg5[%c0_31, %c2_32, %c2_33] : memref<4x18x18xf32, #tpu.memory_space<vmem>>, vector<4x16x16xf32>
    %14 = tpu.iota {dimensions = array<i32: 0>} : vector<16x32xi32>
    %15 = tpu.iota {dimensions = array<i32: 1>} : vector<16x32xi32>
    %c2_i32 = arith.constant 2 : i32
    %16 = vector.broadcast %c2_i32 : i32 to vector<16x32xi32>
    %17 = arith.muli %16, %14 : vector<16x32xi32>
    %c0_i32 = arith.constant 0 : i32
    %18 = vector.broadcast %c0_i32 : i32 to vector<16x32xi32>
    %19 = arith.addi %17, %18 : vector<16x32xi32>
    %20 = arith.cmpi eq, %15, %19 : vector<16x32xi32>
    %21 = arith.extui %20 : vector<16x32xi1> to vector<16x32xi32>
    %22 = arith.sitofp %21 : vector<16x32xi32> to vector<16x32xf32>
    %c2_i32_34 = arith.constant 2 : i32
    %23 = vector.broadcast %c2_i32_34 : i32 to vector<16x32xi32>
    %24 = arith.muli %23, %14 : vector<16x32xi32>
    %c1_i32 = arith.constant 1 : i32
    %25 = vector.broadcast %c1_i32 : i32 to vector<16x32xi32>
    %26 = arith.addi %24, %25 : vector<16x32xi32>
    %27 = arith.cmpi eq, %15, %26 : vector<16x32xi32>
    %28 = arith.extui %27 : vector<16x32xi1> to vector<16x32xi32>
    %29 = arith.sitofp %28 : vector<16x32xi32> to vector<16x32xf32>
    %30 = tpu.iota {dimensions = array<i32: 0>} : vector<32x16xi32>
    %31 = tpu.iota {dimensions = array<i32: 1>} : vector<32x16xi32>
    %c2_i32_35 = arith.constant 2 : i32
    %32 = vector.broadcast %c2_i32_35 : i32 to vector<32x16xi32>
    %33 = arith.muli %32, %31 : vector<32x16xi32>
    %c0_i32_36 = arith.constant 0 : i32
    %34 = vector.broadcast %c0_i32_36 : i32 to vector<32x16xi32>
    %35 = arith.addi %33, %34 : vector<32x16xi32>
    %36 = arith.cmpi eq, %30, %35 : vector<32x16xi32>
    %37 = arith.extui %36 : vector<32x16xi1> to vector<32x16xi32>
    %38 = arith.sitofp %37 : vector<32x16xi32> to vector<32x16xf32>
    %c2_i32_37 = arith.constant 2 : i32
    %39 = vector.broadcast %c2_i32_37 : i32 to vector<32x16xi32>
    %40 = arith.muli %39, %31 : vector<32x16xi32>
    %c1_i32_38 = arith.constant 1 : i32
    %41 = vector.broadcast %c1_i32_38 : i32 to vector<32x16xi32>
    %42 = arith.addi %40, %41 : vector<32x16xi32>
    %43 = arith.cmpi eq, %30, %42 : vector<32x16xi32>
    %44 = arith.extui %43 : vector<32x16xi1> to vector<32x16xi32>
    %45 = arith.sitofp %44 : vector<32x16xi32> to vector<32x16xf32>
    %cst_39 = arith.constant 0.000000e+00 : f32
    %46 = vector.broadcast %cst_39 : f32 to vector<16x16xf32>
    %c0_40 = arith.constant 0 : index
    %47 = memref.load %arg2[%c0_40] : memref<256xf32, #tpu.memory_space<smem>>
    %48 = vector.extract_strided_slice %5 {offsets = [0, 0, 0], sizes = [1, 16, 16], strides = [1, 1, 1]} : vector<4x16x16xf32> to vector<1x16x16xf32>
    %49 = vector.shape_cast %48 : vector<1x16x16xf32> to vector<16x16xf32>
    %50 = vector.broadcast %47 : f32 to vector<16x16xf32>
    %51 = arith.mulf %50, %49 : vector<16x16xf32>
    %52 = arith.addf %46, %51 : vector<16x16xf32>
    %c16 = arith.constant 16 : index
    %53 = memref.load %arg2[%c16] : memref<256xf32, #tpu.memory_space<smem>>
    %54 = vector.extract_strided_slice %6 {offsets = [0, 0, 0], sizes = [1, 16, 16], strides = [1, 1, 1]} : vector<4x16x16xf32> to vector<1x16x16xf32>
    %55 = vector.shape_cast %54 : vector<1x16x16xf32> to vector<16x16xf32>
    %56 = vector.broadcast %53 : f32 to vector<16x16xf32>
    %57 = arith.mulf %56, %55 : vector<16x16xf32>
    %58 = arith.addf %52, %57 : vector<16x16xf32>
    %c32 = arith.constant 32 : index
    %59 = memref.load %arg2[%c32] : memref<256xf32, #tpu.memory_space<smem>>
    %60 = vector.extract_strided_slice %8 {offsets = [0, 0, 0], sizes = [1, 16, 16], strides = [1, 1, 1]} : vector<4x16x16xf32> to vector<1x16x16xf32>
    %61 = vector.shape_cast %60 : vector<1x16x16xf32> to vector<16x16xf32>
    %62 = vector.broadcast %59 : f32 to vector<16x16xf32>
    %63 = arith.mulf %62, %61 : vector<16x16xf32>
    %64 = arith.addf %58, %63 : vector<16x16xf32>
    %c48 = arith.constant 48 : index
    %65 = memref.load %arg2[%c48] : memref<256xf32, #tpu.memory_space<smem>>
    %66 = vector.extract_strided_slice %9 {offsets = [0, 0, 0], sizes = [1, 16, 16], strides = [1, 1, 1]} : vector<4x16x16xf32> to vector<1x16x16xf32>
    %67 = vector.shape_cast %66 : vector<1x16x16xf32> to vector<16x16xf32>
    %68 = vector.broadcast %65 : f32 to vector<16x16xf32>
    %69 = arith.mulf %68, %67 : vector<16x16xf32>
    %70 = arith.addf %64, %69 : vector<16x16xf32>
    %c4 = arith.constant 4 : index
    %71 = memref.load %arg2[%c4] : memref<256xf32, #tpu.memory_space<smem>>
    %72 = vector.extract_strided_slice %5 {offsets = [1, 0, 0], sizes = [1, 16, 16], strides = [1, 1, 1]} : vector<4x16x16xf32> to vector<1x16x16xf32>
    %73 = vector.shape_cast %72 : vector<1x16x16xf32> to vector<16x16xf32>
    %74 = vector.broadcast %71 : f32 to vector<16x16xf32>
    %75 = arith.mulf %74, %73 : vector<16x16xf32>
    %76 = arith.addf %70, %75 : vector<16x16xf32>
    %c20 = arith.constant 20 : index
    %77 = memref.load %arg2[%c20] : memref<256xf32, #tpu.memory_space<smem>>
    %78 = vector.extract_strided_slice %6 {offsets = [1, 0, 0], sizes = [1, 16, 16], strides = [1, 1, 1]} : vector<4x16x16xf32> to vector<1x16x16xf32>
    %79 = vector.shape_cast %78 : vector<1x16x16xf32> to vector<16x16xf32>
    %80 = vector.broadcast %77 : f32 to vector<16x16xf32>
    %81 = arith.mulf %80, %79 : vector<16x16xf32>
    %82 = arith.addf %76, %81 : vector<16x16xf32>
    %c36 = arith.constant 36 : index
    %83 = memref.load %arg2[%c36] : memref<256xf32, #tpu.memory_space<smem>>
    %84 = vector.extract_strided_slice %8 {offsets = [1, 0, 0], sizes = [1, 16, 16], strides = [1, 1, 1]} : vector<4x16x16xf32> to vector<1x16x16xf32>
    %85 = vector.shape_cast %84 : vector<1x16x16xf32> to vector<16x16xf32>
    %86 = vector.broadcast %83 : f32 to vector<16x16xf32>
    %87 = arith.mulf %86, %85 : vector<16x16xf32>
    %88 = arith.addf %82, %87 : vector<16x16xf32>
    %c52 = arith.constant 52 : index
    %89 = memref.load %arg2[%c52] : memref<256xf32, #tpu.memory_space<smem>>
    %90 = vector.extract_strided_slice %9 {offsets = [1, 0, 0], sizes = [1, 16, 16], strides = [1, 1, 1]} : vector<4x16x16xf32> to vector<1x16x16xf32>
    %91 = vector.shape_cast %90 : vector<1x16x16xf32> to vector<16x16xf32>
    %92 = vector.broadcast %89 : f32 to vector<16x16xf32>
    %93 = arith.mulf %92, %91 : vector<16x16xf32>
    %94 = arith.addf %88, %93 : vector<16x16xf32>
    %c8 = arith.constant 8 : index
    %95 = memref.load %arg2[%c8] : memref<256xf32, #tpu.memory_space<smem>>
    %96 = vector.extract_strided_slice %5 {offsets = [2, 0, 0], sizes = [1, 16, 16], strides = [1, 1, 1]} : vector<4x16x16xf32> to vector<1x16x16xf32>
    %97 = vector.shape_cast %96 : vector<1x16x16xf32> to vector<16x16xf32>
    %98 = vector.broadcast %95 : f32 to vector<16x16xf32>
    %99 = arith.mulf %98, %97 : vector<16x16xf32>
    %100 = arith.addf %94, %99 : vector<16x16xf32>
    %c24 = arith.constant 24 : index
    %101 = memref.load %arg2[%c24] : memref<256xf32, #tpu.memory_space<smem>>
    %102 = vector.extract_strided_slice %6 {offsets = [2, 0, 0], sizes = [1, 16, 16], strides = [1, 1, 1]} : vector<4x16x16xf32> to vector<1x16x16xf32>
    %103 = vector.shape_cast %102 : vector<1x16x16xf32> to vector<16x16xf32>
    %104 = vector.broadcast %101 : f32 to vector<16x16xf32>
    %105 = arith.mulf %104, %103 : vector<16x16xf32>
    %106 = arith.addf %100, %105 : vector<16x16xf32>
    %c40 = arith.constant 40 : index
    %107 = memref.load %arg2[%c40] : memref<256xf32, #tpu.memory_space<smem>>
    %108 = vector.extract_strided_slice %8 {offsets = [2, 0, 0], sizes = [1, 16, 16], strides = [1, 1, 1]} : vector<4x16x16xf32> to vector<1x16x16xf32>
    %109 = vector.shape_cast %108 : vector<1x16x16xf32> to vector<16x16xf32>
    %110 = vector.broadcast %107 : f32 to vector<16x16xf32>
    %111 = arith.mulf %110, %109 : vector<16x16xf32>
    %112 = arith.addf %106, %111 : vector<16x16xf32>
    %c56 = arith.constant 56 : index
    %113 = memref.load %arg2[%c56] : memref<256xf32, #tpu.memory_space<smem>>
    %114 = vector.extract_strided_slice %9 {offsets = [2, 0, 0], sizes = [1, 16, 16], strides = [1, 1, 1]} : vector<4x16x16xf32> to vector<1x16x16xf32>
    %115 = vector.shape_cast %114 : vector<1x16x16xf32> to vector<16x16xf32>
    %116 = vector.broadcast %113 : f32 to vector<16x16xf32>
    %117 = arith.mulf %116, %115 : vector<16x16xf32>
    %118 = arith.addf %112, %117 : vector<16x16xf32>
    %c12 = arith.constant 12 : index
    %119 = memref.load %arg2[%c12] : memref<256xf32, #tpu.memory_space<smem>>
    %120 = vector.extract_strided_slice %5 {offsets = [3, 0, 0], sizes = [1, 16, 16], strides = [1, 1, 1]} : vector<4x16x16xf32> to vector<1x16x16xf32>
    %121 = vector.shape_cast %120 : vector<1x16x16xf32> to vector<16x16xf32>
    %122 = vector.broadcast %119 : f32 to vector<16x16xf32>
    %123 = arith.mulf %122, %121 : vector<16x16xf32>
    %124 = arith.addf %118, %123 : vector<16x16xf32>
    %c28 = arith.constant 28 : index
    %125 = memref.load %arg2[%c28] : memref<256xf32, #tpu.memory_space<smem>>
    %126 = vector.extract_strided_slice %6 {offsets = [3, 0, 0], sizes = [1, 16, 16], strides = [1, 1, 1]} : vector<4x16x16xf32> to vector<1x16x16xf32>
    %127 = vector.shape_cast %126 : vector<1x16x16xf32> to vector<16x16xf32>
    %128 = vector.broadcast %125 : f32 to vector<16x16xf32>
    %129 = arith.mulf %128, %127 : vector<16x16xf32>
    %130 = arith.addf %124, %129 : vector<16x16xf32>
    %c44 = arith.constant 44 : index
    %131 = memref.load %arg2[%c44] : memref<256xf32, #tpu.memory_space<smem>>
    %132 = vector.extract_strided_slice %8 {offsets = [3, 0, 0], sizes = [1, 16, 16], strides = [1, 1, 1]} : vector<4x16x16xf32> to vector<1x16x16xf32>
    %133 = vector.shape_cast %132 : vector<1x16x16xf32> to vector<16x16xf32>
    %134 = vector.broadcast %131 : f32 to vector<16x16xf32>
    %135 = arith.mulf %134, %133 : vector<16x16xf32>
    %136 = arith.addf %130, %135 : vector<16x16xf32>
    %c60 = arith.constant 60 : index
    %137 = memref.load %arg2[%c60] : memref<256xf32, #tpu.memory_space<smem>>
    %138 = vector.extract_strided_slice %9 {offsets = [3, 0, 0], sizes = [1, 16, 16], strides = [1, 1, 1]} : vector<4x16x16xf32> to vector<1x16x16xf32>
    %139 = vector.shape_cast %138 : vector<1x16x16xf32> to vector<16x16xf32>
    %140 = vector.broadcast %137 : f32 to vector<16x16xf32>
    %141 = arith.mulf %140, %139 : vector<16x16xf32>
    %142 = arith.addf %136, %141 : vector<16x16xf32>
    %cst_41 = arith.constant 0.000000e+00 : f32
    %143 = vector.broadcast %cst_41 : f32 to vector<16x16xf32>
    %c64 = arith.constant 64 : index
    %144 = memref.load %arg2[%c64] : memref<256xf32, #tpu.memory_space<smem>>
    %145 = vector.extract_strided_slice %6 {offsets = [0, 0, 0], sizes = [1, 16, 16], strides = [1, 1, 1]} : vector<4x16x16xf32> to vector<1x16x16xf32>
    %146 = vector.shape_cast %145 : vector<1x16x16xf32> to vector<16x16xf32>
    %147 = vector.broadcast %144 : f32 to vector<16x16xf32>
    %148 = arith.mulf %147, %146 : vector<16x16xf32>
    %149 = arith.addf %143, %148 : vector<16x16xf32>
    %c80 = arith.constant 80 : index
    %150 = memref.load %arg2[%c80] : memref<256xf32, #tpu.memory_space<smem>>
    %151 = vector.extract_strided_slice %7 {offsets = [0, 0, 0], sizes = [1, 16, 16], strides = [1, 1, 1]} : vector<4x16x16xf32> to vector<1x16x16xf32>
    %152 = vector.shape_cast %151 : vector<1x16x16xf32> to vector<16x16xf32>
    %153 = vector.broadcast %150 : f32 to vector<16x16xf32>
    %154 = arith.mulf %153, %152 : vector<16x16xf32>
    %155 = arith.addf %149, %154 : vector<16x16xf32>
    %c96 = arith.constant 96 : index
    %156 = memref.load %arg2[%c96] : memref<256xf32, #tpu.memory_space<smem>>
    %157 = vector.extract_strided_slice %9 {offsets = [0, 0, 0], sizes = [1, 16, 16], strides = [1, 1, 1]} : vector<4x16x16xf32> to vector<1x16x16xf32>
    %158 = vector.shape_cast %157 : vector<1x16x16xf32> to vector<16x16xf32>
    %159 = vector.broadcast %156 : f32 to vector<16x16xf32>
    %160 = arith.mulf %159, %158 : vector<16x16xf32>
    %161 = arith.addf %155, %160 : vector<16x16xf32>
    %c112 = arith.constant 112 : index
    %162 = memref.load %arg2[%c112] : memref<256xf32, #tpu.memory_space<smem>>
    %163 = vector.extract_strided_slice %10 {offsets = [0, 0, 0], sizes = [1, 16, 16], strides = [1, 1, 1]} : vector<4x16x16xf32> to vector<1x16x16xf32>
    %164 = vector.shape_cast %163 : vector<1x16x16xf32> to vector<16x16xf32>
    %165 = vector.broadcast %162 : f32 to vector<16x16xf32>
    %166 = arith.mulf %165, %164 : vector<16x16xf32>
    %167 = arith.addf %161, %166 : vector<16x16xf32>
    %c68 = arith.constant 68 : index
    %168 = memref.load %arg2[%c68] : memref<256xf32, #tpu.memory_space<smem>>
    %169 = vector.extract_strided_slice %6 {offsets = [1, 0, 0], sizes = [1, 16, 16], strides = [1, 1, 1]} : vector<4x16x16xf32> to vector<1x16x16xf32>
    %170 = vector.shape_cast %169 : vector<1x16x16xf32> to vector<16x16xf32>
    %171 = vector.broadcast %168 : f32 to vector<16x16xf32>
    %172 = arith.mulf %171, %170 : vector<16x16xf32>
    %173 = arith.addf %167, %172 : vector<16x16xf32>
    %c84 = arith.constant 84 : index
    %174 = memref.load %arg2[%c84] : memref<256xf32, #tpu.memory_space<smem>>
    %175 = vector.extract_strided_slice %7 {offsets = [1, 0, 0], sizes = [1, 16, 16], strides = [1, 1, 1]} : vector<4x16x16xf32> to vector<1x16x16xf32>
    %176 = vector.shape_cast %175 : vector<1x16x16xf32> to vector<16x16xf32>
    %177 = vector.broadcast %174 : f32 to vector<16x16xf32>
    %178 = arith.mulf %177, %176 : vector<16x16xf32>
    %179 = arith.addf %173, %178 : vector<16x16xf32>
    %c100 = arith.constant 100 : index
    %180 = memref.load %arg2[%c100] : memref<256xf32, #tpu.memory_space<smem>>
    %181 = vector.extract_strided_slice %9 {offsets = [1, 0, 0], sizes = [1, 16, 16], strides = [1, 1, 1]} : vector<4x16x16xf32> to vector<1x16x16xf32>
    %182 = vector.shape_cast %181 : vector<1x16x16xf32> to vector<16x16xf32>
    %183 = vector.broadcast %180 : f32 to vector<16x16xf32>
    %184 = arith.mulf %183, %182 : vector<16x16xf32>
    %185 = arith.addf %179, %184 : vector<16x16xf32>
    %c116 = arith.constant 116 : index
    %186 = memref.load %arg2[%c116] : memref<256xf32, #tpu.memory_space<smem>>
    %187 = vector.extract_strided_slice %10 {offsets = [1, 0, 0], sizes = [1, 16, 16], strides = [1, 1, 1]} : vector<4x16x16xf32> to vector<1x16x16xf32>
    %188 = vector.shape_cast %187 : vector<1x16x16xf32> to vector<16x16xf32>
    %189 = vector.broadcast %186 : f32 to vector<16x16xf32>
    %190 = arith.mulf %189, %188 : vector<16x16xf32>
    %191 = arith.addf %185, %190 : vector<16x16xf32>
    %c72 = arith.constant 72 : index
    %192 = memref.load %arg2[%c72] : memref<256xf32, #tpu.memory_space<smem>>
    %193 = vector.extract_strided_slice %6 {offsets = [2, 0, 0], sizes = [1, 16, 16], strides = [1, 1, 1]} : vector<4x16x16xf32> to vector<1x16x16xf32>
    %194 = vector.shape_cast %193 : vector<1x16x16xf32> to vector<16x16xf32>
    %195 = vector.broadcast %192 : f32 to vector<16x16xf32>
    %196 = arith.mulf %195, %194 : vector<16x16xf32>
    %197 = arith.addf %191, %196 : vector<16x16xf32>
    %c88 = arith.constant 88 : index
    %198 = memref.load %arg2[%c88] : memref<256xf32, #tpu.memory_space<smem>>
    %199 = vector.extract_strided_slice %7 {offsets = [2, 0, 0], sizes = [1, 16, 16], strides = [1, 1, 1]} : vector<4x16x16xf32> to vector<1x16x16xf32>
    %200 = vector.shape_cast %199 : vector<1x16x16xf32> to vector<16x16xf32>
    %201 = vector.broadcast %198 : f32 to vector<16x16xf32>
    %202 = arith.mulf %201, %200 : vector<16x16xf32>
    %203 = arith.addf %197, %202 : vector<16x16xf32>
    %c104 = arith.constant 104 : index
    %204 = memref.load %arg2[%c104] : memref<256xf32, #tpu.memory_space<smem>>
    %205 = vector.extract_strided_slice %9 {offsets = [2, 0, 0], sizes = [1, 16, 16], strides = [1, 1, 1]} : vector<4x16x16xf32> to vector<1x16x16xf32>
    %206 = vector.shape_cast %205 : vector<1x16x16xf32> to vector<16x16xf32>
    %207 = vector.broadcast %204 : f32 to vector<16x16xf32>
    %208 = arith.mulf %207, %206 : vector<16x16xf32>
    %209 = arith.addf %203, %208 : vector<16x16xf32>
    %c120 = arith.constant 120 : index
    %210 = memref.load %arg2[%c120] : memref<256xf32, #tpu.memory_space<smem>>
    %211 = vector.extract_strided_slice %10 {offsets = [2, 0, 0], sizes = [1, 16, 16], strides = [1, 1, 1]} : vector<4x16x16xf32> to vector<1x16x16xf32>
    %212 = vector.shape_cast %211 : vector<1x16x16xf32> to vector<16x16xf32>
    %213 = vector.broadcast %210 : f32 to vector<16x16xf32>
    %214 = arith.mulf %213, %212 : vector<16x16xf32>
    %215 = arith.addf %209, %214 : vector<16x16xf32>
    %c76 = arith.constant 76 : index
    %216 = memref.load %arg2[%c76] : memref<256xf32, #tpu.memory_space<smem>>
    %217 = vector.extract_strided_slice %6 {offsets = [3, 0, 0], sizes = [1, 16, 16], strides = [1, 1, 1]} : vector<4x16x16xf32> to vector<1x16x16xf32>
    %218 = vector.shape_cast %217 : vector<1x16x16xf32> to vector<16x16xf32>
    %219 = vector.broadcast %216 : f32 to vector<16x16xf32>
    %220 = arith.mulf %219, %218 : vector<16x16xf32>
    %221 = arith.addf %215, %220 : vector<16x16xf32>
    %c92 = arith.constant 92 : index
    %222 = memref.load %arg2[%c92] : memref<256xf32, #tpu.memory_space<smem>>
    %223 = vector.extract_strided_slice %7 {offsets = [3, 0, 0], sizes = [1, 16, 16], strides = [1, 1, 1]} : vector<4x16x16xf32> to vector<1x16x16xf32>
    %224 = vector.shape_cast %223 : vector<1x16x16xf32> to vector<16x16xf32>
    %225 = vector.broadcast %222 : f32 to vector<16x16xf32>
    %226 = arith.mulf %225, %224 : vector<16x16xf32>
    %227 = arith.addf %221, %226 : vector<16x16xf32>
    %c108 = arith.constant 108 : index
    %228 = memref.load %arg2[%c108] : memref<256xf32, #tpu.memory_space<smem>>
    %229 = vector.extract_strided_slice %9 {offsets = [3, 0, 0], sizes = [1, 16, 16], strides = [1, 1, 1]} : vector<4x16x16xf32> to vector<1x16x16xf32>
    %230 = vector.shape_cast %229 : vector<1x16x16xf32> to vector<16x16xf32>
    %231 = vector.broadcast %228 : f32 to vector<16x16xf32>
    %232 = arith.mulf %231, %230 : vector<16x16xf32>
    %233 = arith.addf %227, %232 : vector<16x16xf32>
    %c124 = arith.constant 124 : index
    %234 = memref.load %arg2[%c124] : memref<256xf32, #tpu.memory_space<smem>>
    %235 = vector.extract_strided_slice %10 {offsets = [3, 0, 0], sizes = [1, 16, 16], strides = [1, 1, 1]} : vector<4x16x16xf32> to vector<1x16x16xf32>
    %236 = vector.shape_cast %235 : vector<1x16x16xf32> to vector<16x16xf32>
    %237 = vector.broadcast %234 : f32 to vector<16x16xf32>
    %238 = arith.mulf %237, %236 : vector<16x16xf32>
    %239 = arith.addf %233, %238 : vector<16x16xf32>
    %cst_42 = arith.constant dense<0.000000e+00> : vector<16x32xf32>
    %240 = tpu.matmul %142, %22, %cst_42 {dimension_numbers = #tpu.dot_dimension_numbers<[1], [0], [0], [1], [0, 0, 1, 1], [], []>} : vector<16x16xf32>, vector<16x32xf32>, vector<16x32xf32> -> vector<16x32xf32>
    %cst_43 = arith.constant dense<0.000000e+00> : vector<16x32xf32>
    %241 = tpu.matmul %239, %29, %cst_43 {dimension_numbers = #tpu.dot_dimension_numbers<[1], [0], [0], [1], [0, 0, 1, 1], [], []>} : vector<16x16xf32>, vector<16x32xf32>, vector<16x32xf32> -> vector<16x32xf32>
    %242 = arith.addf %240, %241 : vector<16x32xf32>
    %cst_44 = arith.constant 0.000000e+00 : f32
    %243 = vector.broadcast %cst_44 : f32 to vector<16x16xf32>
    %c128 = arith.constant 128 : index
    %244 = memref.load %arg2[%c128] : memref<256xf32, #tpu.memory_space<smem>>
    %245 = vector.extract_strided_slice %8 {offsets = [0, 0, 0], sizes = [1, 16, 16], strides = [1, 1, 1]} : vector<4x16x16xf32> to vector<1x16x16xf32>
    %246 = vector.shape_cast %245 : vector<1x16x16xf32> to vector<16x16xf32>
    %247 = vector.broadcast %244 : f32 to vector<16x16xf32>
    %248 = arith.mulf %247, %246 : vector<16x16xf32>
    %249 = arith.addf %243, %248 : vector<16x16xf32>
    %c144 = arith.constant 144 : index
    %250 = memref.load %arg2[%c144] : memref<256xf32, #tpu.memory_space<smem>>
    %251 = vector.extract_strided_slice %9 {offsets = [0, 0, 0], sizes = [1, 16, 16], strides = [1, 1, 1]} : vector<4x16x16xf32> to vector<1x16x16xf32>
    %252 = vector.shape_cast %251 : vector<1x16x16xf32> to vector<16x16xf32>
    %253 = vector.broadcast %250 : f32 to vector<16x16xf32>
    %254 = arith.mulf %253, %252 : vector<16x16xf32>
    %255 = arith.addf %249, %254 : vector<16x16xf32>
    %c160 = arith.constant 160 : index
    %256 = memref.load %arg2[%c160] : memref<256xf32, #tpu.memory_space<smem>>
    %257 = vector.extract_strided_slice %11 {offsets = [0, 0, 0], sizes = [1, 16, 16], strides = [1, 1, 1]} : vector<4x16x16xf32> to vector<1x16x16xf32>
    %258 = vector.shape_cast %257 : vector<1x16x16xf32> to vector<16x16xf32>
    %259 = vector.broadcast %256 : f32 to vector<16x16xf32>
    %260 = arith.mulf %259, %258 : vector<16x16xf32>
    %261 = arith.addf %255, %260 : vector<16x16xf32>
    %c176 = arith.constant 176 : index
    %262 = memref.load %arg2[%c176] : memref<256xf32, #tpu.memory_space<smem>>
    %263 = vector.extract_strided_slice %12 {offsets = [0, 0, 0], sizes = [1, 16, 16], strides = [1, 1, 1]} : vector<4x16x16xf32> to vector<1x16x16xf32>
    %264 = vector.shape_cast %263 : vector<1x16x16xf32> to vector<16x16xf32>
    %265 = vector.broadcast %262 : f32 to vector<16x16xf32>
    %266 = arith.mulf %265, %264 : vector<16x16xf32>
    %267 = arith.addf %261, %266 : vector<16x16xf32>
    %c132 = arith.constant 132 : index
    %268 = memref.load %arg2[%c132] : memref<256xf32, #tpu.memory_space<smem>>
    %269 = vector.extract_strided_slice %8 {offsets = [1, 0, 0], sizes = [1, 16, 16], strides = [1, 1, 1]} : vector<4x16x16xf32> to vector<1x16x16xf32>
    %270 = vector.shape_cast %269 : vector<1x16x16xf32> to vector<16x16xf32>
    %271 = vector.broadcast %268 : f32 to vector<16x16xf32>
    %272 = arith.mulf %271, %270 : vector<16x16xf32>
    %273 = arith.addf %267, %272 : vector<16x16xf32>
    %c148 = arith.constant 148 : index
    %274 = memref.load %arg2[%c148] : memref<256xf32, #tpu.memory_space<smem>>
    %275 = vector.extract_strided_slice %9 {offsets = [1, 0, 0], sizes = [1, 16, 16], strides = [1, 1, 1]} : vector<4x16x16xf32> to vector<1x16x16xf32>
    %276 = vector.shape_cast %275 : vector<1x16x16xf32> to vector<16x16xf32>
    %277 = vector.broadcast %274 : f32 to vector<16x16xf32>
    %278 = arith.mulf %277, %276 : vector<16x16xf32>
    %279 = arith.addf %273, %278 : vector<16x16xf32>
    %c164 = arith.constant 164 : index
    %280 = memref.load %arg2[%c164] : memref<256xf32, #tpu.memory_space<smem>>
    %281 = vector.extract_strided_slice %11 {offsets = [1, 0, 0], sizes = [1, 16, 16], strides = [1, 1, 1]} : vector<4x16x16xf32> to vector<1x16x16xf32>
    %282 = vector.shape_cast %281 : vector<1x16x16xf32> to vector<16x16xf32>
    %283 = vector.broadcast %280 : f32 to vector<16x16xf32>
    %284 = arith.mulf %283, %282 : vector<16x16xf32>
    %285 = arith.addf %279, %284 : vector<16x16xf32>
    %c180 = arith.constant 180 : index
    %286 = memref.load %arg2[%c180] : memref<256xf32, #tpu.memory_space<smem>>
    %287 = vector.extract_strided_slice %12 {offsets = [1, 0, 0], sizes = [1, 16, 16], strides = [1, 1, 1]} : vector<4x16x16xf32> to vector<1x16x16xf32>
    %288 = vector.shape_cast %287 : vector<1x16x16xf32> to vector<16x16xf32>
    %289 = vector.broadcast %286 : f32 to vector<16x16xf32>
    %290 = arith.mulf %289, %288 : vector<16x16xf32>
    %291 = arith.addf %285, %290 : vector<16x16xf32>
    %c136 = arith.constant 136 : index
    %292 = memref.load %arg2[%c136] : memref<256xf32, #tpu.memory_space<smem>>
    %293 = vector.extract_strided_slice %8 {offsets = [2, 0, 0], sizes = [1, 16, 16], strides = [1, 1, 1]} : vector<4x16x16xf32> to vector<1x16x16xf32>
    %294 = vector.shape_cast %293 : vector<1x16x16xf32> to vector<16x16xf32>
    %295 = vector.broadcast %292 : f32 to vector<16x16xf32>
    %296 = arith.mulf %295, %294 : vector<16x16xf32>
    %297 = arith.addf %291, %296 : vector<16x16xf32>
    %c152 = arith.constant 152 : index
    %298 = memref.load %arg2[%c152] : memref<256xf32, #tpu.memory_space<smem>>
    %299 = vector.extract_strided_slice %9 {offsets = [2, 0, 0], sizes = [1, 16, 16], strides = [1, 1, 1]} : vector<4x16x16xf32> to vector<1x16x16xf32>
    %300 = vector.shape_cast %299 : vector<1x16x16xf32> to vector<16x16xf32>
    %301 = vector.broadcast %298 : f32 to vector<16x16xf32>
    %302 = arith.mulf %301, %300 : vector<16x16xf32>
    %303 = arith.addf %297, %302 : vector<16x16xf32>
    %c168 = arith.constant 168 : index
    %304 = memref.load %arg2[%c168] : memref<256xf32, #tpu.memory_space<smem>>
    %305 = vector.extract_strided_slice %11 {offsets = [2, 0, 0], sizes = [1, 16, 16], strides = [1, 1, 1]} : vector<4x16x16xf32> to vector<1x16x16xf32>
    %306 = vector.shape_cast %305 : vector<1x16x16xf32> to vector<16x16xf32>
    %307 = vector.broadcast %304 : f32 to vector<16x16xf32>
    %308 = arith.mulf %307, %306 : vector<16x16xf32>
    %309 = arith.addf %303, %308 : vector<16x16xf32>
    %c184 = arith.constant 184 : index
    %310 = memref.load %arg2[%c184] : memref<256xf32, #tpu.memory_space<smem>>
    %311 = vector.extract_strided_slice %12 {offsets = [2, 0, 0], sizes = [1, 16, 16], strides = [1, 1, 1]} : vector<4x16x16xf32> to vector<1x16x16xf32>
    %312 = vector.shape_cast %311 : vector<1x16x16xf32> to vector<16x16xf32>
    %313 = vector.broadcast %310 : f32 to vector<16x16xf32>
    %314 = arith.mulf %313, %312 : vector<16x16xf32>
    %315 = arith.addf %309, %314 : vector<16x16xf32>
    %c140 = arith.constant 140 : index
    %316 = memref.load %arg2[%c140] : memref<256xf32, #tpu.memory_space<smem>>
    %317 = vector.extract_strided_slice %8 {offsets = [3, 0, 0], sizes = [1, 16, 16], strides = [1, 1, 1]} : vector<4x16x16xf32> to vector<1x16x16xf32>
    %318 = vector.shape_cast %317 : vector<1x16x16xf32> to vector<16x16xf32>
    %319 = vector.broadcast %316 : f32 to vector<16x16xf32>
    %320 = arith.mulf %319, %318 : vector<16x16xf32>
    %321 = arith.addf %315, %320 : vector<16x16xf32>
    %c156 = arith.constant 156 : index
    %322 = memref.load %arg2[%c156] : memref<256xf32, #tpu.memory_space<smem>>
    %323 = vector.extract_strided_slice %9 {offsets = [3, 0, 0], sizes = [1, 16, 16], strides = [1, 1, 1]} : vector<4x16x16xf32> to vector<1x16x16xf32>
    %324 = vector.shape_cast %323 : vector<1x16x16xf32> to vector<16x16xf32>
    %325 = vector.broadcast %322 : f32 to vector<16x16xf32>
    %326 = arith.mulf %325, %324 : vector<16x16xf32>
    %327 = arith.addf %321, %326 : vector<16x16xf32>
    %c172 = arith.constant 172 : index
    %328 = memref.load %arg2[%c172] : memref<256xf32, #tpu.memory_space<smem>>
    %329 = vector.extract_strided_slice %11 {offsets = [3, 0, 0], sizes = [1, 16, 16], strides = [1, 1, 1]} : vector<4x16x16xf32> to vector<1x16x16xf32>
    %330 = vector.shape_cast %329 : vector<1x16x16xf32> to vector<16x16xf32>
    %331 = vector.broadcast %328 : f32 to vector<16x16xf32>
    %332 = arith.mulf %331, %330 : vector<16x16xf32>
    %333 = arith.addf %327, %332 : vector<16x16xf32>
    %c188 = arith.constant 188 : index
    %334 = memref.load %arg2[%c188] : memref<256xf32, #tpu.memory_space<smem>>
    %335 = vector.extract_strided_slice %12 {offsets = [3, 0, 0], sizes = [1, 16, 16], strides = [1, 1, 1]} : vector<4x16x16xf32> to vector<1x16x16xf32>
    %336 = vector.shape_cast %335 : vector<1x16x16xf32> to vector<16x16xf32>
    %337 = vector.broadcast %334 : f32 to vector<16x16xf32>
    %338 = arith.mulf %337, %336 : vector<16x16xf32>
    %339 = arith.addf %333, %338 : vector<16x16xf32>
    %cst_45 = arith.constant 0.000000e+00 : f32
    %340 = vector.broadcast %cst_45 : f32 to vector<16x16xf32>
    %c192 = arith.constant 192 : index
    %341 = memref.load %arg2[%c192] : memref<256xf32, #tpu.memory_space<smem>>
    %342 = vector.extract_strided_slice %9 {offsets = [0, 0, 0], sizes = [1, 16, 16], strides = [1, 1, 1]} : vector<4x16x16xf32> to vector<1x16x16xf32>
    %343 = vector.shape_cast %342 : vector<1x16x16xf32> to vector<16x16xf32>
    %344 = vector.broadcast %341 : f32 to vector<16x16xf32>
    %345 = arith.mulf %344, %343 : vector<16x16xf32>
    %346 = arith.addf %340, %345 : vector<16x16xf32>
    %c208 = arith.constant 208 : index
    %347 = memref.load %arg2[%c208] : memref<256xf32, #tpu.memory_space<smem>>
    %348 = vector.extract_strided_slice %10 {offsets = [0, 0, 0], sizes = [1, 16, 16], strides = [1, 1, 1]} : vector<4x16x16xf32> to vector<1x16x16xf32>
    %349 = vector.shape_cast %348 : vector<1x16x16xf32> to vector<16x16xf32>
    %350 = vector.broadcast %347 : f32 to vector<16x16xf32>
    %351 = arith.mulf %350, %349 : vector<16x16xf32>
    %352 = arith.addf %346, %351 : vector<16x16xf32>
    %c224 = arith.constant 224 : index
    %353 = memref.load %arg2[%c224] : memref<256xf32, #tpu.memory_space<smem>>
    %354 = vector.extract_strided_slice %12 {offsets = [0, 0, 0], sizes = [1, 16, 16], strides = [1, 1, 1]} : vector<4x16x16xf32> to vector<1x16x16xf32>
    %355 = vector.shape_cast %354 : vector<1x16x16xf32> to vector<16x16xf32>
    %356 = vector.broadcast %353 : f32 to vector<16x16xf32>
    %357 = arith.mulf %356, %355 : vector<16x16xf32>
    %358 = arith.addf %352, %357 : vector<16x16xf32>
    %c240 = arith.constant 240 : index
    %359 = memref.load %arg2[%c240] : memref<256xf32, #tpu.memory_space<smem>>
    %360 = vector.extract_strided_slice %13 {offsets = [0, 0, 0], sizes = [1, 16, 16], strides = [1, 1, 1]} : vector<4x16x16xf32> to vector<1x16x16xf32>
    %361 = vector.shape_cast %360 : vector<1x16x16xf32> to vector<16x16xf32>
    %362 = vector.broadcast %359 : f32 to vector<16x16xf32>
    %363 = arith.mulf %362, %361 : vector<16x16xf32>
    %364 = arith.addf %358, %363 : vector<16x16xf32>
    %c196 = arith.constant 196 : index
    %365 = memref.load %arg2[%c196] : memref<256xf32, #tpu.memory_space<smem>>
    %366 = vector.extract_strided_slice %9 {offsets = [1, 0, 0], sizes = [1, 16, 16], strides = [1, 1, 1]} : vector<4x16x16xf32> to vector<1x16x16xf32>
    %367 = vector.shape_cast %366 : vector<1x16x16xf32> to vector<16x16xf32>
    %368 = vector.broadcast %365 : f32 to vector<16x16xf32>
    %369 = arith.mulf %368, %367 : vector<16x16xf32>
    %370 = arith.addf %364, %369 : vector<16x16xf32>
    %c212 = arith.constant 212 : index
    %371 = memref.load %arg2[%c212] : memref<256xf32, #tpu.memory_space<smem>>
    %372 = vector.extract_strided_slice %10 {offsets = [1, 0, 0], sizes = [1, 16, 16], strides = [1, 1, 1]} : vector<4x16x16xf32> to vector<1x16x16xf32>
    %373 = vector.shape_cast %372 : vector<1x16x16xf32> to vector<16x16xf32>
    %374 = vector.broadcast %371 : f32 to vector<16x16xf32>
    %375 = arith.mulf %374, %373 : vector<16x16xf32>
    %376 = arith.addf %370, %375 : vector<16x16xf32>
    %c228 = arith.constant 228 : index
    %377 = memref.load %arg2[%c228] : memref<256xf32, #tpu.memory_space<smem>>
    %378 = vector.extract_strided_slice %12 {offsets = [1, 0, 0], sizes = [1, 16, 16], strides = [1, 1, 1]} : vector<4x16x16xf32> to vector<1x16x16xf32>
    %379 = vector.shape_cast %378 : vector<1x16x16xf32> to vector<16x16xf32>
    %380 = vector.broadcast %377 : f32 to vector<16x16xf32>
    %381 = arith.mulf %380, %379 : vector<16x16xf32>
    %382 = arith.addf %376, %381 : vector<16x16xf32>
    %c244 = arith.constant 244 : index
    %383 = memref.load %arg2[%c244] : memref<256xf32, #tpu.memory_space<smem>>
    %384 = vector.extract_strided_slice %13 {offsets = [1, 0, 0], sizes = [1, 16, 16], strides = [1, 1, 1]} : vector<4x16x16xf32> to vector<1x16x16xf32>
    %385 = vector.shape_cast %384 : vector<1x16x16xf32> to vector<16x16xf32>
    %386 = vector.broadcast %383 : f32 to vector<16x16xf32>
    %387 = arith.mulf %386, %385 : vector<16x16xf32>
    %388 = arith.addf %382, %387 : vector<16x16xf32>
    %c200 = arith.constant 200 : index
    %389 = memref.load %arg2[%c200] : memref<256xf32, #tpu.memory_space<smem>>
    %390 = vector.extract_strided_slice %9 {offsets = [2, 0, 0], sizes = [1, 16, 16], strides = [1, 1, 1]} : vector<4x16x16xf32> to vector<1x16x16xf32>
    %391 = vector.shape_cast %390 : vector<1x16x16xf32> to vector<16x16xf32>
    %392 = vector.broadcast %389 : f32 to vector<16x16xf32>
    %393 = arith.mulf %392, %391 : vector<16x16xf32>
    %394 = arith.addf %388, %393 : vector<16x16xf32>
    %c216 = arith.constant 216 : index
    %395 = memref.load %arg2[%c216] : memref<256xf32, #tpu.memory_space<smem>>
    %396 = vector.extract_strided_slice %10 {offsets = [2, 0, 0], sizes = [1, 16, 16], strides = [1, 1, 1]} : vector<4x16x16xf32> to vector<1x16x16xf32>
    %397 = vector.shape_cast %396 : vector<1x16x16xf32> to vector<16x16xf32>
    %398 = vector.broadcast %395 : f32 to vector<16x16xf32>
    %399 = arith.mulf %398, %397 : vector<16x16xf32>
    %400 = arith.addf %394, %399 : vector<16x16xf32>
    %c232 = arith.constant 232 : index
    %401 = memref.load %arg2[%c232] : memref<256xf32, #tpu.memory_space<smem>>
    %402 = vector.extract_strided_slice %12 {offsets = [2, 0, 0], sizes = [1, 16, 16], strides = [1, 1, 1]} : vector<4x16x16xf32> to vector<1x16x16xf32>
    %403 = vector.shape_cast %402 : vector<1x16x16xf32> to vector<16x16xf32>
    %404 = vector.broadcast %401 : f32 to vector<16x16xf32>
    %405 = arith.mulf %404, %403 : vector<16x16xf32>
    %406 = arith.addf %400, %405 : vector<16x16xf32>
    %c248 = arith.constant 248 : index
    %407 = memref.load %arg2[%c248] : memref<256xf32, #tpu.memory_space<smem>>
    %408 = vector.extract_strided_slice %13 {offsets = [2, 0, 0], sizes = [1, 16, 16], strides = [1, 1, 1]} : vector<4x16x16xf32> to vector<1x16x16xf32>
    %409 = vector.shape_cast %408 : vector<1x16x16xf32> to vector<16x16xf32>
    %410 = vector.broadcast %407 : f32 to vector<16x16xf32>
    %411 = arith.mulf %410, %409 : vector<16x16xf32>
    %412 = arith.addf %406, %411 : vector<16x16xf32>
    %c204 = arith.constant 204 : index
    %413 = memref.load %arg2[%c204] : memref<256xf32, #tpu.memory_space<smem>>
    %414 = vector.extract_strided_slice %9 {offsets = [3, 0, 0], sizes = [1, 16, 16], strides = [1, 1, 1]} : vector<4x16x16xf32> to vector<1x16x16xf32>
    %415 = vector.shape_cast %414 : vector<1x16x16xf32> to vector<16x16xf32>
    %416 = vector.broadcast %413 : f32 to vector<16x16xf32>
    %417 = arith.mulf %416, %415 : vector<16x16xf32>
    %418 = arith.addf %412, %417 : vector<16x16xf32>
    %c220 = arith.constant 220 : index
    %419 = memref.load %arg2[%c220] : memref<256xf32, #tpu.memory_space<smem>>
    %420 = vector.extract_strided_slice %10 {offsets = [3, 0, 0], sizes = [1, 16, 16], strides = [1, 1, 1]} : vector<4x16x16xf32> to vector<1x16x16xf32>
    %421 = vector.shape_cast %420 : vector<1x16x16xf32> to vector<16x16xf32>
    %422 = vector.broadcast %419 : f32 to vector<16x16xf32>
    %423 = arith.mulf %422, %421 : vector<16x16xf32>
    %424 = arith.addf %418, %423 : vector<16x16xf32>
    %c236 = arith.constant 236 : index
    %425 = memref.load %arg2[%c236] : memref<256xf32, #tpu.memory_space<smem>>
    %426 = vector.extract_strided_slice %12 {offsets = [3, 0, 0], sizes = [1, 16, 16], strides = [1, 1, 1]} : vector<4x16x16xf32> to vector<1x16x16xf32>
    %427 = vector.shape_cast %426 : vector<1x16x16xf32> to vector<16x16xf32>
    %428 = vector.broadcast %425 : f32 to vector<16x16xf32>
    %429 = arith.mulf %428, %427 : vector<16x16xf32>
    %430 = arith.addf %424, %429 : vector<16x16xf32>
    %c252 = arith.constant 252 : index
    %431 = memref.load %arg2[%c252] : memref<256xf32, #tpu.memory_space<smem>>
    %432 = vector.extract_strided_slice %13 {offsets = [3, 0, 0], sizes = [1, 16, 16], strides = [1, 1, 1]} : vector<4x16x16xf32> to vector<1x16x16xf32>
    %433 = vector.shape_cast %432 : vector<1x16x16xf32> to vector<16x16xf32>
    %434 = vector.broadcast %431 : f32 to vector<16x16xf32>
    %435 = arith.mulf %434, %433 : vector<16x16xf32>
    %436 = arith.addf %430, %435 : vector<16x16xf32>
    %cst_46 = arith.constant dense<0.000000e+00> : vector<16x32xf32>
    %437 = tpu.matmul %339, %22, %cst_46 {dimension_numbers = #tpu.dot_dimension_numbers<[1], [0], [0], [1], [0, 0, 1, 1], [], []>} : vector<16x16xf32>, vector<16x32xf32>, vector<16x32xf32> -> vector<16x32xf32>
    %cst_47 = arith.constant dense<0.000000e+00> : vector<16x32xf32>
    %438 = tpu.matmul %436, %29, %cst_47 {dimension_numbers = #tpu.dot_dimension_numbers<[1], [0], [0], [1], [0, 0, 1, 1], [], []>} : vector<16x16xf32>, vector<16x32xf32>, vector<16x32xf32> -> vector<16x32xf32>
    %439 = arith.addf %437, %438 : vector<16x32xf32>
    %cst_48 = arith.constant dense<0.000000e+00> : vector<32x32xf32>
    %440 = tpu.matmul %38, %242, %cst_48 {dimension_numbers = #tpu.dot_dimension_numbers<[1], [0], [0], [1], [0, 0, 1, 1], [], []>} : vector<32x16xf32>, vector<16x32xf32>, vector<32x32xf32> -> vector<32x32xf32>
    %cst_49 = arith.constant dense<0.000000e+00> : vector<32x32xf32>
    %441 = tpu.matmul %45, %439, %cst_49 {dimension_numbers = #tpu.dot_dimension_numbers<[1], [0], [0], [1], [0, 0, 1, 1], [], []>} : vector<32x16xf32>, vector<16x32xf32>, vector<32x32xf32> -> vector<32x32xf32>
    %442 = arith.addf %440, %441 : vector<32x32xf32>
    %c0_50 = arith.constant 0 : index
    %443 = memref.load %arg3[%c0_50] : memref<4xf32, #tpu.memory_space<smem>>
    %444 = vector.broadcast %443 : f32 to vector<32x32xf32>
    %445 = arith.addf %442, %444 : vector<32x32xf32>
    %c0_51 = arith.constant 0 : index
    %c0_52 = arith.constant 0 : index
    %c0_53 = arith.constant 0 : index
    %c0_54 = arith.constant 0 : index
    %446 = vector.load %arg4[%c0_51, %c0_52, %c0_53, %c0_54] : memref<1x4x32x32xf32, #tpu.memory_space<vmem>>, vector<1x1x32x32xf32>
    %447 = vector.shape_cast %446 : vector<1x1x32x32xf32> to vector<32x32xf32>
    %448 = vector.shape_cast %445 : vector<32x32xf32> to vector<1x1x32x32xf32>
    tpu.vector_store %arg4[%c0_51, %c0_52, %c0_53, %c0_54], %448 {strides = array<i32>} : memref<1x4x32x32xf32, #tpu.memory_space<vmem>>, vector<1x1x32x32xf32>,
    %cst_55 = arith.constant 0.000000e+00 : f32
    %449 = vector.broadcast %cst_55 : f32 to vector<16x16xf32>
    %c1_56 = arith.constant 1 : index
    %450 = memref.load %arg2[%c1_56] : memref<256xf32, #tpu.memory_space<smem>>
    %451 = vector.extract_strided_slice %5 {offsets = [0, 0, 0], sizes = [1, 16, 16], strides = [1, 1, 1]} : vector<4x16x16xf32> to vector<1x16x16xf32>
    %452 = vector.shape_cast %451 : vector<1x16x16xf32> to vector<16x16xf32>
    %453 = vector.broadcast %450 : f32 to vector<16x16xf32>
    %454 = arith.mulf %453, %452 : vector<16x16xf32>
    %455 = arith.addf %449, %454 : vector<16x16xf32>
    %c17 = arith.constant 17 : index
    %456 = memref.load %arg2[%c17] : memref<256xf32, #tpu.memory_space<smem>>
    %457 = vector.extract_strided_slice %6 {offsets = [0, 0, 0], sizes = [1, 16, 16], strides = [1, 1, 1]} : vector<4x16x16xf32> to vector<1x16x16xf32>
    %458 = vector.shape_cast %457 : vector<1x16x16xf32> to vector<16x16xf32>
    %459 = vector.broadcast %456 : f32 to vector<16x16xf32>
    %460 = arith.mulf %459, %458 : vector<16x16xf32>
    %461 = arith.addf %455, %460 : vector<16x16xf32>
    %c33 = arith.constant 33 : index
    %462 = memref.load %arg2[%c33] : memref<256xf32, #tpu.memory_space<smem>>
    %463 = vector.extract_strided_slice %8 {offsets = [0, 0, 0], sizes = [1, 16, 16], strides = [1, 1, 1]} : vector<4x16x16xf32> to vector<1x16x16xf32>
    %464 = vector.shape_cast %463 : vector<1x16x16xf32> to vector<16x16xf32>
    %465 = vector.broadcast %462 : f32 to vector<16x16xf32>
    %466 = arith.mulf %465, %464 : vector<16x16xf32>
    %467 = arith.addf %461, %466 : vector<16x16xf32>
    %c49 = arith.constant 49 : index
    %468 = memref.load %arg2[%c49] : memref<256xf32, #tpu.memory_space<smem>>
    %469 = vector.extract_strided_slice %9 {offsets = [0, 0, 0], sizes = [1, 16, 16], strides = [1, 1, 1]} : vector<4x16x16xf32> to vector<1x16x16xf32>
    %470 = vector.shape_cast %469 : vector<1x16x16xf32> to vector<16x16xf32>
    %471 = vector.broadcast %468 : f32 to vector<16x16xf32>
    %472 = arith.mulf %471, %470 : vector<16x16xf32>
    %473 = arith.addf %467, %472 : vector<16x16xf32>
    %c5 = arith.constant 5 : index
    %474 = memref.load %arg2[%c5] : memref<256xf32, #tpu.memory_space<smem>>
    %475 = vector.extract_strided_slice %5 {offsets = [1, 0, 0], sizes = [1, 16, 16], strides = [1, 1, 1]} : vector<4x16x16xf32> to vector<1x16x16xf32>
    %476 = vector.shape_cast %475 : vector<1x16x16xf32> to vector<16x16xf32>
    %477 = vector.broadcast %474 : f32 to vector<16x16xf32>
    %478 = arith.mulf %477, %476 : vector<16x16xf32>
    %479 = arith.addf %473, %478 : vector<16x16xf32>
    %c21 = arith.constant 21 : index
    %480 = memref.load %arg2[%c21] : memref<256xf32, #tpu.memory_space<smem>>
    %481 = vector.extract_strided_slice %6 {offsets = [1, 0, 0], sizes = [1, 16, 16], strides = [1, 1, 1]} : vector<4x16x16xf32> to vector<1x16x16xf32>
    %482 = vector.shape_cast %481 : vector<1x16x16xf32> to vector<16x16xf32>
    %483 = vector.broadcast %480 : f32 to vector<16x16xf32>
    %484 = arith.mulf %483, %482 : vector<16x16xf32>
    %485 = arith.addf %479, %484 : vector<16x16xf32>
    %c37 = arith.constant 37 : index
    %486 = memref.load %arg2[%c37] : memref<256xf32, #tpu.memory_space<smem>>
    %487 = vector.extract_strided_slice %8 {offsets = [1, 0, 0], sizes = [1, 16, 16], strides = [1, 1, 1]} : vector<4x16x16xf32> to vector<1x16x16xf32>
    %488 = vector.shape_cast %487 : vector<1x16x16xf32> to vector<16x16xf32>
    %489 = vector.broadcast %486 : f32 to vector<16x16xf32>
    %490 = arith.mulf %489, %488 : vector<16x16xf32>
    %491 = arith.addf %485, %490 : vector<16x16xf32>
    %c53 = arith.constant 53 : index
    %492 = memref.load %arg2[%c53] : memref<256xf32, #tpu.memory_space<smem>>
    %493 = vector.extract_strided_slice %9 {offsets = [1, 0, 0], sizes = [1, 16, 16], strides = [1, 1, 1]} : vector<4x16x16xf32> to vector<1x16x16xf32>
    %494 = vector.shape_cast %493 : vector<1x16x16xf32> to vector<16x16xf32>
    %495 = vector.broadcast %492 : f32 to vector<16x16xf32>
    %496 = arith.mulf %495, %494 : vector<16x16xf32>
    %497 = arith.addf %491, %496 : vector<16x16xf32>
    %c9 = arith.constant 9 : index
    %498 = memref.load %arg2[%c9] : memref<256xf32, #tpu.memory_space<smem>>
    %499 = vector.extract_strided_slice %5 {offsets = [2, 0, 0], sizes = [1, 16, 16], strides = [1, 1, 1]} : vector<4x16x16xf32> to vector<1x16x16xf32>
    %500 = vector.shape_cast %499 : vector<1x16x16xf32> to vector<16x16xf32>
    %501 = vector.broadcast %498 : f32 to vector<16x16xf32>
    %502 = arith.mulf %501, %500 : vector<16x16xf32>
    %503 = arith.addf %497, %502 : vector<16x16xf32>
    %c25 = arith.constant 25 : index
    %504 = memref.load %arg2[%c25] : memref<256xf32, #tpu.memory_space<smem>>
    %505 = vector.extract_strided_slice %6 {offsets = [2, 0, 0], sizes = [1, 16, 16], strides = [1, 1, 1]} : vector<4x16x16xf32> to vector<1x16x16xf32>
    %506 = vector.shape_cast %505 : vector<1x16x16xf32> to vector<16x16xf32>
    %507 = vector.broadcast %504 : f32 to vector<16x16xf32>
    %508 = arith.mulf %507, %506 : vector<16x16xf32>
    %509 = arith.addf %503, %508 : vector<16x16xf32>
    %c41 = arith.constant 41 : index
    %510 = memref.load %arg2[%c41] : memref<256xf32, #tpu.memory_space<smem>>
    %511 = vector.extract_strided_slice %8 {offsets = [2, 0, 0], sizes = [1, 16, 16], strides = [1, 1, 1]} : vector<4x16x16xf32> to vector<1x16x16xf32>
    %512 = vector.shape_cast %511 : vector<1x16x16xf32> to vector<16x16xf32>
    %513 = vector.broadcast %510 : f32 to vector<16x16xf32>
    %514 = arith.mulf %513, %512 : vector<16x16xf32>
    %515 = arith.addf %509, %514 : vector<16x16xf32>
    %c57 = arith.constant 57 : index
    %516 = memref.load %arg2[%c57] : memref<256xf32, #tpu.memory_space<smem>>
    %517 = vector.extract_strided_slice %9 {offsets = [2, 0, 0], sizes = [1, 16, 16], strides = [1, 1, 1]} : vector<4x16x16xf32> to vector<1x16x16xf32>
    %518 = vector.shape_cast %517 : vector<1x16x16xf32> to vector<16x16xf32>
    %519 = vector.broadcast %516 : f32 to vector<16x16xf32>
    %520 = arith.mulf %519, %518 : vector<16x16xf32>
    %521 = arith.addf %515, %520 : vector<16x16xf32>
    %c13 = arith.constant 13 : index
    %522 = memref.load %arg2[%c13] : memref<256xf32, #tpu.memory_space<smem>>
    %523 = vector.extract_strided_slice %5 {offsets = [3, 0, 0], sizes = [1, 16, 16], strides = [1, 1, 1]} : vector<4x16x16xf32> to vector<1x16x16xf32>
    %524 = vector.shape_cast %523 : vector<1x16x16xf32> to vector<16x16xf32>
    %525 = vector.broadcast %522 : f32 to vector<16x16xf32>
    %526 = arith.mulf %525, %524 : vector<16x16xf32>
    %527 = arith.addf %521, %526 : vector<16x16xf32>
    %c29 = arith.constant 29 : index
    %528 = memref.load %arg2[%c29] : memref<256xf32, #tpu.memory_space<smem>>
    %529 = vector.extract_strided_slice %6 {offsets = [3, 0, 0], sizes = [1, 16, 16], strides = [1, 1, 1]} : vector<4x16x16xf32> to vector<1x16x16xf32>
    %530 = vector.shape_cast %529 : vector<1x16x16xf32> to vector<16x16xf32>
    %531 = vector.broadcast %528 : f32 to vector<16x16xf32>
    %532 = arith.mulf %531, %530 : vector<16x16xf32>
    %533 = arith.addf %527, %532 : vector<16x16xf32>
    %c45 = arith.constant 45 : index
    %534 = memref.load %arg2[%c45] : memref<256xf32, #tpu.memory_space<smem>>
    %535 = vector.extract_strided_slice %8 {offsets = [3, 0, 0], sizes = [1, 16, 16], strides = [1, 1, 1]} : vector<4x16x16xf32> to vector<1x16x16xf32>
    %536 = vector.shape_cast %535 : vector<1x16x16xf32> to vector<16x16xf32>
    %537 = vector.broadcast %534 : f32 to vector<16x16xf32>
    %538 = arith.mulf %537, %536 : vector<16x16xf32>
    %539 = arith.addf %533, %538 : vector<16x16xf32>
    %c61 = arith.constant 61 : index
    %540 = memref.load %arg2[%c61] : memref<256xf32, #tpu.memory_space<smem>>
    %541 = vector.extract_strided_slice %9 {offsets = [3, 0, 0], sizes = [1, 16, 16], strides = [1, 1, 1]} : vector<4x16x16xf32> to vector<1x16x16xf32>
    %542 = vector.shape_cast %541 : vector<1x16x16xf32> to vector<16x16xf32>
    %543 = vector.broadcast %540 : f32 to vector<16x16xf32>
    %544 = arith.mulf %543, %542 : vector<16x16xf32>
    %545 = arith.addf %539, %544 : vector<16x16xf32>
    %cst_57 = arith.constant 0.000000e+00 : f32
    %546 = vector.broadcast %cst_57 : f32 to vector<16x16xf32>
    %c65 = arith.constant 65 : index
    %547 = memref.load %arg2[%c65] : memref<256xf32, #tpu.memory_space<smem>>
    %548 = vector.extract_strided_slice %6 {offsets = [0, 0, 0], sizes = [1, 16, 16], strides = [1, 1, 1]} : vector<4x16x16xf32> to vector<1x16x16xf32>
    %549 = vector.shape_cast %548 : vector<1x16x16xf32> to vector<16x16xf32>
    %550 = vector.broadcast %547 : f32 to vector<16x16xf32>
    %551 = arith.mulf %550, %549 : vector<16x16xf32>
    %552 = arith.addf %546, %551 : vector<16x16xf32>
    %c81 = arith.constant 81 : index
    %553 = memref.load %arg2[%c81] : memref<256xf32, #tpu.memory_space<smem>>
    %554 = vector.extract_strided_slice %7 {offsets = [0, 0, 0], sizes = [1, 16, 16], strides = [1, 1, 1]} : vector<4x16x16xf32> to vector<1x16x16xf32>
    %555 = vector.shape_cast %554 : vector<1x16x16xf32> to vector<16x16xf32>
    %556 = vector.broadcast %553 : f32 to vector<16x16xf32>
    %557 = arith.mulf %556, %555 : vector<16x16xf32>
    %558 = arith.addf %552, %557 : vector<16x16xf32>
    %c97 = arith.constant 97 : index
    %559 = memref.load %arg2[%c97] : memref<256xf32, #tpu.memory_space<smem>>
    %560 = vector.extract_strided_slice %9 {offsets = [0, 0, 0], sizes = [1, 16, 16], strides = [1, 1, 1]} : vector<4x16x16xf32> to vector<1x16x16xf32>
    %561 = vector.shape_cast %560 : vector<1x16x16xf32> to vector<16x16xf32>
    %562 = vector.broadcast %559 : f32 to vector<16x16xf32>
    %563 = arith.mulf %562, %561 : vector<16x16xf32>
    %564 = arith.addf %558, %563 : vector<16x16xf32>
    %c113 = arith.constant 113 : index
    %565 = memref.load %arg2[%c113] : memref<256xf32, #tpu.memory_space<smem>>
    %566 = vector.extract_strided_slice %10 {offsets = [0, 0, 0], sizes = [1, 16, 16], strides = [1, 1, 1]} : vector<4x16x16xf32> to vector<1x16x16xf32>
    %567 = vector.shape_cast %566 : vector<1x16x16xf32> to vector<16x16xf32>
    %568 = vector.broadcast %565 : f32 to vector<16x16xf32>
    %569 = arith.mulf %568, %567 : vector<16x16xf32>
    %570 = arith.addf %564, %569 : vector<16x16xf32>
    %c69 = arith.constant 69 : index
    %571 = memref.load %arg2[%c69] : memref<256xf32, #tpu.memory_space<smem>>
    %572 = vector.extract_strided_slice %6 {offsets = [1, 0, 0], sizes = [1, 16, 16], strides = [1, 1, 1]} : vector<4x16x16xf32> to vector<1x16x16xf32>
    %573 = vector.shape_cast %572 : vector<1x16x16xf32> to vector<16x16xf32>
    %574 = vector.broadcast %571 : f32 to vector<16x16xf32>
    %575 = arith.mulf %574, %573 : vector<16x16xf32>
    %576 = arith.addf %570, %575 : vector<16x16xf32>
    %c85 = arith.constant 85 : index
    %577 = memref.load %arg2[%c85] : memref<256xf32, #tpu.memory_space<smem>>
    %578 = vector.extract_strided_slice %7 {offsets = [1, 0, 0], sizes = [1, 16, 16], strides = [1, 1, 1]} : vector<4x16x16xf32> to vector<1x16x16xf32>
    %579 = vector.shape_cast %578 : vector<1x16x16xf32> to vector<16x16xf32>
    %580 = vector.broadcast %577 : f32 to vector<16x16xf32>
    %581 = arith.mulf %580, %579 : vector<16x16xf32>
    %582 = arith.addf %576, %581 : vector<16x16xf32>
    %c101 = arith.constant 101 : index
    %583 = memref.load %arg2[%c101] : memref<256xf32, #tpu.memory_space<smem>>
    %584 = vector.extract_strided_slice %9 {offsets = [1, 0, 0], sizes = [1, 16, 16], strides = [1, 1, 1]} : vector<4x16x16xf32> to vector<1x16x16xf32>
    %585 = vector.shape_cast %584 : vector<1x16x16xf32> to vector<16x16xf32>
    %586 = vector.broadcast %583 : f32 to vector<16x16xf32>
    %587 = arith.mulf %586, %585 : vector<16x16xf32>
    %588 = arith.addf %582, %587 : vector<16x16xf32>
    %c117 = arith.constant 117 : index
    %589 = memref.load %arg2[%c117] : memref<256xf32, #tpu.memory_space<smem>>
    %590 = vector.extract_strided_slice %10 {offsets = [1, 0, 0], sizes = [1, 16, 16], strides = [1, 1, 1]} : vector<4x16x16xf32> to vector<1x16x16xf32>
    %591 = vector.shape_cast %590 : vector<1x16x16xf32> to vector<16x16xf32>
    %592 = vector.broadcast %589 : f32 to vector<16x16xf32>
    %593 = arith.mulf %592, %591 : vector<16x16xf32>
    %594 = arith.addf %588, %593 : vector<16x16xf32>
    %c73 = arith.constant 73 : index
    %595 = memref.load %arg2[%c73] : memref<256xf32, #tpu.memory_space<smem>>
    %596 = vector.extract_strided_slice %6 {offsets = [2, 0, 0], sizes = [1, 16, 16], strides = [1, 1, 1]} : vector<4x16x16xf32> to vector<1x16x16xf32>
    %597 = vector.shape_cast %596 : vector<1x16x16xf32> to vector<16x16xf32>
    %598 = vector.broadcast %595 : f32 to vector<16x16xf32>
    %599 = arith.mulf %598, %597 : vector<16x16xf32>
    %600 = arith.addf %594, %599 : vector<16x16xf32>
    %c89 = arith.constant 89 : index
    %601 = memref.load %arg2[%c89] : memref<256xf32, #tpu.memory_space<smem>>
    %602 = vector.extract_strided_slice %7 {offsets = [2, 0, 0], sizes = [1, 16, 16], strides = [1, 1, 1]} : vector<4x16x16xf32> to vector<1x16x16xf32>
    %603 = vector.shape_cast %602 : vector<1x16x16xf32> to vector<16x16xf32>
    %604 = vector.broadcast %601 : f32 to vector<16x16xf32>
    %605 = arith.mulf %604, %603 : vector<16x16xf32>
    %606 = arith.addf %600, %605 : vector<16x16xf32>
    %c105 = arith.constant 105 : index
    %607 = memref.load %arg2[%c105] : memref<256xf32, #tpu.memory_space<smem>>
    %608 = vector.extract_strided_slice %9 {offsets = [2, 0, 0], sizes = [1, 16, 16], strides = [1, 1, 1]} : vector<4x16x16xf32> to vector<1x16x16xf32>
    %609 = vector.shape_cast %608 : vector<1x16x16xf32> to vector<16x16xf32>
    %610 = vector.broadcast %607 : f32 to vector<16x16xf32>
    %611 = arith.mulf %610, %609 : vector<16x16xf32>
    %612 = arith.addf %606, %611 : vector<16x16xf32>
    %c121 = arith.constant 121 : index
    %613 = memref.load %arg2[%c121] : memref<256xf32, #tpu.memory_space<smem>>
    %614 = vector.extract_strided_slice %10 {offsets = [2, 0, 0], sizes = [1, 16, 16], strides = [1, 1, 1]} : vector<4x16x16xf32> to vector<1x16x16xf32>
    %615 = vector.shape_cast %614 : vector<1x16x16xf32> to vector<16x16xf32>
    %616 = vector.broadcast %613 : f32 to vector<16x16xf32>
    %617 = arith.mulf %616, %615 : vector<16x16xf32>
    %618 = arith.addf %612, %617 : vector<16x16xf32>
    %c77 = arith.constant 77 : index
    %619 = memref.load %arg2[%c77] : memref<256xf32, #tpu.memory_space<smem>>
    %620 = vector.extract_strided_slice %6 {offsets = [3, 0, 0], sizes = [1, 16, 16], strides = [1, 1, 1]} : vector<4x16x16xf32> to vector<1x16x16xf32>
    %621 = vector.shape_cast %620 : vector<1x16x16xf32> to vector<16x16xf32>
    %622 = vector.broadcast %619 : f32 to vector<16x16xf32>
    %623 = arith.mulf %622, %621 : vector<16x16xf32>
    %624 = arith.addf %618, %623 : vector<16x16xf32>
    %c93 = arith.constant 93 : index
    %625 = memref.load %arg2[%c93] : memref<256xf32, #tpu.memory_space<smem>>
    %626 = vector.extract_strided_slice %7 {offsets = [3, 0, 0], sizes = [1, 16, 16], strides = [1, 1, 1]} : vector<4x16x16xf32> to vector<1x16x16xf32>
    %627 = vector.shape_cast %626 : vector<1x16x16xf32> to vector<16x16xf32>
    %628 = vector.broadcast %625 : f32 to vector<16x16xf32>
    %629 = arith.mulf %628, %627 : vector<16x16xf32>
    %630 = arith.addf %624, %629 : vector<16x16xf32>
    %c109 = arith.constant 109 : index
    %631 = memref.load %arg2[%c109] : memref<256xf32, #tpu.memory_space<smem>>
    %632 = vector.extract_strided_slice %9 {offsets = [3, 0, 0], sizes = [1, 16, 16], strides = [1, 1, 1]} : vector<4x16x16xf32> to vector<1x16x16xf32>
    %633 = vector.shape_cast %632 : vector<1x16x16xf32> to vector<16x16xf32>
    %634 = vector.broadcast %631 : f32 to vector<16x16xf32>
    %635 = arith.mulf %634, %633 : vector<16x16xf32>
    %636 = arith.addf %630, %635 : vector<16x16xf32>
    %c125 = arith.constant 125 : index
    %637 = memref.load %arg2[%c125] : memref<256xf32, #tpu.memory_space<smem>>
    %638 = vector.extract_strided_slice %10 {offsets = [3, 0, 0], sizes = [1, 16, 16], strides = [1, 1, 1]} : vector<4x16x16xf32> to vector<1x16x16xf32>
    %639 = vector.shape_cast %638 : vector<1x16x16xf32> to vector<16x16xf32>
    %640 = vector.broadcast %637 : f32 to vector<16x16xf32>
    %641 = arith.mulf %640, %639 : vector<16x16xf32>
    %642 = arith.addf %636, %641 : vector<16x16xf32>
    %cst_58 = arith.constant dense<0.000000e+00> : vector<16x32xf32>
    %643 = tpu.matmul %545, %22, %cst_58 {dimension_numbers = #tpu.dot_dimension_numbers<[1], [0], [0], [1], [0, 0, 1, 1], [], []>} : vector<16x16xf32>, vector<16x32xf32>, vector<16x32xf32> -> vector<16x32xf32>
    %cst_59 = arith.constant dense<0.000000e+00> : vector<16x32xf32>
    %644 = tpu.matmul %642, %29, %cst_59 {dimension_numbers = #tpu.dot_dimension_numbers<[1], [0], [0], [1], [0, 0, 1, 1], [], []>} : vector<16x16xf32>, vector<16x32xf32>, vector<16x32xf32> -> vector<16x32xf32>
    %645 = arith.addf %643, %644 : vector<16x32xf32>
    %cst_60 = arith.constant 0.000000e+00 : f32
    %646 = vector.broadcast %cst_60 : f32 to vector<16x16xf32>
    %c129 = arith.constant 129 : index
    %647 = memref.load %arg2[%c129] : memref<256xf32, #tpu.memory_space<smem>>
    %648 = vector.extract_strided_slice %8 {offsets = [0, 0, 0], sizes = [1, 16, 16], strides = [1, 1, 1]} : vector<4x16x16xf32> to vector<1x16x16xf32>
    %649 = vector.shape_cast %648 : vector<1x16x16xf32> to vector<16x16xf32>
    %650 = vector.broadcast %647 : f32 to vector<16x16xf32>
    %651 = arith.mulf %650, %649 : vector<16x16xf32>
    %652 = arith.addf %646, %651 : vector<16x16xf32>
    %c145 = arith.constant 145 : index
    %653 = memref.load %arg2[%c145] : memref<256xf32, #tpu.memory_space<smem>>
    %654 = vector.extract_strided_slice %9 {offsets = [0, 0, 0], sizes = [1, 16, 16], strides = [1, 1, 1]} : vector<4x16x16xf32> to vector<1x16x16xf32>
    %655 = vector.shape_cast %654 : vector<1x16x16xf32> to vector<16x16xf32>
    %656 = vector.broadcast %653 : f32 to vector<16x16xf32>
    %657 = arith.mulf %656, %655 : vector<16x16xf32>
    %658 = arith.addf %652, %657 : vector<16x16xf32>
    %c161 = arith.constant 161 : index
    %659 = memref.load %arg2[%c161] : memref<256xf32, #tpu.memory_space<smem>>
    %660 = vector.extract_strided_slice %11 {offsets = [0, 0, 0], sizes = [1, 16, 16], strides = [1, 1, 1]} : vector<4x16x16xf32> to vector<1x16x16xf32>
    %661 = vector.shape_cast %660 : vector<1x16x16xf32> to vector<16x16xf32>
    %662 = vector.broadcast %659 : f32 to vector<16x16xf32>
    %663 = arith.mulf %662, %661 : vector<16x16xf32>
    %664 = arith.addf %658, %663 : vector<16x16xf32>
    %c177 = arith.constant 177 : index
    %665 = memref.load %arg2[%c177] : memref<256xf32, #tpu.memory_space<smem>>
    %666 = vector.extract_strided_slice %12 {offsets = [0, 0, 0], sizes = [1, 16, 16], strides = [1, 1, 1]} : vector<4x16x16xf32> to vector<1x16x16xf32>
    %667 = vector.shape_cast %666 : vector<1x16x16xf32> to vector<16x16xf32>
    %668 = vector.broadcast %665 : f32 to vector<16x16xf32>
    %669 = arith.mulf %668, %667 : vector<16x16xf32>
    %670 = arith.addf %664, %669 : vector<16x16xf32>
    %c133 = arith.constant 133 : index
    %671 = memref.load %arg2[%c133] : memref<256xf32, #tpu.memory_space<smem>>
    %672 = vector.extract_strided_slice %8 {offsets = [1, 0, 0], sizes = [1, 16, 16], strides = [1, 1, 1]} : vector<4x16x16xf32> to vector<1x16x16xf32>
    %673 = vector.shape_cast %672 : vector<1x16x16xf32> to vector<16x16xf32>
    %674 = vector.broadcast %671 : f32 to vector<16x16xf32>
    %675 = arith.mulf %674, %673 : vector<16x16xf32>
    %676 = arith.addf %670, %675 : vector<16x16xf32>
    %c149 = arith.constant 149 : index
    %677 = memref.load %arg2[%c149] : memref<256xf32, #tpu.memory_space<smem>>
    %678 = vector.extract_strided_slice %9 {offsets = [1, 0, 0], sizes = [1, 16, 16], strides = [1, 1, 1]} : vector<4x16x16xf32> to vector<1x16x16xf32>
    %679 = vector.shape_cast %678 : vector<1x16x16xf32> to vector<16x16xf32>
    %680 = vector.broadcast %677 : f32 to vector<16x16xf32>
    %681 = arith.mulf %680, %679 : vector<16x16xf32>
    %682 = arith.addf %676, %681 : vector<16x16xf32>
    %c165 = arith.constant 165 : index
    %683 = memref.load %arg2[%c165] : memref<256xf32, #tpu.memory_space<smem>>
    %684 = vector.extract_strided_slice %11 {offsets = [1, 0, 0], sizes = [1, 16, 16], strides = [1, 1, 1]} : vector<4x16x16xf32> to vector<1x16x16xf32>
    %685 = vector.shape_cast %684 : vector<1x16x16xf32> to vector<16x16xf32>
    %686 = vector.broadcast %683 : f32 to vector<16x16xf32>
    %687 = arith.mulf %686, %685 : vector<16x16xf32>
    %688 = arith.addf %682, %687 : vector<16x16xf32>
    %c181 = arith.constant 181 : index
    %689 = memref.load %arg2[%c181] : memref<256xf32, #tpu.memory_space<smem>>
    %690 = vector.extract_strided_slice %12 {offsets = [1, 0, 0], sizes = [1, 16, 16], strides = [1, 1, 1]} : vector<4x16x16xf32> to vector<1x16x16xf32>
    %691 = vector.shape_cast %690 : vector<1x16x16xf32> to vector<16x16xf32>
    %692 = vector.broadcast %689 : f32 to vector<16x16xf32>
    %693 = arith.mulf %692, %691 : vector<16x16xf32>
    %694 = arith.addf %688, %693 : vector<16x16xf32>
    %c137 = arith.constant 137 : index
    %695 = memref.load %arg2[%c137] : memref<256xf32, #tpu.memory_space<smem>>
    %696 = vector.extract_strided_slice %8 {offsets = [2, 0, 0], sizes = [1, 16, 16], strides = [1, 1, 1]} : vector<4x16x16xf32> to vector<1x16x16xf32>
    %697 = vector.shape_cast %696 : vector<1x16x16xf32> to vector<16x16xf32>
    %698 = vector.broadcast %695 : f32 to vector<16x16xf32>
    %699 = arith.mulf %698, %697 : vector<16x16xf32>
    %700 = arith.addf %694, %699 : vector<16x16xf32>
    %c153 = arith.constant 153 : index
    %701 = memref.load %arg2[%c153] : memref<256xf32, #tpu.memory_space<smem>>
    %702 = vector.extract_strided_slice %9 {offsets = [2, 0, 0], sizes = [1, 16, 16], strides = [1, 1, 1]} : vector<4x16x16xf32> to vector<1x16x16xf32>
    %703 = vector.shape_cast %702 : vector<1x16x16xf32> to vector<16x16xf32>
    %704 = vector.broadcast %701 : f32 to vector<16x16xf32>
    %705 = arith.mulf %704, %703 : vector<16x16xf32>
    %706 = arith.addf %700, %705 : vector<16x16xf32>
    %c169 = arith.constant 169 : index
    %707 = memref.load %arg2[%c169] : memref<256xf32, #tpu.memory_space<smem>>
    %708 = vector.extract_strided_slice %11 {offsets = [2, 0, 0], sizes = [1, 16, 16], strides = [1, 1, 1]} : vector<4x16x16xf32> to vector<1x16x16xf32>
    %709 = vector.shape_cast %708 : vector<1x16x16xf32> to vector<16x16xf32>
    %710 = vector.broadcast %707 : f32 to vector<16x16xf32>
    %711 = arith.mulf %710, %709 : vector<16x16xf32>
    %712 = arith.addf %706, %711 : vector<16x16xf32>
    %c185 = arith.constant 185 : index
    %713 = memref.load %arg2[%c185] : memref<256xf32, #tpu.memory_space<smem>>
    %714 = vector.extract_strided_slice %12 {offsets = [2, 0, 0], sizes = [1, 16, 16], strides = [1, 1, 1]} : vector<4x16x16xf32> to vector<1x16x16xf32>
    %715 = vector.shape_cast %714 : vector<1x16x16xf32> to vector<16x16xf32>
    %716 = vector.broadcast %713 : f32 to vector<16x16xf32>
    %717 = arith.mulf %716, %715 : vector<16x16xf32>
    %718 = arith.addf %712, %717 : vector<16x16xf32>
    %c141 = arith.constant 141 : index
    %719 = memref.load %arg2[%c141] : memref<256xf32, #tpu.memory_space<smem>>
    %720 = vector.extract_strided_slice %8 {offsets = [3, 0, 0], sizes = [1, 16, 16], strides = [1, 1, 1]} : vector<4x16x16xf32> to vector<1x16x16xf32>
    %721 = vector.shape_cast %720 : vector<1x16x16xf32> to vector<16x16xf32>
    %722 = vector.broadcast %719 : f32 to vector<16x16xf32>
    %723 = arith.mulf %722, %721 : vector<16x16xf32>
    %724 = arith.addf %718, %723 : vector<16x16xf32>
    %c157 = arith.constant 157 : index
    %725 = memref.load %arg2[%c157] : memref<256xf32, #tpu.memory_space<smem>>
    %726 = vector.extract_strided_slice %9 {offsets = [3, 0, 0], sizes = [1, 16, 16], strides = [1, 1, 1]} : vector<4x16x16xf32> to vector<1x16x16xf32>
    %727 = vector.shape_cast %726 : vector<1x16x16xf32> to vector<16x16xf32>
    %728 = vector.broadcast %725 : f32 to vector<16x16xf32>
    %729 = arith.mulf %728, %727 : vector<16x16xf32>
    %730 = arith.addf %724, %729 : vector<16x16xf32>
    %c173 = arith.constant 173 : index
    %731 = memref.load %arg2[%c173] : memref<256xf32, #tpu.memory_space<smem>>
    %732 = vector.extract_strided_slice %11 {offsets = [3, 0, 0], sizes = [1, 16, 16], strides = [1, 1, 1]} : vector<4x16x16xf32> to vector<1x16x16xf32>
    %733 = vector.shape_cast %732 : vector<1x16x16xf32> to vector<16x16xf32>
    %734 = vector.broadcast %731 : f32 to vector<16x16xf32>
    %735 = arith.mulf %734, %733 : vector<16x16xf32>
    %736 = arith.addf %730, %735 : vector<16x16xf32>
    %c189 = arith.constant 189 : index
    %737 = memref.load %arg2[%c189] : memref<256xf32, #tpu.memory_space<smem>>
    %738 = vector.extract_strided_slice %12 {offsets = [3, 0, 0], sizes = [1, 16, 16], strides = [1, 1, 1]} : vector<4x16x16xf32> to vector<1x16x16xf32>
    %739 = vector.shape_cast %738 : vector<1x16x16xf32> to vector<16x16xf32>
    %740 = vector.broadcast %737 : f32 to vector<16x16xf32>
    %741 = arith.mulf %740, %739 : vector<16x16xf32>
    %742 = arith.addf %736, %741 : vector<16x16xf32>
    %cst_61 = arith.constant 0.000000e+00 : f32
    %743 = vector.broadcast %cst_61 : f32 to vector<16x16xf32>
    %c193 = arith.constant 193 : index
    %744 = memref.load %arg2[%c193] : memref<256xf32, #tpu.memory_space<smem>>
    %745 = vector.extract_strided_slice %9 {offsets = [0, 0, 0], sizes = [1, 16, 16], strides = [1, 1, 1]} : vector<4x16x16xf32> to vector<1x16x16xf32>
    %746 = vector.shape_cast %745 : vector<1x16x16xf32> to vector<16x16xf32>
    %747 = vector.broadcast %744 : f32 to vector<16x16xf32>
    %748 = arith.mulf %747, %746 : vector<16x16xf32>
    %749 = arith.addf %743, %748 : vector<16x16xf32>
    %c209 = arith.constant 209 : index
    %750 = memref.load %arg2[%c209] : memref<256xf32, #tpu.memory_space<smem>>
    %751 = vector.extract_strided_slice %10 {offsets = [0, 0, 0], sizes = [1, 16, 16], strides = [1, 1, 1]} : vector<4x16x16xf32> to vector<1x16x16xf32>
    %752 = vector.shape_cast %751 : vector<1x16x16xf32> to vector<16x16xf32>
    %753 = vector.broadcast %750 : f32 to vector<16x16xf32>
    %754 = arith.mulf %753, %752 : vector<16x16xf32>
    %755 = arith.addf %749, %754 : vector<16x16xf32>
    %c225 = arith.constant 225 : index
    %756 = memref.load %arg2[%c225] : memref<256xf32, #tpu.memory_space<smem>>
    %757 = vector.extract_strided_slice %12 {offsets = [0, 0, 0], sizes = [1, 16, 16], strides = [1, 1, 1]} : vector<4x16x16xf32> to vector<1x16x16xf32>
    %758 = vector.shape_cast %757 : vector<1x16x16xf32> to vector<16x16xf32>
    %759 = vector.broadcast %756 : f32 to vector<16x16xf32>
    %760 = arith.mulf %759, %758 : vector<16x16xf32>
    %761 = arith.addf %755, %760 : vector<16x16xf32>
    %c241 = arith.constant 241 : index
    %762 = memref.load %arg2[%c241] : memref<256xf32, #tpu.memory_space<smem>>
    %763 = vector.extract_strided_slice %13 {offsets = [0, 0, 0], sizes = [1, 16, 16], strides = [1, 1, 1]} : vector<4x16x16xf32> to vector<1x16x16xf32>
    %764 = vector.shape_cast %763 : vector<1x16x16xf32> to vector<16x16xf32>
    %765 = vector.broadcast %762 : f32 to vector<16x16xf32>
    %766 = arith.mulf %765, %764 : vector<16x16xf32>
    %767 = arith.addf %761, %766 : vector<16x16xf32>
    %c197 = arith.constant 197 : index
    %768 = memref.load %arg2[%c197] : memref<256xf32, #tpu.memory_space<smem>>
    %769 = vector.extract_strided_slice %9 {offsets = [1, 0, 0], sizes = [1, 16, 16], strides = [1, 1, 1]} : vector<4x16x16xf32> to vector<1x16x16xf32>
    %770 = vector.shape_cast %769 : vector<1x16x16xf32> to vector<16x16xf32>
    %771 = vector.broadcast %768 : f32 to vector<16x16xf32>
    %772 = arith.mulf %771, %770 : vector<16x16xf32>
    %773 = arith.addf %767, %772 : vector<16x16xf32>
    %c213 = arith.constant 213 : index
    %774 = memref.load %arg2[%c213] : memref<256xf32, #tpu.memory_space<smem>>
    %775 = vector.extract_strided_slice %10 {offsets = [1, 0, 0], sizes = [1, 16, 16], strides = [1, 1, 1]} : vector<4x16x16xf32> to vector<1x16x16xf32>
    %776 = vector.shape_cast %775 : vector<1x16x16xf32> to vector<16x16xf32>
    %777 = vector.broadcast %774 : f32 to vector<16x16xf32>
    %778 = arith.mulf %777, %776 : vector<16x16xf32>
    %779 = arith.addf %773, %778 : vector<16x16xf32>
    %c229 = arith.constant 229 : index
    %780 = memref.load %arg2[%c229] : memref<256xf32, #tpu.memory_space<smem>>
    %781 = vector.extract_strided_slice %12 {offsets = [1, 0, 0], sizes = [1, 16, 16], strides = [1, 1, 1]} : vector<4x16x16xf32> to vector<1x16x16xf32>
    %782 = vector.shape_cast %781 : vector<1x16x16xf32> to vector<16x16xf32>
    %783 = vector.broadcast %780 : f32 to vector<16x16xf32>
    %784 = arith.mulf %783, %782 : vector<16x16xf32>
    %785 = arith.addf %779, %784 : vector<16x16xf32>
    %c245 = arith.constant 245 : index
    %786 = memref.load %arg2[%c245] : memref<256xf32, #tpu.memory_space<smem>>
    %787 = vector.extract_strided_slice %13 {offsets = [1, 0, 0], sizes = [1, 16, 16], strides = [1, 1, 1]} : vector<4x16x16xf32> to vector<1x16x16xf32>
    %788 = vector.shape_cast %787 : vector<1x16x16xf32> to vector<16x16xf32>
    %789 = vector.broadcast %786 : f32 to vector<16x16xf32>
    %790 = arith.mulf %789, %788 : vector<16x16xf32>
    %791 = arith.addf %785, %790 : vector<16x16xf32>
    %c201 = arith.constant 201 : index
    %792 = memref.load %arg2[%c201] : memref<256xf32, #tpu.memory_space<smem>>
    %793 = vector.extract_strided_slice %9 {offsets = [2, 0, 0], sizes = [1, 16, 16], strides = [1, 1, 1]} : vector<4x16x16xf32> to vector<1x16x16xf32>
    %794 = vector.shape_cast %793 : vector<1x16x16xf32> to vector<16x16xf32>
    %795 = vector.broadcast %792 : f32 to vector<16x16xf32>
    %796 = arith.mulf %795, %794 : vector<16x16xf32>
    %797 = arith.addf %791, %796 : vector<16x16xf32>
    %c217 = arith.constant 217 : index
    %798 = memref.load %arg2[%c217] : memref<256xf32, #tpu.memory_space<smem>>
    %799 = vector.extract_strided_slice %10 {offsets = [2, 0, 0], sizes = [1, 16, 16], strides = [1, 1, 1]} : vector<4x16x16xf32> to vector<1x16x16xf32>
    %800 = vector.shape_cast %799 : vector<1x16x16xf32> to vector<16x16xf32>
    %801 = vector.broadcast %798 : f32 to vector<16x16xf32>
    %802 = arith.mulf %801, %800 : vector<16x16xf32>
    %803 = arith.addf %797, %802 : vector<16x16xf32>
    %c233 = arith.constant 233 : index
    %804 = memref.load %arg2[%c233] : memref<256xf32, #tpu.memory_space<smem>>
    %805 = vector.extract_strided_slice %12 {offsets = [2, 0, 0], sizes = [1, 16, 16], strides = [1, 1, 1]} : vector<4x16x16xf32> to vector<1x16x16xf32>
    %806 = vector.shape_cast %805 : vector<1x16x16xf32> to vector<16x16xf32>
    %807 = vector.broadcast %804 : f32 to vector<16x16xf32>
    %808 = arith.mulf %807, %806 : vector<16x16xf32>
    %809 = arith.addf %803, %808 : vector<16x16xf32>
    %c249 = arith.constant 249 : index
    %810 = memref.load %arg2[%c249] : memref<256xf32, #tpu.memory_space<smem>>
    %811 = vector.extract_strided_slice %13 {offsets = [2, 0, 0], sizes = [1, 16, 16], strides = [1, 1, 1]} : vector<4x16x16xf32> to vector<1x16x16xf32>
    %812 = vector.shape_cast %811 : vector<1x16x16xf32> to vector<16x16xf32>
    %813 = vector.broadcast %810 : f32 to vector<16x16xf32>
    %814 = arith.mulf %813, %812 : vector<16x16xf32>
    %815 = arith.addf %809, %814 : vector<16x16xf32>
    %c205 = arith.constant 205 : index
    %816 = memref.load %arg2[%c205] : memref<256xf32, #tpu.memory_space<smem>>
    %817 = vector.extract_strided_slice %9 {offsets = [3, 0, 0], sizes = [1, 16, 16], strides = [1, 1, 1]} : vector<4x16x16xf32> to vector<1x16x16xf32>
    %818 = vector.shape_cast %817 : vector<1x16x16xf32> to vector<16x16xf32>
    %819 = vector.broadcast %816 : f32 to vector<16x16xf32>
    %820 = arith.mulf %819, %818 : vector<16x16xf32>
    %821 = arith.addf %815, %820 : vector<16x16xf32>
    %c221 = arith.constant 221 : index
    %822 = memref.load %arg2[%c221] : memref<256xf32, #tpu.memory_space<smem>>
    %823 = vector.extract_strided_slice %10 {offsets = [3, 0, 0], sizes = [1, 16, 16], strides = [1, 1, 1]} : vector<4x16x16xf32> to vector<1x16x16xf32>
    %824 = vector.shape_cast %823 : vector<1x16x16xf32> to vector<16x16xf32>
    %825 = vector.broadcast %822 : f32 to vector<16x16xf32>
    %826 = arith.mulf %825, %824 : vector<16x16xf32>
    %827 = arith.addf %821, %826 : vector<16x16xf32>
    %c237 = arith.constant 237 : index
    %828 = memref.load %arg2[%c237] : memref<256xf32, #tpu.memory_space<smem>>
    %829 = vector.extract_strided_slice %12 {offsets = [3, 0, 0], sizes = [1, 16, 16], strides = [1, 1, 1]} : vector<4x16x16xf32> to vector<1x16x16xf32>
    %830 = vector.shape_cast %829 : vector<1x16x16xf32> to vector<16x16xf32>
    %831 = vector.broadcast %828 : f32 to vector<16x16xf32>
    %832 = arith.mulf %831, %830 : vector<16x16xf32>
    %833 = arith.addf %827, %832 : vector<16x16xf32>
    %c253 = arith.constant 253 : index
    %834 = memref.load %arg2[%c253] : memref<256xf32, #tpu.memory_space<smem>>
    %835 = vector.extract_strided_slice %13 {offsets = [3, 0, 0], sizes = [1, 16, 16], strides = [1, 1, 1]} : vector<4x16x16xf32> to vector<1x16x16xf32>
    %836 = vector.shape_cast %835 : vector<1x16x16xf32> to vector<16x16xf32>
    %837 = vector.broadcast %834 : f32 to vector<16x16xf32>
    %838 = arith.mulf %837, %836 : vector<16x16xf32>
    %839 = arith.addf %833, %838 : vector<16x16xf32>
    %cst_62 = arith.constant dense<0.000000e+00> : vector<16x32xf32>
    %840 = tpu.matmul %742, %22, %cst_62 {dimension_numbers = #tpu.dot_dimension_numbers<[1], [0], [0], [1], [0, 0, 1, 1], [], []>} : vector<16x16xf32>, vector<16x32xf32>, vector<16x32xf32> -> vector<16x32xf32>
    %cst_63 = arith.constant dense<0.000000e+00> : vector<16x32xf32>
    %841 = tpu.matmul %839, %29, %cst_63 {dimension_numbers = #tpu.dot_dimension_numbers<[1], [0], [0], [1], [0, 0, 1, 1], [], []>} : vector<16x16xf32>, vector<16x32xf32>, vector<16x32xf32> -> vector<16x32xf32>
    %842 = arith.addf %840, %841 : vector<16x32xf32>
    %cst_64 = arith.constant dense<0.000000e+00> : vector<32x32xf32>
    %843 = tpu.matmul %38, %645, %cst_64 {dimension_numbers = #tpu.dot_dimension_numbers<[1], [0], [0], [1], [0, 0, 1, 1], [], []>} : vector<32x16xf32>, vector<16x32xf32>, vector<32x32xf32> -> vector<32x32xf32>
    %cst_65 = arith.constant dense<0.000000e+00> : vector<32x32xf32>
    %844 = tpu.matmul %45, %842, %cst_65 {dimension_numbers = #tpu.dot_dimension_numbers<[1], [0], [0], [1], [0, 0, 1, 1], [], []>} : vector<32x16xf32>, vector<16x32xf32>, vector<32x32xf32> -> vector<32x32xf32>
    %845 = arith.addf %843, %844 : vector<32x32xf32>
    %c1_66 = arith.constant 1 : index
    %846 = memref.load %arg3[%c1_66] : memref<4xf32, #tpu.memory_space<smem>>
    %847 = vector.broadcast %846 : f32 to vector<32x32xf32>
    %848 = arith.addf %845, %847 : vector<32x32xf32>
    %c0_67 = arith.constant 0 : index
    %c1_68 = arith.constant 1 : index
    %c0_69 = arith.constant 0 : index
    %c0_70 = arith.constant 0 : index
    %849 = vector.load %arg4[%c0_67, %c1_68, %c0_69, %c0_70] : memref<1x4x32x32xf32, #tpu.memory_space<vmem>>, vector<1x1x32x32xf32>
    %850 = vector.shape_cast %849 : vector<1x1x32x32xf32> to vector<32x32xf32>
    %851 = vector.shape_cast %848 : vector<32x32xf32> to vector<1x1x32x32xf32>
    tpu.vector_store %arg4[%c0_67, %c1_68, %c0_69, %c0_70], %851 {strides = array<i32>} : memref<1x4x32x32xf32, #tpu.memory_space<vmem>>, vector<1x1x32x32xf32>,
    %cst_71 = arith.constant 0.000000e+00 : f32
    %852 = vector.broadcast %cst_71 : f32 to vector<16x16xf32>
    %c2_72 = arith.constant 2 : index
    %853 = memref.load %arg2[%c2_72] : memref<256xf32, #tpu.memory_space<smem>>
    %854 = vector.extract_strided_slice %5 {offsets = [0, 0, 0], sizes = [1, 16, 16], strides = [1, 1, 1]} : vector<4x16x16xf32> to vector<1x16x16xf32>
    %855 = vector.shape_cast %854 : vector<1x16x16xf32> to vector<16x16xf32>
    %856 = vector.broadcast %853 : f32 to vector<16x16xf32>
    %857 = arith.mulf %856, %855 : vector<16x16xf32>
    %858 = arith.addf %852, %857 : vector<16x16xf32>
    %c18 = arith.constant 18 : index
    %859 = memref.load %arg2[%c18] : memref<256xf32, #tpu.memory_space<smem>>
    %860 = vector.extract_strided_slice %6 {offsets = [0, 0, 0], sizes = [1, 16, 16], strides = [1, 1, 1]} : vector<4x16x16xf32> to vector<1x16x16xf32>
    %861 = vector.shape_cast %860 : vector<1x16x16xf32> to vector<16x16xf32>
    %862 = vector.broadcast %859 : f32 to vector<16x16xf32>
    %863 = arith.mulf %862, %861 : vector<16x16xf32>
    %864 = arith.addf %858, %863 : vector<16x16xf32>
    %c34 = arith.constant 34 : index
    %865 = memref.load %arg2[%c34] : memref<256xf32, #tpu.memory_space<smem>>
    %866 = vector.extract_strided_slice %8 {offsets = [0, 0, 0], sizes = [1, 16, 16], strides = [1, 1, 1]} : vector<4x16x16xf32> to vector<1x16x16xf32>
    %867 = vector.shape_cast %866 : vector<1x16x16xf32> to vector<16x16xf32>
    %868 = vector.broadcast %865 : f32 to vector<16x16xf32>
    %869 = arith.mulf %868, %867 : vector<16x16xf32>
    %870 = arith.addf %864, %869 : vector<16x16xf32>
    %c50 = arith.constant 50 : index
    %871 = memref.load %arg2[%c50] : memref<256xf32, #tpu.memory_space<smem>>
    %872 = vector.extract_strided_slice %9 {offsets = [0, 0, 0], sizes = [1, 16, 16], strides = [1, 1, 1]} : vector<4x16x16xf32> to vector<1x16x16xf32>
    %873 = vector.shape_cast %872 : vector<1x16x16xf32> to vector<16x16xf32>
    %874 = vector.broadcast %871 : f32 to vector<16x16xf32>
    %875 = arith.mulf %874, %873 : vector<16x16xf32>
    %876 = arith.addf %870, %875 : vector<16x16xf32>
    %c6 = arith.constant 6 : index
    %877 = memref.load %arg2[%c6] : memref<256xf32, #tpu.memory_space<smem>>
    %878 = vector.extract_strided_slice %5 {offsets = [1, 0, 0], sizes = [1, 16, 16], strides = [1, 1, 1]} : vector<4x16x16xf32> to vector<1x16x16xf32>
    %879 = vector.shape_cast %878 : vector<1x16x16xf32> to vector<16x16xf32>
    %880 = vector.broadcast %877 : f32 to vector<16x16xf32>
    %881 = arith.mulf %880, %879 : vector<16x16xf32>
    %882 = arith.addf %876, %881 : vector<16x16xf32>
    %c22 = arith.constant 22 : index
    %883 = memref.load %arg2[%c22] : memref<256xf32, #tpu.memory_space<smem>>
    %884 = vector.extract_strided_slice %6 {offsets = [1, 0, 0], sizes = [1, 16, 16], strides = [1, 1, 1]} : vector<4x16x16xf32> to vector<1x16x16xf32>
    %885 = vector.shape_cast %884 : vector<1x16x16xf32> to vector<16x16xf32>
    %886 = vector.broadcast %883 : f32 to vector<16x16xf32>
    %887 = arith.mulf %886, %885 : vector<16x16xf32>
    %888 = arith.addf %882, %887 : vector<16x16xf32>
    %c38 = arith.constant 38 : index
    %889 = memref.load %arg2[%c38] : memref<256xf32, #tpu.memory_space<smem>>
    %890 = vector.extract_strided_slice %8 {offsets = [1, 0, 0], sizes = [1, 16, 16], strides = [1, 1, 1]} : vector<4x16x16xf32> to vector<1x16x16xf32>
    %891 = vector.shape_cast %890 : vector<1x16x16xf32> to vector<16x16xf32>
    %892 = vector.broadcast %889 : f32 to vector<16x16xf32>
    %893 = arith.mulf %892, %891 : vector<16x16xf32>
    %894 = arith.addf %888, %893 : vector<16x16xf32>
    %c54 = arith.constant 54 : index
    %895 = memref.load %arg2[%c54] : memref<256xf32, #tpu.memory_space<smem>>
    %896 = vector.extract_strided_slice %9 {offsets = [1, 0, 0], sizes = [1, 16, 16], strides = [1, 1, 1]} : vector<4x16x16xf32> to vector<1x16x16xf32>
    %897 = vector.shape_cast %896 : vector<1x16x16xf32> to vector<16x16xf32>
    %898 = vector.broadcast %895 : f32 to vector<16x16xf32>
    %899 = arith.mulf %898, %897 : vector<16x16xf32>
    %900 = arith.addf %894, %899 : vector<16x16xf32>
    %c10 = arith.constant 10 : index
    %901 = memref.load %arg2[%c10] : memref<256xf32, #tpu.memory_space<smem>>
    %902 = vector.extract_strided_slice %5 {offsets = [2, 0, 0], sizes = [1, 16, 16], strides = [1, 1, 1]} : vector<4x16x16xf32> to vector<1x16x16xf32>
    %903 = vector.shape_cast %902 : vector<1x16x16xf32> to vector<16x16xf32>
    %904 = vector.broadcast %901 : f32 to vector<16x16xf32>
    %905 = arith.mulf %904, %903 : vector<16x16xf32>
    %906 = arith.addf %900, %905 : vector<16x16xf32>
    %c26 = arith.constant 26 : index
    %907 = memref.load %arg2[%c26] : memref<256xf32, #tpu.memory_space<smem>>
    %908 = vector.extract_strided_slice %6 {offsets = [2, 0, 0], sizes = [1, 16, 16], strides = [1, 1, 1]} : vector<4x16x16xf32> to vector<1x16x16xf32>
    %909 = vector.shape_cast %908 : vector<1x16x16xf32> to vector<16x16xf32>
    %910 = vector.broadcast %907 : f32 to vector<16x16xf32>
    %911 = arith.mulf %910, %909 : vector<16x16xf32>
    %912 = arith.addf %906, %911 : vector<16x16xf32>
    %c42 = arith.constant 42 : index
    %913 = memref.load %arg2[%c42] : memref<256xf32, #tpu.memory_space<smem>>
    %914 = vector.extract_strided_slice %8 {offsets = [2, 0, 0], sizes = [1, 16, 16], strides = [1, 1, 1]} : vector<4x16x16xf32> to vector<1x16x16xf32>
    %915 = vector.shape_cast %914 : vector<1x16x16xf32> to vector<16x16xf32>
    %916 = vector.broadcast %913 : f32 to vector<16x16xf32>
    %917 = arith.mulf %916, %915 : vector<16x16xf32>
    %918 = arith.addf %912, %917 : vector<16x16xf32>
    %c58 = arith.constant 58 : index
    %919 = memref.load %arg2[%c58] : memref<256xf32, #tpu.memory_space<smem>>
    %920 = vector.extract_strided_slice %9 {offsets = [2, 0, 0], sizes = [1, 16, 16], strides = [1, 1, 1]} : vector<4x16x16xf32> to vector<1x16x16xf32>
    %921 = vector.shape_cast %920 : vector<1x16x16xf32> to vector<16x16xf32>
    %922 = vector.broadcast %919 : f32 to vector<16x16xf32>
    %923 = arith.mulf %922, %921 : vector<16x16xf32>
    %924 = arith.addf %918, %923 : vector<16x16xf32>
    %c14 = arith.constant 14 : index
    %925 = memref.load %arg2[%c14] : memref<256xf32, #tpu.memory_space<smem>>
    %926 = vector.extract_strided_slice %5 {offsets = [3, 0, 0], sizes = [1, 16, 16], strides = [1, 1, 1]} : vector<4x16x16xf32> to vector<1x16x16xf32>
    %927 = vector.shape_cast %926 : vector<1x16x16xf32> to vector<16x16xf32>
    %928 = vector.broadcast %925 : f32 to vector<16x16xf32>
    %929 = arith.mulf %928, %927 : vector<16x16xf32>
    %930 = arith.addf %924, %929 : vector<16x16xf32>
    %c30 = arith.constant 30 : index
    %931 = memref.load %arg2[%c30] : memref<256xf32, #tpu.memory_space<smem>>
    %932 = vector.extract_strided_slice %6 {offsets = [3, 0, 0], sizes = [1, 16, 16], strides = [1, 1, 1]} : vector<4x16x16xf32> to vector<1x16x16xf32>
    %933 = vector.shape_cast %932 : vector<1x16x16xf32> to vector<16x16xf32>
    %934 = vector.broadcast %931 : f32 to vector<16x16xf32>
    %935 = arith.mulf %934, %933 : vector<16x16xf32>
    %936 = arith.addf %930, %935 : vector<16x16xf32>
    %c46 = arith.constant 46 : index
    %937 = memref.load %arg2[%c46] : memref<256xf32, #tpu.memory_space<smem>>
    %938 = vector.extract_strided_slice %8 {offsets = [3, 0, 0], sizes = [1, 16, 16], strides = [1, 1, 1]} : vector<4x16x16xf32> to vector<1x16x16xf32>
    %939 = vector.shape_cast %938 : vector<1x16x16xf32> to vector<16x16xf32>
    %940 = vector.broadcast %937 : f32 to vector<16x16xf32>
    %941 = arith.mulf %940, %939 : vector<16x16xf32>
    %942 = arith.addf %936, %941 : vector<16x16xf32>
    %c62 = arith.constant 62 : index
    %943 = memref.load %arg2[%c62] : memref<256xf32, #tpu.memory_space<smem>>
    %944 = vector.extract_strided_slice %9 {offsets = [3, 0, 0], sizes = [1, 16, 16], strides = [1, 1, 1]} : vector<4x16x16xf32> to vector<1x16x16xf32>
    %945 = vector.shape_cast %944 : vector<1x16x16xf32> to vector<16x16xf32>
    %946 = vector.broadcast %943 : f32 to vector<16x16xf32>
    %947 = arith.mulf %946, %945 : vector<16x16xf32>
    %948 = arith.addf %942, %947 : vector<16x16xf32>
    %cst_73 = arith.constant 0.000000e+00 : f32
    %949 = vector.broadcast %cst_73 : f32 to vector<16x16xf32>
    %c66 = arith.constant 66 : index
    %950 = memref.load %arg2[%c66] : memref<256xf32, #tpu.memory_space<smem>>
    %951 = vector.extract_strided_slice %6 {offsets = [0, 0, 0], sizes = [1, 16, 16], strides = [1, 1, 1]} : vector<4x16x16xf32> to vector<1x16x16xf32>
    %952 = vector.shape_cast %951 : vector<1x16x16xf32> to vector<16x16xf32>
    %953 = vector.broadcast %950 : f32 to vector<16x16xf32>
    %954 = arith.mulf %953, %952 : vector<16x16xf32>
    %955 = arith.addf %949, %954 : vector<16x16xf32>
    %c82 = arith.constant 82 : index
    %956 = memref.load %arg2[%c82] : memref<256xf32, #tpu.memory_space<smem>>
    %957 = vector.extract_strided_slice %7 {offsets = [0, 0, 0], sizes = [1, 16, 16], strides = [1, 1, 1]} : vector<4x16x16xf32> to vector<1x16x16xf32>
    %958 = vector.shape_cast %957 : vector<1x16x16xf32> to vector<16x16xf32>
    %959 = vector.broadcast %956 : f32 to vector<16x16xf32>
    %960 = arith.mulf %959, %958 : vector<16x16xf32>
    %961 = arith.addf %955, %960 : vector<16x16xf32>
    %c98 = arith.constant 98 : index
    %962 = memref.load %arg2[%c98] : memref<256xf32, #tpu.memory_space<smem>>
    %963 = vector.extract_strided_slice %9 {offsets = [0, 0, 0], sizes = [1, 16, 16], strides = [1, 1, 1]} : vector<4x16x16xf32> to vector<1x16x16xf32>
    %964 = vector.shape_cast %963 : vector<1x16x16xf32> to vector<16x16xf32>
    %965 = vector.broadcast %962 : f32 to vector<16x16xf32>
    %966 = arith.mulf %965, %964 : vector<16x16xf32>
    %967 = arith.addf %961, %966 : vector<16x16xf32>
    %c114 = arith.constant 114 : index
    %968 = memref.load %arg2[%c114] : memref<256xf32, #tpu.memory_space<smem>>
    %969 = vector.extract_strided_slice %10 {offsets = [0, 0, 0], sizes = [1, 16, 16], strides = [1, 1, 1]} : vector<4x16x16xf32> to vector<1x16x16xf32>
    %970 = vector.shape_cast %969 : vector<1x16x16xf32> to vector<16x16xf32>
    %971 = vector.broadcast %968 : f32 to vector<16x16xf32>
    %972 = arith.mulf %971, %970 : vector<16x16xf32>
    %973 = arith.addf %967, %972 : vector<16x16xf32>
    %c70 = arith.constant 70 : index
    %974 = memref.load %arg2[%c70] : memref<256xf32, #tpu.memory_space<smem>>
    %975 = vector.extract_strided_slice %6 {offsets = [1, 0, 0], sizes = [1, 16, 16], strides = [1, 1, 1]} : vector<4x16x16xf32> to vector<1x16x16xf32>
    %976 = vector.shape_cast %975 : vector<1x16x16xf32> to vector<16x16xf32>
    %977 = vector.broadcast %974 : f32 to vector<16x16xf32>
    %978 = arith.mulf %977, %976 : vector<16x16xf32>
    %979 = arith.addf %973, %978 : vector<16x16xf32>
    %c86 = arith.constant 86 : index
    %980 = memref.load %arg2[%c86] : memref<256xf32, #tpu.memory_space<smem>>
    %981 = vector.extract_strided_slice %7 {offsets = [1, 0, 0], sizes = [1, 16, 16], strides = [1, 1, 1]} : vector<4x16x16xf32> to vector<1x16x16xf32>
    %982 = vector.shape_cast %981 : vector<1x16x16xf32> to vector<16x16xf32>
    %983 = vector.broadcast %980 : f32 to vector<16x16xf32>
    %984 = arith.mulf %983, %982 : vector<16x16xf32>
    %985 = arith.addf %979, %984 : vector<16x16xf32>
    %c102 = arith.constant 102 : index
    %986 = memref.load %arg2[%c102] : memref<256xf32, #tpu.memory_space<smem>>
    %987 = vector.extract_strided_slice %9 {offsets = [1, 0, 0], sizes = [1, 16, 16], strides = [1, 1, 1]} : vector<4x16x16xf32> to vector<1x16x16xf32>
    %988 = vector.shape_cast %987 : vector<1x16x16xf32> to vector<16x16xf32>
    %989 = vector.broadcast %986 : f32 to vector<16x16xf32>
    %990 = arith.mulf %989, %988 : vector<16x16xf32>
    %991 = arith.addf %985, %990 : vector<16x16xf32>
    %c118 = arith.constant 118 : index
    %992 = memref.load %arg2[%c118] : memref<256xf32, #tpu.memory_space<smem>>
    %993 = vector.extract_strided_slice %10 {offsets = [1, 0, 0], sizes = [1, 16, 16], strides = [1, 1, 1]} : vector<4x16x16xf32> to vector<1x16x16xf32>
    %994 = vector.shape_cast %993 : vector<1x16x16xf32> to vector<16x16xf32>
    %995 = vector.broadcast %992 : f32 to vector<16x16xf32>
    %996 = arith.mulf %995, %994 : vector<16x16xf32>
    %997 = arith.addf %991, %996 : vector<16x16xf32>
    %c74 = arith.constant 74 : index
    %998 = memref.load %arg2[%c74] : memref<256xf32, #tpu.memory_space<smem>>
    %999 = vector.extract_strided_slice %6 {offsets = [2, 0, 0], sizes = [1, 16, 16], strides = [1, 1, 1]} : vector<4x16x16xf32> to vector<1x16x16xf32>
    %1000 = vector.shape_cast %999 : vector<1x16x16xf32> to vector<16x16xf32>
    %1001 = vector.broadcast %998 : f32 to vector<16x16xf32>
    %1002 = arith.mulf %1001, %1000 : vector<16x16xf32>
    %1003 = arith.addf %997, %1002 : vector<16x16xf32>
    %c90 = arith.constant 90 : index
    %1004 = memref.load %arg2[%c90] : memref<256xf32, #tpu.memory_space<smem>>
    %1005 = vector.extract_strided_slice %7 {offsets = [2, 0, 0], sizes = [1, 16, 16], strides = [1, 1, 1]} : vector<4x16x16xf32> to vector<1x16x16xf32>
    %1006 = vector.shape_cast %1005 : vector<1x16x16xf32> to vector<16x16xf32>
    %1007 = vector.broadcast %1004 : f32 to vector<16x16xf32>
    %1008 = arith.mulf %1007, %1006 : vector<16x16xf32>
    %1009 = arith.addf %1003, %1008 : vector<16x16xf32>
    %c106 = arith.constant 106 : index
    %1010 = memref.load %arg2[%c106] : memref<256xf32, #tpu.memory_space<smem>>
    %1011 = vector.extract_strided_slice %9 {offsets = [2, 0, 0], sizes = [1, 16, 16], strides = [1, 1, 1]} : vector<4x16x16xf32> to vector<1x16x16xf32>
    %1012 = vector.shape_cast %1011 : vector<1x16x16xf32> to vector<16x16xf32>
    %1013 = vector.broadcast %1010 : f32 to vector<16x16xf32>
    %1014 = arith.mulf %1013, %1012 : vector<16x16xf32>
    %1015 = arith.addf %1009, %1014 : vector<16x16xf32>
    %c122 = arith.constant 122 : index
    %1016 = memref.load %arg2[%c122] : memref<256xf32, #tpu.memory_space<smem>>
    %1017 = vector.extract_strided_slice %10 {offsets = [2, 0, 0], sizes = [1, 16, 16], strides = [1, 1, 1]} : vector<4x16x16xf32> to vector<1x16x16xf32>
    %1018 = vector.shape_cast %1017 : vector<1x16x16xf32> to vector<16x16xf32>
    %1019 = vector.broadcast %1016 : f32 to vector<16x16xf32>
    %1020 = arith.mulf %1019, %1018 : vector<16x16xf32>
    %1021 = arith.addf %1015, %1020 : vector<16x16xf32>
    %c78 = arith.constant 78 : index
    %1022 = memref.load %arg2[%c78] : memref<256xf32, #tpu.memory_space<smem>>
    %1023 = vector.extract_strided_slice %6 {offsets = [3, 0, 0], sizes = [1, 16, 16], strides = [1, 1, 1]} : vector<4x16x16xf32> to vector<1x16x16xf32>
    %1024 = vector.shape_cast %1023 : vector<1x16x16xf32> to vector<16x16xf32>
    %1025 = vector.broadcast %1022 : f32 to vector<16x16xf32>
    %1026 = arith.mulf %1025, %1024 : vector<16x16xf32>
    %1027 = arith.addf %1021, %1026 : vector<16x16xf32>
    %c94 = arith.constant 94 : index
    %1028 = memref.load %arg2[%c94] : memref<256xf32, #tpu.memory_space<smem>>
    %1029 = vector.extract_strided_slice %7 {offsets = [3, 0, 0], sizes = [1, 16, 16], strides = [1, 1, 1]} : vector<4x16x16xf32> to vector<1x16x16xf32>
    %1030 = vector.shape_cast %1029 : vector<1x16x16xf32> to vector<16x16xf32>
    %1031 = vector.broadcast %1028 : f32 to vector<16x16xf32>
    %1032 = arith.mulf %1031, %1030 : vector<16x16xf32>
    %1033 = arith.addf %1027, %1032 : vector<16x16xf32>
    %c110 = arith.constant 110 : index
    %1034 = memref.load %arg2[%c110] : memref<256xf32, #tpu.memory_space<smem>>
    %1035 = vector.extract_strided_slice %9 {offsets = [3, 0, 0], sizes = [1, 16, 16], strides = [1, 1, 1]} : vector<4x16x16xf32> to vector<1x16x16xf32>
    %1036 = vector.shape_cast %1035 : vector<1x16x16xf32> to vector<16x16xf32>
    %1037 = vector.broadcast %1034 : f32 to vector<16x16xf32>
    %1038 = arith.mulf %1037, %1036 : vector<16x16xf32>
    %1039 = arith.addf %1033, %1038 : vector<16x16xf32>
    %c126 = arith.constant 126 : index
    %1040 = memref.load %arg2[%c126] : memref<256xf32, #tpu.memory_space<smem>>
    %1041 = vector.extract_strided_slice %10 {offsets = [3, 0, 0], sizes = [1, 16, 16], strides = [1, 1, 1]} : vector<4x16x16xf32> to vector<1x16x16xf32>
    %1042 = vector.shape_cast %1041 : vector<1x16x16xf32> to vector<16x16xf32>
    %1043 = vector.broadcast %1040 : f32 to vector<16x16xf32>
    %1044 = arith.mulf %1043, %1042 : vector<16x16xf32>
    %1045 = arith.addf %1039, %1044 : vector<16x16xf32>
    %cst_74 = arith.constant dense<0.000000e+00> : vector<16x32xf32>
    %1046 = tpu.matmul %948, %22, %cst_74 {dimension_numbers = #tpu.dot_dimension_numbers<[1], [0], [0], [1], [0, 0, 1, 1], [], []>} : vector<16x16xf32>, vector<16x32xf32>, vector<16x32xf32> -> vector<16x32xf32>
    %cst_75 = arith.constant dense<0.000000e+00> : vector<16x32xf32>
    %1047 = tpu.matmul %1045, %29, %cst_75 {dimension_numbers = #tpu.dot_dimension_numbers<[1], [0], [0], [1], [0, 0, 1, 1], [], []>} : vector<16x16xf32>, vector<16x32xf32>, vector<16x32xf32> -> vector<16x32xf32>
    %1048 = arith.addf %1046, %1047 : vector<16x32xf32>
    %cst_76 = arith.constant 0.000000e+00 : f32
    %1049 = vector.broadcast %cst_76 : f32 to vector<16x16xf32>
    %c130 = arith.constant 130 : index
    %1050 = memref.load %arg2[%c130] : memref<256xf32, #tpu.memory_space<smem>>
    %1051 = vector.extract_strided_slice %8 {offsets = [0, 0, 0], sizes = [1, 16, 16], strides = [1, 1, 1]} : vector<4x16x16xf32> to vector<1x16x16xf32>
    %1052 = vector.shape_cast %1051 : vector<1x16x16xf32> to vector<16x16xf32>
    %1053 = vector.broadcast %1050 : f32 to vector<16x16xf32>
    %1054 = arith.mulf %1053, %1052 : vector<16x16xf32>
    %1055 = arith.addf %1049, %1054 : vector<16x16xf32>
    %c146 = arith.constant 146 : index
    %1056 = memref.load %arg2[%c146] : memref<256xf32, #tpu.memory_space<smem>>
    %1057 = vector.extract_strided_slice %9 {offsets = [0, 0, 0], sizes = [1, 16, 16], strides = [1, 1, 1]} : vector<4x16x16xf32> to vector<1x16x16xf32>
    %1058 = vector.shape_cast %1057 : vector<1x16x16xf32> to vector<16x16xf32>
    %1059 = vector.broadcast %1056 : f32 to vector<16x16xf32>
    %1060 = arith.mulf %1059, %1058 : vector<16x16xf32>
    %1061 = arith.addf %1055, %1060 : vector<16x16xf32>
    %c162 = arith.constant 162 : index
    %1062 = memref.load %arg2[%c162] : memref<256xf32, #tpu.memory_space<smem>>
    %1063 = vector.extract_strided_slice %11 {offsets = [0, 0, 0], sizes = [1, 16, 16], strides = [1, 1, 1]} : vector<4x16x16xf32> to vector<1x16x16xf32>
    %1064 = vector.shape_cast %1063 : vector<1x16x16xf32> to vector<16x16xf32>
    %1065 = vector.broadcast %1062 : f32 to vector<16x16xf32>
    %1066 = arith.mulf %1065, %1064 : vector<16x16xf32>
    %1067 = arith.addf %1061, %1066 : vector<16x16xf32>
    %c178 = arith.constant 178 : index
    %1068 = memref.load %arg2[%c178] : memref<256xf32, #tpu.memory_space<smem>>
    %1069 = vector.extract_strided_slice %12 {offsets = [0, 0, 0], sizes = [1, 16, 16], strides = [1, 1, 1]} : vector<4x16x16xf32> to vector<1x16x16xf32>
    %1070 = vector.shape_cast %1069 : vector<1x16x16xf32> to vector<16x16xf32>
    %1071 = vector.broadcast %1068 : f32 to vector<16x16xf32>
    %1072 = arith.mulf %1071, %1070 : vector<16x16xf32>
    %1073 = arith.addf %1067, %1072 : vector<16x16xf32>
    %c134 = arith.constant 134 : index
    %1074 = memref.load %arg2[%c134] : memref<256xf32, #tpu.memory_space<smem>>
    %1075 = vector.extract_strided_slice %8 {offsets = [1, 0, 0], sizes = [1, 16, 16], strides = [1, 1, 1]} : vector<4x16x16xf32> to vector<1x16x16xf32>
    %1076 = vector.shape_cast %1075 : vector<1x16x16xf32> to vector<16x16xf32>
    %1077 = vector.broadcast %1074 : f32 to vector<16x16xf32>
    %1078 = arith.mulf %1077, %1076 : vector<16x16xf32>
    %1079 = arith.addf %1073, %1078 : vector<16x16xf32>
    %c150 = arith.constant 150 : index
    %1080 = memref.load %arg2[%c150] : memref<256xf32, #tpu.memory_space<smem>>
    %1081 = vector.extract_strided_slice %9 {offsets = [1, 0, 0], sizes = [1, 16, 16], strides = [1, 1, 1]} : vector<4x16x16xf32> to vector<1x16x16xf32>
    %1082 = vector.shape_cast %1081 : vector<1x16x16xf32> to vector<16x16xf32>
    %1083 = vector.broadcast %1080 : f32 to vector<16x16xf32>
    %1084 = arith.mulf %1083, %1082 : vector<16x16xf32>
    %1085 = arith.addf %1079, %1084 : vector<16x16xf32>
    %c166 = arith.constant 166 : index
    %1086 = memref.load %arg2[%c166] : memref<256xf32, #tpu.memory_space<smem>>
    %1087 = vector.extract_strided_slice %11 {offsets = [1, 0, 0], sizes = [1, 16, 16], strides = [1, 1, 1]} : vector<4x16x16xf32> to vector<1x16x16xf32>
    %1088 = vector.shape_cast %1087 : vector<1x16x16xf32> to vector<16x16xf32>
    %1089 = vector.broadcast %1086 : f32 to vector<16x16xf32>
    %1090 = arith.mulf %1089, %1088 : vector<16x16xf32>
    %1091 = arith.addf %1085, %1090 : vector<16x16xf32>
    %c182 = arith.constant 182 : index
    %1092 = memref.load %arg2[%c182] : memref<256xf32, #tpu.memory_space<smem>>
    %1093 = vector.extract_strided_slice %12 {offsets = [1, 0, 0], sizes = [1, 16, 16], strides = [1, 1, 1]} : vector<4x16x16xf32> to vector<1x16x16xf32>
    %1094 = vector.shape_cast %1093 : vector<1x16x16xf32> to vector<16x16xf32>
    %1095 = vector.broadcast %1092 : f32 to vector<16x16xf32>
    %1096 = arith.mulf %1095, %1094 : vector<16x16xf32>
    %1097 = arith.addf %1091, %1096 : vector<16x16xf32>
    %c138 = arith.constant 138 : index
    %1098 = memref.load %arg2[%c138] : memref<256xf32, #tpu.memory_space<smem>>
    %1099 = vector.extract_strided_slice %8 {offsets = [2, 0, 0], sizes = [1, 16, 16], strides = [1, 1, 1]} : vector<4x16x16xf32> to vector<1x16x16xf32>
    %1100 = vector.shape_cast %1099 : vector<1x16x16xf32> to vector<16x16xf32>
    %1101 = vector.broadcast %1098 : f32 to vector<16x16xf32>
    %1102 = arith.mulf %1101, %1100 : vector<16x16xf32>
    %1103 = arith.addf %1097, %1102 : vector<16x16xf32>
    %c154 = arith.constant 154 : index
    %1104 = memref.load %arg2[%c154] : memref<256xf32, #tpu.memory_space<smem>>
    %1105 = vector.extract_strided_slice %9 {offsets = [2, 0, 0], sizes = [1, 16, 16], strides = [1, 1, 1]} : vector<4x16x16xf32> to vector<1x16x16xf32>
    %1106 = vector.shape_cast %1105 : vector<1x16x16xf32> to vector<16x16xf32>
    %1107 = vector.broadcast %1104 : f32 to vector<16x16xf32>
    %1108 = arith.mulf %1107, %1106 : vector<16x16xf32>
    %1109 = arith.addf %1103, %1108 : vector<16x16xf32>
    %c170 = arith.constant 170 : index
    %1110 = memref.load %arg2[%c170] : memref<256xf32, #tpu.memory_space<smem>>
    %1111 = vector.extract_strided_slice %11 {offsets = [2, 0, 0], sizes = [1, 16, 16], strides = [1, 1, 1]} : vector<4x16x16xf32> to vector<1x16x16xf32>
    %1112 = vector.shape_cast %1111 : vector<1x16x16xf32> to vector<16x16xf32>
    %1113 = vector.broadcast %1110 : f32 to vector<16x16xf32>
    %1114 = arith.mulf %1113, %1112 : vector<16x16xf32>
    %1115 = arith.addf %1109, %1114 : vector<16x16xf32>
    %c186 = arith.constant 186 : index
    %1116 = memref.load %arg2[%c186] : memref<256xf32, #tpu.memory_space<smem>>
    %1117 = vector.extract_strided_slice %12 {offsets = [2, 0, 0], sizes = [1, 16, 16], strides = [1, 1, 1]} : vector<4x16x16xf32> to vector<1x16x16xf32>
    %1118 = vector.shape_cast %1117 : vector<1x16x16xf32> to vector<16x16xf32>
    %1119 = vector.broadcast %1116 : f32 to vector<16x16xf32>
    %1120 = arith.mulf %1119, %1118 : vector<16x16xf32>
    %1121 = arith.addf %1115, %1120 : vector<16x16xf32>
    %c142 = arith.constant 142 : index
    %1122 = memref.load %arg2[%c142] : memref<256xf32, #tpu.memory_space<smem>>
    %1123 = vector.extract_strided_slice %8 {offsets = [3, 0, 0], sizes = [1, 16, 16], strides = [1, 1, 1]} : vector<4x16x16xf32> to vector<1x16x16xf32>
    %1124 = vector.shape_cast %1123 : vector<1x16x16xf32> to vector<16x16xf32>
    %1125 = vector.broadcast %1122 : f32 to vector<16x16xf32>
    %1126 = arith.mulf %1125, %1124 : vector<16x16xf32>
    %1127 = arith.addf %1121, %1126 : vector<16x16xf32>
    %c158 = arith.constant 158 : index
    %1128 = memref.load %arg2[%c158] : memref<256xf32, #tpu.memory_space<smem>>
    %1129 = vector.extract_strided_slice %9 {offsets = [3, 0, 0], sizes = [1, 16, 16], strides = [1, 1, 1]} : vector<4x16x16xf32> to vector<1x16x16xf32>
    %1130 = vector.shape_cast %1129 : vector<1x16x16xf32> to vector<16x16xf32>
    %1131 = vector.broadcast %1128 : f32 to vector<16x16xf32>
    %1132 = arith.mulf %1131, %1130 : vector<16x16xf32>
    %1133 = arith.addf %1127, %1132 : vector<16x16xf32>
    %c174 = arith.constant 174 : index
    %1134 = memref.load %arg2[%c174] : memref<256xf32, #tpu.memory_space<smem>>
    %1135 = vector.extract_strided_slice %11 {offsets = [3, 0, 0], sizes = [1, 16, 16], strides = [1, 1, 1]} : vector<4x16x16xf32> to vector<1x16x16xf32>
    %1136 = vector.shape_cast %1135 : vector<1x16x16xf32> to vector<16x16xf32>
    %1137 = vector.broadcast %1134 : f32 to vector<16x16xf32>
    %1138 = arith.mulf %1137, %1136 : vector<16x16xf32>
    %1139 = arith.addf %1133, %1138 : vector<16x16xf32>
    %c190 = arith.constant 190 : index
    %1140 = memref.load %arg2[%c190] : memref<256xf32, #tpu.memory_space<smem>>
    %1141 = vector.extract_strided_slice %12 {offsets = [3, 0, 0], sizes = [1, 16, 16], strides = [1, 1, 1]} : vector<4x16x16xf32> to vector<1x16x16xf32>
    %1142 = vector.shape_cast %1141 : vector<1x16x16xf32> to vector<16x16xf32>
    %1143 = vector.broadcast %1140 : f32 to vector<16x16xf32>
    %1144 = arith.mulf %1143, %1142 : vector<16x16xf32>
    %1145 = arith.addf %1139, %1144 : vector<16x16xf32>
    %cst_77 = arith.constant 0.000000e+00 : f32
    %1146 = vector.broadcast %cst_77 : f32 to vector<16x16xf32>
    %c194 = arith.constant 194 : index
    %1147 = memref.load %arg2[%c194] : memref<256xf32, #tpu.memory_space<smem>>
    %1148 = vector.extract_strided_slice %9 {offsets = [0, 0, 0], sizes = [1, 16, 16], strides = [1, 1, 1]} : vector<4x16x16xf32> to vector<1x16x16xf32>
    %1149 = vector.shape_cast %1148 : vector<1x16x16xf32> to vector<16x16xf32>
    %1150 = vector.broadcast %1147 : f32 to vector<16x16xf32>
    %1151 = arith.mulf %1150, %1149 : vector<16x16xf32>
    %1152 = arith.addf %1146, %1151 : vector<16x16xf32>
    %c210 = arith.constant 210 : index
    %1153 = memref.load %arg2[%c210] : memref<256xf32, #tpu.memory_space<smem>>
    %1154 = vector.extract_strided_slice %10 {offsets = [0, 0, 0], sizes = [1, 16, 16], strides = [1, 1, 1]} : vector<4x16x16xf32> to vector<1x16x16xf32>
    %1155 = vector.shape_cast %1154 : vector<1x16x16xf32> to vector<16x16xf32>
    %1156 = vector.broadcast %1153 : f32 to vector<16x16xf32>
    %1157 = arith.mulf %1156, %1155 : vector<16x16xf32>
    %1158 = arith.addf %1152, %1157 : vector<16x16xf32>
    %c226 = arith.constant 226 : index
    %1159 = memref.load %arg2[%c226] : memref<256xf32, #tpu.memory_space<smem>>
    %1160 = vector.extract_strided_slice %12 {offsets = [0, 0, 0], sizes = [1, 16, 16], strides = [1, 1, 1]} : vector<4x16x16xf32> to vector<1x16x16xf32>
    %1161 = vector.shape_cast %1160 : vector<1x16x16xf32> to vector<16x16xf32>
    %1162 = vector.broadcast %1159 : f32 to vector<16x16xf32>
    %1163 = arith.mulf %1162, %1161 : vector<16x16xf32>
    %1164 = arith.addf %1158, %1163 : vector<16x16xf32>
    %c242 = arith.constant 242 : index
    %1165 = memref.load %arg2[%c242] : memref<256xf32, #tpu.memory_space<smem>>
    %1166 = vector.extract_strided_slice %13 {offsets = [0, 0, 0], sizes = [1, 16, 16], strides = [1, 1, 1]} : vector<4x16x16xf32> to vector<1x16x16xf32>
    %1167 = vector.shape_cast %1166 : vector<1x16x16xf32> to vector<16x16xf32>
    %1168 = vector.broadcast %1165 : f32 to vector<16x16xf32>
    %1169 = arith.mulf %1168, %1167 : vector<16x16xf32>
    %1170 = arith.addf %1164, %1169 : vector<16x16xf32>
    %c198 = arith.constant 198 : index
    %1171 = memref.load %arg2[%c198] : memref<256xf32, #tpu.memory_space<smem>>
    %1172 = vector.extract_strided_slice %9 {offsets = [1, 0, 0], sizes = [1, 16, 16], strides = [1, 1, 1]} : vector<4x16x16xf32> to vector<1x16x16xf32>
    %1173 = vector.shape_cast %1172 : vector<1x16x16xf32> to vector<16x16xf32>
    %1174 = vector.broadcast %1171 : f32 to vector<16x16xf32>
    %1175 = arith.mulf %1174, %1173 : vector<16x16xf32>
    %1176 = arith.addf %1170, %1175 : vector<16x16xf32>
    %c214 = arith.constant 214 : index
    %1177 = memref.load %arg2[%c214] : memref<256xf32, #tpu.memory_space<smem>>
    %1178 = vector.extract_strided_slice %10 {offsets = [1, 0, 0], sizes = [1, 16, 16], strides = [1, 1, 1]} : vector<4x16x16xf32> to vector<1x16x16xf32>
    %1179 = vector.shape_cast %1178 : vector<1x16x16xf32> to vector<16x16xf32>
    %1180 = vector.broadcast %1177 : f32 to vector<16x16xf32>
    %1181 = arith.mulf %1180, %1179 : vector<16x16xf32>
    %1182 = arith.addf %1176, %1181 : vector<16x16xf32>
    %c230 = arith.constant 230 : index
    %1183 = memref.load %arg2[%c230] : memref<256xf32, #tpu.memory_space<smem>>
    %1184 = vector.extract_strided_slice %12 {offsets = [1, 0, 0], sizes = [1, 16, 16], strides = [1, 1, 1]} : vector<4x16x16xf32> to vector<1x16x16xf32>
    %1185 = vector.shape_cast %1184 : vector<1x16x16xf32> to vector<16x16xf32>
    %1186 = vector.broadcast %1183 : f32 to vector<16x16xf32>
    %1187 = arith.mulf %1186, %1185 : vector<16x16xf32>
    %1188 = arith.addf %1182, %1187 : vector<16x16xf32>
    %c246 = arith.constant 246 : index
    %1189 = memref.load %arg2[%c246] : memref<256xf32, #tpu.memory_space<smem>>
    %1190 = vector.extract_strided_slice %13 {offsets = [1, 0, 0], sizes = [1, 16, 16], strides = [1, 1, 1]} : vector<4x16x16xf32> to vector<1x16x16xf32>
    %1191 = vector.shape_cast %1190 : vector<1x16x16xf32> to vector<16x16xf32>
    %1192 = vector.broadcast %1189 : f32 to vector<16x16xf32>
    %1193 = arith.mulf %1192, %1191 : vector<16x16xf32>
    %1194 = arith.addf %1188, %1193 : vector<16x16xf32>
    %c202 = arith.constant 202 : index
    %1195 = memref.load %arg2[%c202] : memref<256xf32, #tpu.memory_space<smem>>
    %1196 = vector.extract_strided_slice %9 {offsets = [2, 0, 0], sizes = [1, 16, 16], strides = [1, 1, 1]} : vector<4x16x16xf32> to vector<1x16x16xf32>
    %1197 = vector.shape_cast %1196 : vector<1x16x16xf32> to vector<16x16xf32>
    %1198 = vector.broadcast %1195 : f32 to vector<16x16xf32>
    %1199 = arith.mulf %1198, %1197 : vector<16x16xf32>
    %1200 = arith.addf %1194, %1199 : vector<16x16xf32>
    %c218 = arith.constant 218 : index
    %1201 = memref.load %arg2[%c218] : memref<256xf32, #tpu.memory_space<smem>>
    %1202 = vector.extract_strided_slice %10 {offsets = [2, 0, 0], sizes = [1, 16, 16], strides = [1, 1, 1]} : vector<4x16x16xf32> to vector<1x16x16xf32>
    %1203 = vector.shape_cast %1202 : vector<1x16x16xf32> to vector<16x16xf32>
    %1204 = vector.broadcast %1201 : f32 to vector<16x16xf32>
    %1205 = arith.mulf %1204, %1203 : vector<16x16xf32>
    %1206 = arith.addf %1200, %1205 : vector<16x16xf32>
    %c234 = arith.constant 234 : index
    %1207 = memref.load %arg2[%c234] : memref<256xf32, #tpu.memory_space<smem>>
    %1208 = vector.extract_strided_slice %12 {offsets = [2, 0, 0], sizes = [1, 16, 16], strides = [1, 1, 1]} : vector<4x16x16xf32> to vector<1x16x16xf32>
    %1209 = vector.shape_cast %1208 : vector<1x16x16xf32> to vector<16x16xf32>
    %1210 = vector.broadcast %1207 : f32 to vector<16x16xf32>
    %1211 = arith.mulf %1210, %1209 : vector<16x16xf32>
    %1212 = arith.addf %1206, %1211 : vector<16x16xf32>
    %c250 = arith.constant 250 : index
    %1213 = memref.load %arg2[%c250] : memref<256xf32, #tpu.memory_space<smem>>
    %1214 = vector.extract_strided_slice %13 {offsets = [2, 0, 0], sizes = [1, 16, 16], strides = [1, 1, 1]} : vector<4x16x16xf32> to vector<1x16x16xf32>
    %1215 = vector.shape_cast %1214 : vector<1x16x16xf32> to vector<16x16xf32>
    %1216 = vector.broadcast %1213 : f32 to vector<16x16xf32>
    %1217 = arith.mulf %1216, %1215 : vector<16x16xf32>
    %1218 = arith.addf %1212, %1217 : vector<16x16xf32>
    %c206 = arith.constant 206 : index
    %1219 = memref.load %arg2[%c206] : memref<256xf32, #tpu.memory_space<smem>>
    %1220 = vector.extract_strided_slice %9 {offsets = [3, 0, 0], sizes = [1, 16, 16], strides = [1, 1, 1]} : vector<4x16x16xf32> to vector<1x16x16xf32>
    %1221 = vector.shape_cast %1220 : vector<1x16x16xf32> to vector<16x16xf32>
    %1222 = vector.broadcast %1219 : f32 to vector<16x16xf32>
    %1223 = arith.mulf %1222, %1221 : vector<16x16xf32>
    %1224 = arith.addf %1218, %1223 : vector<16x16xf32>
    %c222 = arith.constant 222 : index
    %1225 = memref.load %arg2[%c222] : memref<256xf32, #tpu.memory_space<smem>>
    %1226 = vector.extract_strided_slice %10 {offsets = [3, 0, 0], sizes = [1, 16, 16], strides = [1, 1, 1]} : vector<4x16x16xf32> to vector<1x16x16xf32>
    %1227 = vector.shape_cast %1226 : vector<1x16x16xf32> to vector<16x16xf32>
    %1228 = vector.broadcast %1225 : f32 to vector<16x16xf32>
    %1229 = arith.mulf %1228, %1227 : vector<16x16xf32>
    %1230 = arith.addf %1224, %1229 : vector<16x16xf32>
    %c238 = arith.constant 238 : index
    %1231 = memref.load %arg2[%c238] : memref<256xf32, #tpu.memory_space<smem>>
    %1232 = vector.extract_strided_slice %12 {offsets = [3, 0, 0], sizes = [1, 16, 16], strides = [1, 1, 1]} : vector<4x16x16xf32> to vector<1x16x16xf32>
    %1233 = vector.shape_cast %1232 : vector<1x16x16xf32> to vector<16x16xf32>
    %1234 = vector.broadcast %1231 : f32 to vector<16x16xf32>
    %1235 = arith.mulf %1234, %1233 : vector<16x16xf32>
    %1236 = arith.addf %1230, %1235 : vector<16x16xf32>
    %c254 = arith.constant 254 : index
    %1237 = memref.load %arg2[%c254] : memref<256xf32, #tpu.memory_space<smem>>
    %1238 = vector.extract_strided_slice %13 {offsets = [3, 0, 0], sizes = [1, 16, 16], strides = [1, 1, 1]} : vector<4x16x16xf32> to vector<1x16x16xf32>
    %1239 = vector.shape_cast %1238 : vector<1x16x16xf32> to vector<16x16xf32>
    %1240 = vector.broadcast %1237 : f32 to vector<16x16xf32>
    %1241 = arith.mulf %1240, %1239 : vector<16x16xf32>
    %1242 = arith.addf %1236, %1241 : vector<16x16xf32>
    %cst_78 = arith.constant dense<0.000000e+00> : vector<16x32xf32>
    %1243 = tpu.matmul %1145, %22, %cst_78 {dimension_numbers = #tpu.dot_dimension_numbers<[1], [0], [0], [1], [0, 0, 1, 1], [], []>} : vector<16x16xf32>, vector<16x32xf32>, vector<16x32xf32> -> vector<16x32xf32>
    %cst_79 = arith.constant dense<0.000000e+00> : vector<16x32xf32>
    %1244 = tpu.matmul %1242, %29, %cst_79 {dimension_numbers = #tpu.dot_dimension_numbers<[1], [0], [0], [1], [0, 0, 1, 1], [], []>} : vector<16x16xf32>, vector<16x32xf32>, vector<16x32xf32> -> vector<16x32xf32>
    %1245 = arith.addf %1243, %1244 : vector<16x32xf32>
    %cst_80 = arith.constant dense<0.000000e+00> : vector<32x32xf32>
    %1246 = tpu.matmul %38, %1048, %cst_80 {dimension_numbers = #tpu.dot_dimension_numbers<[1], [0], [0], [1], [0, 0, 1, 1], [], []>} : vector<32x16xf32>, vector<16x32xf32>, vector<32x32xf32> -> vector<32x32xf32>
    %cst_81 = arith.constant dense<0.000000e+00> : vector<32x32xf32>
    %1247 = tpu.matmul %45, %1245, %cst_81 {dimension_numbers = #tpu.dot_dimension_numbers<[1], [0], [0], [1], [0, 0, 1, 1], [], []>} : vector<32x16xf32>, vector<16x32xf32>, vector<32x32xf32> -> vector<32x32xf32>
    %1248 = arith.addf %1246, %1247 : vector<32x32xf32>
    %c2_82 = arith.constant 2 : index
    %1249 = memref.load %arg3[%c2_82] : memref<4xf32, #tpu.memory_space<smem>>
    %1250 = vector.broadcast %1249 : f32 to vector<32x32xf32>
    %1251 = arith.addf %1248, %1250 : vector<32x32xf32>
    %c0_83 = arith.constant 0 : index
    %c2_84 = arith.constant 2 : index
    %c0_85 = arith.constant 0 : index
    %c0_86 = arith.constant 0 : index
    %1252 = vector.load %arg4[%c0_83, %c2_84, %c0_85, %c0_86] : memref<1x4x32x32xf32, #tpu.memory_space<vmem>>, vector<1x1x32x32xf32>
    %1253 = vector.shape_cast %1252 : vector<1x1x32x32xf32> to vector<32x32xf32>
    %1254 = vector.shape_cast %1251 : vector<32x32xf32> to vector<1x1x32x32xf32>
    tpu.vector_store %arg4[%c0_83, %c2_84, %c0_85, %c0_86], %1254 {strides = array<i32>} : memref<1x4x32x32xf32, #tpu.memory_space<vmem>>, vector<1x1x32x32xf32>,
    %cst_87 = arith.constant 0.000000e+00 : f32
    %1255 = vector.broadcast %cst_87 : f32 to vector<16x16xf32>
    %c3 = arith.constant 3 : index
    %1256 = memref.load %arg2[%c3] : memref<256xf32, #tpu.memory_space<smem>>
    %1257 = vector.extract_strided_slice %5 {offsets = [0, 0, 0], sizes = [1, 16, 16], strides = [1, 1, 1]} : vector<4x16x16xf32> to vector<1x16x16xf32>
    %1258 = vector.shape_cast %1257 : vector<1x16x16xf32> to vector<16x16xf32>
    %1259 = vector.broadcast %1256 : f32 to vector<16x16xf32>
    %1260 = arith.mulf %1259, %1258 : vector<16x16xf32>
    %1261 = arith.addf %1255, %1260 : vector<16x16xf32>
    %c19 = arith.constant 19 : index
    %1262 = memref.load %arg2[%c19] : memref<256xf32, #tpu.memory_space<smem>>
    %1263 = vector.extract_strided_slice %6 {offsets = [0, 0, 0], sizes = [1, 16, 16], strides = [1, 1, 1]} : vector<4x16x16xf32> to vector<1x16x16xf32>
    %1264 = vector.shape_cast %1263 : vector<1x16x16xf32> to vector<16x16xf32>
    %1265 = vector.broadcast %1262 : f32 to vector<16x16xf32>
    %1266 = arith.mulf %1265, %1264 : vector<16x16xf32>
    %1267 = arith.addf %1261, %1266 : vector<16x16xf32>
    %c35 = arith.constant 35 : index
    %1268 = memref.load %arg2[%c35] : memref<256xf32, #tpu.memory_space<smem>>
    %1269 = vector.extract_strided_slice %8 {offsets = [0, 0, 0], sizes = [1, 16, 16], strides = [1, 1, 1]} : vector<4x16x16xf32> to vector<1x16x16xf32>
    %1270 = vector.shape_cast %1269 : vector<1x16x16xf32> to vector<16x16xf32>
    %1271 = vector.broadcast %1268 : f32 to vector<16x16xf32>
    %1272 = arith.mulf %1271, %1270 : vector<16x16xf32>
    %1273 = arith.addf %1267, %1272 : vector<16x16xf32>
    %c51 = arith.constant 51 : index
    %1274 = memref.load %arg2[%c51] : memref<256xf32, #tpu.memory_space<smem>>
    %1275 = vector.extract_strided_slice %9 {offsets = [0, 0, 0], sizes = [1, 16, 16], strides = [1, 1, 1]} : vector<4x16x16xf32> to vector<1x16x16xf32>
    %1276 = vector.shape_cast %1275 : vector<1x16x16xf32> to vector<16x16xf32>
    %1277 = vector.broadcast %1274 : f32 to vector<16x16xf32>
    %1278 = arith.mulf %1277, %1276 : vector<16x16xf32>
    %1279 = arith.addf %1273, %1278 : vector<16x16xf32>
    %c7 = arith.constant 7 : index
    %1280 = memref.load %arg2[%c7] : memref<256xf32, #tpu.memory_space<smem>>
    %1281 = vector.extract_strided_slice %5 {offsets = [1, 0, 0], sizes = [1, 16, 16], strides = [1, 1, 1]} : vector<4x16x16xf32> to vector<1x16x16xf32>
    %1282 = vector.shape_cast %1281 : vector<1x16x16xf32> to vector<16x16xf32>
    %1283 = vector.broadcast %1280 : f32 to vector<16x16xf32>
    %1284 = arith.mulf %1283, %1282 : vector<16x16xf32>
    %1285 = arith.addf %1279, %1284 : vector<16x16xf32>
    %c23 = arith.constant 23 : index
    %1286 = memref.load %arg2[%c23] : memref<256xf32, #tpu.memory_space<smem>>
    %1287 = vector.extract_strided_slice %6 {offsets = [1, 0, 0], sizes = [1, 16, 16], strides = [1, 1, 1]} : vector<4x16x16xf32> to vector<1x16x16xf32>
    %1288 = vector.shape_cast %1287 : vector<1x16x16xf32> to vector<16x16xf32>
    %1289 = vector.broadcast %1286 : f32 to vector<16x16xf32>
    %1290 = arith.mulf %1289, %1288 : vector<16x16xf32>
    %1291 = arith.addf %1285, %1290 : vector<16x16xf32>
    %c39 = arith.constant 39 : index
    %1292 = memref.load %arg2[%c39] : memref<256xf32, #tpu.memory_space<smem>>
    %1293 = vector.extract_strided_slice %8 {offsets = [1, 0, 0], sizes = [1, 16, 16], strides = [1, 1, 1]} : vector<4x16x16xf32> to vector<1x16x16xf32>
    %1294 = vector.shape_cast %1293 : vector<1x16x16xf32> to vector<16x16xf32>
    %1295 = vector.broadcast %1292 : f32 to vector<16x16xf32>
    %1296 = arith.mulf %1295, %1294 : vector<16x16xf32>
    %1297 = arith.addf %1291, %1296 : vector<16x16xf32>
    %c55 = arith.constant 55 : index
    %1298 = memref.load %arg2[%c55] : memref<256xf32, #tpu.memory_space<smem>>
    %1299 = vector.extract_strided_slice %9 {offsets = [1, 0, 0], sizes = [1, 16, 16], strides = [1, 1, 1]} : vector<4x16x16xf32> to vector<1x16x16xf32>
    %1300 = vector.shape_cast %1299 : vector<1x16x16xf32> to vector<16x16xf32>
    %1301 = vector.broadcast %1298 : f32 to vector<16x16xf32>
    %1302 = arith.mulf %1301, %1300 : vector<16x16xf32>
    %1303 = arith.addf %1297, %1302 : vector<16x16xf32>
    %c11 = arith.constant 11 : index
    %1304 = memref.load %arg2[%c11] : memref<256xf32, #tpu.memory_space<smem>>
    %1305 = vector.extract_strided_slice %5 {offsets = [2, 0, 0], sizes = [1, 16, 16], strides = [1, 1, 1]} : vector<4x16x16xf32> to vector<1x16x16xf32>
    %1306 = vector.shape_cast %1305 : vector<1x16x16xf32> to vector<16x16xf32>
    %1307 = vector.broadcast %1304 : f32 to vector<16x16xf32>
    %1308 = arith.mulf %1307, %1306 : vector<16x16xf32>
    %1309 = arith.addf %1303, %1308 : vector<16x16xf32>
    %c27 = arith.constant 27 : index
    %1310 = memref.load %arg2[%c27] : memref<256xf32, #tpu.memory_space<smem>>
    %1311 = vector.extract_strided_slice %6 {offsets = [2, 0, 0], sizes = [1, 16, 16], strides = [1, 1, 1]} : vector<4x16x16xf32> to vector<1x16x16xf32>
    %1312 = vector.shape_cast %1311 : vector<1x16x16xf32> to vector<16x16xf32>
    %1313 = vector.broadcast %1310 : f32 to vector<16x16xf32>
    %1314 = arith.mulf %1313, %1312 : vector<16x16xf32>
    %1315 = arith.addf %1309, %1314 : vector<16x16xf32>
    %c43 = arith.constant 43 : index
    %1316 = memref.load %arg2[%c43] : memref<256xf32, #tpu.memory_space<smem>>
    %1317 = vector.extract_strided_slice %8 {offsets = [2, 0, 0], sizes = [1, 16, 16], strides = [1, 1, 1]} : vector<4x16x16xf32> to vector<1x16x16xf32>
    %1318 = vector.shape_cast %1317 : vector<1x16x16xf32> to vector<16x16xf32>
    %1319 = vector.broadcast %1316 : f32 to vector<16x16xf32>
    %1320 = arith.mulf %1319, %1318 : vector<16x16xf32>
    %1321 = arith.addf %1315, %1320 : vector<16x16xf32>
    %c59 = arith.constant 59 : index
    %1322 = memref.load %arg2[%c59] : memref<256xf32, #tpu.memory_space<smem>>
    %1323 = vector.extract_strided_slice %9 {offsets = [2, 0, 0], sizes = [1, 16, 16], strides = [1, 1, 1]} : vector<4x16x16xf32> to vector<1x16x16xf32>
    %1324 = vector.shape_cast %1323 : vector<1x16x16xf32> to vector<16x16xf32>
    %1325 = vector.broadcast %1322 : f32 to vector<16x16xf32>
    %1326 = arith.mulf %1325, %1324 : vector<16x16xf32>
    %1327 = arith.addf %1321, %1326 : vector<16x16xf32>
    %c15 = arith.constant 15 : index
    %1328 = memref.load %arg2[%c15] : memref<256xf32, #tpu.memory_space<smem>>
    %1329 = vector.extract_strided_slice %5 {offsets = [3, 0, 0], sizes = [1, 16, 16], strides = [1, 1, 1]} : vector<4x16x16xf32> to vector<1x16x16xf32>
    %1330 = vector.shape_cast %1329 : vector<1x16x16xf32> to vector<16x16xf32>
    %1331 = vector.broadcast %1328 : f32 to vector<16x16xf32>
    %1332 = arith.mulf %1331, %1330 : vector<16x16xf32>
    %1333 = arith.addf %1327, %1332 : vector<16x16xf32>
    %c31 = arith.constant 31 : index
    %1334 = memref.load %arg2[%c31] : memref<256xf32, #tpu.memory_space<smem>>
    %1335 = vector.extract_strided_slice %6 {offsets = [3, 0, 0], sizes = [1, 16, 16], strides = [1, 1, 1]} : vector<4x16x16xf32> to vector<1x16x16xf32>
    %1336 = vector.shape_cast %1335 : vector<1x16x16xf32> to vector<16x16xf32>
    %1337 = vector.broadcast %1334 : f32 to vector<16x16xf32>
    %1338 = arith.mulf %1337, %1336 : vector<16x16xf32>
    %1339 = arith.addf %1333, %1338 : vector<16x16xf32>
    %c47 = arith.constant 47 : index
    %1340 = memref.load %arg2[%c47] : memref<256xf32, #tpu.memory_space<smem>>
    %1341 = vector.extract_strided_slice %8 {offsets = [3, 0, 0], sizes = [1, 16, 16], strides = [1, 1, 1]} : vector<4x16x16xf32> to vector<1x16x16xf32>
    %1342 = vector.shape_cast %1341 : vector<1x16x16xf32> to vector<16x16xf32>
    %1343 = vector.broadcast %1340 : f32 to vector<16x16xf32>
    %1344 = arith.mulf %1343, %1342 : vector<16x16xf32>
    %1345 = arith.addf %1339, %1344 : vector<16x16xf32>
    %c63 = arith.constant 63 : index
    %1346 = memref.load %arg2[%c63] : memref<256xf32, #tpu.memory_space<smem>>
    %1347 = vector.extract_strided_slice %9 {offsets = [3, 0, 0], sizes = [1, 16, 16], strides = [1, 1, 1]} : vector<4x16x16xf32> to vector<1x16x16xf32>
    %1348 = vector.shape_cast %1347 : vector<1x16x16xf32> to vector<16x16xf32>
    %1349 = vector.broadcast %1346 : f32 to vector<16x16xf32>
    %1350 = arith.mulf %1349, %1348 : vector<16x16xf32>
    %1351 = arith.addf %1345, %1350 : vector<16x16xf32>
    %cst_88 = arith.constant 0.000000e+00 : f32
    %1352 = vector.broadcast %cst_88 : f32 to vector<16x16xf32>
    %c67 = arith.constant 67 : index
    %1353 = memref.load %arg2[%c67] : memref<256xf32, #tpu.memory_space<smem>>
    %1354 = vector.extract_strided_slice %6 {offsets = [0, 0, 0], sizes = [1, 16, 16], strides = [1, 1, 1]} : vector<4x16x16xf32> to vector<1x16x16xf32>
    %1355 = vector.shape_cast %1354 : vector<1x16x16xf32> to vector<16x16xf32>
    %1356 = vector.broadcast %1353 : f32 to vector<16x16xf32>
    %1357 = arith.mulf %1356, %1355 : vector<16x16xf32>
    %1358 = arith.addf %1352, %1357 : vector<16x16xf32>
    %c83 = arith.constant 83 : index
    %1359 = memref.load %arg2[%c83] : memref<256xf32, #tpu.memory_space<smem>>
    %1360 = vector.extract_strided_slice %7 {offsets = [0, 0, 0], sizes = [1, 16, 16], strides = [1, 1, 1]} : vector<4x16x16xf32> to vector<1x16x16xf32>
    %1361 = vector.shape_cast %1360 : vector<1x16x16xf32> to vector<16x16xf32>
    %1362 = vector.broadcast %1359 : f32 to vector<16x16xf32>
    %1363 = arith.mulf %1362, %1361 : vector<16x16xf32>
    %1364 = arith.addf %1358, %1363 : vector<16x16xf32>
    %c99 = arith.constant 99 : index
    %1365 = memref.load %arg2[%c99] : memref<256xf32, #tpu.memory_space<smem>>
    %1366 = vector.extract_strided_slice %9 {offsets = [0, 0, 0], sizes = [1, 16, 16], strides = [1, 1, 1]} : vector<4x16x16xf32> to vector<1x16x16xf32>
    %1367 = vector.shape_cast %1366 : vector<1x16x16xf32> to vector<16x16xf32>
    %1368 = vector.broadcast %1365 : f32 to vector<16x16xf32>
    %1369 = arith.mulf %1368, %1367 : vector<16x16xf32>
    %1370 = arith.addf %1364, %1369 : vector<16x16xf32>
    %c115 = arith.constant 115 : index
    %1371 = memref.load %arg2[%c115] : memref<256xf32, #tpu.memory_space<smem>>
    %1372 = vector.extract_strided_slice %10 {offsets = [0, 0, 0], sizes = [1, 16, 16], strides = [1, 1, 1]} : vector<4x16x16xf32> to vector<1x16x16xf32>
    %1373 = vector.shape_cast %1372 : vector<1x16x16xf32> to vector<16x16xf32>
    %1374 = vector.broadcast %1371 : f32 to vector<16x16xf32>
    %1375 = arith.mulf %1374, %1373 : vector<16x16xf32>
    %1376 = arith.addf %1370, %1375 : vector<16x16xf32>
    %c71 = arith.constant 71 : index
    %1377 = memref.load %arg2[%c71] : memref<256xf32, #tpu.memory_space<smem>>
    %1378 = vector.extract_strided_slice %6 {offsets = [1, 0, 0], sizes = [1, 16, 16], strides = [1, 1, 1]} : vector<4x16x16xf32> to vector<1x16x16xf32>
    %1379 = vector.shape_cast %1378 : vector<1x16x16xf32> to vector<16x16xf32>
    %1380 = vector.broadcast %1377 : f32 to vector<16x16xf32>
    %1381 = arith.mulf %1380, %1379 : vector<16x16xf32>
    %1382 = arith.addf %1376, %1381 : vector<16x16xf32>
    %c87 = arith.constant 87 : index
    %1383 = memref.load %arg2[%c87] : memref<256xf32, #tpu.memory_space<smem>>
    %1384 = vector.extract_strided_slice %7 {offsets = [1, 0, 0], sizes = [1, 16, 16], strides = [1, 1, 1]} : vector<4x16x16xf32> to vector<1x16x16xf32>
    %1385 = vector.shape_cast %1384 : vector<1x16x16xf32> to vector<16x16xf32>
    %1386 = vector.broadcast %1383 : f32 to vector<16x16xf32>
    %1387 = arith.mulf %1386, %1385 : vector<16x16xf32>
    %1388 = arith.addf %1382, %1387 : vector<16x16xf32>
    %c103 = arith.constant 103 : index
    %1389 = memref.load %arg2[%c103] : memref<256xf32, #tpu.memory_space<smem>>
    %1390 = vector.extract_strided_slice %9 {offsets = [1, 0, 0], sizes = [1, 16, 16], strides = [1, 1, 1]} : vector<4x16x16xf32> to vector<1x16x16xf32>
    %1391 = vector.shape_cast %1390 : vector<1x16x16xf32> to vector<16x16xf32>
    %1392 = vector.broadcast %1389 : f32 to vector<16x16xf32>
    %1393 = arith.mulf %1392, %1391 : vector<16x16xf32>
    %1394 = arith.addf %1388, %1393 : vector<16x16xf32>
    %c119 = arith.constant 119 : index
    %1395 = memref.load %arg2[%c119] : memref<256xf32, #tpu.memory_space<smem>>
    %1396 = vector.extract_strided_slice %10 {offsets = [1, 0, 0], sizes = [1, 16, 16], strides = [1, 1, 1]} : vector<4x16x16xf32> to vector<1x16x16xf32>
    %1397 = vector.shape_cast %1396 : vector<1x16x16xf32> to vector<16x16xf32>
    %1398 = vector.broadcast %1395 : f32 to vector<16x16xf32>
    %1399 = arith.mulf %1398, %1397 : vector<16x16xf32>
    %1400 = arith.addf %1394, %1399 : vector<16x16xf32>
    %c75 = arith.constant 75 : index
    %1401 = memref.load %arg2[%c75] : memref<256xf32, #tpu.memory_space<smem>>
    %1402 = vector.extract_strided_slice %6 {offsets = [2, 0, 0], sizes = [1, 16, 16], strides = [1, 1, 1]} : vector<4x16x16xf32> to vector<1x16x16xf32>
    %1403 = vector.shape_cast %1402 : vector<1x16x16xf32> to vector<16x16xf32>
    %1404 = vector.broadcast %1401 : f32 to vector<16x16xf32>
    %1405 = arith.mulf %1404, %1403 : vector<16x16xf32>
    %1406 = arith.addf %1400, %1405 : vector<16x16xf32>
    %c91 = arith.constant 91 : index
    %1407 = memref.load %arg2[%c91] : memref<256xf32, #tpu.memory_space<smem>>
    %1408 = vector.extract_strided_slice %7 {offsets = [2, 0, 0], sizes = [1, 16, 16], strides = [1, 1, 1]} : vector<4x16x16xf32> to vector<1x16x16xf32>
    %1409 = vector.shape_cast %1408 : vector<1x16x16xf32> to vector<16x16xf32>
    %1410 = vector.broadcast %1407 : f32 to vector<16x16xf32>
    %1411 = arith.mulf %1410, %1409 : vector<16x16xf32>
    %1412 = arith.addf %1406, %1411 : vector<16x16xf32>
    %c107 = arith.constant 107 : index
    %1413 = memref.load %arg2[%c107] : memref<256xf32, #tpu.memory_space<smem>>
    %1414 = vector.extract_strided_slice %9 {offsets = [2, 0, 0], sizes = [1, 16, 16], strides = [1, 1, 1]} : vector<4x16x16xf32> to vector<1x16x16xf32>
    %1415 = vector.shape_cast %1414 : vector<1x16x16xf32> to vector<16x16xf32>
    %1416 = vector.broadcast %1413 : f32 to vector<16x16xf32>
    %1417 = arith.mulf %1416, %1415 : vector<16x16xf32>
    %1418 = arith.addf %1412, %1417 : vector<16x16xf32>
    %c123 = arith.constant 123 : index
    %1419 = memref.load %arg2[%c123] : memref<256xf32, #tpu.memory_space<smem>>
    %1420 = vector.extract_strided_slice %10 {offsets = [2, 0, 0], sizes = [1, 16, 16], strides = [1, 1, 1]} : vector<4x16x16xf32> to vector<1x16x16xf32>
    %1421 = vector.shape_cast %1420 : vector<1x16x16xf32> to vector<16x16xf32>
    %1422 = vector.broadcast %1419 : f32 to vector<16x16xf32>
    %1423 = arith.mulf %1422, %1421 : vector<16x16xf32>
    %1424 = arith.addf %1418, %1423 : vector<16x16xf32>
    %c79 = arith.constant 79 : index
    %1425 = memref.load %arg2[%c79] : memref<256xf32, #tpu.memory_space<smem>>
    %1426 = vector.extract_strided_slice %6 {offsets = [3, 0, 0], sizes = [1, 16, 16], strides = [1, 1, 1]} : vector<4x16x16xf32> to vector<1x16x16xf32>
    %1427 = vector.shape_cast %1426 : vector<1x16x16xf32> to vector<16x16xf32>
    %1428 = vector.broadcast %1425 : f32 to vector<16x16xf32>
    %1429 = arith.mulf %1428, %1427 : vector<16x16xf32>
    %1430 = arith.addf %1424, %1429 : vector<16x16xf32>
    %c95 = arith.constant 95 : index
    %1431 = memref.load %arg2[%c95] : memref<256xf32, #tpu.memory_space<smem>>
    %1432 = vector.extract_strided_slice %7 {offsets = [3, 0, 0], sizes = [1, 16, 16], strides = [1, 1, 1]} : vector<4x16x16xf32> to vector<1x16x16xf32>
    %1433 = vector.shape_cast %1432 : vector<1x16x16xf32> to vector<16x16xf32>
    %1434 = vector.broadcast %1431 : f32 to vector<16x16xf32>
    %1435 = arith.mulf %1434, %1433 : vector<16x16xf32>
    %1436 = arith.addf %1430, %1435 : vector<16x16xf32>
    %c111 = arith.constant 111 : index
    %1437 = memref.load %arg2[%c111] : memref<256xf32, #tpu.memory_space<smem>>
    %1438 = vector.extract_strided_slice %9 {offsets = [3, 0, 0], sizes = [1, 16, 16], strides = [1, 1, 1]} : vector<4x16x16xf32> to vector<1x16x16xf32>
    %1439 = vector.shape_cast %1438 : vector<1x16x16xf32> to vector<16x16xf32>
    %1440 = vector.broadcast %1437 : f32 to vector<16x16xf32>
    %1441 = arith.mulf %1440, %1439 : vector<16x16xf32>
    %1442 = arith.addf %1436, %1441 : vector<16x16xf32>
    %c127 = arith.constant 127 : index
    %1443 = memref.load %arg2[%c127] : memref<256xf32, #tpu.memory_space<smem>>
    %1444 = vector.extract_strided_slice %10 {offsets = [3, 0, 0], sizes = [1, 16, 16], strides = [1, 1, 1]} : vector<4x16x16xf32> to vector<1x16x16xf32>
    %1445 = vector.shape_cast %1444 : vector<1x16x16xf32> to vector<16x16xf32>
    %1446 = vector.broadcast %1443 : f32 to vector<16x16xf32>
    %1447 = arith.mulf %1446, %1445 : vector<16x16xf32>
    %1448 = arith.addf %1442, %1447 : vector<16x16xf32>
    %cst_89 = arith.constant dense<0.000000e+00> : vector<16x32xf32>
    %1449 = tpu.matmul %1351, %22, %cst_89 {dimension_numbers = #tpu.dot_dimension_numbers<[1], [0], [0], [1], [0, 0, 1, 1], [], []>} : vector<16x16xf32>, vector<16x32xf32>, vector<16x32xf32> -> vector<16x32xf32>
    %cst_90 = arith.constant dense<0.000000e+00> : vector<16x32xf32>
    %1450 = tpu.matmul %1448, %29, %cst_90 {dimension_numbers = #tpu.dot_dimension_numbers<[1], [0], [0], [1], [0, 0, 1, 1], [], []>} : vector<16x16xf32>, vector<16x32xf32>, vector<16x32xf32> -> vector<16x32xf32>
    %1451 = arith.addf %1449, %1450 : vector<16x32xf32>
    %cst_91 = arith.constant 0.000000e+00 : f32
    %1452 = vector.broadcast %cst_91 : f32 to vector<16x16xf32>
    %c131 = arith.constant 131 : index
    %1453 = memref.load %arg2[%c131] : memref<256xf32, #tpu.memory_space<smem>>
    %1454 = vector.extract_strided_slice %8 {offsets = [0, 0, 0], sizes = [1, 16, 16], strides = [1, 1, 1]} : vector<4x16x16xf32> to vector<1x16x16xf32>
    %1455 = vector.shape_cast %1454 : vector<1x16x16xf32> to vector<16x16xf32>
    %1456 = vector.broadcast %1453 : f32 to vector<16x16xf32>
    %1457 = arith.mulf %1456, %1455 : vector<16x16xf32>
    %1458 = arith.addf %1452, %1457 : vector<16x16xf32>
    %c147 = arith.constant 147 : index
    %1459 = memref.load %arg2[%c147] : memref<256xf32, #tpu.memory_space<smem>>
    %1460 = vector.extract_strided_slice %9 {offsets = [0, 0, 0], sizes = [1, 16, 16], strides = [1, 1, 1]} : vector<4x16x16xf32> to vector<1x16x16xf32>
    %1461 = vector.shape_cast %1460 : vector<1x16x16xf32> to vector<16x16xf32>
    %1462 = vector.broadcast %1459 : f32 to vector<16x16xf32>
    %1463 = arith.mulf %1462, %1461 : vector<16x16xf32>
    %1464 = arith.addf %1458, %1463 : vector<16x16xf32>
    %c163 = arith.constant 163 : index
    %1465 = memref.load %arg2[%c163] : memref<256xf32, #tpu.memory_space<smem>>
    %1466 = vector.extract_strided_slice %11 {offsets = [0, 0, 0], sizes = [1, 16, 16], strides = [1, 1, 1]} : vector<4x16x16xf32> to vector<1x16x16xf32>
    %1467 = vector.shape_cast %1466 : vector<1x16x16xf32> to vector<16x16xf32>
    %1468 = vector.broadcast %1465 : f32 to vector<16x16xf32>
    %1469 = arith.mulf %1468, %1467 : vector<16x16xf32>
    %1470 = arith.addf %1464, %1469 : vector<16x16xf32>
    %c179 = arith.constant 179 : index
    %1471 = memref.load %arg2[%c179] : memref<256xf32, #tpu.memory_space<smem>>
    %1472 = vector.extract_strided_slice %12 {offsets = [0, 0, 0], sizes = [1, 16, 16], strides = [1, 1, 1]} : vector<4x16x16xf32> to vector<1x16x16xf32>
    %1473 = vector.shape_cast %1472 : vector<1x16x16xf32> to vector<16x16xf32>
    %1474 = vector.broadcast %1471 : f32 to vector<16x16xf32>
    %1475 = arith.mulf %1474, %1473 : vector<16x16xf32>
    %1476 = arith.addf %1470, %1475 : vector<16x16xf32>
    %c135 = arith.constant 135 : index
    %1477 = memref.load %arg2[%c135] : memref<256xf32, #tpu.memory_space<smem>>
    %1478 = vector.extract_strided_slice %8 {offsets = [1, 0, 0], sizes = [1, 16, 16], strides = [1, 1, 1]} : vector<4x16x16xf32> to vector<1x16x16xf32>
    %1479 = vector.shape_cast %1478 : vector<1x16x16xf32> to vector<16x16xf32>
    %1480 = vector.broadcast %1477 : f32 to vector<16x16xf32>
    %1481 = arith.mulf %1480, %1479 : vector<16x16xf32>
    %1482 = arith.addf %1476, %1481 : vector<16x16xf32>
    %c151 = arith.constant 151 : index
    %1483 = memref.load %arg2[%c151] : memref<256xf32, #tpu.memory_space<smem>>
    %1484 = vector.extract_strided_slice %9 {offsets = [1, 0, 0], sizes = [1, 16, 16], strides = [1, 1, 1]} : vector<4x16x16xf32> to vector<1x16x16xf32>
    %1485 = vector.shape_cast %1484 : vector<1x16x16xf32> to vector<16x16xf32>
    %1486 = vector.broadcast %1483 : f32 to vector<16x16xf32>
    %1487 = arith.mulf %1486, %1485 : vector<16x16xf32>
    %1488 = arith.addf %1482, %1487 : vector<16x16xf32>
    %c167 = arith.constant 167 : index
    %1489 = memref.load %arg2[%c167] : memref<256xf32, #tpu.memory_space<smem>>
    %1490 = vector.extract_strided_slice %11 {offsets = [1, 0, 0], sizes = [1, 16, 16], strides = [1, 1, 1]} : vector<4x16x16xf32> to vector<1x16x16xf32>
    %1491 = vector.shape_cast %1490 : vector<1x16x16xf32> to vector<16x16xf32>
    %1492 = vector.broadcast %1489 : f32 to vector<16x16xf32>
    %1493 = arith.mulf %1492, %1491 : vector<16x16xf32>
    %1494 = arith.addf %1488, %1493 : vector<16x16xf32>
    %c183 = arith.constant 183 : index
    %1495 = memref.load %arg2[%c183] : memref<256xf32, #tpu.memory_space<smem>>
    %1496 = vector.extract_strided_slice %12 {offsets = [1, 0, 0], sizes = [1, 16, 16], strides = [1, 1, 1]} : vector<4x16x16xf32> to vector<1x16x16xf32>
    %1497 = vector.shape_cast %1496 : vector<1x16x16xf32> to vector<16x16xf32>
    %1498 = vector.broadcast %1495 : f32 to vector<16x16xf32>
    %1499 = arith.mulf %1498, %1497 : vector<16x16xf32>
    %1500 = arith.addf %1494, %1499 : vector<16x16xf32>
    %c139 = arith.constant 139 : index
    %1501 = memref.load %arg2[%c139] : memref<256xf32, #tpu.memory_space<smem>>
    %1502 = vector.extract_strided_slice %8 {offsets = [2, 0, 0], sizes = [1, 16, 16], strides = [1, 1, 1]} : vector<4x16x16xf32> to vector<1x16x16xf32>
    %1503 = vector.shape_cast %1502 : vector<1x16x16xf32> to vector<16x16xf32>
    %1504 = vector.broadcast %1501 : f32 to vector<16x16xf32>
    %1505 = arith.mulf %1504, %1503 : vector<16x16xf32>
    %1506 = arith.addf %1500, %1505 : vector<16x16xf32>
    %c155 = arith.constant 155 : index
    %1507 = memref.load %arg2[%c155] : memref<256xf32, #tpu.memory_space<smem>>
    %1508 = vector.extract_strided_slice %9 {offsets = [2, 0, 0], sizes = [1, 16, 16], strides = [1, 1, 1]} : vector<4x16x16xf32> to vector<1x16x16xf32>
    %1509 = vector.shape_cast %1508 : vector<1x16x16xf32> to vector<16x16xf32>
    %1510 = vector.broadcast %1507 : f32 to vector<16x16xf32>
    %1511 = arith.mulf %1510, %1509 : vector<16x16xf32>
    %1512 = arith.addf %1506, %1511 : vector<16x16xf32>
    %c171 = arith.constant 171 : index
    %1513 = memref.load %arg2[%c171] : memref<256xf32, #tpu.memory_space<smem>>
    %1514 = vector.extract_strided_slice %11 {offsets = [2, 0, 0], sizes = [1, 16, 16], strides = [1, 1, 1]} : vector<4x16x16xf32> to vector<1x16x16xf32>
    %1515 = vector.shape_cast %1514 : vector<1x16x16xf32> to vector<16x16xf32>
    %1516 = vector.broadcast %1513 : f32 to vector<16x16xf32>
    %1517 = arith.mulf %1516, %1515 : vector<16x16xf32>
    %1518 = arith.addf %1512, %1517 : vector<16x16xf32>
    %c187 = arith.constant 187 : index
    %1519 = memref.load %arg2[%c187] : memref<256xf32, #tpu.memory_space<smem>>
    %1520 = vector.extract_strided_slice %12 {offsets = [2, 0, 0], sizes = [1, 16, 16], strides = [1, 1, 1]} : vector<4x16x16xf32> to vector<1x16x16xf32>
    %1521 = vector.shape_cast %1520 : vector<1x16x16xf32> to vector<16x16xf32>
    %1522 = vector.broadcast %1519 : f32 to vector<16x16xf32>
    %1523 = arith.mulf %1522, %1521 : vector<16x16xf32>
    %1524 = arith.addf %1518, %1523 : vector<16x16xf32>
    %c143 = arith.constant 143 : index
    %1525 = memref.load %arg2[%c143] : memref<256xf32, #tpu.memory_space<smem>>
    %1526 = vector.extract_strided_slice %8 {offsets = [3, 0, 0], sizes = [1, 16, 16], strides = [1, 1, 1]} : vector<4x16x16xf32> to vector<1x16x16xf32>
    %1527 = vector.shape_cast %1526 : vector<1x16x16xf32> to vector<16x16xf32>
    %1528 = vector.broadcast %1525 : f32 to vector<16x16xf32>
    %1529 = arith.mulf %1528, %1527 : vector<16x16xf32>
    %1530 = arith.addf %1524, %1529 : vector<16x16xf32>
    %c159 = arith.constant 159 : index
    %1531 = memref.load %arg2[%c159] : memref<256xf32, #tpu.memory_space<smem>>
    %1532 = vector.extract_strided_slice %9 {offsets = [3, 0, 0], sizes = [1, 16, 16], strides = [1, 1, 1]} : vector<4x16x16xf32> to vector<1x16x16xf32>
    %1533 = vector.shape_cast %1532 : vector<1x16x16xf32> to vector<16x16xf32>
    %1534 = vector.broadcast %1531 : f32 to vector<16x16xf32>
    %1535 = arith.mulf %1534, %1533 : vector<16x16xf32>
    %1536 = arith.addf %1530, %1535 : vector<16x16xf32>
    %c175 = arith.constant 175 : index
    %1537 = memref.load %arg2[%c175] : memref<256xf32, #tpu.memory_space<smem>>
    %1538 = vector.extract_strided_slice %11 {offsets = [3, 0, 0], sizes = [1, 16, 16], strides = [1, 1, 1]} : vector<4x16x16xf32> to vector<1x16x16xf32>
    %1539 = vector.shape_cast %1538 : vector<1x16x16xf32> to vector<16x16xf32>
    %1540 = vector.broadcast %1537 : f32 to vector<16x16xf32>
    %1541 = arith.mulf %1540, %1539 : vector<16x16xf32>
    %1542 = arith.addf %1536, %1541 : vector<16x16xf32>
    %c191 = arith.constant 191 : index
    %1543 = memref.load %arg2[%c191] : memref<256xf32, #tpu.memory_space<smem>>
    %1544 = vector.extract_strided_slice %12 {offsets = [3, 0, 0], sizes = [1, 16, 16], strides = [1, 1, 1]} : vector<4x16x16xf32> to vector<1x16x16xf32>
    %1545 = vector.shape_cast %1544 : vector<1x16x16xf32> to vector<16x16xf32>
    %1546 = vector.broadcast %1543 : f32 to vector<16x16xf32>
    %1547 = arith.mulf %1546, %1545 : vector<16x16xf32>
    %1548 = arith.addf %1542, %1547 : vector<16x16xf32>
    %cst_92 = arith.constant 0.000000e+00 : f32
    %1549 = vector.broadcast %cst_92 : f32 to vector<16x16xf32>
    %c195 = arith.constant 195 : index
    %1550 = memref.load %arg2[%c195] : memref<256xf32, #tpu.memory_space<smem>>
    %1551 = vector.extract_strided_slice %9 {offsets = [0, 0, 0], sizes = [1, 16, 16], strides = [1, 1, 1]} : vector<4x16x16xf32> to vector<1x16x16xf32>
    %1552 = vector.shape_cast %1551 : vector<1x16x16xf32> to vector<16x16xf32>
    %1553 = vector.broadcast %1550 : f32 to vector<16x16xf32>
    %1554 = arith.mulf %1553, %1552 : vector<16x16xf32>
    %1555 = arith.addf %1549, %1554 : vector<16x16xf32>
    %c211 = arith.constant 211 : index
    %1556 = memref.load %arg2[%c211] : memref<256xf32, #tpu.memory_space<smem>>
    %1557 = vector.extract_strided_slice %10 {offsets = [0, 0, 0], sizes = [1, 16, 16], strides = [1, 1, 1]} : vector<4x16x16xf32> to vector<1x16x16xf32>
    %1558 = vector.shape_cast %1557 : vector<1x16x16xf32> to vector<16x16xf32>
    %1559 = vector.broadcast %1556 : f32 to vector<16x16xf32>
    %1560 = arith.mulf %1559, %1558 : vector<16x16xf32>
    %1561 = arith.addf %1555, %1560 : vector<16x16xf32>
    %c227 = arith.constant 227 : index
    %1562 = memref.load %arg2[%c227] : memref<256xf32, #tpu.memory_space<smem>>
    %1563 = vector.extract_strided_slice %12 {offsets = [0, 0, 0], sizes = [1, 16, 16], strides = [1, 1, 1]} : vector<4x16x16xf32> to vector<1x16x16xf32>
    %1564 = vector.shape_cast %1563 : vector<1x16x16xf32> to vector<16x16xf32>
    %1565 = vector.broadcast %1562 : f32 to vector<16x16xf32>
    %1566 = arith.mulf %1565, %1564 : vector<16x16xf32>
    %1567 = arith.addf %1561, %1566 : vector<16x16xf32>
    %c243 = arith.constant 243 : index
    %1568 = memref.load %arg2[%c243] : memref<256xf32, #tpu.memory_space<smem>>
    %1569 = vector.extract_strided_slice %13 {offsets = [0, 0, 0], sizes = [1, 16, 16], strides = [1, 1, 1]} : vector<4x16x16xf32> to vector<1x16x16xf32>
    %1570 = vector.shape_cast %1569 : vector<1x16x16xf32> to vector<16x16xf32>
    %1571 = vector.broadcast %1568 : f32 to vector<16x16xf32>
    %1572 = arith.mulf %1571, %1570 : vector<16x16xf32>
    %1573 = arith.addf %1567, %1572 : vector<16x16xf32>
    %c199 = arith.constant 199 : index
    %1574 = memref.load %arg2[%c199] : memref<256xf32, #tpu.memory_space<smem>>
    %1575 = vector.extract_strided_slice %9 {offsets = [1, 0, 0], sizes = [1, 16, 16], strides = [1, 1, 1]} : vector<4x16x16xf32> to vector<1x16x16xf32>
    %1576 = vector.shape_cast %1575 : vector<1x16x16xf32> to vector<16x16xf32>
    %1577 = vector.broadcast %1574 : f32 to vector<16x16xf32>
    %1578 = arith.mulf %1577, %1576 : vector<16x16xf32>
    %1579 = arith.addf %1573, %1578 : vector<16x16xf32>
    %c215 = arith.constant 215 : index
    %1580 = memref.load %arg2[%c215] : memref<256xf32, #tpu.memory_space<smem>>
    %1581 = vector.extract_strided_slice %10 {offsets = [1, 0, 0], sizes = [1, 16, 16], strides = [1, 1, 1]} : vector<4x16x16xf32> to vector<1x16x16xf32>
    %1582 = vector.shape_cast %1581 : vector<1x16x16xf32> to vector<16x16xf32>
    %1583 = vector.broadcast %1580 : f32 to vector<16x16xf32>
    %1584 = arith.mulf %1583, %1582 : vector<16x16xf32>
    %1585 = arith.addf %1579, %1584 : vector<16x16xf32>
    %c231 = arith.constant 231 : index
    %1586 = memref.load %arg2[%c231] : memref<256xf32, #tpu.memory_space<smem>>
    %1587 = vector.extract_strided_slice %12 {offsets = [1, 0, 0], sizes = [1, 16, 16], strides = [1, 1, 1]} : vector<4x16x16xf32> to vector<1x16x16xf32>
    %1588 = vector.shape_cast %1587 : vector<1x16x16xf32> to vector<16x16xf32>
    %1589 = vector.broadcast %1586 : f32 to vector<16x16xf32>
    %1590 = arith.mulf %1589, %1588 : vector<16x16xf32>
    %1591 = arith.addf %1585, %1590 : vector<16x16xf32>
    %c247 = arith.constant 247 : index
    %1592 = memref.load %arg2[%c247] : memref<256xf32, #tpu.memory_space<smem>>
    %1593 = vector.extract_strided_slice %13 {offsets = [1, 0, 0], sizes = [1, 16, 16], strides = [1, 1, 1]} : vector<4x16x16xf32> to vector<1x16x16xf32>
    %1594 = vector.shape_cast %1593 : vector<1x16x16xf32> to vector<16x16xf32>
    %1595 = vector.broadcast %1592 : f32 to vector<16x16xf32>
    %1596 = arith.mulf %1595, %1594 : vector<16x16xf32>
    %1597 = arith.addf %1591, %1596 : vector<16x16xf32>
    %c203 = arith.constant 203 : index
    %1598 = memref.load %arg2[%c203] : memref<256xf32, #tpu.memory_space<smem>>
    %1599 = vector.extract_strided_slice %9 {offsets = [2, 0, 0], sizes = [1, 16, 16], strides = [1, 1, 1]} : vector<4x16x16xf32> to vector<1x16x16xf32>
    %1600 = vector.shape_cast %1599 : vector<1x16x16xf32> to vector<16x16xf32>
    %1601 = vector.broadcast %1598 : f32 to vector<16x16xf32>
    %1602 = arith.mulf %1601, %1600 : vector<16x16xf32>
    %1603 = arith.addf %1597, %1602 : vector<16x16xf32>
    %c219 = arith.constant 219 : index
    %1604 = memref.load %arg2[%c219] : memref<256xf32, #tpu.memory_space<smem>>
    %1605 = vector.extract_strided_slice %10 {offsets = [2, 0, 0], sizes = [1, 16, 16], strides = [1, 1, 1]} : vector<4x16x16xf32> to vector<1x16x16xf32>
    %1606 = vector.shape_cast %1605 : vector<1x16x16xf32> to vector<16x16xf32>
    %1607 = vector.broadcast %1604 : f32 to vector<16x16xf32>
    %1608 = arith.mulf %1607, %1606 : vector<16x16xf32>
    %1609 = arith.addf %1603, %1608 : vector<16x16xf32>
    %c235 = arith.constant 235 : index
    %1610 = memref.load %arg2[%c235] : memref<256xf32, #tpu.memory_space<smem>>
    %1611 = vector.extract_strided_slice %12 {offsets = [2, 0, 0], sizes = [1, 16, 16], strides = [1, 1, 1]} : vector<4x16x16xf32> to vector<1x16x16xf32>
    %1612 = vector.shape_cast %1611 : vector<1x16x16xf32> to vector<16x16xf32>
    %1613 = vector.broadcast %1610 : f32 to vector<16x16xf32>
    %1614 = arith.mulf %1613, %1612 : vector<16x16xf32>
    %1615 = arith.addf %1609, %1614 : vector<16x16xf32>
    %c251 = arith.constant 251 : index
    %1616 = memref.load %arg2[%c251] : memref<256xf32, #tpu.memory_space<smem>>
    %1617 = vector.extract_strided_slice %13 {offsets = [2, 0, 0], sizes = [1, 16, 16], strides = [1, 1, 1]} : vector<4x16x16xf32> to vector<1x16x16xf32>
    %1618 = vector.shape_cast %1617 : vector<1x16x16xf32> to vector<16x16xf32>
    %1619 = vector.broadcast %1616 : f32 to vector<16x16xf32>
    %1620 = arith.mulf %1619, %1618 : vector<16x16xf32>
    %1621 = arith.addf %1615, %1620 : vector<16x16xf32>
    %c207 = arith.constant 207 : index
    %1622 = memref.load %arg2[%c207] : memref<256xf32, #tpu.memory_space<smem>>
    %1623 = vector.extract_strided_slice %9 {offsets = [3, 0, 0], sizes = [1, 16, 16], strides = [1, 1, 1]} : vector<4x16x16xf32> to vector<1x16x16xf32>
    %1624 = vector.shape_cast %1623 : vector<1x16x16xf32> to vector<16x16xf32>
    %1625 = vector.broadcast %1622 : f32 to vector<16x16xf32>
    %1626 = arith.mulf %1625, %1624 : vector<16x16xf32>
    %1627 = arith.addf %1621, %1626 : vector<16x16xf32>
    %c223 = arith.constant 223 : index
    %1628 = memref.load %arg2[%c223] : memref<256xf32, #tpu.memory_space<smem>>
    %1629 = vector.extract_strided_slice %10 {offsets = [3, 0, 0], sizes = [1, 16, 16], strides = [1, 1, 1]} : vector<4x16x16xf32> to vector<1x16x16xf32>
    %1630 = vector.shape_cast %1629 : vector<1x16x16xf32> to vector<16x16xf32>
    %1631 = vector.broadcast %1628 : f32 to vector<16x16xf32>
    %1632 = arith.mulf %1631, %1630 : vector<16x16xf32>
    %1633 = arith.addf %1627, %1632 : vector<16x16xf32>
    %c239 = arith.constant 239 : index
    %1634 = memref.load %arg2[%c239] : memref<256xf32, #tpu.memory_space<smem>>
    %1635 = vector.extract_strided_slice %12 {offsets = [3, 0, 0], sizes = [1, 16, 16], strides = [1, 1, 1]} : vector<4x16x16xf32> to vector<1x16x16xf32>
    %1636 = vector.shape_cast %1635 : vector<1x16x16xf32> to vector<16x16xf32>
    %1637 = vector.broadcast %1634 : f32 to vector<16x16xf32>
    %1638 = arith.mulf %1637, %1636 : vector<16x16xf32>
    %1639 = arith.addf %1633, %1638 : vector<16x16xf32>
    %c255 = arith.constant 255 : index
    %1640 = memref.load %arg2[%c255] : memref<256xf32, #tpu.memory_space<smem>>
    %1641 = vector.extract_strided_slice %13 {offsets = [3, 0, 0], sizes = [1, 16, 16], strides = [1, 1, 1]} : vector<4x16x16xf32> to vector<1x16x16xf32>
    %1642 = vector.shape_cast %1641 : vector<1x16x16xf32> to vector<16x16xf32>
    %1643 = vector.broadcast %1640 : f32 to vector<16x16xf32>
    %1644 = arith.mulf %1643, %1642 : vector<16x16xf32>
    %1645 = arith.addf %1639, %1644 : vector<16x16xf32>
    %cst_93 = arith.constant dense<0.000000e+00> : vector<16x32xf32>
    %1646 = tpu.matmul %1548, %22, %cst_93 {dimension_numbers = #tpu.dot_dimension_numbers<[1], [0], [0], [1], [0, 0, 1, 1], [], []>} : vector<16x16xf32>, vector<16x32xf32>, vector<16x32xf32> -> vector<16x32xf32>
    %cst_94 = arith.constant dense<0.000000e+00> : vector<16x32xf32>
    %1647 = tpu.matmul %1645, %29, %cst_94 {dimension_numbers = #tpu.dot_dimension_numbers<[1], [0], [0], [1], [0, 0, 1, 1], [], []>} : vector<16x16xf32>, vector<16x32xf32>, vector<16x32xf32> -> vector<16x32xf32>
    %1648 = arith.addf %1646, %1647 : vector<16x32xf32>
    %cst_95 = arith.constant dense<0.000000e+00> : vector<32x32xf32>
    %1649 = tpu.matmul %38, %1451, %cst_95 {dimension_numbers = #tpu.dot_dimension_numbers<[1], [0], [0], [1], [0, 0, 1, 1], [], []>} : vector<32x16xf32>, vector<16x32xf32>, vector<32x32xf32> -> vector<32x32xf32>
    %cst_96 = arith.constant dense<0.000000e+00> : vector<32x32xf32>
    %1650 = tpu.matmul %45, %1648, %cst_96 {dimension_numbers = #tpu.dot_dimension_numbers<[1], [0], [0], [1], [0, 0, 1, 1], [], []>} : vector<32x16xf32>, vector<16x32xf32>, vector<32x32xf32> -> vector<32x32xf32>
    %1651 = arith.addf %1649, %1650 : vector<32x32xf32>
    %c3_97 = arith.constant 3 : index
    %1652 = memref.load %arg3[%c3_97] : memref<4xf32, #tpu.memory_space<smem>>
    %1653 = vector.broadcast %1652 : f32 to vector<32x32xf32>
    %1654 = arith.addf %1651, %1653 : vector<32x32xf32>
    %c0_98 = arith.constant 0 : index
    %c3_99 = arith.constant 3 : index
    %c0_100 = arith.constant 0 : index
    %c0_101 = arith.constant 0 : index
    %1655 = vector.load %arg4[%c0_98, %c3_99, %c0_100, %c0_101] : memref<1x4x32x32xf32, #tpu.memory_space<vmem>>, vector<1x1x32x32xf32>
    %1656 = vector.shape_cast %1655 : vector<1x1x32x32xf32> to vector<32x32xf32>
    %1657 = vector.shape_cast %1654 : vector<32x32xf32> to vector<1x1x32x32xf32>
    tpu.vector_store %arg4[%c0_98, %c3_99, %c0_100, %c0_101], %1657 {strides = array<i32>} : memref<1x4x32x32xf32, #tpu.memory_space<vmem>>, vector<1x1x32x32xf32>,
    return
  }
  func.func @transform_0(%arg0: i32) -> (i32, i32, i32, i32) {
    %c0_i32 = arith.constant 0 : i32
    %c0_i32_0 = arith.constant 0 : i32
    %c0_i32_1 = arith.constant 0 : i32
    %c0_i32_2 = arith.constant 0 : i32
    return %arg0, %c0_i32, %c0_i32_0, %c0_i32_1 : i32, i32, i32, i32
  }
  func.func @transform_1(%arg0: i32) -> i32 {
    %c0_i32 = arith.constant 0 : i32
    %c0_i32_0 = arith.constant 0 : i32
    return %c0_i32 : i32
  }
  func.func @transform_2(%arg0: i32) -> i32 {
    %c0_i32 = arith.constant 0 : i32
    %c0_i32_0 = arith.constant 0 : i32
    return %c0_i32 : i32
  }
  func.func @transform_3(%arg0: i32) -> (i32, i32, i32, i32) {
    %c0_i32 = arith.constant 0 : i32
    %c0_i32_0 = arith.constant 0 : i32
    %c0_i32_1 = arith.constant 0 : i32
    %c0_i32_2 = arith.constant 0 : i32
    return %arg0, %c0_i32, %c0_i32_0, %c0_i32_1 : i32, i32, i32, i32
  }
}

</mosaic_0001>

<bundles_post_ra>
// kernel: tpu_custom_call.1
= control target key start
LH: loop header
LB: loop body
LE: loop exit
PB: predicated region body
PF: predicated region fallthrough
CT: control target
= control target key end

     0   :  { %s9208_s0 = inlined_call_operand.hbm [shape: f32[2,4,16,16], index: 0, kind: input, shape index: {}]   ;;  %s9209_s1 = inlined_call_operand.vmem [shape: f32[256], index: 1, kind: input, shape index: {}]   ;;  %s9210_s2 = inlined_call_operand.vmem [shape: f32[4], index: 2, kind: input, shape index: {}]   ;;  %s9211_s3 = inlined_call_operand.hbm [shape: f32[2,4,32,32], index: 3, kind: output, shape index: {}]  }
   0x1   :  { %9248 = sst [smem:[#allocation75_spill]] %s9208_s0 }
   0x2   :  { %9249 = sst [smem:[#allocation76_spill]] %s9209_s1 }
   0x3   :  { %9250 = sst [smem:[#allocation77_spill]] %s9210_s2 }
   0x4   :  { %8 = vsyncpa [#allocation4], 0 }
   0x5   :  { %10 = vsyncpa [#allocation4 + $0x1], 0 }
   0x6   :  { %11 = vsyncpa [#allocation6], 0 }
   0x7   :  { %12 = vsyncpa [#allocation9], 0 }
   0x8   :  { %13 = vsyncpa [#allocation5], 0 }
   0x9   :  { %15 = vsyncpa [#allocation5 + $0x1], 0  ;;  %s6243_s12 = smov 0   ;;  %s6245_s13 = smov 0  }
   0xa   :  { %s6247_s14 = smov 0   ;;  %s6249_s15 = smov 0  }
   0xb LB: > { %s6264_s16 = sadd.s32 4294967295, %s6209_s15   ;;  %s5098_s17 = sadd.s32 4294967294, %s6209_s15   ;;  %s6209_s15 = sphi %s6249_s15, %s9512_s15   ;;  %s6205_s14 = sphi %s6247_s14, %s9511_s14   ;;  %s6201_s13 = sphi %s6245_s13, %s9510_s13   ;;  %s6197_s12 = sphi %s6243_s12, %s9509_s12  }
   0xc   : > { %s6268_s18 = sadd.s32 1, %s6209_s15   ;;  %s28_s19 = sadd.s32 1, %s6205_s14 }
   0xd   : > { %s25_s20 = ssub.s32 %s6209_s15, %s6268_s18  ;;  %p35_p0 = scmp.ne.s32.totalorder %s6205_s14, %s6201_s13 }
   0xe   : > { %p26_p1 = scmp.eq.s32.totalorder %s25_s20, 0  ;;  %p36_p2 = scmp.eq.s32.totalorder %s6209_s15, 0 }
   0xf   : > { %p41_p3 = scmp.ne.s32.totalorder %s6201_s13, %s6197_s12  ;;  %p9212_p4 = scmp.eq.s32.totalorder %s6264_s16, 0 }
  0x10   : > { %s6280_s21 = scalar_select %p26_p1, %s6205_s14, %s28_s19  }
  0x11   : > { %p6282_p5 = por %p36_p2, %p35_p0  ;;  %p6288_p6 = por %p9212_p4, %p41_p3 }
  0x12   : > { %9251 = sst [smem:[#allocation15_spill]] %s6280_s21  ;;  %p107_p7 = scmp.eq.s32.totalorder %s6264_s16, 1 }
  0x13   : > { %s9253_s23 = scalar_select %p6288_p6, 1, 0 }
  0x14   : > { %p113_p8 = scmp.eq.s32.totalorder %s5098_s17, 1  ;;  %p5099_p9 = scmp.ge.s32.totalorder %s6209_s15, 1 }
  0x15   : > { %p120_p10 = scmp.lt.s32.totalorder %s6209_s15, 3  ;;  %p6295_p11 = por %p107_p7, %p35_p0 }
  0x16   : > { %p6299_p12 = por %p113_p8, %p41_p3  ;;  %s9257_s1 = sld [smem:[#allocation76_spill]] }
  0x17   : > { %s9254_s24 = scalar_select %p6295_p11, 1, 0 }
  0x18   : > { %s9255_s25 = scalar_select %p6299_p12, 1, 0 }
  0x19   : > { %p6303_p13 = pnand %p5099_p9, %p120_p10  ;;  %p5957_p2 = scmp.lt.s32.totalorder %s6209_s15, 2 }
  0x1a   : > { %s9259_s2 = sld [smem:[#allocation77_spill]] }
  0x1b   : > { %s9256_s26 = scalar_select %p6303_p13, 1, 0 }
  0x1c   : > { %s133_s29 = sshll.u32 %s9257_s1, 4  ;;  %p5940_p1 = pneg %p6303_p13  ;;  %s134_s29 = int_to_ptr.vmem [resolvable:$true] %s133_s29 }
  0x1d   : > { %p6325_p3 = pnand %p5957_p2, %p6282_p5  ;;  %s6075_s8 = scalar_lea.vmem %s134_s29, 32 }
  0x1e   : > { %p6316_p7 = pnand %p5940_p1, %p9212_p4  ;;  %p6076_p8 = scmp.ne.s32.totalorder %s134_s29, %s6075_s8 }
  0x1f   : > { %s9260_s7 = scalar_select %p6325_p3, 1, 0 }
  0x20   : > { %s144_s6 = sshll.u32 %s9259_s2, 4  ;;  %p6077_p9 = pneg %p6316_p7  ;;  %s145_s6 = int_to_ptr.vmem [resolvable:$true] %s144_s6 }
  0x21   : > { %p6083_p0 = scmp.lt.s32.totalorder %s134_s29, %s134_s29  ;;  %p6084_p4 = scmp.lt.s32.totalorder %s6075_s8, %s6075_s8 }
  0x22   : > { %p6078_p10 = pnand %p6077_p9, %p6076_p8 }
  0x23   : > { %p6085_p12 = por %p6084_p4, %p6083_p0 }
  0x24   : > { %p6079_p1 = pneg %p6078_p10 }
  0x26   : > { %p6086_p11 = pnand %p6085_p12, %p6079_p1 }
  0x28   : > { %6089 = shalt.err (!%p6086_p11)
}
  0x29   : > { %s6211_s9 = smov [#allocation7]   ;;  %s155_s10 = sand.u32 1, %s6205_s14  }
  0x2a   : > { %5943 = dma.vmem_to_smem (!%p6316_p7), %s134_s29, 32, %s6211_s9, [#allocation6]  }
  0x2b   : > { %s6090_s11 = scalar_lea.vmem %s145_s6, 16  ;;  %p6098_p8 = scmp.lt.s32.totalorder %s145_s6, %s145_s6 }
  0x2c   : > { %p6091_p5 = scmp.ne.s32.totalorder %s145_s6, %s6090_s11  ;;  %p6099_p10 = scmp.lt.s32.totalorder %s6090_s11, %s6090_s11 }
  0x2e   : > { %p6093_p2 = pnand %p6091_p5, %p6077_p9  ;;  %p6100_p13 = por %p6099_p10, %p6098_p8 }
  0x30   : > { %p6094_p6 = pneg %p6093_p2 }
  0x32   : > { %p6101_p3 = pnand %p6100_p13, %p6094_p6 }
  0x34   : > { %6104 = shalt.err (!%p6101_p3)
}
  0x35   : > { %s6212_s17 = smov [#allocation8]   ;;  %s5103_s19 = sshll.u32 %s155_s10, 6 }
  0x36   : > { %5946 = dma.vmem_to_smem (!%p6316_p7), %s145_s6, 16, %s6212_s17, [#allocation9]  }
  0x37   : > { %s5494_s20 = sshll.u32 %s6209_s15, 10  ;;  %s9261_s0 = sld [smem:[#allocation75_spill]] }
  0x38   : > { %s159_s29 = scalar_lea.vmem [#allocation3], %s5103_s19  ;;  %s6350_s30 = scalar_lea.sflag [#allocation4], %s155_s10 }
  0x39   : > { %s166_s4 = sshll.u32 %s159_s29, 4  ;;  %p9262_p6 = scmp.ne.s32.totalorder %s9260_s7, 0  ;;  %s6348_s4 = int_to_ptr.vmem [resolvable:$true] %s166_s4 }
  0x3b   : > { %p6107_p11 = pneg %p9262_p6 }
  0x3d   : > { %s6346_s28 = scalar_lea.hbm %s9261_s0, %s5494_s20  ;;  %s6110_s9 = scalar_lea.hbm %s9261_s0, 2048 }
  0x3e   : > { %s6105_s5 = scalar_lea.hbm %s6346_s28, 1024  ;;  %p6111_p0 = scmp.lt.u32.totalorder %s6346_s28, %s9261_s0 }
  0x3f   : > { %p6106_p4 = scmp.ne.s32.totalorder %s6346_s28, %s6105_s5  ;;  %p6112_p7 = scmp.lt.u32.totalorder %s6110_s9, %s6105_s5 }
  0x40   : > { %p6114_p9 = scmp.lt.u32.totalorder %s6105_s5, %s6346_s28 }
  0x41   : > { %p6108_p12 = pnand %p6107_p11, %p6106_p4  ;;  %p6113_p3 = por %p6112_p7, %p6111_p0 }
  0x43   : > { %p6109_p13 = pneg %p6108_p12  ;;  %p6115_p1 = por %p6114_p9, %p6113_p3 }
  0x45   : > { %p6116_p5 = pnand %p6115_p1, %p6109_p13 }
  0x47   : > { %6119 = shalt.err (!%p6116_p5)
}
  0x48   : > { %s6120_s10 = scalar_lea.vmem %s6348_s4, 1024  ;;  %s6213_s19 = smov [#allocation3]  }
  0x49   : > { %p6121_p2 = scmp.ne.s32.totalorder %s6348_s4, %s6120_s10  ;;  %s6125_s20 = sshll.u32 %s6213_s19, 4  ;;  %s6126_s20 = int_to_ptr.vmem [resolvable:$false] %s6125_s20 }
  0x4a   : > { %s6127_s22 = scalar_lea.vmem %s6126_s20, 2048  ;;  %p6128_p4 = scmp.lt.s32.totalorder %s6348_s4, %s6126_s20 }
  0x4b   : > { %p6123_p8 = pnand %p6121_p2, %p6107_p11  ;;  %p6129_p12 = scmp.lt.s32.totalorder %s6127_s22, %s6120_s10 }
  0x4d   : > { %p6124_p10 = pneg %p6123_p8  ;;  %p6130_p0 = por %p6129_p12, %p6128_p4 }
  0x4f   : > { %p6131_p7 = pnand %p6130_p0, %p6124_p10 }
  0x51   : > { %6134 = shalt.err (!%p6131_p7)
}
  0x52   : > { %s6214_s27 = smov 128   ;;  %s6215_s29 = smov 8  }
  0x53   : > { %5950 = dma.hbm_to_vmem [thread:$0]  (!%p9262_p6), %s6346_s28, 1024, %s6348_s4, %s6350_s30, %s6214_s27, %s6214_s27, %s6215_s29  }
  0x54   : > { %p9263_p11 = scmp.ne.s32.totalorder %s9256_s26, 0 }
  0x56   : > { %178 = sbr.rel (%p9263_p11) target bundleno = 1354 (0x54a), region = 32 }
  0x5d   : > { %s6381_s5 = sand.u32 1, %s6201_s13   ;;  %p9264_p13 = scmp.ne.s32.totalorder %s9253_s23, 0 }
  0x5e   : > { %s5107_s6 = sshll.u32 %s6381_s5, 6  ;;  %s181_s8 = scalar_lea.sflag [#allocation4], %s6381_s5 }
  0x5f   : > { %s6385_s9 = scalar_lea.vmem [#allocation3], %s5107_s6 }
  0x60   : > { %6180 = dma.done.wait (%p9264_p13), %s181_s8, 1024  }
  0x61   : > { %6182 = vsyncadd (%p9264_p13), %s181_s8, 4294966272  ;;  %p9265_p6 = scmp.eq.s32.totalorder %s6264_s16, 0 }
  0x63   : > { %6184 = dma.done.wait (%p9265_p6), [#allocation6], 32   ;;  %p9266_p3 = pmov %p9265_p6 }
  0x65   : > { %6186 = vsyncadd (%p9266_p3), [#allocation6], 4294967264  ;;  %p9267_p9 = pmov %p9266_p3 }
  0x66   : > { %p9268_p1 = pmov %p9266_p3 }
  0x67   : > { %6188 = dma.done.wait (%p9267_p9), [#allocation9], 16  }
  0x68   : > { %6190 = vsyncadd (%p9268_p1), [#allocation9], 4294967280 }
  0x69   : > { %197 = sfence }
  0x6a   : > { %v230_v0 = vld [vmem:[%s6385_s9] sm:$0xff]  ;;  %v232_v1 = vld [vmem:[%s6385_s9 + $0x10] sm:$0xff]  ;;  %vm216_vm0 = vcmask 146432   ;;  %s6216_s23 = smov 1   ;;  %vm219_vm1 = vcmask 140288   ;;  %v231_v2 = vld [vmem:[%s6385_s9 + $0x8] sm:$0xff] }
  0x6b   : > { %246 = vrot.lane.b32.xlu0 %v230_v0, %s6216_s23  ;;  %250 = vrot.lane.b32.xlu1 %v232_v1, %s6216_s23  ;;  %v233_v3 = vld [vmem:[%s6385_s9 + $0x18] sm:$0xff]  ;;  %v9217_v4 = vmov 0.0   ;;  %v234_v5 = vld [vmem:[%s6385_s9 + $0x20] sm:$0xff]  ;;  %vm270_vm2 = vcmask 138248   ;;  %s5179_s26 = sld [smem:[#allocation7 + $0xd0]]  ;;  %s6423_s28 = sld [smem:[#allocation7 + $0xd4]] }
  0x6c   : > { %217 = vst.msk [vmem:[#allocation2] sm:$0xff] %vm216_vm0, %v9217_v4  ;;  %218 = vst.msk [vmem:[#allocation2 + $0x8] sm:$0xff] %vm216_vm0, %v9217_v4  ;;  %v235_v6 = vld [vmem:[%s6385_s9 + $0x28] sm:$0xff]  ;;  %v236_v7 = vld [vmem:[%s6385_s9 + $0x30] sm:$0xff]  ;;  %s6421_s7 = sld [smem:[#allocation7 + $0xf0]]  ;;  %s6433_s4 = sld [smem:[#allocation7 + $0xf4]] }
  0x6d   : > { %221 = vst.msk [vmem:[#allocation2 + $0x18] sm:$0xff] %vm216_vm0, %v9217_v4  ;;  %222 = vst.msk [vmem:[#allocation2 + $0x20] sm:$0xff] %vm216_vm0, %v9217_v4  ;;  %v237_v8 = vld [vmem:[%s6385_s9 + $0x38] sm:$0xff]  ;;  %s6218_s30 = smov 127   ;;  %s6443_s11 = sld [smem:[#allocation7 + $0xd8]]  ;;  %vm678_vm9 = vcmask 130048  }
  0x6e   : > { %224 = vst.msk [vmem:[#allocation2 + $0x30] sm:$0xff] %vm216_vm0, %v9217_v4  ;;  %225 = vst.msk [vmem:[#allocation2 + $0x38] sm:$0xff] %vm216_vm0, %v9217_v4  ;;  %s6456_s17 = sld [smem:[#allocation7 + $0xf8]]  ;;  %s5191_s10 = sld [smem:[#allocation7 + $0xdc]] }
  0x6f   : > { %227 = vst.msk [vmem:[#allocation2 + $0x48] sm:$0xff] %vm216_vm0, %v9217_v4  ;;  %228 = vst.msk [vmem:[#allocation2 + $0x50] sm:$0xff] %vm216_vm0, %v9217_v4  ;;  %248 = vrot.lane.b32.xlu0 %v231_v2, %s6216_s23  ;;  %252 = vrot.lane.b32.xlu1 %v233_v3, %s6216_s23  ;;  %s5193_s19 = sld [smem:[#allocation7 + $0xfc]]  ;;  %s5163_s20 = sld [smem:[#allocation7 + $0x90]] }
  0x70   : > { %220 = vst.msk [vmem:[#allocation2 + $0x10] sm:$0x3] %vm219_vm1, %v9217_v4  ;;  %223 = vst.msk [vmem:[#allocation2 + $0x28] sm:$0x3] %vm219_vm1, %v9217_v4  ;;  %s5165_s22 = sld [smem:[#allocation7 + $0xb0]]  ;;  %s5167_s27 = sld [smem:[#allocation7 + $0x94]] }
  0x71   : > { %226 = vst.msk [vmem:[#allocation2 + $0x40] sm:$0x3] %vm219_vm1, %v9217_v4  ;;  %229 = vst.msk [vmem:[#allocation2 + $0x58] sm:$0x3] %vm219_vm1, %v9217_v4  ;;  %v1006_v13 = vstv %s5179_s26  ;;  %v1046_v22 = vstv %s6423_s28  ;;  %s5169_s29 = sld [smem:[#allocation7 + $0xb4]]  ;;  %s5171_s6 = sld [smem:[#allocation7 + $0x98]] }
  0x72   : > { %v1026_v18 = vstv %s6421_s7  ;;  %v1066_v32 = vstv %s6433_s4  ;;  %s5173_s8 = sld [smem:[#allocation7 + $0xb8]]  ;;  %s5175_s9 = sld [smem:[#allocation7 + $0x9c]] }
  0x73   : > { %254 = vrot.lane.b32.xlu0 %v234_v5, %s6216_s23  ;;  %256 = vrot.lane.b32.xlu1 %v235_v6, %s6216_s23  ;;  %v1086_v35 = vstv %s6443_s11  ;;  %s5227_s26 = sld [smem:[#allocation7 + $0x51]]  ;;  %s5231_s28 = sld [smem:[#allocation7 + $0x55]] }
  0x74   : > { %v1106_v41 = vstv %s6456_s17  ;;  %v1126_v46 = vstv %s5191_s10  ;;  %s5229_s7 = sld [smem:[#allocation7 + $0x71]]  ;;  %s5233_s4 = sld [smem:[#allocation7 + $0x75]] }
  0x75   : > { %v1146_v51 = vstv %s5193_s19  ;;  %v846_v56 = vstv %s5163_s20  ;;  %s5267_s11 = sld [smem:[#allocation7 + $0xd1]]  ;;  %s5139_s19 = sld [smem:[#allocation7 + $0x50]] }
  0x76   : > { %v866_v59 = vstv %s5165_s22  ;;  %v886_v62 = vstv %s5167_s27  ;;  %s5235_s17 = sld [smem:[#allocation7 + $0x59]]  ;;  %s5271_s22 = sld [smem:[#allocation7 + $0xd5]] }
  0x77   : > { %258 = vrot.lane.b32.xlu0 %v236_v7, %s6216_s23  ;;  %260 = vrot.lane.b32.xlu1 %v237_v8, %s6216_s23  ;;  %v906_v1 = vstv %s5169_s29  ;;  %v926_v5 = vstv %s5171_s6  ;;  %s5177_s23 = sld [smem:[#allocation7 + $0xbc]]  ;;  %s5269_s10 = sld [smem:[#allocation7 + $0xf1]] }
  0x78   : > { %v946_v8 = vstv %s5173_s8  ;;  %s5237_s20 = sld [smem:[#allocation7 + $0x79]]  ;;  %s5141_s27 = sld [smem:[#allocation7 + $0x70]] }
  0x79   : > { %s6582_s29 = sld [smem:[#allocation7 + $0x5d]]  ;;  %s6590_s8 = sld [smem:[#allocation7 + $0x52]] }
  0x7a   : > { %s6584_s6 = sld [smem:[#allocation7 + $0xf5]]  ;;  %s8390_s1 = sld [smem:[#allocation7 + $0xa]] }
  0x7b   : > { %s8385_s0 = sld [smem:[#allocation7 + $0xad]]  ;;  %s8392_s2 = sld [smem:[#allocation7 + $0x3f]] }
  0x7c   : > { %s8400_s21 = sld [smem:[#allocation7 + $0x9b]]  ;;  %p9505_p2 = scmp.ne.s32.totalorder %s9254_s24, 0 }
  0xdd   : > { %v247_v9 = vpop.permute.xlu0 %246  ;;  %v251_v10 = vpop.permute.xlu1 %250 }
  0xde   : > { %271 = vst.msk [vmem:[#allocation2 + $0x1] sm:$0xff] %vm270_vm2, %v247_v9  ;;  %273 = vst.msk [vmem:[#allocation2 + $0x19] sm:$0xff] %vm270_vm2, %v251_v10 }
  0xe1   : > { %v249_v11 = vpop.permute.xlu0 %248  ;;  %v253_v12 = vpop.permute.xlu1 %252 }
  0xe2   : > { %272 = vst.msk [vmem:[#allocation2 + $0x9] sm:$0xff] %vm270_vm2, %v249_v11  ;;  %274 = vst.msk [vmem:[#allocation2 + $0x21] sm:$0xff] %vm270_vm2, %v253_v12  ;;  %v966_v11 = vstv %s5175_s9  ;;  %s6605_s9 = sld [smem:[#allocation7 + $0x54]] }
  0xe5   : > { %v6427_v14 = vld [vmem:[#allocation2 + $0x1] sm:$0xff]  ;;  %v255_v15 = vpop.permute.xlu0 %254  ;;  %v257_v16 = vpop.permute.xlu1 %256  ;;  %v6436_v19 = vld [vmem:[#allocation2 + $0x19] sm:$0xff] }
  0xe6   : > { %v1007_v17 = vmul.f32 %v1006_v13, %v6427_v14  ;;  %275 = vst.msk [vmem:[#allocation2 + $0x31] sm:$0xff] %vm270_vm2, %v255_v15  ;;  %276 = vst.msk [vmem:[#allocation2 + $0x39] sm:$0xff] %vm270_vm2, %v257_v16  ;;  %v1047_v28 = vmul.f32 %v1046_v22, %v6436_v19  ;;  %v847_v58 = vmul.f32 %v846_v56, %v6427_v14  ;;  %v986_v15 = vstv %s5177_s23  ;;  %s6613_s23 = sld [smem:[#allocation7 + $0x7d]] }
  0xe7   : > { %v887_v0 = vmul.f32 %v886_v62, %v6436_v19 }
  0xe8   : > { %1011 = vrot.lane.b32.xlu0 %v1007_v17, %s6218_s30 }
  0xe9   : > { %v6438_v20 = vld [vmem:[#allocation2 + $0x9] sm:$0xff]  ;;  %v259_v23 = vpop.permute.xlu0 %258  ;;  %v261_v24 = vpop.permute.xlu1 %260  ;;  %v6454_v29 = vld [vmem:[#allocation2 + $0x21] sm:$0xff] }
  0xea   : > { %v6440_v21 = vld [vmem:[#allocation2 + $0x2] sm:$0xff]  ;;  %v1008_v25 = vmul.f32 %v1006_v13, %v6438_v20  ;;  %277 = vst.msk [vmem:[#allocation2 + $0x49] sm:$0xff] %vm270_vm2, %v259_v23  ;;  %278 = vst.msk [vmem:[#allocation2 + $0x51] sm:$0xff] %vm270_vm2, %v261_v24  ;;  %v6449_v27 = vld [vmem:[#allocation2 + $0xa] sm:$0xff]  ;;  %v1048_v33 = vmul.f32 %v1046_v22, %v6454_v29  ;;  %v848_v60 = vmul.f32 %v846_v56, %v6438_v20  ;;  %v1697_v22 = vstv %s5227_s26  ;;  %s6615_s26 = sld [smem:[#allocation7 + $0xd9]] }
  0xeb   : > { %v1027_v26 = vmul.f32 %v1026_v18, %v6440_v21  ;;  %v1028_v30 = vmul.f32 %v1026_v18, %v6449_v27  ;;  %v6459_v31 = vld [vmem:[#allocation2 + $0x1a] sm:$0xff]  ;;  %v6469_v37 = vld [vmem:[#allocation2 + $0x22] sm:$0xff]  ;;  %v867_v61 = vmul.f32 %v866_v59, %v6440_v21  ;;  %v868_v63 = vmul.f32 %v866_v59, %v6449_v27 }
  0xec   : > { %1013 = vrot.lane.b32.xlu1 %v1008_v25, %s6218_s30  ;;  %v1067_v36 = vmul.f32 %v1066_v32, %v6459_v31  ;;  %v1068_v42 = vmul.f32 %v1066_v32, %v6469_v37  ;;  %v888_v2 = vmul.f32 %v886_v62, %v6454_v29  ;;  %v907_v3 = vmul.f32 %v906_v1, %v6459_v31  ;;  %v6534_v18 = vld [vmem:[#allocation2] sm:$0xff]  ;;  %v6540_v25 = vld [vmem:[#allocation2 + $0x8] sm:$0xff]  ;;  %v6546_v32 = vld [vmem:[#allocation2 + $0x18] sm:$0xff] }
  0xed   : > { %1031 = vrot.lane.b32.xlu0 %v1027_v26, %s6218_s30  ;;  %v6465_v34 = vld [vmem:[#allocation2 + $0x31] sm:$0xff]  ;;  %v6474_v39 = vld [vmem:[#allocation2 + $0x39] sm:$0xff]  ;;  %v908_v6 = vmul.f32 %v906_v1, %v6469_v37  ;;  %v1698_v24 = vmul.f32 %v1697_v22, %v6534_v18  ;;  %v1717_v26 = vstv %s5229_s7  ;;  %s6624_s7 = sld [smem:[#allocation7 + $0x72]]  ;;  %vm1525_vm2 = vcmask 261120  }
  0xee   : > { %v1087_v38 = vmul.f32 %v1086_v35, %v6465_v34  ;;  %v6476_v40 = vld [vmem:[#allocation2 + $0x32] sm:$0xff]  ;;  %v1088_v43 = vmul.f32 %v1086_v35, %v6474_v39  ;;  %v6486_v47 = vld [vmem:[#allocation2 + $0x3a] sm:$0xff]  ;;  %v927_v7 = vmul.f32 %v926_v5, %v6465_v34  ;;  %v928_v9 = vmul.f32 %v926_v5, %v6474_v39 }
  0xef   : > { %v1107_v44 = vmul.f32 %v1106_v41, %v6476_v40  ;;  %v1108_v52 = vmul.f32 %v1106_v41, %v6486_v47  ;;  %v947_v10 = vmul.f32 %v946_v8, %v6476_v40  ;;  %v948_v12 = vmul.f32 %v946_v8, %v6486_v47  ;;  %v6568_v56 = vld [vmem:[#allocation2 + $0x38] sm:$0xff] }
  0xf0   : > { %1033 = vrot.lane.b32.xlu1 %v1028_v30, %s6218_s30  ;;  %v1718_v30 = vmul.f32 %v1717_v26, %v6427_v14  ;;  %v1719_v35 = vmul.f32 %v1717_v26, %v6438_v20  ;;  %v1757_v41 = vstv %s5233_s4  ;;  %s6655_s4 = sld [smem:[#allocation7 + $0xf9]] }
  0xf1   : > { %1051 = vrot.lane.b32.xlu0 %v1047_v28, %s6218_s30  ;;  %v6484_v45 = vld [vmem:[#allocation2 + $0x49] sm:$0xff]  ;;  %v6491_v49 = vld [vmem:[#allocation2 + $0x51] sm:$0xff]  ;;  %v1699_v28 = vmul.f32 %v1697_v22, %v6540_v25 }
  0xf2   : > { %v1127_v48 = vmul.f32 %v1126_v46, %v6484_v45  ;;  %v6493_v50 = vld [vmem:[#allocation2 + $0x4a] sm:$0xff]  ;;  %v1128_v53 = vmul.f32 %v1126_v46, %v6491_v49  ;;  %v6500_v55 = vld [vmem:[#allocation2 + $0x52] sm:$0xff]  ;;  %v967_v13 = vmul.f32 %v966_v11, %v6484_v45  ;;  %v968_v16 = vmul.f32 %v966_v11, %v6491_v49 }
  0xf3   : > { %v1147_v54 = vmul.f32 %v1146_v51, %v6493_v50  ;;  %v1148_v57 = vmul.f32 %v1146_v51, %v6500_v55  ;;  %v987_v17 = vmul.f32 %v986_v15, %v6493_v50  ;;  %v988_v23 = vmul.f32 %v986_v15, %v6500_v55  ;;  %v6562_v51 = vld [vmem:[#allocation2 + $0x30] sm:$0xff] }
  0xf4   : > { %1053 = vrot.lane.b32.xlu1 %v1048_v33, %s6218_s30  ;;  %v1737_v33 = vstv %s5231_s28  ;;  %v2243_v11 = vstv %s6584_s6  ;;  %v2850_v15 = vstv %s6590_s8  ;;  %v6611_v22 = vld [vmem:[#allocation2 + $0x50] sm:$0xff]  ;;  %s6645_s28 = sld [smem:[#allocation7 + $0x74]]  ;;  %s6745_s6 = sld [smem:[#allocation7 + $0xf2]] }
  0xf5   : > { %1071 = vrot.lane.b32.xlu0 %v1067_v36, %s6218_s30  ;;  %v1738_v36 = vmul.f32 %v1737_v33, %v6546_v32  ;;  %v2245_v26 = vmul.f32 %v2243_v11, %v6469_v37  ;;  %s6759_s8 = sld [smem:[#allocation7 + $0xc0]] }
  0xf8   : > { %1073 = vrot.lane.b32.xlu1 %v1068_v42, %s6218_s30 }
  0xf9   : > { %1091 = vrot.lane.b32.xlu0 %v1087_v38, %s6218_s30  ;;  %v6552_v38 = vld [vmem:[#allocation2 + $0x20] sm:$0xff] }
  0xfa   : > { %v1739_v42 = vmul.f32 %v1737_v33, %v6552_v38 }
  0xfc   : > { %1093 = vrot.lane.b32.xlu1 %v1088_v43, %s6218_s30  ;;  %v1758_v43 = vmul.f32 %v1757_v41, %v6436_v19 }
  0xfd   : > { %1111 = vrot.lane.b32.xlu0 %v1107_v44, %s6218_s30  ;;  %v2183_v44 = vstv %s5267_s11  ;;  %s6657_s11 = sld [smem:[#allocation7 + $0x56]] }
  0xfe   : > { %v2184_v46 = vmul.f32 %v2183_v44, %v6427_v14 }
 0x100   : > { %1113 = vrot.lane.b32.xlu1 %v1108_v52, %s6218_s30  ;;  %v1777_v52 = vstv %s5235_s17  ;;  %s6678_s17 = sld [smem:[#allocation7 + $0x58]] }
 0x101   : > { %1131 = vrot.lane.b32.xlu0 %v1127_v48, %s6218_s30  ;;  %v1759_v48 = vmul.f32 %v1757_v41, %v6454_v29  ;;  %v1779_v59 = vmul.f32 %v1777_v52, %v6568_v56  ;;  %v1837_v41 = vstv %s6613_s23  ;;  %s6772_s23 = sld [smem:[#allocation7 + $0xe0]] }
 0x104   : > { %1133 = vrot.lane.b32.xlu1 %v1128_v53, %s6218_s30  ;;  %v2185_v53 = vmul.f32 %v2183_v44, %v6438_v20 }
 0x105   : > { %1151 = vrot.lane.b32.xlu0 %v1147_v54, %s6218_s30  ;;  %v1778_v54 = vmul.f32 %v1777_v52, %v6562_v51  ;;  %v2870_v52 = vstv %s6624_s7  ;;  %s6782_s7 = sld [smem:[#allocation7 + $0xd6]] }
 0x108   : > { %1153 = vrot.lane.b32.xlu1 %v1148_v57, %s6218_s30  ;;  %v2203_v57 = vstv %s5269_s10  ;;  %s6688_s10 = sld [smem:[#allocation7 + $0xdd]] }
 0x109   : > { %851 = vrot.lane.b32.xlu0 %v847_v58, %s6218_s30  ;;  %v2204_v58 = vmul.f32 %v2203_v57, %v6440_v21 }
 0x10c   : > { %853 = vrot.lane.b32.xlu1 %v848_v60, %s6218_s30  ;;  %v519_v60 = vstv %s5139_s19  ;;  %s6690_s19 = sld [smem:[#allocation7 + $0x76]] }
 0x10d   : > { %871 = vrot.lane.b32.xlu0 %v867_v61, %s6218_s30  ;;  %v2205_v61 = vmul.f32 %v2203_v57, %v6449_v27  ;;  %v520_v62 = vmul.f32 %v519_v60, %v6534_v18  ;;  %v2871_v57 = vmul.f32 %v2870_v52, %v6427_v14 }
 0x110   : > { %873 = vrot.lane.b32.xlu1 %v868_v63, %s6218_s30  ;;  %v1797_v63 = vstv %s5237_s20  ;;  %s6701_s20 = sld [smem:[#allocation7 + $0xd2]] }
 0x111   : > { %891 = vrot.lane.b32.xlu0 %v887_v0, %s6218_s30  ;;  %v2223_v0 = vstv %s5271_s22  ;;  %v1798_v1 = vmul.f32 %v1797_v63, %v6465_v34  ;;  %v1799_v5 = vmul.f32 %v1797_v63, %v6474_v39  ;;  %v579_v63 = vstv %s6645_s28  ;;  %s6722_s22 = sld [smem:[#allocation7 + $0x78]]  ;;  %s6798_s28 = sld [smem:[#allocation7 + $0xc4]] }
 0x114   : > { %893 = vrot.lane.b32.xlu1 %v888_v2, %s6218_s30  ;;  %v2224_v2 = vmul.f32 %v2223_v0, %v6436_v19 }
 0x115   : > { %911 = vrot.lane.b32.xlu0 %v907_v3, %s6218_s30  ;;  %v521_v3 = vmul.f32 %v519_v60, %v6540_v25 }
 0x118   : > { %913 = vrot.lane.b32.xlu1 %v908_v6, %s6218_s30  ;;  %v539_v6 = vstv %s5141_s27  ;;  %s6732_s27 = sld [smem:[#allocation7 + $0xfd]] }
 0x119   : > { %931 = vrot.lane.b32.xlu0 %v927_v7, %s6218_s30  ;;  %v2225_v7 = vmul.f32 %v2223_v0, %v6454_v29  ;;  %v540_v8 = vmul.f32 %v539_v6, %v6427_v14 }
 0x11c   : > { %933 = vrot.lane.b32.xlu1 %v928_v9, %s6218_s30  ;;  %v6596_v9 = vld [vmem:[#allocation2 + $0x48] sm:$0xff] }
 0x11d   : > { %951 = vrot.lane.b32.xlu0 %v947_v10, %s6218_s30  ;;  %v1817_v10 = vstv %s6582_s29  ;;  %s6734_s29 = sld [smem:[#allocation7 + $0x5a]] }
 0x120   : > { %953 = vrot.lane.b32.xlu1 %v948_v12, %s6218_s30  ;;  %v1818_v12 = vmul.f32 %v1817_v10, %v6596_v9 }
 0x121   : > { %971 = vrot.lane.b32.xlu0 %v967_v13, %s6218_s30  ;;  %v2244_v13 = vmul.f32 %v2243_v11, %v6459_v31 }
 0x124   : > { %973 = vrot.lane.b32.xlu1 %v968_v16, %s6218_s30  ;;  %v2851_v16 = vmul.f32 %v2850_v15, %v6534_v18 }
 0x125   : > { %991 = vrot.lane.b32.xlu0 %v987_v17, %s6218_s30  ;;  %v541_v17 = vmul.f32 %v539_v6, %v6438_v20  ;;  %v2890_v6 = vstv %s6657_s11  ;;  %s6822_s11 = sld [smem:[#allocation7 + $0x5e]] }
 0x126   : > { %v2891_v11 = vmul.f32 %v2890_v6, %v6546_v32 }
 0x128   : > { %993 = vrot.lane.b32.xlu1 %v988_v23, %s6218_s30 }
 0x129   : > { %1702 = vrot.lane.b32.xlu0 %v1698_v24, %s6218_s30  ;;  %v1819_v24 = vmul.f32 %v1817_v10, %v6611_v22 }
 0x12c   : > { %1704 = vrot.lane.b32.xlu1 %v1699_v28, %s6218_s30  ;;  %v559_v28 = vstv %s6605_s9  ;;  %s6768_s9 = sld [smem:[#allocation7 + $0x5c]] }
 0x12d   : > { %1722 = vrot.lane.b32.xlu0 %v1718_v30, %s6218_s30 }
 0x130   : > { %1724 = vrot.lane.b32.xlu1 %v1719_v35, %s6218_s30  ;;  %v2852_v35 = vmul.f32 %v2850_v15, %v6540_v25  ;;  %v581_v15 = vmul.f32 %v579_v63, %v6454_v29 }
 0x131   : > { %1742 = vrot.lane.b32.xlu0 %v1738_v36, %s6218_s30  ;;  %v560_v36 = vmul.f32 %v559_v28, %v6546_v32 }
 0x134   : > { %1744 = vrot.lane.b32.xlu1 %v1739_v42, %s6218_s30  ;;  %v2263_v42 = vstv %s6615_s26  ;;  %s6780_s26 = sld [smem:[#allocation7 + $0x7a]] }
 0x135   : > { %1762 = vrot.lane.b32.xlu0 %v1758_v43, %s6218_s30 }
 0x138   : > { %2188 = vrot.lane.b32.xlu1 %v2184_v46, %s6218_s30  ;;  %v1838_v46 = vmul.f32 %v1837_v41, %v6484_v45 }
 0x139   : > { %1764 = vrot.lane.b32.xlu0 %v1759_v48, %s6218_s30  ;;  %v2264_v48 = vmul.f32 %v2263_v42, %v6465_v34 }
 0x13c   : > { %2190 = vrot.lane.b32.xlu1 %v2185_v53, %s6218_s30 }
 0x13d   : > { %1782 = vrot.lane.b32.xlu0 %v1778_v54, %s6218_s30 }
 0x140   : > { %2208 = vrot.lane.b32.xlu1 %v2204_v58, %s6218_s30  ;;  %v561_v58 = vmul.f32 %v559_v28, %v6552_v38  ;;  %v2892_v28 = vmul.f32 %v2890_v6, %v6552_v38 }
 0x141   : > { %1784 = vrot.lane.b32.xlu0 %v1779_v59, %s6218_s30 }
 0x144   : > { %2210 = vrot.lane.b32.xlu1 %v2205_v61, %s6218_s30  ;;  %v1839_v61 = vmul.f32 %v1837_v41, %v6491_v49  ;;  %v2910_v41 = vstv %s6690_s19  ;;  %s6840_s19 = sld [smem:[#allocation7 + $0x53]] }
 0x145   : > { %524 = vrot.lane.b32.xlu0 %v520_v62, %s6218_s30  ;;  %v2265_v62 = vmul.f32 %v2263_v42, %v6474_v39  ;;  %v2912_v6 = vmul.f32 %v2910_v41, %v6454_v29 }
 0x148   : > { %1802 = vrot.lane.b32.xlu1 %v1798_v1, %s6218_s30 }
 0x149   : > { %2228 = vrot.lane.b32.xlu0 %v2224_v2, %s6218_s30  ;;  %v2872_v2 = vmul.f32 %v2870_v52, %v6438_v20  ;;  %v2911_v52 = vmul.f32 %v2910_v41, %v6436_v19 }
 0x14c   : > { %526 = vrot.lane.b32.xlu1 %v521_v3, %s6218_s30  ;;  %v580_v3 = vmul.f32 %v579_v63, %v6436_v19 }
 0x14d   : > { %1804 = vrot.lane.b32.xlu0 %v1799_v5, %s6218_s30  ;;  %v2283_v5 = vstv %s6655_s4  ;;  %s6809_s4 = sld [smem:[#allocation7 + $0x7c]] }
 0x14e   : > { %v2284_v10 = vmul.f32 %v2283_v5, %v6476_v40 }
 0x150   : > { %2230 = vrot.lane.b32.xlu1 %v2225_v7, %s6218_s30 }
 0x151   : > { %544 = vrot.lane.b32.xlu0 %v540_v8, %s6218_s30 }
 0x154   : > { %1822 = vrot.lane.b32.xlu1 %v1818_v12, %s6218_s30 }
 0x155   : > { %2248 = vrot.lane.b32.xlu0 %v2244_v13, %s6218_s30 }
 0x158   : > { %2855 = vrot.lane.b32.xlu1 %v2851_v16, %s6218_s30  ;;  %v2285_v16 = vmul.f32 %v2283_v5, %v6486_v47 }
 0x159   : > { %546 = vrot.lane.b32.xlu0 %v541_v17, %s6218_s30  ;;  %v599_v17 = vstv %s6678_s17  ;;  %s6824_s17 = sld [smem:[#allocation7 + $0xf6]] }
 0x15a   : > { %v6619_v23 = vpop.permute.xlu0 %1011  ;;  %v601_v63 = vmul.f32 %v599_v17, %v6568_v56 }
 0x15c   : > { %1824 = vrot.lane.b32.xlu1 %v1819_v24, %s6218_s30 }
 0x15d   : > { %2250 = vrot.lane.b32.xlu0 %v2245_v26, %s6218_s30 }
 0x15e   : > { %v6628_v30 = vpop.permute.xlu1 %1013 }
 0x15f   : > { %v6630_v33 = vpop.permute.xlu0 %1031 }
 0x160   : > { %2857 = vrot.lane.b32.xlu1 %v2852_v35, %s6218_s30  ;;  %v600_v35 = vmul.f32 %v599_v17, %v6562_v51 }
 0x161   : > { %564 = vrot.lane.b32.xlu0 %v560_v36, %s6218_s30  ;;  %v2303_v36 = vstv %s6688_s10  ;;  %s6830_s10 = sld [smem:[#allocation7 + $0xe4]] }
 0x162   : > { %v6638_v43 = vpop.permute.xlu1 %1033  ;;  %v2305_v5 = vmul.f32 %v2303_v36, %v6491_v49 }
 0x163   : > { %v6640_v44 = vpop.permute.xlu0 %1051 }
 0x164   : > { %1842 = vrot.lane.b32.xlu1 %v1838_v46, %s6218_s30 }
 0x165   : > { %2268 = vrot.lane.b32.xlu0 %v2264_v48, %s6218_s30  ;;  %v2304_v48 = vmul.f32 %v2303_v36, %v6484_v45 }
 0x166   : > { %v6649_v53 = vpop.permute.xlu1 %1053 }
 0x167   : > { %v6651_v54 = vpop.permute.xlu0 %1071 }
 0x168   : > { %2875 = vrot.lane.b32.xlu1 %v2871_v57, %s6218_s30  ;;  %v3336_v57 = vstv %s6701_s20  ;;  %s6858_s20 = sld [smem:[#allocation7 + $0xc8]] }
 0x169   : > { %566 = vrot.lane.b32.xlu0 %v561_v58, %s6218_s30 }
 0x16a   : > { %v6661_v59 = vpop.permute.xlu1 %1073 }
 0x16b   : > { %v6663_v60 = vpop.permute.xlu0 %1091 }
 0x16c   : > { %1844 = vrot.lane.b32.xlu1 %v1839_v61, %s6218_s30 }
 0x16d   : > { %2270 = vrot.lane.b32.xlu0 %v2265_v62, %s6218_s30  ;;  %v3337_v62 = vmul.f32 %v3336_v57, %v6427_v14 }
 0x16e   : > { %v6670_v0 = vpop.permute.xlu1 %1093 }
 0x16f   : > { %v6672_v1 = vpop.permute.xlu0 %1111 }
 0x170   : > { %2877 = vrot.lane.b32.xlu1 %v2872_v2, %s6218_s30 }
 0x171   : > { %584 = vrot.lane.b32.xlu0 %v580_v3, %s6218_s30 }
 0x172   : > { %v6682_v7 = vpop.permute.xlu1 %1113 }
 0x173   : > { %v6684_v8 = vpop.permute.xlu0 %1131 }
 0x174   : > { %2288 = vrot.lane.b32.xlu1 %v2284_v10, %s6218_s30  ;;  %v619_v10 = vstv %s6722_s22  ;;  %s6868_s22 = sld [smem:[#allocation7 + $0x7e]] }
 0x175   : > { %2895 = vrot.lane.b32.xlu0 %v2891_v11, %s6218_s30  ;;  %v620_v17 = vmul.f32 %v619_v10, %v6465_v34 }
 0x176   : > { %v6694_v12 = vpop.permute.xlu1 %1133 }
 0x177   : > { %v6696_v13 = vpop.permute.xlu0 %1151 }
 0x178   : > { %586 = vrot.lane.b32.xlu1 %v581_v15, %s6218_s30 }
 0x179   : > { %2290 = vrot.lane.b32.xlu0 %v2285_v16, %s6218_s30  ;;  %v3338_v16 = vmul.f32 %v3336_v57, %v6438_v20  ;;  %v3356_v57 = vstv %s6745_s6  ;;  %s6888_s6 = sld [smem:[#allocation7 + $0xe8]] }
 0x17a   : > { %v6705_v24 = vpop.permute.xlu1 %1153 }
 0x17b   : > { %v6707_v26 = vpop.permute.xlu0 %851 }
 0x17c   : > { %2897 = vrot.lane.b32.xlu1 %v2892_v28, %s6218_s30  ;;  %v2323_v28 = vstv %s6732_s27  ;;  %s6880_s27 = sld [smem:[#allocation7 + $0xda]] }
 0x17d   : > { %604 = vrot.lane.b32.xlu0 %v600_v35, %s6218_s30  ;;  %v2930_v35 = vstv %s6734_s29  ;;  %s6882_s29 = sld [smem:[#allocation7 + $0x73]] }
 0x17e   : > { %v6715_v42 = vpop.permute.xlu1 %853  ;;  %v2932_v4 = vmul.f32 %v2930_v35, %v6568_v56 }
 0x17f   : > { %v6717_v46 = vpop.permute.xlu0 %871 }
 0x180   : > { %2308 = vrot.lane.b32.xlu1 %v2304_v48, %s6218_s30  ;;  %v2324_v48 = vmul.f32 %v2323_v28, %v6493_v50 }
 0x181   : > { %2915 = vrot.lane.b32.xlu0 %v2911_v52, %s6218_s30  ;;  %v2931_v52 = vmul.f32 %v2930_v35, %v6562_v51 }
 0x182   : > { %v6726_v58 = vpop.permute.xlu1 %873 }
 0x183   : > { %v6728_v61 = vpop.permute.xlu0 %891 }
 0x184   : > { %3341 = vrot.lane.b32.xlu1 %v3337_v62, %s6218_s30 }
 0x185   : > { %606 = vrot.lane.b32.xlu0 %v601_v63, %s6218_s30 }
 0x186   : > { %v6738_v2 = vpop.permute.xlu1 %893 }
 0x187   : > { %v6740_v3 = vpop.permute.xlu0 %911 }
 0x188   : > { %9269 = vst [vmem:[#allocation16_spill] sm:$0xff] %v6740_v3  ;;  %2310 = vrot.lane.b32.xlu1 %v2305_v5, %s6218_s30  ;;  %v3357_v5 = vmul.f32 %v3356_v57, %v6440_v21  ;;  %v4003_v3 = vstv %s6840_s19  ;;  %s5211_s19 = sld [smem:[#allocation7 + $0x11]] }
 0x189   : > { %2917 = vrot.lane.b32.xlu0 %v2912_v6, %s6218_s30  ;;  %v621_v6 = vmul.f32 %v619_v10, %v6474_v39  ;;  %v639_v10 = vstv %s6768_s9  ;;  %s6916_s9 = sld [smem:[#allocation7 + $0xcc]] }
 0x18a   : > { %v6749_v11 = vpop.permute.xlu1 %913  ;;  %v640_v35 = vmul.f32 %v639_v10, %v6596_v9 }
 0x18b   : > { %9270 = vst [vmem:[#allocation17_spill] sm:$0xff] %v6749_v11  ;;  %v6751_v15 = vpop.permute.xlu0 %931 }
 0x18c   : > { %9271 = vst [vmem:[#allocation18_spill] sm:$0xff] %v6751_v15  ;;  %3343 = vrot.lane.b32.xlu1 %v3338_v16, %s6218_s30  ;;  %v1000_v16 = vstv %s6759_s8  ;;  %s6910_s8 = sld [smem:[#allocation7 + $0xfa]] }
 0x18d   : > { %624 = vrot.lane.b32.xlu0 %v620_v17, %s6218_s30 }
 0x18e   : > { %v6761_v36 = vpop.permute.xlu1 %933 }
 0x18f   : > { %9272 = vst [vmem:[#allocation19_spill] sm:$0xff] %v6761_v36  ;;  %v6763_v41 = vpop.permute.xlu0 %951 }
 0x190   : > { %9273 = vst [vmem:[#allocation20_spill] sm:$0xff] %v6763_v41  ;;  %2328 = vrot.lane.b32.xlu1 %v2324_v48, %s6218_s30  ;;  %v3376_v41 = vstv %s6782_s7  ;;  %s6944_s7 = sld [smem:[#allocation7 + $0xec]] }
 0x191   : > { %2935 = vrot.lane.b32.xlu0 %v2931_v52, %s6218_s30  ;;  %v2325_v52 = vmul.f32 %v2323_v28, %v6500_v55  ;;  %v3358_v28 = vmul.f32 %v3356_v57, %v6449_v27  ;;  %v3377_v15 = vmul.f32 %v3376_v41, %v6436_v19 }
 0x192   : > { %v6774_v62 = vpop.permute.xlu1 %953 }
 0x193   : > { %9274 = vst [vmem:[#allocation21_spill] sm:$0xff] %v6774_v62  ;;  %v6776_v63 = vpop.permute.xlu0 %971 }
 0x194   : > { %9275 = vst [vmem:[#allocation22_spill] sm:$0xff] %v6776_v63  ;;  %3361 = vrot.lane.b32.xlu1 %v3357_v5, %s6218_s30  ;;  %v1001_v63 = vmul.f32 %v1000_v16, %v6427_v14  ;;  %v1020_v5 = vstv %s6772_s23  ;;  %s6925_s23 = sld [smem:[#allocation7 + $0x57]] }
 0x195   : > { %626 = vrot.lane.b32.xlu0 %v621_v6, %s6218_s30 }
 0x196   : > { %v6787_v17 = vpop.permute.xlu1 %973  ;;  %v1017_v6 = vadd.f32 %v6619_v23, %v1001_v63 }
 0x197   : > { %9276 = vst [vmem:[#allocation23_spill] sm:$0xff] %v6787_v17  ;;  %v6789_v48 = vpop.permute.xlu0 %991 }
 0x198   : > { %9277 = vst [vmem:[#allocation24_spill] sm:$0xff] %v6789_v48  ;;  %2330 = vrot.lane.b32.xlu1 %v2325_v52, %s6218_s30  ;;  %v2950_v48 = vstv %s6780_s26  ;;  %v1021_v52 = vmul.f32 %v1020_v5, %v6440_v21  ;;  %v1022_v21 = vmul.f32 %v1020_v5, %v6449_v27  ;;  %v659_v5 = vstv %s6809_s4  ;;  %s6938_s26 = sld [smem:[#allocation7 + $0xde]]  ;;  %s6956_s4 = sld [smem:[#allocation7 + $0x77]] }
 0x199   : > { %2937 = vrot.lane.b32.xlu0 %v2932_v4, %s6218_s30  ;;  %v1002_v4 = vmul.f32 %v1000_v16, %v6438_v20  ;;  %v2951_v36 = vmul.f32 %v2950_v48, %v6465_v34  ;;  %v2952_v27 = vmul.f32 %v2950_v48, %v6474_v39  ;;  %v3378_v48 = vmul.f32 %v3376_v41, %v6454_v29 }
 0x19a   : > { %v6801_v17 = vpop.permute.xlu1 %993  ;;  %v1023_v63 = vadd.f32 %v1021_v52, %v1017_v6 }
 0x19b   : > { %9278 = vst [vmem:[#allocation25_spill] sm:$0xff] %v6801_v17  ;;  %v6803_v62 = vpop.permute.xlu0 %1702  ;;  %v1018_v23 = vadd.f32 %v6628_v30, %v1002_v4  ;;  %v1040_v30 = vstv %s6798_s28  ;;  %v641_v4 = vmul.f32 %v639_v10, %v6611_v22  ;;  %v660_v10 = vmul.f32 %v659_v5, %v6484_v45  ;;  %s6946_s28 = sld [smem:[#allocation7 + $0xd3]] }
 0x19c   : > { %3363 = vrot.lane.b32.xlu1 %v3358_v28, %s6218_s30  ;;  %v1037_v16 = vadd.f32 %v6630_v33, %v1023_v63  ;;  %v2970_v63 = vstv %s6822_s11  ;;  %v1042_v11 = vmul.f32 %v1040_v30, %v6454_v29  ;;  %s7001_s11 = sld [smem:[#allocation7 + $0xfe]] }
 0x19d   : > { %644 = vrot.lane.b32.xlu0 %v640_v35, %s6218_s30  ;;  %v1024_v6 = vadd.f32 %v1022_v21, %v1018_v23  ;;  %v3396_v21 = vstv %s6824_s17  ;;  %v2971_v41 = vmul.f32 %v2970_v63, %v6596_v9  ;;  %s7020_s17 = sld [smem:[#allocation7 + $0x5b]] }
 0x19e   : > { %v6816_v17 = vpop.permute.xlu1 %1704 }
 0x19f   : > { %v6818_v57 = vpop.permute.xlu0 %1722  ;;  %v1038_v33 = vadd.f32 %v6638_v43, %v1024_v6 }
 0x1a0   : > { %2955 = vrot.lane.b32.xlu1 %v2951_v36, %s6218_s30 }
 0x1a1   : > { %3381 = vrot.lane.b32.xlu0 %v3377_v15, %s6218_s30  ;;  %v1041_v15 = vmul.f32 %v1040_v30, %v6436_v19 }
 0x1a2   : > { %v6833_v28 = vpop.permute.xlu1 %1724 }
 0x1a3   : > { %v6835_v35 = vpop.permute.xlu0 %1742  ;;  %v1043_v36 = vadd.f32 %v1041_v15, %v1037_v16  ;;  %v1044_v16 = vadd.f32 %v1042_v11, %v1038_v33  ;;  %v3397_v15 = vmul.f32 %v3396_v21, %v6459_v31 }
 0x1a4   : > { %646 = vrot.lane.b32.xlu1 %v641_v4, %s6218_s30  ;;  %v1060_v4 = vstv %s6830_s10  ;;  %s7022_s10 = sld [smem:[#allocation7 + $0xf3]] }
 0x1a5   : > { %2957 = vrot.lane.b32.xlu0 %v2952_v27, %s6218_s30  ;;  %v1057_v43 = vadd.f32 %v6640_v44, %v1043_v36  ;;  %v1061_v30 = vmul.f32 %v1060_v4, %v6459_v31  ;;  %v1058_v44 = vadd.f32 %v6649_v53, %v1044_v16  ;;  %v1062_v31 = vmul.f32 %v1060_v4, %v6469_v37 }
 0x1a6   : > { %v6846_v52 = vpop.permute.xlu1 %1744  ;;  %v1080_v53 = vstv %s6858_s20  ;;  %v3398_v4 = vmul.f32 %v3396_v21, %v6469_v37  ;;  %v3416_v37 = vstv %s6880_s27  ;;  %v4023_v21 = vstv %s6882_s29  ;;  %s7077_s20 = sld [smem:[#allocation7 + $0x7b]]  ;;  %s7100_s27 = sld [smem:[#allocation7 + $0x31]] }
 0x1a7   : > { %v6848_v23 = vpop.permute.xlu0 %1762  ;;  %v1063_v11 = vadd.f32 %v1061_v30, %v1057_v43  ;;  %v1064_v16 = vadd.f32 %v1062_v31, %v1058_v44  ;;  %v2990_v30 = vstv %s6868_s22  ;;  %v4005_v31 = vmul.f32 %v4003_v3, %v6540_v25  ;;  %s7087_s22 = sld [smem:[#allocation7 + $0xd7]] }
 0x1a8   : > { %3383 = vrot.lane.b32.xlu1 %v3378_v48, %s6218_s30  ;;  %v4004_v48 = vmul.f32 %v4003_v3, %v6534_v18  ;;  %s7113_s29 = sld [smem:[#allocation7 + $0x5f]] }
 0x1a9   : > { %664 = vrot.lane.b32.xlu0 %v660_v10, %s6218_s30  ;;  %v661_v10 = vmul.f32 %v659_v5, %v6491_v49  ;;  %v1077_v43 = vadd.f32 %v6651_v54, %v1063_v11  ;;  %v1078_v54 = vadd.f32 %v6661_v59, %v1064_v16  ;;  %v1100_v59 = vstv %s6888_s6  ;;  %s7128_s6 = sld [smem:[#allocation7 + $0xf7]] }
 0x1aa   : > { %v6861_v6 = vpop.permute.xlu1 %2188 }
 0x1ab   : > { %v6863_v27 = vpop.permute.xlu0 %1764 }
 0x1ac   : > { %2975 = vrot.lane.b32.xlu1 %v2971_v41, %s6218_s30 }
 0x1ad   : > { %3401 = vrot.lane.b32.xlu0 %v3397_v15, %s6218_s30  ;;  %v2972_v15 = vmul.f32 %v2970_v63, %v6611_v22  ;;  %v2991_v63 = vmul.f32 %v2990_v30, %v6484_v45 }
 0x1ae   : > { %v6874_v33 = vpop.permute.xlu1 %2190 }
 0x1af   : > { %v6876_v36 = vpop.permute.xlu0 %1782 }
 0x1b0   : > { %4008 = vrot.lane.b32.xlu1 %v4004_v48, %s6218_s30  ;;  %v1081_v48 = vmul.f32 %v1080_v53, %v6465_v34 }
 0x1b1   : > { %666 = vrot.lane.b32.xlu0 %v661_v10, %s6218_s30 }
 0x1b2   : > { %v6891_v41 = vpop.permute.xlu1 %2208  ;;  %v1083_v44 = vadd.f32 %v1081_v48, %v1077_v43  ;;  %v4024_v48 = vmul.f32 %v4023_v21, %v6427_v14 }
 0x1b3   : > { %9279 = vst [vmem:[#allocation26_spill] sm:$0xff] %v6891_v41  ;;  %v6893_v5 = vpop.permute.xlu0 %1784  ;;  %v1082_v41 = vmul.f32 %v1080_v53, %v6474_v39  ;;  %v1101_v53 = vmul.f32 %v1100_v59, %v6476_v40 }
 0x1b4   : > { %2977 = vrot.lane.b32.xlu1 %v2972_v15, %s6218_s30  ;;  %v1097_v43 = vadd.f32 %v6663_v60, %v1083_v44 }
 0x1b5   : > { %3403 = vrot.lane.b32.xlu0 %v3398_v4, %s6218_s30  ;;  %v1084_v16 = vadd.f32 %v1082_v41, %v1078_v54  ;;  %v3417_v4 = vmul.f32 %v3416_v37, %v6465_v34  ;;  %v2992_v34 = vmul.f32 %v2990_v30, %v6491_v49 }
 0x1b6   : > { %v6902_v11 = vpop.permute.xlu1 %2210  ;;  %v1103_v41 = vadd.f32 %v1101_v53, %v1097_v43 }
 0x1b7   : > { %v6904_v10 = vpop.permute.xlu0 %524  ;;  %v1098_v60 = vadd.f32 %v6670_v0, %v1084_v16  ;;  %v1120_v0 = vstv %s6916_s9  ;;  %s7145_s9 = sld [smem:[#allocation7 + $0x15]] }
 0x1b8   : > { %9280 = vst [vmem:[#allocation27_spill] sm:$0xff] %v6904_v10  ;;  %4010 = vrot.lane.b32.xlu1 %v4005_v31, %s6218_s30  ;;  %v3418_v31 = vmul.f32 %v3416_v37, %v6474_v39  ;;  %v1102_v10 = vmul.f32 %v1100_v59, %v6486_v47  ;;  %v1117_v43 = vadd.f32 %v6672_v1, %v1103_v41  ;;  %v303_v41 = vlaneseq }
 0x1b9   : > { %2995 = vrot.lane.b32.xlu0 %v2991_v63, %s6218_s30  ;;  %v3436_v63 = vstv %s6910_s8  ;;  %v4025_v37 = vmul.f32 %v4023_v21, %v6438_v20  ;;  %v3456_v21 = vstv %s6938_s26  ;;  %s7132_s8 = sld [smem:[#allocation7 + $0x41]]  ;;  %s7158_s26 = sld [smem:[#allocation7 + $0x7f]] }
 0x1ba   : > { %v6919_v3 = vpop.permute.xlu1 %1802  ;;  %v1104_v30 = vadd.f32 %v1102_v10, %v1098_v60  ;;  %v3437_v59 = vmul.f32 %v3436_v63, %v6476_v40  ;;  %v3438_v40 = vmul.f32 %v3436_v63, %v6486_v47  ;;  %v3457_v63 = vmul.f32 %v3456_v21, %v6484_v45 }
 0x1bb   : > { %v6921_v15 = vpop.permute.xlu0 %2228 }
 0x1bc   : > { %3421 = vrot.lane.b32.xlu1 %v3417_v4, %s6218_s30  ;;  %v4043_v4 = vstv %s6925_s23  ;;  %v1118_v1 = vadd.f32 %v6682_v7, %v1104_v30  ;;  %v4489_v7 = vstv %s6946_s28  ;;  %s7149_s23 = sld [smem:[#allocation7 + $0x61]]  ;;  %s7178_s28 = sld [smem:[#allocation7 + $0x45]] }
 0x1bd   : > { %4028 = vrot.lane.b32.xlu0 %v4024_v48, %s6218_s30  ;;  %v1121_v48 = vmul.f32 %v1120_v0, %v6484_v45  ;;  %v4044_v20 = vmul.f32 %v4043_v4, %v6546_v32  ;;  %v4045_v47 = vmul.f32 %v4043_v4, %v6552_v38 }
 0x1be   : > { %v6931_v54 = vpop.permute.xlu1 %526 }
 0x1bf   : > { %9281 = vst [vmem:[#allocation28_spill] sm:$0xff] %v6931_v54  ;;  %v6933_v44 = vpop.permute.xlu0 %1804  ;;  %v1123_v10 = vadd.f32 %v1121_v48, %v1117_v43  ;;  %v6974_v43 = vshrl.u32 %v303_v41, 7 }
 0x1c0   : > { %2997 = vrot.lane.b32.xlu1 %v2992_v34, %s6218_s30  ;;  %v1122_v34 = vmul.f32 %v1120_v0, %v6491_v49  ;;  %v4063_v0 = vstv %s6956_s4  ;;  %s7190_s4 = sld [smem:[#allocation7 + $0x35]] }
 0x1c1   : > { %3423 = vrot.lane.b32.xlu0 %v3418_v31, %s6218_s30  ;;  %v1140_v31 = vstv %s6944_s7  ;;  %9283 = vst [vmem:[#allocation30_spill] sm:$0xff] %v6974_v43  ;;  %v1137_v30 = vadd.f32 %v6684_v8, %v1123_v10  ;;  %s7172_s7 = sld [smem:[#allocation7 + $0xdb]] }
 0x1c2   : > { %v6949_v16 = vpop.permute.xlu1 %2230  ;;  %v1141_v54 = vmul.f32 %v1140_v31, %v6493_v50 }
 0x1c3   : > { %v6951_v39 = vpop.permute.xlu0 %544 }
 0x1c4   : > { %9282 = vst [vmem:[#allocation29_spill] sm:$0xff] %v6951_v39  ;;  %4030 = vrot.lane.b32.xlu1 %v4025_v37, %s6218_s30  ;;  %v1124_v37 = vadd.f32 %v1122_v34, %v1118_v1  ;;  %v308_v39 = vmul.u32 2, %v6974_v43  ;;  %v1143_v45 = vadd.f32 %v1141_v54, %v1137_v30  ;;  %v3458_v30 = vmul.f32 %v3456_v21, %v6491_v49 }
 0x1c5   : > { %3441 = vrot.lane.b32.xlu0 %v3437_v59, %s6218_s30 }
 0x1c6   : > { %v6962_v53 = vpop.permute.xlu1 %1822  ;;  %v316_v1 = vadd.s32 1, %v308_v39  ;;  %v1138_v4 = vadd.f32 %v6694_v12, %v1124_v37  ;;  %v4065_v37 = vmul.f32 %v4063_v0, %v6454_v29 }
 0x1c7   : > { %v6964_v60 = vpop.permute.xlu0 %2248 }
 0x1c8   : > { %4048 = vrot.lane.b32.xlu1 %v4044_v20, %s6218_s30  ;;  %v6985_v20 = vadd.s32 8, %v6974_v43  ;;  %v4490_v43 = vmul.f32 %v4489_v7, %v6427_v14 }
 0x1c9   : > { %3443 = vrot.lane.b32.xlu0 %v3438_v40, %s6218_s30  ;;  %v6987_v40 = vand.u32 127, %v303_v41  ;;  %v4064_v41 = vmul.f32 %v4063_v0, %v6436_v19  ;;  %v1157_v19 = vadd.f32 %v6696_v13, %v1143_v45  ;;  %v9293_v13 = vmov 0 }
 0x1ca   : > { %v6977_v59 = vpop.permute.xlu1 %2855  ;;  %9286 = vst [vmem:[#allocation33_spill] sm:$0xff] %v6985_v20  ;;  %v309_v8 = vmul.u32 2, %v6985_v20 }
 0x1cb   : > { %9284 = vst [vmem:[#allocation31_spill] sm:$0xff] %v6977_v59  ;;  %v6979_v48 = vpop.permute.xlu0 %546  ;;  %9287 = vst [vmem:[#allocation34_spill] sm:$0xff] %v6987_v40  ;;  %vm318_vm3 = vcmp.eq.s32.totalorder %v6987_v40, %v316_v1  ;;  %vm310_vm4 = vcmp.eq.s32.totalorder %v6987_v40, %v308_v39  ;;  %v9221_v39 = vmov 1.0|1.0   ;;  %v4083_v1 = vstv %s7020_s17  ;;  %s7211_s17 = sld [smem:[#allocation7 + $0x80]] }
 0x1cc   : > { %9285 = vst [vmem:[#allocation32_spill] sm:$0xff] %v6979_v48  ;;  %4050 = vrot.lane.b32.xlu1 %v4045_v47, %s6218_s30  ;;  %v317_v59 = vadd.s32 1, %v309_v8  ;;  %v1142_v47 = vmul.f32 %v1140_v31, %v6500_v55  ;;  %vm311_vm5 = vcmp.eq.s32.totalorder %v6987_v40, %v309_v8  ;;  %v9290_v31 = vmov 0  ;;  %v7061_v8 = vld [vmem:[#allocation2 + $0x9] sm:$0xff] }
 0x1cd   : > { %3461 = vrot.lane.b32.xlu0 %v3457_v63, %s6218_s30  ;;  %vm7027_vm8 = vmpackc.low %vm311_vm5, %vm310_vm4  ;;  %v4491_v29 = vmul.f32 %v7061_v8, %v4489_v7 }
 0x1ce   : > { %v6995_v10 = vpop.permute.xlu1 %1824  ;;  %vm319_vm6 = vcmp.eq.s32.totalorder %v6987_v40, %v317_v59  ;;  %v1144_v14 = vadd.f32 %v1142_v47, %v1138_v4  ;;  %v9294_v13 = vsel %vm7027_vm8, 4294967295, %v9293_v13  ;;  %v3476_v59 = vstv %s7001_s11  ;;  %s7206_s11 = sld [smem:[#allocation7 + $0x91]] }
 0x1cf   : > { %v6997_v34 = vpop.permute.xlu0 %2250  ;;  %vm7016_vm7 = vmpackc.low %vm319_vm6, %vm318_vm3  ;;  %9295 = vst [vmem:[#allocation38_spill] sm:$0xff] %v9294_v13  ;;  %v3477_v0 = vmul.f32 %v3476_v59, %v6493_v50  ;;  %v4509_v4 = vstv %s7022_s10  ;;  %v4084_v47 = vmul.f32 %v4083_v1, %v6562_v51  ;;  %v1537_v51 = vstv %s5211_s19  ;;  %s7214_s10 = sld [smem:[#allocation7 + $0x65]]  ;;  %s7226_s19 = sld [smem:[#allocation7 + $0xfb]] }
 0x1d0   : > { %4068 = vrot.lane.b32.xlu1 %v4064_v41, %s6218_s30  ;;  %v9291_v31 = vsel %vm7016_vm7, 4294967295, %v9290_v31  ;;  %5809 = vmatprep.subr.msk.bf16.mxu1 %vm7016_vm7, %v9221_v39  ;;  %v1158_v49 = vadd.f32 %v6705_v24, %v1144_v14  ;;  %v1557_v40 = vstv %s7100_s27  ;;  %s7252_s27 = sld [smem:[#allocation7 + $0x49]] }
 0x1d1   : > { %4494 = vrot.lane.b32.xlu0 %v4490_v43, %s6218_s30  ;;  %9292 = vst [vmem:[#allocation37_spill] sm:$0xff] %v9291_v31  ;;  %5801 = vmatprep.subr.msk.bf16.mxu0 %vm7016_vm7, %v9221_v39  ;;  %v7124_v31 = vld [vmem:[#allocation2 + $0x39] sm:$0xff] }
 0x1d2   : > { %v7011_v12 = vpop.permute.xlu1 %2857  ;;  %5811 = vmatpush3.bf16.msk.msra.mxu1 %vm7016_vm7, %v9221_v39  ;;  %5803 = vmatpush3.bf16.msk.msra.mxu0 %vm7016_vm7, %v9221_v39 }
 0x1d3   : > { %9288 = vst [vmem:[#allocation35_spill] sm:$0xff] %v7011_v12  ;;  %v7013_v54 = vpop.permute.xlu0 %564  ;;  %5813 = vmatprep.subr.msk.bf16.mxu1 %vm7027_vm8, %v9221_v39  ;;  %5805 = vmatprep.subr.msk.bf16.mxu0 %vm7027_vm8, %v9221_v39  ;;  %v7121_v39 = vld [vmem:[#allocation2 + $0x19] sm:$0xff] }
 0x1d4   : > { %9289 = vst [vmem:[#allocation36_spill] sm:$0xff] %v7013_v54  ;;  %3463 = vrot.lane.b32.xlu1 %v3458_v30, %s6218_s30  ;;  %v3478_v30 = vmul.f32 %v3476_v59, %v6500_v55  ;;  %v1538_v55 = vmul.f32 %v1537_v51, %v6534_v18  ;;  %v4103_v59 = vstv %s7077_s20  ;;  %s7233_s20 = sld [smem:[#allocation7 + $0xa0]] }
 0x1d5   : > { %1161 = vrot.lane.b32.xlu0 %v1157_v19, %s6218_s30  ;;  %v7074_v19 = vld [vmem:[#allocation2 + $0x2] sm:$0xff]  ;;  %v4105_v20 = vmul.f32 %v7124_v31, %v4103_v59  ;;  %v4589_v54 = vstv %s7226_s19  ;;  %s7393_s19 = sld [smem:[#allocation7 + $0xa8]] }
 0x1d6   : > { %v7043_v21 = vpop.permute.xlu1 %1842  ;;  %v4510_v14 = vmul.f32 %v7074_v19, %v4509_v4 }
 0x1d7   : > { %v7045_v43 = vpop.permute.xlu0 %2268 }
 0x1d8   : > { %1163 = vrot.lane.b32.xlu1 %v1158_v49, %s6218_s30  ;;  %v4085_v49 = vmul.f32 %v4083_v1, %v6568_v56 }
 0x1d9   : > { %4070 = vrot.lane.b32.xlu0 %v4065_v37, %s6218_s30 }
 0x1da   : > { %v7057_v24 = vpop.permute.xlu1 %2875 }
 0x1db   : > { %9296 = vst [vmem:[#allocation39_spill] sm:$0xff] %v7057_v24  ;;  %v7059_v63 = vpop.permute.xlu0 %566  ;;  %v4549_v24 = vstv %s7128_s6  ;;  %s7269_s6 = sld [smem:[#allocation7 + $0x84]] }
 0x1dc   : > { %9297 = vst [vmem:[#allocation40_spill] sm:$0xff] %v7059_v63  ;;  %4496 = vrot.lane.b32.xlu1 %v4491_v29, %s6218_s30  ;;  %v7185_v63 = vld [vmem:[#allocation2 + $0x22] sm:$0xff] }
 0x1dd   : > { %3481 = vrot.lane.b32.xlu0 %v3477_v0, %s6218_s30  ;;  %v7095_v0 = vld [vmem:[#allocation2 + $0xa] sm:$0xff] }
 0x1de   : > { %v7069_v45 = vpop.permute.xlu1 %1844 }
 0x1df   : > { %v7071_v41 = vpop.permute.xlu0 %2270 }
 0x1e0   : > { %4088 = vrot.lane.b32.xlu1 %v4084_v47, %s6218_s30  ;;  %v4511_v47 = vmul.f32 %v7095_v0, %v4509_v4 }
 0x1e1   : > { %4514 = vrot.lane.b32.xlu0 %v4510_v14, %s6218_s30  ;;  %v1539_v14 = vmul.f32 %v1537_v51, %v6540_v25 }
 0x1e2   : > { %v7081_v50 = vpop.permute.xlu1 %2877 }
 0x1e3   : > { %9298 = vst [vmem:[#allocation41_spill] sm:$0xff] %v7081_v50  ;;  %v7083_v7 = vpop.permute.xlu0 %584 }
 0x1e4   : > { %9299 = vst [vmem:[#allocation42_spill] sm:$0xff] %v7083_v7  ;;  %3483 = vrot.lane.b32.xlu1 %v3478_v30, %s6218_s30  ;;  %v7109_v30 = vld [vmem:[#allocation2 + $0x31] sm:$0xff] }
 0x1e5   : > { %4090 = vrot.lane.b32.xlu0 %v4085_v49, %s6218_s30  ;;  %v4104_v4 = vmul.f32 %v7109_v30, %v4103_v59  ;;  %v4529_v49 = vstv %s7087_s22  ;;  %v7141_v59 = vld [vmem:[#allocation2 + $0x1] sm:$0xff]  ;;  %s7243_s22 = sld [smem:[#allocation7 + $0x19]] }
 0x1e6   : > { %v7091_v37 = vpop.permute.xlu1 %2288  ;;  %v4530_v51 = vmul.f32 %v7121_v39, %v4529_v49  ;;  %v1558_v50 = vmul.f32 %v7141_v59, %v1557_v40 }
 0x1e7   : > { %v7093_v29 = vpop.permute.xlu0 %2895 }
 0x1e8   : > { %9300 = vst [vmem:[#allocation43_spill] sm:$0xff] %v7093_v29  ;;  %4516 = vrot.lane.b32.xlu1 %v4511_v47, %s6218_s30 }
 0x1e9   : > { %1542 = vrot.lane.b32.xlu0 %v1538_v55, %s6218_s30 }
 0x1ea   : > { %v7104_v56 = vpop.permute.xlu1 %586 }
 0x1eb   : > { %9301 = vst [vmem:[#allocation44_spill] sm:$0xff] %v7104_v56  ;;  %v7106_v1 = vpop.permute.xlu0 %2290  ;;  %v1617_v48 = vstv %s7243_s22  ;;  %s7409_s22 = sld [smem:[#allocation7 + $0xc1]] }
 0x1ec   : > { %1544 = vrot.lane.b32.xlu1 %v1539_v14, %s6218_s30 }
 0x1ed   : > { %4108 = vrot.lane.b32.xlu0 %v4104_v4, %s6218_s30 }
 0x1ee   : > { %v7117_v47 = vpop.permute.xlu1 %2897 }
 0x1ef   : > { %9302 = vst [vmem:[#allocation45_spill] sm:$0xff] %v7117_v47  ;;  %v7119_v55 = vpop.permute.xlu0 %604  ;;  %v7138_v47 = vld [vmem:[#allocation2 + $0x21] sm:$0xff] }
 0x1f0   : > { %9303 = vst [vmem:[#allocation46_spill] sm:$0xff] %v7119_v55  ;;  %4534 = vrot.lane.b32.xlu1 %v4530_v51, %s6218_s30  ;;  %v4531_v29 = vmul.f32 %v7138_v47, %v4529_v49  ;;  %v4123_v55 = vstv %s7113_s29  ;;  %v1559_v49 = vmul.f32 %v7061_v8, %v1557_v40  ;;  %s7254_s29 = sld [smem:[#allocation7 + $0xb1]] }
 0x1f1   : > { %4110 = vrot.lane.b32.xlu0 %v4105_v20, %s6218_s30 }
 0x1f2   : > { %v7134_v14 = vpop.permute.xlu1 %2308 }
 0x1f3   : > { %v7136_v4 = vpop.permute.xlu0 %2915 }
 0x1f4   : > { %9304 = vst [vmem:[#allocation47_spill] sm:$0xff] %v7136_v4  ;;  %4536 = vrot.lane.b32.xlu1 %v4531_v29, %s6218_s30  ;;  %v4124_v4 = vmul.f32 %v4123_v55, %v6596_v9  ;;  %v4125_v9 = vmul.f32 %v4123_v55, %v6611_v22  ;;  %v4551_v22 = vmul.f32 %v7185_v63, %v4549_v24  ;;  %v4143_v55 = vstv %s7158_s26  ;;  %s7306_s26 = sld [smem:[#allocation7 + $0xa4]] }
 0x1f5   : > { %1562 = vrot.lane.b32.xlu0 %v1558_v50, %s6218_s30  ;;  %v1691_v50 = vstv %s7132_s8  ;;  %s7271_s8 = sld [smem:[#allocation7 + $0x69]] }
 0x1f6   : > { %v7151_v20 = vpop.permute.xlu1 %3341  ;;  %v1692_v12 = vmul.f32 %v1691_v50, %v6534_v18 }
 0x1f7   : > { %9305 = vst [vmem:[#allocation48_spill] sm:$0xff] %v7151_v20  ;;  %v7153_v51 = vpop.permute.xlu0 %606  ;;  %v7167_v20 = vld [vmem:[#allocation2 + $0x1a] sm:$0xff] }
 0x1f8   : > { %9306 = vst [vmem:[#allocation49_spill] sm:$0xff] %v7153_v51  ;;  %1564 = vrot.lane.b32.xlu1 %v1559_v49, %s6218_s30  ;;  %v4550_v40 = vmul.f32 %v7167_v20, %v4549_v24  ;;  %v1577_v51 = vstv %s7145_s9  ;;  %v1708_v49 = vadd.f32 %v6803_v62, %v1692_v12  ;;  %s7284_s9 = sld [smem:[#allocation7 + $0xdf]] }
 0x1f9   : > { %4128 = vrot.lane.b32.xlu0 %v4124_v4, %s6218_s30  ;;  %v1711_v4 = vstv %s7149_s23  ;;  %v1578_v18 = vmul.f32 %v1577_v51, %v6546_v32  ;;  %v1579_v32 = vmul.f32 %v1577_v51, %v6552_v38  ;;  %s7304_s23 = sld [smem:[#allocation7 + $0x10]] }
 0x1fa   : > { %v7163_v29 = vpop.permute.xlu1 %2310 }
 0x1fb   : > { %9307 = vst [vmem:[#allocation50_spill] sm:$0xff] %v7163_v29  ;;  %v7165_v56 = vpop.permute.xlu0 %2917 }
 0x1fc   : > { %9308 = vst [vmem:[#allocation51_spill] sm:$0xff] %v7165_v56  ;;  %4554 = vrot.lane.b32.xlu1 %v4550_v40, %s6218_s30  ;;  %v1693_v40 = vmul.f32 %v1691_v50, %v6540_v25  ;;  %v4569_v50 = vstv %s7172_s7  ;;  %s7314_s7 = sld [smem:[#allocation7 + $0x4d]] }
 0x1fd   : > { %4130 = vrot.lane.b32.xlu0 %v4125_v9, %s6218_s30  ;;  %v1712_v9 = vmul.f32 %v7141_v59, %v1711_v4 }
 0x1fe   : > { %v7181_v56 = vpop.permute.xlu1 %3343  ;;  %v1709_v62 = vadd.f32 %v6816_v17, %v1693_v40  ;;  %v1731_v17 = vstv %s7178_s28  ;;  %v4570_v40 = vmul.f32 %v7109_v30, %v4569_v50  ;;  %s7317_s28 = sld [smem:[#allocation7 + $0x39]] }
 0x1ff   : > { %9309 = vst [vmem:[#allocation52_spill] sm:$0xff] %v7181_v56  ;;  %v7183_v7 = vpop.permute.xlu0 %624  ;;  %v1714_v12 = vadd.f32 %v1712_v9, %v1708_v49 }
 0x200   : > { %9310 = vst [vmem:[#allocation53_spill] sm:$0xff] %v7183_v7  ;;  %4556 = vrot.lane.b32.xlu1 %v4551_v22, %s6218_s30  ;;  %v7202_v7 = vld [vmem:[#allocation2 + $0x49] sm:$0xff]  ;;  %v1713_v22 = vmul.f32 %v7061_v8, %v1711_v4  ;;  %v7222_v4 = vld [vmem:[#allocation2 + $0x51] sm:$0xff] }
 0x201   : > { %1582 = vrot.lane.b32.xlu0 %v1578_v18, %s6218_s30  ;;  %v4144_v25 = vmul.f32 %v7202_v7, %v4143_v55  ;;  %v1728_v38 = vadd.f32 %v6818_v57, %v1714_v12  ;;  %v4145_v9 = vmul.f32 %v7222_v4, %v4143_v55 }
 0x202   : > { %v7197_v56 = vpop.permute.xlu1 %2328  ;;  %v1715_v51 = vadd.f32 %v1713_v22, %v1709_v62  ;;  %v4571_v22 = vmul.f32 %v7124_v31, %v4569_v50 }
 0x203   : > { %9311 = vst [vmem:[#allocation54_spill] sm:$0xff] %v7197_v56  ;;  %v7199_v24 = vpop.permute.xlu0 %2935 }
 0x204   : > { %9312 = vst [vmem:[#allocation55_spill] sm:$0xff] %v7199_v24  ;;  %1584 = vrot.lane.b32.xlu1 %v1579_v32, %s6218_s30  ;;  %v1597_v32 = vstv %s7190_s4  ;;  %v1729_v57 = vadd.f32 %v6833_v28, %v1715_v51  ;;  %v840_v28 = vstv %s7211_s17  ;;  %s7330_s4 = sld [smem:[#allocation7 + $0x95]]  ;;  %s7352_s17 = sld [smem:[#allocation7 + $0x88]] }
 0x205   : > { %4148 = vrot.lane.b32.xlu0 %v4144_v25, %s6218_s30  ;;  %v7228_v25 = vld [vmem:[#allocation2 + $0x18] sm:$0xff] }
 0x206   : > { %v7217_v49 = vpop.permute.xlu1 %3361  ;;  %v1732_v24 = vmul.f32 %v7228_v25, %v1731_v17 }
 0x207   : > { %9313 = vst [vmem:[#allocation56_spill] sm:$0xff] %v7217_v49  ;;  %v7219_v18 = vpop.permute.xlu0 %626  ;;  %v1598_v49 = vmul.f32 %v7121_v39, %v1597_v32 }
 0x208   : > { %9314 = vst [vmem:[#allocation57_spill] sm:$0xff] %v7219_v18  ;;  %4574 = vrot.lane.b32.xlu1 %v4570_v40, %s6218_s30  ;;  %v1734_v62 = vadd.f32 %v1732_v24, %v1728_v38  ;;  %v2023_v18 = vstv %s7206_s11  ;;  %v7245_v40 = vld [vmem:[#allocation2 + $0x20] sm:$0xff]  ;;  %v1751_v24 = vstv %s7214_s10  ;;  %s7338_s11 = sld [smem:[#allocation7 + $0x6d]]  ;;  %s7383_s10 = sld [smem:[#allocation7 + $0xff]] }
 0x209   : > { %4150 = vrot.lane.b32.xlu0 %v4145_v9, %s6218_s30  ;;  %v1733_v9 = vmul.f32 %v7245_v40, %v1731_v17  ;;  %v2024_v17 = vmul.f32 %v7141_v59, %v2023_v18 }
 0x20a   : > { %v7236_v12 = vpop.permute.xlu1 %2330  ;;  %v1748_v50 = vadd.f32 %v6835_v35, %v1734_v62  ;;  %v860_v35 = vstv %s7233_s20  ;;  %s7406_s20 = sld [smem:[#allocation7 + $0x30]] }
 0x20b   : > { %9315 = vst [vmem:[#allocation58_spill] sm:$0xff] %v7236_v12  ;;  %v7238_v55 = vpop.permute.xlu0 %2937  ;;  %v1735_v38 = vadd.f32 %v1733_v9, %v1729_v57  ;;  %v1752_v12 = vmul.f32 %v7121_v39, %v1751_v24  ;;  %v2025_v57 = vmul.f32 %v7061_v8, %v2023_v18  ;;  %v861_v56 = vmul.f32 %v7074_v19, %v860_v35 }
 0x20c   : > { %9316 = vst [vmem:[#allocation59_spill] sm:$0xff] %v7238_v55  ;;  %4576 = vrot.lane.b32.xlu1 %v4571_v22, %s6218_s30  ;;  %v1599_v22 = vmul.f32 %v7138_v47, %v1597_v32  ;;  %v1753_v18 = vmul.f32 %v7138_v47, %v1751_v24  ;;  %v7300_v24 = vld [vmem:[#allocation2 + $0x30] sm:$0xff] }
 0x20d   : > { %1602 = vrot.lane.b32.xlu0 %v1598_v49, %s6218_s30  ;;  %v841_v49 = vmul.f32 %v7141_v59, %v840_v28  ;;  %v1749_v62 = vadd.f32 %v6846_v52, %v1735_v38  ;;  %v1754_v9 = vadd.f32 %v1752_v12, %v1748_v50  ;;  %v7291_v52 = vld [vmem:[#allocation2 + $0x3a] sm:$0xff]  ;;  %v2043_v50 = vstv %s7254_s29  ;;  %s7424_s29 = sld [smem:[#allocation7 + $0xb5]] }
 0x20e   : > { %v7257_v51 = vpop.permute.xlu1 %3363  ;;  %v4591_v12 = vmul.f32 %v7291_v52, %v4589_v54 }
 0x20f   : > { %9317 = vst [vmem:[#allocation60_spill] sm:$0xff] %v7257_v51  ;;  %v7259_v55 = vpop.permute.xlu0 %644  ;;  %v857_v32 = vadd.f32 %v6707_v26, %v841_v49  ;;  %v1771_v26 = vstv %s7252_s27  ;;  %v1768_v49 = vadd.f32 %v6848_v23, %v1754_v9  ;;  %s7422_s27 = sld [smem:[#allocation7 + $0x1d]] }
 0x210   : > { %9318 = vst [vmem:[#allocation61_spill] sm:$0xff] %v7259_v55  ;;  %2028 = vrot.lane.b32.xlu1 %v2024_v17, %s6218_s30  ;;  %v7280_v17 = vld [vmem:[#allocation2 + $0x32] sm:$0xff] }
 0x211   : > { %1604 = vrot.lane.b32.xlu0 %v1599_v22, %s6218_s30  ;;  %v4590_v22 = vmul.f32 %v7280_v17, %v4589_v54  ;;  %v863_v38 = vadd.f32 %v861_v56, %v857_v32  ;;  %v1772_v54 = vmul.f32 %v7300_v24, %v1771_v26  ;;  %v880_v56 = vstv %s7269_s6  ;;  %s7426_s6 = sld [smem:[#allocation7 + $0xe1]] }
 0x212   : > { %v7276_v51 = vpop.permute.xlu1 %2955  ;;  %v1791_v32 = vstv %s7271_s8  ;;  %s7432_s8 = sld [smem:[#allocation7 + $0x8c]] }
 0x213   : > { %9319 = vst [vmem:[#allocation62_spill] sm:$0xff] %v7276_v51  ;;  %v7278_v55 = vpop.permute.xlu0 %3381 }
 0x214   : > { %9320 = vst [vmem:[#allocation63_spill] sm:$0xff] %v7278_v55  ;;  %2030 = vrot.lane.b32.xlu1 %v2025_v57, %s6218_s30  ;;  %v1755_v55 = vadd.f32 %v1753_v18, %v1749_v62  ;;  %v1618_v57 = vmul.f32 %v7300_v24, %v1617_v48  ;;  %v2044_v62 = vmul.f32 %v7074_v19, %v2043_v50 }
 0x215   : > { %4594 = vrot.lane.b32.xlu0 %v4590_v22, %s6218_s30  ;;  %v842_v22 = vmul.f32 %v7061_v8, %v840_v28  ;;  %v877_v28 = vadd.f32 %v6717_v46, %v863_v38  ;;  %v1774_v18 = vadd.f32 %v1772_v54, %v1768_v49  ;;  %v881_v46 = vmul.f32 %v7121_v39, %v880_v56 }
 0x216   : > { %v7296_v51 = vpop.permute.xlu1 %646  ;;  %v1769_v9 = vadd.f32 %v6863_v27, %v1755_v55 }
 0x217   : > { %9321 = vst [vmem:[#allocation64_spill] sm:$0xff] %v7296_v51  ;;  %v7298_v29 = vpop.permute.xlu0 %2957  ;;  %v858_v23 = vadd.f32 %v6715_v42, %v842_v22  ;;  %v862_v22 = vmul.f32 %v7095_v0, %v860_v35  ;;  %v4609_v51 = vstv %s7284_s9  ;;  %v1788_v27 = vadd.f32 %v6876_v36, %v1774_v18  ;;  %s7445_s9 = sld [smem:[#allocation7 + $0x12]] }
 0x218   : > { %9322 = vst [vmem:[#allocation65_spill] sm:$0xff] %v7298_v29  ;;  %4596 = vrot.lane.b32.xlu1 %v4591_v12, %s6218_s30  ;;  %v883_v35 = vadd.f32 %v881_v46, %v877_v28  ;;  %v2045_v36 = vmul.f32 %v7095_v0, %v2043_v50  ;;  %v900_v18 = vstv %s7306_s26  ;;  %v1637_v50 = vstv %s7317_s28  ;;  %s7469_s26 = sld [smem:[#allocation7 + $0xac]]  ;;  %s7487_s28 = sld [smem:[#allocation7 + $0xe5]] }
 0x219   : > { %1622 = vrot.lane.b32.xlu0 %v1618_v57, %s6218_s30  ;;  %v7325_v57 = vld [vmem:[#allocation2 + $0x38] sm:$0xff]  ;;  %v864_v38 = vadd.f32 %v862_v22, %v858_v23  ;;  %v1811_v22 = vstv %s7314_s7  ;;  %s7483_s7 = sld [smem:[#allocation7 + $0x14]] }
 0x21a   : > { %v7321_v29 = vpop.permute.xlu1 %3383  ;;  %v1619_v42 = vmul.f32 %v7325_v57, %v1617_v48  ;;  %v1773_v55 = vmul.f32 %v7325_v57, %v1771_v26  ;;  %v1792_v48 = vmul.f32 %v7109_v30, %v1791_v32  ;;  %v4610_v26 = vmul.f32 %v7202_v7, %v4609_v51 }
 0x21b   : > { %9323 = vst [vmem:[#allocation66_spill] sm:$0xff] %v7321_v29  ;;  %v7323_v12 = vpop.permute.xlu0 %664  ;;  %v878_v28 = vadd.f32 %v6726_v58, %v864_v38  ;;  %v897_v46 = vadd.f32 %v6728_v61, %v883_v35  ;;  %v882_v38 = vmul.f32 %v7138_v47, %v880_v56  ;;  %v7370_v61 = vld [vmem:[#allocation2 + $0x48] sm:$0xff] }
 0x21c   : > { %2048 = vrot.lane.b32.xlu1 %v2044_v62, %s6218_s30  ;;  %v1775_v49 = vadd.f32 %v1773_v55, %v1769_v9  ;;  %v359_v62 = vstv %s7304_s23  ;;  %v1793_v9 = vmul.f32 %v7124_v31, %v1791_v32  ;;  %v2063_v32 = vstv %s7330_s4  ;;  %s7451_s23 = sld [smem:[#allocation7 + $0xc5]] }
 0x21d   : > { %1624 = vrot.lane.b32.xlu0 %v1619_v42, %s6218_s30  ;;  %v1794_v42 = vadd.f32 %v1792_v48, %v1788_v27  ;;  %v4611_v48 = vmul.f32 %v7222_v4, %v4609_v51  ;;  %v884_v35 = vadd.f32 %v882_v38, %v878_v28  ;;  %v1831_v51 = vstv %s7338_s11  ;;  %v9328_v38 = vld [vmem:[#allocation16_spill] sm:$0xff]  ;;  %s7500_s4 = sld [smem:[#allocation7 + $0x3d]]  ;;  %s7504_s11 = sld [smem:[#allocation7 + $0x99]] }
 0x21e   : > { %v7340_v54 = vpop.permute.xlu1 %2975  ;;  %v1789_v23 = vadd.f32 %v6893_v5, %v1775_v49  ;;  %v7364_v49 = vld [vmem:[#allocation2] sm:$0xff] }
 0x21f   : > { %9324 = vst [vmem:[#allocation67_spill] sm:$0xff] %v7340_v54  ;;  %v7342_v29 = vpop.permute.xlu0 %3401  ;;  %v1808_v55 = vadd.f32 %v6919_v3, %v1794_v42  ;;  %v360_v58 = vmul.f32 %v7364_v49, %v359_v62  ;;  %v1812_v3 = vmul.f32 %v7370_v61, %v1811_v22  ;;  %v1638_v42 = vmul.f32 %v7109_v30, %v1637_v50 }
 0x220   : > { %9325 = vst [vmem:[#allocation68_spill] sm:$0xff] %v7342_v29  ;;  %2050 = vrot.lane.b32.xlu1 %v2045_v36, %s6218_s30  ;;  %v901_v36 = vmul.f32 %v7167_v20, %v900_v18 }
 0x221   : > { %4614 = vrot.lane.b32.xlu0 %v4610_v26, %s6218_s30  ;;  %v1795_v26 = vadd.f32 %v1793_v9, %v1789_v23  ;;  %v1814_v29 = vadd.f32 %v1812_v3, %v1808_v55  ;;  %v2064_v9 = vmul.f32 %v7121_v39, %v2063_v32  ;;  %v1832_v55 = vmul.f32 %v7202_v7, %v1831_v51 }
 0x222   : > { %v7359_v5 = vpop.permute.xlu1 %4008 }
 0x223   : > { %9326 = vst [vmem:[#allocation69_spill] sm:$0xff] %v7359_v5  ;;  %v7361_v27 = vpop.permute.xlu0 %666  ;;  %v903_v5 = vadd.f32 %v901_v36, %v897_v46  ;;  %v1809_v56 = vadd.f32 %v6933_v44, %v1795_v26  ;;  %v898_v44 = vadd.f32 %v6738_v2, %v884_v35  ;;  %v920_v46 = vstv %s7352_s17  ;;  %s7511_s17 = sld [smem:[#allocation7 + $0xc9]] }
 0x224   : > { %4616 = vrot.lane.b32.xlu1 %v4611_v48, %s6218_s30  ;;  %v1828_v48 = vadd.f32 %v6962_v53, %v1814_v29  ;;  %v7401_v29 = vld [vmem:[#allocation2 + $0x8] sm:$0xff]  ;;  %v902_v2 = vmul.f32 %v7185_v63, %v900_v18  ;;  %v921_v35 = vmul.f32 %v7109_v30, %v920_v46  ;;  %v1833_v18 = vmul.f32 %v7222_v4, %v1831_v51 }
 0x225   : > { %364 = vrot.lane.b32.xlu0 %v360_v58, %s6218_s30  ;;  %v7386_v58 = vld [vmem:[#allocation2 + $0x50] sm:$0xff]  ;;  %v917_v36 = vadd.f32 %v9328_v38, %v903_v5 }
 0x226   : > { %v7378_v54 = vpop.permute.xlu1 %2977  ;;  %v1813_v28 = vmul.f32 %v7386_v58, %v1811_v22  ;;  %v361_v22 = vmul.f32 %v7401_v29, %v359_v62  ;;  %v904_v62 = vadd.f32 %v902_v2, %v898_v44  ;;  %v379_v2 = vstv %s7406_s20  ;;  %s7556_s20 = sld [smem:[#allocation7 + $0x34]] }
 0x227   : > { %v7380_v23 = vpop.permute.xlu0 %3403 }
 0x228   : > { %9327 = vst [vmem:[#allocation70_spill] sm:$0xff] %v7380_v23  ;;  %1642 = vrot.lane.b32.xlu1 %v1638_v42, %s6218_s30  ;;  %v1815_v26 = vadd.f32 %v1813_v28, %v1809_v56  ;;  %v1639_v42 = vmul.f32 %v7124_v31, %v1637_v50  ;;  %v1834_v56 = vadd.f32 %v1832_v55, %v1828_v48  ;;  %v4629_v23 = vstv %s7383_s10  ;;  %s7521_s10 = sld [smem:[#allocation7 + $0x32]] }
 0x229   : > { %2068 = vrot.lane.b32.xlu0 %v2064_v9, %s6218_s30  ;;  %v923_v9 = vadd.f32 %v921_v35, %v917_v36  ;;  %v940_v48 = vstv %s7393_s19  ;;  %s7537_s19 = sld [smem:[#allocation7 + $0xe9]] }
 0x22a   : > { %v7397_v3 = vpop.permute.xlu1 %4010  ;;  %v1829_v5 = vadd.f32 %v6995_v10, %v1815_v26  ;;  %v1848_v50 = vadd.f32 %v7043_v21, %v1834_v56  ;;  %v9332_v21 = vld [vmem:[#allocation17_spill] sm:$0xff]  ;;  %v941_v35 = vmul.f32 %v7280_v17, %v940_v48 }
 0x22b   : > { %9329 = vst [vmem:[#allocation16_spill] sm:$0xff] %v7397_v3  ;;  %v7399_v53 = vpop.permute.xlu0 %2995  ;;  %v2065_v3 = vmul.f32 %v7138_v47, %v2063_v32  ;;  %v918_v51 = vadd.f32 %v9332_v21, %v904_v62  ;;  %v9333_v32 = vld [vmem:[#allocation18_spill] sm:$0xff]  ;;  %v1657_v21 = vstv %s7422_s27  ;;  %s7572_s27 = sld [smem:[#allocation7 + $0xb9]] }
 0x22c   : > { %366 = vrot.lane.b32.xlu1 %v361_v22, %s6218_s30  ;;  %v1835_v10 = vadd.f32 %v1833_v18, %v1829_v5  ;;  %v937_v44 = vadd.f32 %v9333_v32, %v923_v9  ;;  %v7440_v22 = vld [vmem:[#allocation2 + $0x4a] sm:$0xff]  ;;  %v2177_v5 = vstv %s7409_s22  ;;  %v7457_v9 = vld [vmem:[#allocation2 + $0x52] sm:$0xff]  ;;  %v380_v18 = vmul.f32 %v7141_v59, %v379_v2  ;;  %s7564_s22 = sld [smem:[#allocation7 + $0xcd]] }
 0x22d   : > { %1644 = vrot.lane.b32.xlu0 %v1639_v42, %s6218_s30  ;;  %v4630_v42 = vmul.f32 %v7440_v22, %v4629_v23  ;;  %v2083_v32 = vstv %s7424_s29  ;;  %s7574_s29 = sld [smem:[#allocation7 + $0x40]] }
 0x22e   : > { %v7416_v28 = vpop.permute.xlu1 %3421  ;;  %v1849_v55 = vadd.f32 %v7069_v45, %v1835_v10  ;;  %v943_v56 = vadd.f32 %v941_v35, %v937_v44  ;;  %v2178_v10 = vmul.f32 %v7141_v59, %v2177_v5 }
 0x22f   : > { %9330 = vst [vmem:[#allocation71_spill] sm:$0xff] %v7416_v28  ;;  %v7418_v38 = vpop.permute.xlu0 %4028 }
 0x230   : > { %9331 = vst [vmem:[#allocation72_spill] sm:$0xff] %v7418_v38  ;;  %2070 = vrot.lane.b32.xlu1 %v2065_v3, %s6218_s30  ;;  %v922_v3 = vmul.f32 %v7124_v31, %v920_v46 }
 0x231   : > { %1852 = vrot.lane.b32.xlu0 %v1848_v50, %s6218_s30  ;;  %v4631_v50 = vmul.f32 %v7457_v9, %v4629_v23  ;;  %v9339_v23 = vld [vmem:[#allocation20_spill] sm:$0xff] }
 0x232   : > { %v7436_v36 = vpop.permute.xlu1 %2997  ;;  %v924_v45 = vadd.f32 %v922_v3, %v918_v51  ;;  %v9338_v51 = vld [vmem:[#allocation19_spill] sm:$0xff]  ;;  %v2194_v3 = vadd.f32 %v6861_v6, %v2178_v10  ;;  %v957_v35 = vadd.f32 %v9339_v23, %v943_v56  ;;  %v2217_v23 = vstv %s7451_s23  ;;  %s7615_s23 = sld [smem:[#allocation7 + $0x44]] }
 0x233   : > { %9334 = vst [vmem:[#allocation17_spill] sm:$0xff] %v7436_v36  ;;  %v7438_v26 = vpop.permute.xlu0 %3423 }
 0x234   : > { %9335 = vst [vmem:[#allocation18_spill] sm:$0xff] %v7438_v26  ;;  %4634 = vrot.lane.b32.xlu1 %v4630_v42, %s6218_s30  ;;  %v938_v44 = vadd.f32 %v9338_v51, %v924_v45  ;;  %v960_v42 = vstv %s7432_s8  ;;  %v942_v45 = vmul.f32 %v7291_v52, %v940_v48  ;;  %v2690_v26 = vstv %s7445_s9  ;;  %s7592_s8 = sld [smem:[#allocation7 + $0x60]]  ;;  %s7595_s9 = sld [smem:[#allocation7 + $0xed]] }
 0x235   : > { %1854 = vrot.lane.b32.xlu0 %v1849_v55, %s6218_s30  ;;  %v2197_v55 = vstv %s7426_s6  ;;  %v961_v6 = vmul.f32 %v7202_v7, %v960_v42  ;;  %v2691_v28 = vmul.f32 %v7364_v49, %v2690_v26  ;;  %s7579_s6 = sld [smem:[#allocation7 + $0x16]] }
 0x236   : > { %v7453_v62 = vpop.permute.xlu1 %4030  ;;  %v2198_v51 = vmul.f32 %v7074_v19, %v2197_v55  ;;  %v944_v56 = vadd.f32 %v942_v45, %v938_v44  ;;  %v2199_v19 = vmul.f32 %v7095_v0, %v2197_v55  ;;  %v9343_v0 = vld [vmem:[#allocation21_spill] sm:$0xff]  ;;  %v980_v44 = vstv %s7469_s26  ;;  %s7629_s26 = sld [smem:[#allocation7 + $0x18]] }
 0x237   : > { %9336 = vst [vmem:[#allocation73_spill] sm:$0xff] %v7453_v62  ;;  %v7455_v46 = vpop.permute.xlu0 %3441  ;;  %v2179_v62 = vmul.f32 %v7061_v8, %v2177_v5  ;;  %v963_v48 = vadd.f32 %v961_v6, %v957_v35  ;;  %v9344_v35 = vld [vmem:[#allocation22_spill] sm:$0xff]  ;;  %v2085_v6 = vmul.f32 %v7185_v63, %v2083_v32 }
 0x238   : > { %9337 = vst [vmem:[#allocation74_spill] sm:$0xff] %v7455_v46  ;;  %4636 = vrot.lane.b32.xlu1 %v4631_v50, %s6218_s30  ;;  %v1658_v50 = vmul.f32 %v7370_v61, %v1657_v21  ;;  %v2200_v10 = vadd.f32 %v2198_v51, %v2194_v3  ;;  %v958_v55 = vadd.f32 %v9343_v0, %v944_v56 }
 0x239   : > { %384 = vrot.lane.b32.xlu0 %v380_v18, %s6218_s30  ;;  %v2084_v18 = vmul.f32 %v7167_v20, %v2083_v32  ;;  %v2195_v5 = vadd.f32 %v6874_v33, %v2179_v62  ;;  %v381_v33 = vmul.f32 %v7061_v8, %v379_v2  ;;  %v9342_v62 = vld [vmem:[#allocation26_spill] sm:$0xff]  ;;  %v2218_v3 = vmul.f32 %v7121_v39, %v2217_v23 }
 0x23a   : > { %v7474_v38 = vpop.permute.xlu1 %4048  ;;  %v2214_v36 = vadd.f32 %v9342_v62, %v2200_v10  ;;  %v977_v2 = vadd.f32 %v9344_v35, %v963_v48  ;;  %v399_v10 = vstv %s7483_s7  ;;  %v981_v48 = vmul.f32 %v7440_v22, %v980_v44  ;;  %s7641_s7 = sld [smem:[#allocation7 + $0x42]] }
 0x23b   : > { %9340 = vst [vmem:[#allocation19_spill] sm:$0xff] %v7474_v38  ;;  %v7476_v46 = vpop.permute.xlu0 %3443 }
 0x23c   : > { %9341 = vst [vmem:[#allocation20_spill] sm:$0xff] %v7476_v46  ;;  %1662 = vrot.lane.b32.xlu1 %v1658_v50, %s6218_s30  ;;  %v2201_v50 = vadd.f32 %v2199_v19, %v2195_v5  ;;  %v962_v5 = vmul.f32 %v7222_v4, %v960_v42  ;;  %v2220_v56 = vadd.f32 %v2218_v3, %v2214_v36  ;;  %v2237_v19 = vstv %s7487_s28  ;;  %s7645_s28 = sld [smem:[#allocation7 + $0x9d]] }
 0x23d   : > { %2088 = vrot.lane.b32.xlu0 %v2084_v18, %s6218_s30  ;;  %v983_v42 = vadd.f32 %v981_v48, %v977_v2  ;;  %v2238_v0 = vmul.f32 %v7167_v20, %v2237_v19  ;;  %v1677_v3 = vstv %s7500_s4  ;;  %v2239_v20 = vmul.f32 %v7185_v63, %v2237_v19  ;;  %s7648_s4 = sld [smem:[#allocation7 + $0x64]] }
 0x23e   : > { %v7493_v38 = vpop.permute.xlu1 %4050  ;;  %v2215_v18 = vadd.f32 %v6902_v11, %v2201_v50  ;;  %v2219_v11 = vmul.f32 %v7138_v47, %v2217_v23  ;;  %v2234_v32 = vadd.f32 %v6921_v15, %v2220_v56  ;;  %v2692_v50 = vmul.f32 %v7401_v29, %v2690_v26 }
 0x23f   : > { %v7495_v46 = vpop.permute.xlu0 %3461  ;;  %v400_v23 = vmul.f32 %v7228_v25, %v399_v10  ;;  %v2103_v15 = vstv %s7504_s11  ;;  %v982_v48 = vmul.f32 %v7457_v9, %v980_v44  ;;  %v9347_v44 = vmov 1.0|1.0   ;;  %s7652_s11 = sld [smem:[#allocation7 + $0x36]] }
 0x240   : > { %2695 = vrot.lane.b32.xlu1 %v2691_v28, %s6218_s30  ;;  %v1659_v28 = vmul.f32 %v7386_v58, %v1657_v21  ;;  %v964_v21 = vadd.f32 %v962_v5, %v958_v55  ;;  %v2221_v36 = vadd.f32 %v2219_v11, %v2215_v18  ;;  %v9345_v55 = vld [vmem:[#allocation23_spill] sm:$0xff]  ;;  %v2240_v26 = vadd.f32 %v2238_v0, %v2234_v32  ;;  %v9346_v18 = vld [vmem:[#allocation24_spill] sm:$0xff] }
 0x241   : > { %386 = vrot.lane.b32.xlu0 %v381_v33, %s6218_s30  ;;  %v401_v0 = vmul.f32 %v7245_v40, %v399_v10 }
 0x242   : > { %v7513_v45 = vpop.permute.xlu1 %4068  ;;  %v2235_v35 = vadd.f32 %v6949_v16, %v2221_v36  ;;  %v978_v2 = vadd.f32 %v9345_v55, %v964_v21  ;;  %v1678_v16 = vmul.f32 %v7202_v7, %v1677_v3  ;;  %v2254_v11 = vadd.f32 %v6964_v60, %v2240_v26 }
 0x243   : > { %v7515_v51 = vpop.permute.xlu0 %4494  ;;  %v2104_v36 = vmul.f32 %v7109_v30, %v2103_v15  ;;  %v2710_v21 = vstv %s7521_s10  ;;  %s7667_s10 = sld [smem:[#allocation7 + $0x62]] }
 0x244   : > { %1664 = vrot.lane.b32.xlu1 %v1659_v28, %s6218_s30  ;;  %v997_v28 = vadd.f32 %v9346_v18, %v983_v42  ;;  %v2241_v32 = vadd.f32 %v2239_v20, %v2235_v35  ;;  %v984_v63 = vadd.f32 %v982_v48, %v978_v2  ;;  %v2277_v35 = vstv %s7537_s19  ;;  %s7674_s19 = sld [smem:[#allocation7 + $0x48]] }
 0x245   : > { %2090 = vrot.lane.b32.xlu0 %v2085_v6, %s6218_s30  ;;  %v2257_v6 = vstv %s7511_s17  ;;  %v2278_v20 = vmul.f32 %v7280_v17, %v2277_v35  ;;  %v2297_v48 = vstv %s7564_s22  ;;  %s7665_s17 = sld [smem:[#allocation7 + $0x92]]  ;;  %s7703_s22 = sld [smem:[#allocation7 + $0x68]] }
 0x246   : > { %v7529_v33 = vpop.permute.xlu1 %3463  ;;  %v2258_v19 = vmul.f32 %v7109_v30, %v2257_v6  ;;  %v2255_v60 = vadd.f32 %v6997_v34, %v2241_v32  ;;  %v2259_v30 = vmul.f32 %v7124_v31, %v2257_v6  ;;  %v9348_v34 = vld [vmem:[#allocation25_spill] sm:$0xff]  ;;  %v2105_v6 = vmul.f32 %v7124_v31, %v2103_v15 }
 0x247   : > { %v1162_v62 = vpop.permute.xlu0 %1161  ;;  %v998_v55 = vadd.f32 %v9348_v34, %v984_v63  ;;  %v2712_v15 = vmul.f32 %v7061_v8, %v2710_v21  ;;  %v2123_v32 = vstv %s7572_s27  ;;  %v513_v63 = vstv %s7574_s29  ;;  %s7706_s27 = sld [smem:[#allocation7 + $0x38]]  ;;  %s7721_s29 = sld [smem:[#allocation7 + $0xbd]] }
 0x248   : > { %5626 = vmatprep.mubr.msk.f32.mxu1 %vm678_vm9, %v1162_v62  ;;  %2697 = vrot.lane.b32.xlu1 %v2692_v50, %s6218_s30  ;;  %v2711_v50 = vmul.f32 %v7141_v59, %v2710_v21  ;;  %v2261_v10 = vadd.f32 %v2259_v30, %v2255_v60  ;;  %v2730_v60 = vstv %s7579_s6  ;;  %v514_v30 = vmul.f32 %v7364_v49, %v513_v63  ;;  %s7724_s6 = sld [smem:[#allocation7 + $0x66]] }
 0x249   : > { %404 = vrot.lane.b32.xlu0 %v400_v23, %s6218_s30  ;;  %v2260_v23 = vadd.f32 %v2258_v19, %v2254_v11  ;;  %v2731_v34 = vmul.f32 %v7228_v25, %v2730_v60 }
 0x24a   : > { %v1164_v5 = vpop.permute.xlu1 %1163 }
 0x24b   : > { %v7546_v56 = vpop.permute.xlu0 %4070  ;;  %5627 = vmatmul.mubr.msk.f32.vlgmr.msra.gmra.mrb[0].mxu1 %vm678_vm9, %v1164_v5  ;;  %v2274_v2 = vadd.f32 %v7045_v43, %v2260_v23  ;;  %v2275_v43 = vadd.f32 %v7071_v41, %v2261_v10  ;;  %v419_v5 = vstv %s7556_s20  ;;  %v2317_v10 = vstv %s7595_s9  ;;  %s7690_s20 = sld [smem:[#allocation7 + $0x46]]  ;;  %s7736_s9 = sld [smem:[#allocation7 + $0x4c]] }
 0x24c   : > { %1682 = vrot.lane.b32.xlu1 %v1678_v16, %s6218_s30  ;;  %5633 = vmatprep.mubr.msk.f32.mxu1 %vm678_vm9, %v997_v28  ;;  %v1679_v28 = vmul.f32 %v7222_v4, %v1677_v3  ;;  %v2279_v3 = vmul.f32 %v7291_v52, %v2277_v35 }
 0x24d   : > { %2108 = vrot.lane.b32.xlu0 %v2104_v36, %s6218_s30  ;;  %5815 = vmatpush3.bf16.msk.msra.mxu1 %vm7027_vm8, %v9347_v44  ;;  %v2280_v16 = vadd.f32 %v2278_v20, %v2274_v2  ;;  %v420_v36 = vmul.f32 %v7121_v39, %v419_v5  ;;  %v2299_v2 = vmul.f32 %v7222_v4, %v2297_v48 }
 0x24e   : > { %v7566_v42 = vpop.permute.xlu1 %4496  ;;  %v2281_v19 = vadd.f32 %v2279_v3, %v2275_v43  ;;  %v421_v3 = vmul.f32 %v7138_v47, %v419_v5 }
 0x24f   : > { %v7568_v62 = vpop.permute.xlu0 %3481  ;;  %v2294_v41 = vadd.f32 %v7091_v37, %v2280_v16 }
 0x250   : > { %2715 = vrot.lane.b32.xlu1 %v2711_v50, %s6218_s30  ;;  %v2298_v50 = vmul.f32 %v7202_v7, %v2297_v48  ;;  %v2295_v21 = vadd.f32 %v7106_v1, %v2281_v19  ;;  %v9350_v1 = vld [vmem:[#allocation27_spill] sm:$0xff] }
 0x251   : > { %406 = vrot.lane.b32.xlu0 %v401_v0, %s6218_s30  ;;  %v2124_v0 = vmul.f32 %v7280_v17, %v2123_v32  ;;  %v515_v17 = vmul.f32 %v7401_v29, %v513_v63  ;;  %v9353_v63 = vld [vmem:[#allocation50_spill] sm:$0xff] }
 0x252   : > { %v7584_v26 = vpop.permute.xlu1 %4088  ;;  %v2300_v35 = vadd.f32 %v2298_v50, %v2294_v41  ;;  %v9352_v41 = vld [vmem:[#allocation28_spill] sm:$0xff] }
 0x253   : > { %v7586_v18 = vpop.permute.xlu0 %4514  ;;  %5634 = vmatmul.mubr.msk.f32.vlgmr.msra.gmra.mrb[0].mxu1 %vm678_vm9, %v998_v55  ;;  %v533_v55 = vstv %s7592_s8  ;;  %s7727_s8 = sld [smem:[#allocation7 + $0x1a]] }
 0x254   : > { %1684 = vrot.lane.b32.xlu1 %v1679_v28, %s6218_s30  ;;  %v530_v28 = vadd.f32 %v9350_v1, %v514_v30  ;;  %v2314_v20 = vadd.f32 %v7134_v14, %v2300_v35  ;;  %v534_v48 = vmul.f32 %v7141_v59, %v533_v55  ;;  %v2125_v14 = vmul.f32 %v7291_v52, %v2123_v32  ;;  %v9355_v1 = vld [vmem:[#allocation54_spill] sm:$0xff] }
 0x255   : > { %2110 = vrot.lane.b32.xlu0 %v2105_v6, %s6218_s30  ;;  %v2301_v6 = vadd.f32 %v2299_v2, %v2295_v21  ;;  %v535_v21 = vmul.f32 %v7061_v8, %v533_v55  ;;  %v553_v52 = vstv %s7615_s23  ;;  %v2319_v32 = vmul.f32 %v7457_v9, %v2317_v10  ;;  %s7745_s23 = sld [smem:[#allocation7 + $0xb2]] }
 0x256   : > { %v7602_v11 = vpop.permute.xlu1 %3483  ;;  %v536_v5 = vadd.f32 %v534_v48, %v530_v28  ;;  %v2732_v35 = vmul.f32 %v7245_v40, %v2730_v60  ;;  %v439_v55 = vstv %s7629_s26  ;;  %v9356_v60 = vld [vmem:[#allocation32_spill] sm:$0xff]  ;;  %s7755_s26 = sld [smem:[#allocation7 + $0x4a]] }
 0x257   : > { %v7604_v31 = vpop.permute.xlu0 %4090  ;;  %v2315_v19 = vadd.f32 %v9353_v63, %v2301_v6  ;;  %v9357_v6 = vld [vmem:[#allocation58_spill] sm:$0xff]  ;;  %v2844_v63 = vstv %s7641_s7  ;;  %s7770_s7 = sld [smem:[#allocation7 + $0x6c]] }
 0x258   : > { %2717 = vrot.lane.b32.xlu1 %v2712_v15, %s6218_s30  ;;  %v2318_v15 = vmul.f32 %v7440_v22, %v2317_v10  ;;  %v554_v10 = vmul.f32 %v7228_v25, %v553_v52 }
 0x259   : > { %424 = vrot.lane.b32.xlu0 %v420_v36, %s6218_s30  ;;  %v531_v36 = vadd.f32 %v9352_v41, %v515_v17  ;;  %v2321_v8 = vadd.f32 %v2319_v32, %v2315_v19  ;;  %v440_v41 = vmul.f32 %v7300_v24, %v439_v55  ;;  %v555_v19 = vmul.f32 %v7245_v40, %v553_v52 }
 0x25a   : > { %v7618_v23 = vpop.permute.xlu1 %4516  ;;  %v2320_v50 = vadd.f32 %v2318_v15, %v2314_v20  ;;  %v2845_v52 = vmul.f32 %v7364_v49, %v2844_v63 }
 0x25b   : > { %v7620_v37 = vpop.permute.xlu0 %1542  ;;  %v537_v28 = vadd.f32 %v535_v21, %v531_v36  ;;  %v2143_v36 = vstv %s7645_s28  ;;  %v9360_v21 = vld [vmem:[#allocation36_spill] sm:$0xff]  ;;  %s7792_s28 = sld [smem:[#allocation7 + $0x6a]] }
 0x25c   : > { %9349 = vst [vmem:[#allocation26_spill] sm:$0xff] %v7620_v37  ;;  %2128 = vrot.lane.b32.xlu1 %v2124_v0, %s6218_s30  ;;  %v2334_v17 = vadd.f32 %v9355_v1, %v2320_v50  ;;  %v2750_v50 = vstv %s7652_s11  ;;  %v2144_v1 = vmul.f32 %v7202_v7, %v2143_v36  ;;  %v2846_v7 = vmul.f32 %v7401_v29, %v2844_v63  ;;  %v9383_v37 = vld [vmem:[#allocation57_spill] sm:$0xff]  ;;  %s7820_s11 = sld [smem:[#allocation7 + $0x4e]] }
 0x25d   : > { %2735 = vrot.lane.b32.xlu0 %v2731_v34, %s6218_s30  ;;  %v9354_v34 = vld [vmem:[#allocation29_spill] sm:$0xff]  ;;  %v551_v20 = vadd.f32 %v9356_v60, %v537_v28  ;;  %v2751_v28 = vmul.f32 %v7121_v39, %v2750_v50  ;;  %v9363_v60 = vld [vmem:[#allocation40_spill] sm:$0xff] }
 0x25e   : > { %v7635_v43 = vpop.permute.xlu1 %1544  ;;  %v550_v2 = vadd.f32 %v9354_v34, %v536_v5  ;;  %v573_v5 = vstv %s7648_s4  ;;  %s7814_s4 = sld [smem:[#allocation7 + $0x1c]] }
 0x25f   : > { %9351 = vst [vmem:[#allocation21_spill] sm:$0xff] %v7635_v43  ;;  %v7637_v16 = vpop.permute.xlu0 %4108  ;;  %v613_v43 = vstv %s7703_s22  ;;  %s7871_s22 = sld [smem:[#allocation7 + $0xe2]] }
 0x260   : > { %426 = vrot.lane.b32.xlu1 %v421_v3, %s6218_s30  ;;  %v2335_v3 = vadd.f32 %v9357_v6, %v2321_v8  ;;  %v3176_v8 = vstv %s7665_s17  ;;  %s7831_s17 = sld [smem:[#allocation7 + $0x3a]] }
 0x261   : > { %2130 = vrot.lane.b32.xlu0 %v2125_v14, %s6218_s30  ;;  %v556_v14 = vadd.f32 %v554_v10, %v550_v2  ;;  %v2864_v10 = vstv %s7667_s10  ;;  %s7837_s10 = sld [smem:[#allocation7 + $0x96]] }
 0x262   : > { %v7658_v0 = vpop.permute.xlu1 %4534 }
 0x263   : > { %v7660_v30 = vpop.permute.xlu0 %4110  ;;  %v570_v32 = vadd.f32 %v9360_v21, %v556_v14 }
 0x264   : > { %2737 = vrot.lane.b32.xlu1 %v2732_v35, %s6218_s30  ;;  %v557_v35 = vadd.f32 %v555_v19, %v551_v20  ;;  %v9364_v20 = vld [vmem:[#allocation31_spill] sm:$0xff] }
 0x265   : > { %2338 = vrot.lane.b32.xlu0 %v2334_v17, %s6218_s30  ;;  %v574_v17 = vmul.f32 %v7121_v39, %v573_v5  ;;  %v593_v39 = vstv %s7674_s19  ;;  %s7853_s19 = sld [smem:[#allocation7 + $0xc2]] }
 0x266   : > { %v7677_v48 = vpop.permute.xlu1 %4536  ;;  %v571_v6 = vadd.f32 %v9363_v60, %v557_v35  ;;  %v3177_v35 = vmul.f32 %v7141_v59, %v3176_v8  ;;  %v9367_v60 = vld [vmem:[#allocation42_spill] sm:$0xff] }
 0x267   : > { %9358 = vst [vmem:[#allocation22_spill] sm:$0xff] %v7677_v48  ;;  %v7679_v15 = vpop.permute.xlu0 %1562  ;;  %v576_v14 = vadd.f32 %v574_v17, %v570_v32  ;;  %v441_v32 = vmul.f32 %v7325_v57, %v439_v55 }
 0x268   : > { %9359 = vst [vmem:[#allocation23_spill] sm:$0xff] %v7679_v15  ;;  %2340 = vrot.lane.b32.xlu1 %v2335_v3, %s6218_s30  ;;  %v2861_v3 = vadd.f32 %v9364_v20, %v2845_v52  ;;  %v9368_v52 = vld [vmem:[#allocation35_spill] sm:$0xff]  ;;  %v2884_v20 = vstv %s7690_s20  ;;  %v7797_v15 = vld [vmem:[#allocation2 + $0x21] sm:$0xff]  ;;  %s7856_s20 = sld [smem:[#allocation7 + $0x6e]] }
 0x269   : > { %444 = vrot.lane.b32.xlu0 %v440_v41, %s6218_s30  ;;  %v575_v41 = vmul.f32 %v7138_v47, %v573_v5  ;;  %v2862_v63 = vadd.f32 %v9368_v52, %v2846_v7 }
 0x26a   : > { %v7692_v34 = vpop.permute.xlu1 %1564 }
 0x26b   : > { %9361 = vst [vmem:[#allocation24_spill] sm:$0xff] %v7692_v34  ;;  %v7694_v2 = vpop.permute.xlu0 %4128  ;;  %v590_v34 = vadd.f32 %v9367_v60, %v576_v14  ;;  %v577_v17 = vadd.f32 %v575_v41, %v571_v6  ;;  %v9369_v14 = vld [vmem:[#allocation44_spill] sm:$0xff] }
 0x26c   : > { %9362 = vst [vmem:[#allocation25_spill] sm:$0xff] %v7694_v2  ;;  %2148 = vrot.lane.b32.xlu1 %v2144_v1, %s6218_s30  ;;  %v2865_v1 = vmul.f32 %v7141_v59, %v2864_v10  ;;  %v7731_v59 = vld [vmem:[#allocation2 + $0x9] sm:$0xff] }
 0x26d   : > { %2755 = vrot.lane.b32.xlu0 %v2751_v28, %s6218_s30  ;;  %v594_v28 = vmul.f32 %v7300_v24, %v593_v39  ;;  %v2866_v55 = vmul.f32 %v7731_v59, %v2864_v10  ;;  %v591_v6 = vadd.f32 %v9369_v14, %v577_v17  ;;  %v595_v10 = vmul.f32 %v7325_v57, %v593_v39 }
 0x26e   : > { %v7713_v19 = vpop.permute.xlu1 %4554  ;;  %v2867_v5 = vadd.f32 %v2865_v1, %v2861_v3  ;;  %v2145_v3 = vmul.f32 %v7222_v4, %v2143_v36  ;;  %v459_v17 = vstv %s7706_s27  ;;  %v2885_v14 = vmul.f32 %v7228_v25, %v2884_v20  ;;  %v9374_v36 = vld [vmem:[#allocation41_spill] sm:$0xff]  ;;  %s7888_s27 = sld [smem:[#allocation7 + $0x3c]] }
 0x26f   : > { %9365 = vst [vmem:[#allocation27_spill] sm:$0xff] %v7713_v19  ;;  %v7715_v21 = vpop.permute.xlu0 %4130  ;;  %v596_v60 = vadd.f32 %v594_v28, %v590_v34  ;;  %v2868_v52 = vadd.f32 %v2866_v55, %v2862_v63  ;;  %v3178_v63 = vmul.f32 %v7731_v59, %v3176_v8  ;;  %v7762_v28 = vld [vmem:[#allocation2 + $0x31] sm:$0xff]  ;;  %v2770_v8 = vstv %s7727_s8  ;;  %s7909_s8 = sld [smem:[#allocation7 + $0xb6]] }
 0x270   : > { %9366 = vst [vmem:[#allocation28_spill] sm:$0xff] %v7715_v21  ;;  %3181 = vrot.lane.b32.xlu1 %v3177_v35, %s6218_s30  ;;  %v9372_v35 = vld [vmem:[#allocation39_spill] sm:$0xff]  ;;  %v614_v25 = vmul.f32 %v7762_v28, %v613_v43  ;;  %v460_v55 = vmul.f32 %v7762_v28, %v459_v17 }
 0x271   : > { %446 = vrot.lane.b32.xlu0 %v441_v32, %s6218_s30  ;;  %v2881_v1 = vadd.f32 %v9372_v35, %v2867_v5  ;;  %v2752_v32 = vmul.f32 %v7138_v47, %v2750_v50  ;;  %v2882_v34 = vadd.f32 %v9374_v36, %v2868_v52  ;;  %v597_v47 = vadd.f32 %v595_v10, %v591_v6  ;;  %v9377_v35 = vld [vmem:[#allocation49_spill] sm:$0xff] }
 0x272   : > { %v7738_v7 = vpop.permute.xlu1 %4556  ;;  %v2904_v6 = vstv %s7724_s6  ;;  %s7904_s6 = sld [smem:[#allocation7 + $0x1e]] }
 0x273   : > { %9370 = vst [vmem:[#allocation50_spill] sm:$0xff] %v7738_v7  ;;  %v7740_v41 = vpop.permute.xlu0 %1582  ;;  %v2887_v5 = vadd.f32 %v2885_v14, %v2881_v1  ;;  %v9378_v1 = vld [vmem:[#allocation43_spill] sm:$0xff] }
 0x274   : > { %9371 = vst [vmem:[#allocation29_spill] sm:$0xff] %v7740_v41  ;;  %2150 = vrot.lane.b32.xlu1 %v2145_v3, %s6218_s30  ;;  %v9373_v41 = vld [vmem:[#allocation46_spill] sm:$0xff]  ;;  %v2886_v3 = vmul.f32 %v7245_v40, %v2884_v20  ;;  %v7776_v14 = vld [vmem:[#allocation2 + $0x39] sm:$0xff]  ;;  %v633_v40 = vstv %s7736_s9  ;;  %s7922_s9 = sld [smem:[#allocation7 + $0x13]] }
 0x275   : > { %v610_v4 = vadd.f32 %v9373_v41, %v596_v60  ;;  %2757 = vrot.lane.b32.xlu0 %v2752_v32, %s6218_s30  ;;  %v2163_v41 = vstv %s7721_s29  ;;  %v611_v60 = vadd.f32 %v9377_v35, %v597_v47  ;;  %v2901_v32 = vadd.f32 %v9378_v1, %v2887_v5  ;;  %v7785_v35 = vld [vmem:[#allocation2 + $0x19] sm:$0xff]  ;;  %s7892_s29 = sld [smem:[#allocation7 + $0xc6]] }
 0x276   : > { %v7757_v50 = vpop.permute.xlu1 %1584  ;;  %v2888_v10 = vadd.f32 %v2886_v3, %v2882_v34  ;;  %v615_v36 = vmul.f32 %v7776_v14, %v613_v43  ;;  %v2905_v5 = vmul.f32 %v7785_v35, %v2904_v6  ;;  %v2771_v34 = vmul.f32 %v7300_v24, %v2770_v8  ;;  %v9382_v3 = vld [vmem:[#allocation45_spill] sm:$0xff] }
 0x277   : > { %9375 = vst [vmem:[#allocation54_spill] sm:$0xff] %v7757_v50  ;;  %v7759_v39 = vpop.permute.xlu0 %4148  ;;  %v616_v52 = vadd.f32 %v614_v25, %v610_v4  ;;  %v9381_v4 = vld [vmem:[#allocation53_spill] sm:$0xff] }
 0x278   : > { %9376 = vst [vmem:[#allocation32_spill] sm:$0xff] %v7759_v39  ;;  %3183 = vrot.lane.b32.xlu1 %v3178_v63, %s6218_s30  ;;  %v2164_v63 = vmul.f32 %v7440_v22, %v2163_v41  ;;  %v2902_v1 = vadd.f32 %v9382_v3, %v2888_v10  ;;  %v617_v43 = vadd.f32 %v615_v36, %v611_v60  ;;  %v7806_v10 = vld [vmem:[#allocation2 + $0x2] sm:$0xff]  ;;  %v9386_v36 = vld [vmem:[#allocation47_spill] sm:$0xff] }
 0x279   : > { %464 = vrot.lane.b32.xlu0 %v460_v55, %s6218_s30  ;;  %v630_v25 = vadd.f32 %v9381_v4, %v616_v52  ;;  %v3196_v55 = vstv %s7745_s23  ;;  %v2907_v50 = vadd.f32 %v2905_v5, %v2901_v32  ;;  %v634_v22 = vmul.f32 %v7370_v61, %v633_v40  ;;  %s7925_s23 = sld [smem:[#allocation7 + $0xe6]] }
 0x27a   : > { %v7780_v20 = vpop.permute.xlu1 %4574  ;;  %v2906_v52 = vmul.f32 %v7797_v15, %v2904_v6  ;;  %v2924_v4 = vstv %s7755_s26  ;;  %v631_v13 = vadd.f32 %v9383_v37, %v617_v43  ;;  %v3197_v32 = vmul.f32 %v7806_v10, %v3196_v55  ;;  %v9387_v43 = vld [vmem:[#allocation61_spill] sm:$0xff]  ;;  %s7945_s26 = sld [smem:[#allocation7 + $0xca]] }
 0x27b   : > { %9379 = vst [vmem:[#allocation58_spill] sm:$0xff] %v7780_v20  ;;  %v7782_v47 = vpop.permute.xlu0 %4150  ;;  %v636_v5 = vadd.f32 %v634_v22, %v630_v25  ;;  %v635_v20 = vmul.f32 %v7386_v58, %v633_v40  ;;  %v653_v6 = vstv %s7770_s7  ;;  %v2925_v37 = vmul.f32 %v7300_v24, %v2924_v4  ;;  %s7959_s7 = sld [smem:[#allocation7 + $0x3e]] }
 0x27c   : > { %9380 = vst [vmem:[#allocation36_spill] sm:$0xff] %v7782_v47  ;;  %2168 = vrot.lane.b32.xlu1 %v2164_v63, %s6218_s30  ;;  %v2921_v63 = vadd.f32 %v9386_v36, %v2907_v50  ;;  %v2908_v3 = vadd.f32 %v2906_v52, %v2902_v1  ;;  %v2165_v1 = vmul.f32 %v7457_v9, %v2163_v41  ;;  %v7827_v52 = vld [vmem:[#allocation2 + $0x49] sm:$0xff] }
 0x27d   : > { %2775 = vrot.lane.b32.xlu0 %v2771_v34, %s6218_s30  ;;  %v461_v34 = vmul.f32 %v7776_v14, %v459_v17  ;;  %v637_v25 = vadd.f32 %v635_v20, %v631_v13  ;;  %v654_v24 = vmul.f32 %v7827_v52, %v653_v6  ;;  %v2944_v13 = vstv %s7792_s28  ;;  %v9390_v20 = vld [vmem:[#allocation64_spill] sm:$0xff]  ;;  %s7969_s28 = sld [smem:[#allocation7 + $0xea]] }
 0x27e   : > { %v7802_v44 = vpop.permute.xlu1 %4576  ;;  %v2927_v22 = vadd.f32 %v2925_v37, %v2921_v63 }
 0x27f   : > { %9384 = vst [vmem:[#allocation40_spill] sm:$0xff] %v7802_v44  ;;  %v7804_v60 = vpop.permute.xlu0 %1602  ;;  %v9388_v44 = vld [vmem:[#allocation51_spill] sm:$0xff]  ;;  %v651_v36 = vadd.f32 %v9390_v20, %v637_v25  ;;  %v9396_v20 = vld [vmem:[#allocation62_spill] sm:$0xff] }
 0x280   : > { %9385 = vst [vmem:[#allocation31_spill] sm:$0xff] %v7804_v60  ;;  %3201 = vrot.lane.b32.xlu1 %v3197_v32, %s6218_s30  ;;  %v650_v60 = vadd.f32 %v9387_v43, %v636_v5  ;;  %v2922_v50 = vadd.f32 %v9388_v44, %v2908_v3  ;;  %v2772_v32 = vmul.f32 %v7325_v57, %v2770_v8  ;;  %v9391_v5 = vld [vmem:[#allocation55_spill] sm:$0xff]  ;;  %v7848_v3 = vld [vmem:[#allocation2 + $0xa] sm:$0xff] }
 0x281   : > { %466 = vrot.lane.b32.xlu0 %v461_v34, %s6218_s30  ;;  %v2926_v44 = vmul.f32 %v7325_v57, %v2924_v4  ;;  %v2941_v9 = vadd.f32 %v9391_v5, %v2927_v22  ;;  %v7841_v34 = vld [vmem:[#allocation2 + $0x51] sm:$0xff]  ;;  %v3198_v37 = vmul.f32 %v7848_v3, %v3196_v55  ;;  %v2945_v43 = vmul.f32 %v7762_v28, %v2944_v13 }
 0x282   : > { %v7822_v17 = vpop.permute.xlu1 %2028  ;;  %v656_v41 = vadd.f32 %v654_v24, %v650_v60  ;;  %v655_v8 = vmul.f32 %v7841_v34, %v653_v6  ;;  %v479_v6 = vstv %s7814_s4  ;;  %v2946_v55 = vmul.f32 %v7776_v14, %v2944_v13  ;;  %s7972_s4 = sld [smem:[#allocation7 + $0x9a]] }
 0x283   : > { %v7824_v40 = vpop.permute.xlu0 %1604  ;;  %v2928_v63 = vadd.f32 %v2926_v44, %v2922_v50  ;;  %v9393_v50 = vld [vmem:[#allocation59_spill] sm:$0xff]  ;;  %v2947_v22 = vadd.f32 %v2945_v43, %v2941_v9  ;;  %v2964_v24 = vstv %s7820_s11  ;;  %v480_v5 = vmul.f32 %v7370_v61, %v479_v6  ;;  %s7975_s11 = sld [smem:[#allocation7 + $0x81]] }
 0x284   : > { %9389 = vst [vmem:[#allocation42_spill] sm:$0xff] %v7824_v40  ;;  %2170 = vrot.lane.b32.xlu1 %v2165_v1, %s6218_s30  ;;  %v670_v60 = vadd.f32 %v7323_v12, %v656_v41  ;;  %v657_v1 = vadd.f32 %v655_v8, %v651_v36  ;;  %v2790_v41 = vstv %s7831_s17  ;;  %v3216_v13 = vstv %s7837_s10  ;;  %s7978_s17 = sld [smem:[#allocation7 + $0x33]]  ;;  %s7991_s10 = sld [smem:[#allocation7 + $0xa1]] }
 0x285   : > { %2777 = vrot.lane.b32.xlu0 %v2772_v32, %s6218_s30  ;;  %v2942_v25 = vadd.f32 %v9393_v50, %v2928_v63  ;;  %v2961_v36 = vadd.f32 %v9396_v20, %v2947_v22  ;;  %v2965_v63 = vmul.f32 %v7370_v61, %v2964_v24  ;;  %v3330_v22 = vstv %s7853_s19  ;;  %s7999_s19 = sld [smem:[#allocation7 + $0xce]] }
 0x286   : > { %v7844_v57 = vpop.permute.xlu1 %2030  ;;  %v671_v12 = vadd.f32 %v7361_v27, %v657_v1  ;;  %v9397_v27 = vld [vmem:[#allocation65_spill] sm:$0xff]  ;;  %v3217_v1 = vmul.f32 %v7785_v35, %v3216_v13 }
 0x287   : > { %v7846_v4 = vpop.permute.xlu0 %4594  ;;  %v2948_v9 = vadd.f32 %v2946_v55, %v2942_v25  ;;  %v2967_v50 = vadd.f32 %v2965_v63, %v2961_v36  ;;  %v2966_v25 = vmul.f32 %v7386_v58, %v2964_v24  ;;  %v2984_v55 = vstv %s7856_s20  ;;  %v7899_v24 = vld [vmem:[#allocation2 + $0x1] sm:$0xff]  ;;  %s8009_s20 = sld [smem:[#allocation7 + $0x43]] }
 0x288   : > { %9392 = vst [vmem:[#allocation35_spill] sm:$0xff] %v7846_v4  ;;  %3203 = vrot.lane.b32.xlu1 %v3198_v37, %s6218_s30  ;;  %v481_v63 = vmul.f32 %v7386_v58, %v479_v6 }
 0x289   : > { %674 = vrot.lane.b32.xlu0 %v670_v60, %s6218_s30  ;;  %v2962_v8 = vadd.f32 %v9397_v27, %v2948_v9  ;;  %v2791_v60 = vmul.f32 %v7762_v28, %v2790_v41  ;;  %v3331_v27 = vmul.f32 %v7899_v24, %v3330_v22 }
 0x28a   : > { %v7864_v32 = vpop.permute.xlu1 %4596 }
 0x28b   : > { %9394 = vst [vmem:[#allocation44_spill] sm:$0xff] %v7864_v32  ;;  %v7866_v44 = vpop.permute.xlu0 %1622 }
 0x28c   : > { %9395 = vst [vmem:[#allocation39_spill] sm:$0xff] %v7866_v44  ;;  %676 = vrot.lane.b32.xlu1 %v671_v12, %s6218_s30  ;;  %v9399_v12 = vld [vmem:[#allocation67_spill] sm:$0xff] }
 0x28d   : > { %484 = vrot.lane.b32.xlu0 %v480_v5, %s6218_s30  ;;  %v2981_v20 = vadd.f32 %v9399_v12, %v2967_v50  ;;  %v2968_v5 = vadd.f32 %v2966_v25, %v2962_v8  ;;  %v3350_v50 = vstv %s7871_s22  ;;  %v9401_v8 = vld [vmem:[#allocation48_spill] sm:$0xff]  ;;  %v3332_v12 = vmul.f32 %v7731_v59, %v3330_v22  ;;  %s8015_s22 = sld [smem:[#allocation7 + $0xba]] }
 0x28e   : > { %v7878_v37 = vpop.permute.xlu1 %2048  ;;  %v3347_v6 = vadd.f32 %v9401_v8, %v3331_v27  ;;  %v9405_v8 = vld [vmem:[#allocation17_spill] sm:$0xff] }
 0x28f   : > { %v7880_v43 = vpop.permute.xlu0 %1624 }
 0x290   : > { %9398 = vst [vmem:[#allocation46_spill] sm:$0xff] %v7880_v43  ;;  %2795 = vrot.lane.b32.xlu1 %v2791_v60, %s6218_s30  ;;  %v2985_v60 = vmul.f32 %v7827_v52, %v2984_v55  ;;  %v2792_v43 = vmul.f32 %v7776_v14, %v2790_v41  ;;  %v2986_v41 = vmul.f32 %v7841_v34, %v2984_v55  ;;  %v499_v55 = vstv %s7888_s27  ;;  %s8021_s27 = sld [smem:[#allocation7 + $0x63]] }
 0x291   : > { %3221 = vrot.lane.b32.xlu0 %v3217_v1, %s6218_s30  ;;  %v2982_v1 = vadd.f32 %v7378_v54, %v2968_v5  ;;  %v3218_v54 = vmul.f32 %v7797_v15, %v3216_v13  ;;  %v3351_v5 = vmul.f32 %v7806_v10, %v3350_v50  ;;  %v3352_v13 = vmul.f32 %v7848_v3, %v3350_v50 }
 0x292   : > { %v7894_v9 = vpop.permute.xlu1 %2050  ;;  %v2987_v25 = vadd.f32 %v2985_v60, %v2981_v20  ;;  %v9404_v20 = vld [vmem:[#allocation52_spill] sm:$0xff]  ;;  %v3370_v60 = vstv %s7892_s29  ;;  %s8023_s29 = sld [smem:[#allocation7 + $0x85]] }
 0x293   : > { %v7896_v36 = vpop.permute.xlu0 %4614  ;;  %v2988_v22 = vadd.f32 %v2986_v41, %v2982_v1  ;;  %v3353_v27 = vadd.f32 %v3351_v5, %v3347_v6  ;;  %v500_v1 = vmul.f32 %v7827_v52, %v499_v55  ;;  %v2810_v41 = vstv %s7904_s6  ;;  %v9408_v5 = vld [vmem:[#allocation60_spill] sm:$0xff]  ;;  %s8032_s6 = sld [smem:[#allocation7 + $0x17]] }
 0x294   : > { %9400 = vst [vmem:[#allocation41_spill] sm:$0xff] %v7896_v36  ;;  %486 = vrot.lane.b32.xlu1 %v481_v63, %s6218_s30  ;;  %v3001_v63 = vadd.f32 %v7399_v53, %v2987_v25  ;;  %v3236_v6 = vstv %s7909_s8  ;;  %v3371_v50 = vmul.f32 %v7785_v35, %v3370_v60  ;;  %v3390_v36 = vstv %s7925_s23  ;;  %s8044_s8 = sld [smem:[#allocation7 + $0x47]] }
 0x295   : > { %2797 = vrot.lane.b32.xlu0 %v2792_v43, %s6218_s30  ;;  %v3348_v43 = vadd.f32 %v9404_v20, %v3332_v12  ;;  %v3002_v53 = vadd.f32 %v9405_v8, %v2988_v22  ;;  %v9407_v12 = vld [vmem:[#allocation56_spill] sm:$0xff]  ;;  %v2811_v8 = vmul.f32 %v7370_v61, %v2810_v41  ;;  %s8052_s23 = sld [smem:[#allocation7 + $0x67]] }
 0x296   : > { %v7915_v40 = vpop.permute.xlu1 %4616  ;;  %v3367_v20 = vadd.f32 %v9407_v12, %v3353_v27  ;;  %v4017_v47 = vstv %s8021_s27  ;;  %s8181_s27 = sld [smem:[#allocation7 + $0xc3]] }
 0x297   : > { %9402 = vst [vmem:[#allocation49_spill] sm:$0xff] %v7915_v40  ;;  %v7917_v44 = vpop.permute.xlu0 %364 }
 0x298   : > { %9403 = vst [vmem:[#allocation43_spill] sm:$0xff] %v7917_v44  ;;  %3223 = vrot.lane.b32.xlu1 %v3218_v54, %s6218_s30  ;;  %v3354_v54 = vadd.f32 %v3352_v13, %v3348_v43  ;;  %v3373_v12 = vadd.f32 %v3371_v50, %v3367_v20  ;;  %v3843_v13 = vstv %s7922_s9  ;;  %s8046_s9 = sld [smem:[#allocation7 + $0xee]] }
 0x299   : > { %3005 = vrot.lane.b32.xlu0 %v3001_v63, %s6218_s30  ;;  %v3844_v50 = vmul.f32 %v7364_v49, %v3843_v13  ;;  %v7981_v49 = vld [vmem:[#allocation2 + $0x22] sm:$0xff] }
 0x29a   : > { %v7933_v25 = vpop.permute.xlu1 %1642  ;;  %v3368_v63 = vadd.f32 %v9408_v5, %v3354_v54 }
 0x29b   : > { %9406 = vst [vmem:[#allocation53_spill] sm:$0xff] %v7933_v25  ;;  %v7935_v40 = vpop.permute.xlu0 %2068  ;;  %v7952_v25 = vld [vmem:[#allocation2 + $0x1a] sm:$0xff] }
 0x29c   : > { %3007 = vrot.lane.b32.xlu1 %v3002_v53, %s6218_s30  ;;  %v3237_v43 = vmul.f32 %v7952_v25, %v3236_v6  ;;  %v3372_v53 = vmul.f32 %v7797_v15, %v3370_v60  ;;  %v501_v60 = vmul.f32 %v7841_v34, %v499_v55 }
 0x29d   : > { %504 = vrot.lane.b32.xlu0 %v500_v1, %s6218_s30  ;;  %v9411_v1 = vld [vmem:[#allocation63_spill] sm:$0xff] }
 0x29e   : > { %v7947_v22 = vpop.permute.xlu1 %366  ;;  %v3387_v54 = vadd.f32 %v9411_v1, %v3373_v12  ;;  %v3374_v5 = vadd.f32 %v3372_v53, %v3368_v63  ;;  %v3410_v53 = vstv %s7945_s26  ;;  %s8075_s26 = sld [smem:[#allocation7 + $0xa5]] }
 0x29f   : > { %9409 = vst [vmem:[#allocation45_spill] sm:$0xff] %v7947_v22  ;;  %v7949_v27 = vpop.permute.xlu0 %1644 }
 0x2a0   : > { %9410 = vst [vmem:[#allocation57_spill] sm:$0xff] %v7949_v27  ;;  %2815 = vrot.lane.b32.xlu1 %v2811_v8, %s6218_s30  ;;  %v3391_v27 = vmul.f32 %v7952_v25, %v3390_v36  ;;  %v9413_v8 = vld [vmem:[#allocation66_spill] sm:$0xff] }
 0x2a1   : > { %3241 = vrot.lane.b32.xlu0 %v3237_v43, %s6218_s30  ;;  %v3388_v12 = vadd.f32 %v9413_v8, %v3374_v5  ;;  %v3392_v43 = vmul.f32 %v7981_v49, %v3390_v36  ;;  %v2812_v5 = vmul.f32 %v7386_v58, %v2810_v41  ;;  %v9416_v8 = vld [vmem:[#allocation68_spill] sm:$0xff]  ;;  %v2830_v36 = vstv %s7959_s7  ;;  %s8082_s7 = sld [smem:[#allocation7 + $0x2]] }
 0x2a2   : > { %v7963_v61 = vpop.permute.xlu1 %2070  ;;  %v3393_v63 = vadd.f32 %v3391_v27, %v3387_v54  ;;  %v3238_v27 = vmul.f32 %v7981_v49, %v3236_v6  ;;  %v3845_v6 = vmul.f32 %v7401_v29, %v3843_v13  ;;  %v9422_v29 = vld [vmem:[#allocation71_spill] sm:$0xff] }
 0x2a3   : > { %v7965_v20 = vpop.permute.xlu0 %1852  ;;  %v3394_v54 = vadd.f32 %v3392_v43, %v3388_v12  ;;  %v2831_v43 = vmul.f32 %v7827_v52, %v2830_v36 }
 0x2a4   : > { %9412 = vst [vmem:[#allocation47_spill] sm:$0xff] %v7965_v20  ;;  %3848 = vrot.lane.b32.xlu1 %v3844_v50, %s6218_s30  ;;  %v3407_v20 = vadd.f32 %v9416_v8, %v3393_v63  ;;  %v3411_v50 = vmul.f32 %v7762_v28, %v3410_v53  ;;  %v3430_v63 = vstv %s7969_s28  ;;  %v3412_v8 = vmul.f32 %v7776_v14, %v3410_v53  ;;  %s8098_s28 = sld [smem:[#allocation7 + $0x22]] }
 0x2a5   : > { %506 = vrot.lane.b32.xlu0 %v501_v60, %s6218_s30  ;;  %v9417_v60 = vld [vmem:[#allocation70_spill] sm:$0xff] }
 0x2a6   : > { %v7985_v55 = vpop.permute.xlu1 %4634  ;;  %v3413_v12 = vadd.f32 %v3411_v50, %v3407_v20 }
 0x2a7   : > { %9414 = vst [vmem:[#allocation61_spill] sm:$0xff] %v7985_v55  ;;  %v7987_v1 = vpop.permute.xlu0 %1854  ;;  %v2684_v2 = vstv %s8082_s7  ;;  %s8215_s7 = sld [smem:[#allocation7 + $0xc7]] }
 0x2a8   : > { %9415 = vst [vmem:[#allocation51_spill] sm:$0xff] %v7987_v1  ;;  %2817 = vrot.lane.b32.xlu1 %v2812_v5, %s6218_s30  ;;  %v3408_v1 = vadd.f32 %v9417_v60, %v3394_v54  ;;  %v3256_v5 = vstv %s7972_s4  ;;  %v3863_v54 = vstv %s7978_s17  ;;  %v9420_v60 = vld [vmem:[#allocation34_spill] sm:$0xff]  ;;  %v3427_v13 = vadd.f32 %v9422_v29, %v3413_v12  ;;  %s8105_s4 = sld [smem:[#allocation7 + $0x9e]]  ;;  %s8114_s17 = sld [smem:[#allocation7 + $0x37]] }
 0x2a9   : > { %3243 = vrot.lane.b32.xlu0 %v3238_v27, %s6218_s30  ;;  %v2017_v27 = vstv %s7975_s11  ;;  %v3257_v55 = vmul.f32 %v7762_v28, %v3256_v5  ;;  %v8037_v12 = vld [vmem:[#allocation2 + $0x32] sm:$0xff]  ;;  %s8112_s11 = sld [smem:[#allocation7 + $0x89]] }
 0x2aa   : > { %v8001_v58 = vpop.permute.xlu1 %4636  ;;  %v3414_v20 = vadd.f32 %v3412_v8, %v3408_v1  ;;  %v2019_v53 = vmul.f32 %v7731_v59, %v2017_v27  ;;  %v3431_v29 = vmul.f32 %v8037_v12, %v3430_v63  ;;  %v2037_v1 = vstv %s7991_s10  ;;  %s8136_s10 = sld [smem:[#allocation7 + $0x93]] }
 0x2ab   : > { %9418 = vst [vmem:[#allocation64_spill] sm:$0xff] %v8001_v58  ;;  %v8003_v41 = vpop.permute.xlu0 %384  ;;  %v8018_v58 = vmul.u32 2, %v9420_v60  ;;  %v3864_v8 = vmul.f32 %v7899_v24, %v3863_v54 }
 0x2ac   : > { %9419 = vst [vmem:[#allocation55_spill] sm:$0xff] %v8003_v41  ;;  %3850 = vrot.lane.b32.xlu1 %v3845_v6, %s6218_s30  ;;  %v2035_v4 = vadd.f32 %v7844_v57, %v2019_v53  ;;  %v3433_v22 = vadd.f32 %v3431_v29, %v3427_v13  ;;  %v8059_v41 = vld [vmem:[#allocation2 + $0x3a] sm:$0xff]  ;;  %v2039_v53 = vmul.f32 %v7848_v3, %v2037_v1 }
 0x2ad   : > { %9421 = vst [vmem:[#allocation59_spill] sm:$0xff] %v8018_v58  ;;  %2835 = vrot.lane.b32.xlu0 %v2831_v43, %s6218_s30  ;;  %v8035_v60 = vadd.s32 1, %v8018_v58  ;;  %v2018_v43 = vmul.f32 %v7899_v24, %v2017_v27  ;;  %v9426_v58 = vld [vmem:[#allocation30_spill] sm:$0xff]  ;;  %v3432_v57 = vmul.f32 %v8059_v41, %v3430_v63  ;;  %v3258_v63 = vmul.f32 %v7776_v14, %v3256_v5 }
 0x2ae   : > { %v8027_v50 = vpop.permute.xlu1 %1662  ;;  %v2041_v44 = vadd.f32 %v2039_v53, %v2035_v4  ;;  %v3883_v53 = vstv %s8032_s6  ;;  %s8190_s6 = sld [smem:[#allocation7 + $0xe3]] }
 0x2af   : > { %9423 = vst [vmem:[#allocation62_spill] sm:$0xff] %v8027_v50  ;;  %v8029_v6 = vpop.permute.xlu0 %2088  ;;  %9424 = vst [vmem:[#allocation65_spill] sm:$0xff] %v8035_v60  ;;  %v9425_v50 = vld [vmem:[#allocation18_spill] sm:$0xff]  ;;  %vm340_vm10 = vcmp.eq.s32.totalorder %v9426_v58, %v8035_v60  ;;  %v2034_v27 = vadd.f32 %v7822_v17, %v2018_v43  ;;  %v2832_v17 = vmul.f32 %v7841_v34, %v2830_v36  ;;  %v3997_v60 = vstv %s8009_s20  ;;  %s8165_s20 = sld [smem:[#allocation7 + $0x6]] }
 0x2b0   : > { %v3428_v32 = vadd.f32 %v9425_v50, %v3414_v20  ;;  %3261 = vrot.lane.b32.xlu1 %v3257_v55, %s6218_s30  ;;  %v9427_v20 = vmov 0.0   ;;  %v3450_v55 = vstv %s7999_s19  ;;  %v9430_v43 = vld [vmem:[#allocation74_spill] sm:$0xff]  ;;  %v2055_v4 = vadd.f32 %v7894_v9, %v2041_v44  ;;  %s8157_s19 = sld [smem:[#allocation7 + $0xa9]] }
 0x2b1   : > { %3868 = vrot.lane.b32.xlu0 %v3864_v8, %s6218_s30  ;;  %v8057_v50 = vsel %vm340_vm10, 1.0, %v9427_v20  ;;  %v3447_v8 = vadd.f32 %v9430_v43, %v3433_v22  ;;  %v2038_v20 = vmul.f32 %v7806_v10, %v2037_v1  ;;  %v3451_v36 = vmul.f32 %v7827_v52, %v3450_v55  ;;  %v9431_v22 = vld [vmem:[#allocation20_spill] sm:$0xff] }
 0x2b2   : > { %9428 = vst [vmem:[#allocation67_spill] sm:$0xff] %v8057_v50  ;;  %v8064_v13 = vpop.permute.xlu1 %2695  ;;  %5640 = vmatprep.mubr.msk.f32.mxu1 %vm678_vm9, %v8057_v50  ;;  %v3434_v58 = vadd.f32 %v3432_v57, %v3428_v32  ;;  %v2057_v50 = vstv %s8023_s29  ;;  %v3865_v57 = vmul.f32 %v7731_v59, %v3863_v54  ;;  %v3452_v9 = vmul.f32 %v7841_v34, %v3450_v55  ;;  %v9433_v54 = vld [vmem:[#allocation69_spill] sm:$0xff]  ;;  %s8187_s29 = sld [smem:[#allocation7 + $0xbe]] }
 0x2b3   : > { %v8066_v29 = vpop.permute.xlu0 %386  ;;  %v2040_v7 = vadd.f32 %v2038_v20, %v2034_v27  ;;  %v8093_v27 = vld [vmem:[#allocation2] sm:$0xff] }
 0x2b4   : > { %9429 = vst [vmem:[#allocation48_spill] sm:$0xff] %v8066_v29  ;;  %2837 = vrot.lane.b32.xlu1 %v2832_v17, %s6218_s30  ;;  %v3276_v29 = vstv %s8015_s22  ;;  %v3448_v32 = vadd.f32 %v9431_v22, %v3434_v58  ;;  %v3998_v20 = vmul.f32 %v8093_v27, %v3997_v60  ;;  %v3453_v17 = vadd.f32 %v3451_v36, %v3447_v8  ;;  %s8168_s22 = sld [smem:[#allocation7 + $0x4b]] }
 0x2b5   : > { %3263 = vrot.lane.b32.xlu0 %v3258_v63, %s6218_s30  ;;  %v2054_v43 = vadd.f32 %v7878_v37, %v2040_v7  ;;  %v3277_v63 = vmul.f32 %v8037_v12, %v3276_v29  ;;  %v3470_v58 = vstv %s8046_s9  ;;  %v2059_v22 = vmul.f32 %v7797_v15, %v2057_v50  ;;  %v8116_v37 = vld [vmem:[#allocation2 + $0x8] sm:$0xff]  ;;  %s8192_s9 = sld [smem:[#allocation7 + $0x6b]] }
 0x2b6   : > { %v8087_v5 = vpop.permute.xlu1 %1664  ;;  %v3467_v8 = vadd.f32 %v7495_v46, %v3453_v17  ;;  %v2058_v7 = vmul.f32 %v7785_v35, %v2057_v50  ;;  %v3999_v55 = vmul.f32 %v8116_v37, %v3997_v60  ;;  %v8123_v46 = vld [vmem:[#allocation2 + $0x18] sm:$0xff]  ;;  %v4018_v17 = vmul.f32 %v7899_v24, %v4017_v47 }
 0x2b7   : > { %9432 = vst [vmem:[#allocation52_spill] sm:$0xff] %v8087_v5  ;;  %v8089_v1 = vpop.permute.xlu0 %2090  ;;  %v4014_v5 = vadd.f32 %v9433_v54, %v3998_v20  ;;  %v2061_v44 = vadd.f32 %v2059_v22, %v2055_v4  ;;  %v3884_v50 = vmul.f32 %v8123_v46, %v3883_v53  ;;  %v3278_v60 = vmul.f32 %v8059_v41, %v3276_v29 }
 0x2b8   : > { %3870 = vrot.lane.b32.xlu1 %v3865_v57, %s6218_s30  ;;  %v3454_v57 = vadd.f32 %v3452_v9, %v3448_v32  ;;  %v2060_v36 = vadd.f32 %v2058_v7, %v2054_v43  ;;  %v9435_v32 = vld [vmem:[#allocation16_spill] sm:$0xff]  ;;  %v4019_v29 = vmul.f32 %v7731_v59, %v4017_v47  ;;  %v8142_v43 = vld [vmem:[#allocation2 + $0x52] sm:$0xff] }
 0x2b9   : > { %3281 = vrot.lane.b32.xlu0 %v3277_v63, %s6218_s30  ;;  %v8127_v63 = vld [vmem:[#allocation2 + $0x4a] sm:$0xff]  ;;  %v4015_v4 = vadd.f32 %v9435_v32, %v3999_v55  ;;  %v2075_v22 = vadd.f32 %v7963_v61, %v2061_v44  ;;  %v4020_v19 = vadd.f32 %v4018_v17, %v4014_v5  ;;  %v8148_v5 = vld [vmem:[#allocation2 + $0x20] sm:$0xff] }
 0x2ba   : > { %v8119_v39 = vpop.permute.xlu1 %2697  ;;  %v3471_v54 = vmul.f32 %v8127_v63, %v3470_v58  ;;  %v3468_v9 = vadd.f32 %v7529_v33, %v3454_v57  ;;  %v2074_v48 = vadd.f32 %v7935_v40, %v2060_v36  ;;  %v3472_v33 = vmul.f32 %v8142_v43, %v3470_v58 }
 0x2bb   : > { %v8121_v20 = vpop.permute.xlu0 %404  ;;  %v3885_v40 = vmul.f32 %v8148_v5, %v3883_v53  ;;  %v2704_v57 = vstv %s8098_s28  ;;  %v4021_v58 = vadd.f32 %v4019_v29, %v4015_v4  ;;  %s8217_s28 = sld [smem:[#allocation7 + $0xe7]] }
 0x2bc   : > { %9434 = vst [vmem:[#allocation17_spill] sm:$0xff] %v8121_v20  ;;  %v2077_v20 = vstv %s8075_s26  ;;  %3888 = vrot.lane.b32.xlu1 %v3884_v50, %s6218_s30  ;;  %v3473_v21 = vadd.f32 %v3471_v54, %v3467_v8  ;;  %v9436_v8 = vld [vmem:[#allocation72_spill] sm:$0xff]  ;;  %v3474_v50 = vadd.f32 %v3472_v33, %v3468_v9  ;;  %v3296_v54 = vstv %s8105_s4  ;;  %s8213_s26 = sld [smem:[#allocation7 + $0xb3]]  ;;  %s8244_s4 = sld [smem:[#allocation7 + $0x20]] }
 0x2bd   : > { %3283 = vrot.lane.b32.xlu0 %v3278_v60, %s6218_s30  ;;  %v2079_v61 = vmul.f32 %v7981_v49, %v2077_v20  ;;  %v4034_v36 = vadd.f32 %v9436_v8, %v4020_v19  ;;  %v2078_v7 = vmul.f32 %v7952_v25, %v2077_v20  ;;  %v9437_v60 = vstv %s8044_s8  ;;  %s8201_s8 = sld [smem:[#allocation7 + $0x1b]] }
 0x2be   : > { %v8146_v44 = vpop.permute.xlu1 %1682  ;;  %v3487_v47 = vadd.f32 %v7568_v62, %v3473_v21  ;;  %v4038_v53 = vmul.f32 %v8123_v46, %v9437_v60  ;;  %v2097_v19 = vstv %s8112_s11  ;;  %v3903_v62 = vstv %s8114_s17  ;;  %v9438_v21 = vld [vmem:[#allocation73_spill] sm:$0xff]  ;;  %s8248_s11 = sld [smem:[#allocation7 + $0x4f]]  ;;  %s8264_s17 = sld [smem:[#allocation7 + $0x3b]] }
 0x2bf   : > { %v2109_v55 = vpop.permute.xlu0 %2108  ;;  %v2081_v17 = vadd.f32 %v2079_v61, %v2075_v22  ;;  %v2080_v32 = vadd.f32 %v2078_v7, %v2074_v48  ;;  %v4035_v20 = vadd.f32 %v9438_v21, %v4021_v58  ;;  %v3488_v4 = vadd.f32 %v7602_v11, %v3474_v50 }
 0x2c0   : > { %3890 = vrot.lane.b32.xlu1 %v3885_v40, %s6218_s30  ;;  %v2685_v9 = vmul.f32 %v8093_v27, %v2684_v2  ;;  %v4040_v48 = vadd.f32 %v4038_v53, %v4034_v36  ;;  %v2686_v61 = vmul.f32 %v8116_v37, %v2684_v2  ;;  %v3297_v8 = vmul.f32 %v7827_v52, %v3296_v54  ;;  %v9440_v2 = vld [vmem:[#allocation19_spill] sm:$0xff] }
 0x2c1   : > { %3491 = vrot.lane.b32.xlu0 %v3487_v47, %s6218_s30  ;;  %v2095_v22 = vadd.f32 %v8089_v1, %v2081_v17  ;;  %v2094_v33 = vadd.f32 %v8029_v6, %v2080_v32  ;;  %v9439_v47 = vmov %v9437_v60  ;;  %v2099_v1 = vmul.f32 %v7776_v14, %v2097_v19 }
 0x2c2   : > { %v2716_v29 = vpop.permute.xlu1 %2715  ;;  %v4039_v7 = vmul.f32 %v8148_v5, %v9439_v47  ;;  %v2701_v11 = vadd.f32 %v8064_v13, %v2685_v9  ;;  %v4329_v36 = vstv %s8136_s10  ;;  %v4054_v6 = vadd.f32 %v9440_v2, %v4040_v48  ;;  %s8266_s10 = sld [smem:[#allocation7 + $0x8d]] }
 0x2c3   : > { %v8175_v40 = vpop.permute.xlu0 %406  ;;  %v2702_v58 = vadd.f32 %v8119_v39, %v2686_v61  ;;  %v2098_v50 = vmul.f32 %v7762_v28, %v2097_v19  ;;  %v2705_v17 = vmul.f32 %v7899_v24, %v2704_v57  ;;  %v2101_v53 = vadd.f32 %v2099_v1, %v2095_v22 }
 0x2c4   : > { %3493 = vrot.lane.b32.xlu1 %v3488_v4, %s6218_s30  ;;  %v4041_v13 = vadd.f32 %v4039_v7, %v4035_v20  ;;  %v3904_v32 = vmul.f32 %v7785_v35, %v3903_v62  ;;  %v9441_v21 = vstv %s8052_s23  ;;  %v4330_v19 = vmul.f32 %v7899_v24, %v4329_v36  ;;  %s8234_s23 = sld [smem:[#allocation7]] }
 0x2c5   : > { %3301 = vrot.lane.b32.xlu0 %v3297_v8, %s6218_s30  ;;  %v4058_v4 = vmul.f32 %v7785_v35, %v9441_v21  ;;  %v2100_v9 = vadd.f32 %v2098_v50, %v2094_v33  ;;  %v2706_v20 = vmul.f32 %v7731_v59, %v2704_v57  ;;  %v2707_v61 = vadd.f32 %v2705_v17, %v2701_v11 }
 0x2c6   : > { %v8198_v60 = vpop.permute.xlu1 %1684  ;;  %v4055_v48 = vadd.f32 %v7493_v38, %v4041_v13  ;;  %v2117_v8 = vstv %s8157_s19  ;;  %v2724_v7 = vstv %s8165_s20  ;;  %v9442_v38 = vmov %v9441_v21  ;;  %s8272_s19 = sld [smem:[#allocation7 + $0xcb]]  ;;  %s8275_s20 = sld [smem:[#allocation7 + $0x26]] }
 0x2c7   : > { %v2111_v39 = vpop.permute.xlu0 %2110  ;;  %v4060_v47 = vadd.f32 %v4058_v4, %v4054_v6  ;;  %v2114_v33 = vadd.f32 %v2109_v55, %v2100_v9  ;;  %v2708_v57 = vadd.f32 %v2706_v20, %v2702_v58  ;;  %v4059_v11 = vmul.f32 %v7797_v15, %v9442_v38  ;;  %v8239_v4 = vld [vmem:[#allocation2 + $0x30] sm:$0xff] }
 0x2c8   : > { %v8209_v22 = vadd.f32 %v2111_v39, %v2101_v53  ;;  %3908 = vrot.lane.b32.xlu1 %v3904_v32, %s6218_s30  ;;  %v4077_v1 = vstv %s8168_s22  ;;  %v2721_v2 = vadd.f32 %v2716_v29, %v2707_v61  ;;  %v3298_v6 = vmul.f32 %v7841_v34, %v3296_v54  ;;  %s8282_s22 = sld [smem:[#allocation7 + $0x97]] }
 0x2c9   : > { %4334 = vrot.lane.b32.xlu0 %v4330_v19, %s6218_s30  ;;  %v4074_v13 = vadd.f32 %v7513_v45, %v4060_v47  ;;  %v3905_v58 = vmul.f32 %v7797_v15, %v3903_v62  ;;  %v2118_v53 = vmul.f32 %v8037_v12, %v2117_v8  ;;  %v4483_v32 = vstv %s8181_s27  ;;  %s8290_s27 = sld [smem:[#allocation7 + $0x6f]] }
 0x2ca   : > { %v2718_v50 = vpop.permute.xlu1 %2717  ;;  %v4061_v21 = vadd.f32 %v4059_v11, %v4055_v48  ;;  %v2725_v29 = vmul.f32 %v8123_v46, %v2724_v7  ;;  %v3316_v54 = vstv %s8187_s29  ;;  %v4078_v45 = vmul.f32 %v8239_v4, %v4077_v1  ;;  %s8299_s29 = sld [smem:[#allocation7 + $0x82]] }
 0x2cb   : > { %v8227_v17 = vadd.f32 %v2718_v50, %v2708_v57  ;;  %v8229_v55 = vpop.permute.xlu0 %424  ;;  %v4503_v9 = vstv %s8190_s6  ;;  %v4097_v39 = vstv %s8192_s9  ;;  %v2120_v62 = vadd.f32 %v2118_v53, %v2114_v33  ;;  %s8312_s6 = sld [smem:[#allocation7 + $0xeb]]  ;;  %s8324_s9 = sld [smem:[#allocation7 + $0x4]] }
 0x2cc   : > { %3303 = vrot.lane.b32.xlu1 %v3298_v6, %s6218_s30  ;;  %v4075_v19 = vadd.f32 %v7546_v56, %v4061_v21  ;;  %v2727_v48 = vadd.f32 %v2725_v29, %v2721_v2  ;;  %v4331_v61 = vmul.f32 %v7731_v59, %v4329_v36  ;;  %v3923_v47 = vstv %s8201_s8  ;;  %v8256_v6 = vld [vmem:[#allocation2 + $0x38] sm:$0xff]  ;;  %s8326_s8 = sld [smem:[#allocation7 + $0x24]] }
 0x2cd   : > { %3910 = vrot.lane.b32.xlu0 %v3905_v58, %s6218_s30  ;;  %v4484_v57 = vmul.f32 %v7899_v24, %v4483_v32  ;;  %v4080_v38 = vadd.f32 %v4078_v45, %v4074_v13  ;;  %v3317_v33 = vmul.f32 %v8127_v63, %v3316_v54  ;;  %v4079_v56 = vmul.f32 %v8256_v6, %v4077_v1 }
 0x2ce   : > { %v2129_v20 = vpop.permute.xlu1 %2128  ;;  %v2119_v36 = vmul.f32 %v8059_v41, %v2117_v8  ;;  %v4349_v2 = vstv %s8213_s26  ;;  %v4523_v21 = vstv %s8215_s7  ;;  %v4543_v29 = vstv %s8217_s28  ;;  %s8332_s26 = sld [smem:[#allocation7 + $0xcf]]  ;;  %s8451_s28 = sld [smem:[#allocation7 + $0xbb]] }
 0x2cf   : > { %v8253_v11 = vadd.f32 %v2129_v20, %v2120_v62  ;;  %v2736_v50 = vpop.permute.xlu0 %2735  ;;  %v4500_v13 = vadd.f32 %v7515_v51, %v4484_v57  ;;  %v4094_v53 = vadd.f32 %v7584_v26, %v4080_v38  ;;  %v4485_v8 = vmul.f32 %v7731_v59, %v4483_v32  ;;  %s8362_s7 = sld [smem:[#allocation7 + $0xb7]] }
 0x2d0   : > { %v8259_v58 = vadd.f32 %v2736_v50, %v2727_v48  ;;  %4336 = vrot.lane.b32.xlu1 %v4331_v61, %s6218_s30  ;;  %v4081_v1 = vadd.f32 %v4079_v56, %v4075_v19  ;;  %v2121_v62 = vadd.f32 %v2119_v36, %v8209_v22  ;;  %v3924_v51 = vmul.f32 %v8239_v4, %v3923_v47 }
 0x2d1   : > { %3321 = vrot.lane.b32.xlu0 %v3317_v33, %s6218_s30  ;;  %v4504_v26 = vmul.f32 %v7806_v10, %v4503_v9  ;;  %v4098_v20 = vmul.f32 %v7762_v28, %v4097_v39  ;;  %v4350_v61 = vmul.f32 %v7806_v10, %v4349_v2  ;;  %v2726_v59 = vmul.f32 %v8148_v5, %v2724_v7 }
 0x2d2   : > { %v8278_v45 = vpop.permute.xlu1 %426  ;;  %v4501_v32 = vadd.f32 %v7566_v42, %v4485_v8  ;;  %v4095_v19 = vadd.f32 %v7604_v31, %v4081_v1  ;;  %v353_v22 = vstv %s8234_s23  ;;  %v373_v33 = vstv %s8244_s4  ;;  %s8546_s23 = sld [smem:[#allocation7 + $0x28]]  ;;  %s8550_s4 = sld [smem:[#allocation7 + $0x86]] }
 0x2d3   : > { %v2131_v48 = vpop.permute.xlu0 %2130  ;;  %v4506_v38 = vadd.f32 %v4504_v26, %v4500_v13  ;;  %v4100_v50 = vadd.f32 %v4098_v20, %v4094_v53  ;;  %v2728_v10 = vadd.f32 %v2726_v59, %v8227_v17  ;;  %v4505_v42 = vmul.f32 %v7848_v3, %v4503_v9 }
 0x2d4   : > { %v8293_v57 = vadd.f32 %v2131_v48, %v2121_v62  ;;  %3928 = vrot.lane.b32.xlu1 %v3924_v51, %s6218_s30  ;;  %v4099_v31 = vmul.f32 %v7776_v14, %v4097_v39  ;;  %v4117_v7 = vstv %s8248_s11  ;;  %v3318_v36 = vmul.f32 %v8142_v43, %v3316_v54  ;;  %s8344_s11 = sld [smem:[#allocation7 + $0x1f]] }
 0x2d5   : > { %4354 = vrot.lane.b32.xlu0 %v4350_v61, %s6218_s30  ;;  %v4520_v13 = vadd.f32 %v7586_v18, %v4506_v38  ;;  %v4114_v53 = vadd.f32 %v7637_v16, %v4100_v50  ;;  %v3925_v1 = vmul.f32 %v8256_v6, %v3923_v47  ;;  %v4507_v9 = vadd.f32 %v4505_v42, %v4501_v32  ;;  %v8320_v16 = vld [vmem:[#allocation2 + $0x48] sm:$0xff]  ;;  %v8349_v42 = vld [vmem:[#allocation2 + $0x50] sm:$0xff] }
 0x2d6   : > { %v2738_v56 = vpop.permute.xlu1 %2737  ;;  %v4101_v62 = vadd.f32 %v4099_v31, %v4095_v19  ;;  %v3943_v39 = vstv %s8264_s17  ;;  %v2137_v54 = vstv %s8266_s10  ;;  %v4524_v18 = vmul.f32 %v7785_v35, %v4523_v21  ;;  %s8364_s17 = sld [smem:[#allocation7 + $0xa2]]  ;;  %s8595_s10 = sld [smem:[#allocation7 + $0x1]] }
 0x2d7   : > { %v8307_v8 = vadd.f32 %v2738_v56, %v2728_v10  ;;  %v8309_v17 = vpop.permute.xlu0 %2338  ;;  %v4118_v51 = vmul.f32 %v8320_v16, %v4117_v7  ;;  %v4563_v26 = vstv %s8272_s19  ;;  %v2744_v47 = vstv %s8275_s20  ;;  %v9443_v56 = vld [vmem:[#allocation25_spill] sm:$0xff]  ;;  %s8615_s19 = sld [smem:[#allocation7 + $0x2c]]  ;;  %s8617_s20 = sld [smem:[#allocation7 + $0x21]] }
 0x2d8   : > { %3323 = vrot.lane.b32.xlu1 %v3318_v36, %s6218_s30  ;;  %v4521_v20 = vadd.f32 %v7618_v23, %v4507_v9  ;;  %v4115_v48 = vadd.f32 %v7660_v30, %v4101_v62  ;;  %v4351_v59 = vmul.f32 %v7848_v3, %v4349_v2  ;;  %v4369_v32 = vstv %s8282_s22  ;;  %s8372_s22 = sld [smem:[#allocation7 + $0xef]] }
 0x2d9   : > { %3930 = vrot.lane.b32.xlu0 %v3925_v1, %s6218_s30  ;;  %v4526_v19 = vadd.f32 %v4524_v18, %v4520_v13  ;;  %v4120_v38 = vadd.f32 %v4118_v51, %v4114_v53  ;;  %v3944_v10 = vmul.f32 %v7762_v28, %v3943_v39  ;;  %v2138_v23 = vmul.f32 %v7827_v52, %v2137_v54 }
 0x2da   : > { %v8334_v61 = vpop.permute.xlu1 %2340  ;;  %v4525_v30 = vmul.f32 %v7797_v15, %v4523_v21  ;;  %v4119_v3 = vmul.f32 %v8349_v42, %v4117_v7  ;;  %v4137_v2 = vstv %s8290_s27  ;;  %v2745_v31 = vmul.f32 %v7785_v35, %v2744_v47  ;;  %s8380_s27 = sld [smem:[#allocation7 + $0x8]] }
 0x2db   : > { %v8338_v50 = vpop.permute.xlu0 %444  ;;  %v4540_v28 = vadd.f32 %v7658_v0, %v4526_v19  ;;  %v4134_v36 = vadd.f32 %v9443_v56, %v4120_v38  ;;  %v2140_v13 = vadd.f32 %v2138_v23, %v8253_v11  ;;  %v3170_v21 = vstv %s8299_s29  ;;  %v9446_v56 = vld [vmem:[#allocation27_spill] sm:$0xff]  ;;  %s8640_s29 = sld [smem:[#allocation7 + $0x5]] }
 0x2dc   : > { %4356 = vrot.lane.b32.xlu1 %v4351_v59, %s6218_s30  ;;  %v4527_v7 = vadd.f32 %v4525_v30, %v4521_v20  ;;  %v4121_v53 = vadd.f32 %v4119_v3, %v4115_v48  ;;  %v2747_v9 = vadd.f32 %v2745_v31, %v8259_v58  ;;  %v4370_v62 = vmul.f32 %v7785_v35, %v4369_v32  ;;  %v9444_v48 = vld [vmem:[#allocation22_spill] sm:$0xff]  ;;  %v9445_v58 = vld [vmem:[#allocation28_spill] sm:$0xff] }
 0x2dd   : > { %3948 = vrot.lane.b32.xlu0 %v3944_v10, %s6218_s30  ;;  %v4544_v0 = vmul.f32 %v7952_v25, %v4543_v29  ;;  %v4138_v11 = vmul.f32 %v7827_v52, %v4137_v2  ;;  %v3945_v20 = vmul.f32 %v7776_v14, %v3943_v39  ;;  %v4583_v19 = vstv %s8312_s6  ;;  %s8675_s6 = sld [smem:[#allocation7 + $0x9]] }
 0x2de   : > { %v2149_v1 = vpop.permute.xlu1 %2148  ;;  %v4541_v59 = vadd.f32 %v9444_v48, %v4527_v7  ;;  %v4135_v35 = vadd.f32 %v9445_v58, %v4121_v53  ;;  %v393_v23 = vstv %s8324_s9  ;;  %v413_v14 = vstv %s8326_s8  ;;  %s8685_s9 = sld [smem:[#allocation7 + $0x29]]  ;;  %s8698_s8 = sld [smem:[#allocation7 + $0xd]] }
 0x2df   : > { %v8374_v18 = vadd.f32 %v2149_v1, %v2140_v13  ;;  %v2756_v51 = vpop.permute.xlu0 %2755  ;;  %v4546_v52 = vadd.f32 %v4544_v0, %v4540_v28  ;;  %v4140_v10 = vadd.f32 %v4138_v11, %v4134_v36  ;;  %v4545_v39 = vmul.f32 %v7981_v49, %v4543_v29  ;;  %v9447_v13 = vld [vmem:[#allocation32_spill] sm:$0xff]  ;;  %v8417_v0 = vld [vmem:[#allocation2 + $0x31] sm:$0xff] }
 0x2e0   : > { %v8382_v38 = vadd.f32 %v2756_v51, %v2747_v9  ;;  %4374 = vrot.lane.b32.xlu1 %v4370_v62, %s6218_s30  ;;  %v4139_v30 = vmul.f32 %v7841_v34, %v4137_v2  ;;  %v4603_v3 = vstv %s8332_s26  ;;  %v4371_v28 = vmul.f32 %v7797_v15, %v4369_v32  ;;  %s8715_s26 = sld [smem:[#allocation7 + $0x2d]] }
 0x2e1   : > { %3950 = vrot.lane.b32.xlu0 %v3945_v20, %s6218_s30  ;;  %v4560_v36 = vadd.f32 %v9446_v56, %v4546_v52  ;;  %v4154_v7 = vadd.f32 %v9447_v13, %v4140_v10  ;;  %v2139_v29 = vmul.f32 %v7841_v34, %v2137_v54  ;;  %v3963_v1 = vstv %s8344_s11  ;;  %v9448_v20 = vld [vmem:[#allocation50_spill] sm:$0xff]  ;;  %v8434_v56 = vld [vmem:[#allocation2 + $0x39] sm:$0xff]  ;;  %s8749_s11 = sld [smem:[#allocation7 + $0x3]] }
 0x2e2   : > { %v3182_v31 = vpop.permute.xlu1 %3181  ;;  %v4547_v2 = vadd.f32 %v4545_v39, %v4541_v59  ;;  %v4141_v9 = vadd.f32 %v4139_v30, %v4135_v35  ;;  %v354_v32 = vmul.f32 %v8093_v27, %v353_v22  ;;  %v2746_v62 = vmul.f32 %v7797_v15, %v2744_v47  ;;  %v9449_v59 = vld [vmem:[#allocation36_spill] sm:$0xff]  ;;  %v9450_v35 = vld [vmem:[#allocation43_spill] sm:$0xff] }
 0x2e3   : > { %v8404_v53 = vpop.permute.xlu0 %446  ;;  %v4564_v11 = vmul.f32 %v8417_v0, %v4563_v26  ;;  %v2141_v34 = vadd.f32 %v2139_v29, %v8293_v57  ;;  %v4389_v54 = vstv %s8362_s7  ;;  %v3190_v51 = vstv %s8364_s17  ;;  %v9451_v29 = vld [vmem:[#allocation58_spill] sm:$0xff]  ;;  %s8772_s7 = sld [smem:[#allocation7 + $0xa6]]  ;;  %s8774_s17 = sld [smem:[#allocation7 + $0x23]] }
 0x2e4   : > { %4376 = vrot.lane.b32.xlu1 %v4371_v28, %s6218_s30  ;;  %v4561_v48 = vadd.f32 %v9448_v20, %v4547_v2  ;;  %v4155_v58 = vadd.f32 %v9449_v59, %v4141_v9  ;;  %v370_v15 = vadd.f32 %v9450_v35, %v354_v32  ;;  %v2748_v52 = vadd.f32 %v2746_v62, %v8307_v8 }
 0x2e5   : > { %4158 = vrot.lane.b32.xlu0 %v4154_v7, %s6218_s30  ;;  %v4566_v10 = vadd.f32 %v4564_v11, %v4560_v36  ;;  %v4623_v39 = vstv %s8372_s22  ;;  %v3964_v28 = vmul.f32 %v8320_v16, %v3963_v1  ;;  %v4565_v13 = vmul.f32 %v8434_v56, %v4563_v26  ;;  %s8791_s22 = sld [smem:[#allocation7 + $0x7]] }
 0x2e6   : > { %v2151_v47 = vpop.permute.xlu1 %2150  ;;  %v374_v7 = vmul.f32 %v7899_v24, %v373_v33  ;;  %v2157_v36 = vstv %s8385_s0  ;;  %v433_v9 = vstv %s8380_s27  ;;  %v2764_v32 = vstv %s8390_s1  ;;  %s8525_s0 = sld [smem:[#allocation7 + $0x9f]]  ;;  %s8800_s27 = sld [smem:[#allocation7 + $0xe]] }
 0x2e7   : > { %v8431_v30 = vadd.f32 %v2151_v47, %v2141_v34  ;;  %v2758_v57 = vpop.permute.xlu0 %2757  ;;  %v4580_v2 = vadd.f32 %v9451_v29, %v4566_v10  ;;  %v3983_v62 = vstv %s8392_s2  ;;  %v4567_v26 = vadd.f32 %v4565_v13, %v4561_v48  ;;  %v9452_v48 = vld [vmem:[#allocation40_spill] sm:$0xff]  ;;  %s8540_s2 = sld [smem:[#allocation7 + $0x2a]]  ;;  %s8572_s1 = sld [smem:[#allocation7 + $0xbf]] }
 0x2e8   : > { %v8442_v8 = vadd.f32 %v2758_v57, %v2748_v52  ;;  %4160 = vrot.lane.b32.xlu1 %v4155_v58, %s6218_s30  ;;  %v376_v11 = vadd.f32 %v374_v7, %v370_v15  ;;  %v4390_v20 = vmul.f32 %v7952_v25, %v4389_v54  ;;  %v4409_v59 = vstv %s8400_s21  ;;  %v9453_v25 = vld [vmem:[#allocation55_spill] sm:$0xff]  ;;  %s8584_s21 = sld [smem:[#allocation7 + $0xc]] }
 0x2e9   : > { %3968 = vrot.lane.b32.xlu0 %v3964_v28, %s6218_s30  ;;  %v4584_v58 = vmul.f32 %v8037_v12, %v4583_v19  ;;  %v3171_v35 = vmul.f32 %v7899_v24, %v3170_v21  ;;  %v3965_v52 = vmul.f32 %v8349_v42, %v3963_v1  ;;  %v2158_v10 = vmul.f32 %v8127_v63, %v2157_v36 }
 0x2ea   : > { %v3184_v34 = vpop.permute.xlu1 %3183  ;;  %v4581_v57 = vadd.f32 %v9452_v48, %v4567_v26  ;;  %v355_v15 = vmul.f32 %v8116_v37, %v353_v22  ;;  %v390_v28 = vadd.f32 %v9453_v25, %v376_v11  ;;  %v2765_v13 = vmul.f32 %v8239_v4, %v2764_v32  ;;  %v9454_v26 = vld [vmem:[#allocation45_spill] sm:$0xff] }
 0x2eb   : > { %v8461_v47 = vpop.permute.xlu0 %464  ;;  %v4586_v7 = vadd.f32 %v4584_v58, %v4580_v2  ;;  %v4585_v24 = vmul.f32 %v8059_v41, %v4583_v19  ;;  %v3187_v1 = vadd.f32 %v3182_v31, %v3171_v35  ;;  %v2160_v29 = vadd.f32 %v2158_v10, %v8374_v18  ;;  %v9455_v58 = vld [vmem:[#allocation35_spill] sm:$0xff]  ;;  %v8491_v10 = vld [vmem:[#allocation2 + $0x2] sm:$0xff] }
 0x2ec   : > { %4394 = vrot.lane.b32.xlu1 %v4390_v20, %s6218_s30  ;;  %v371_v22 = vadd.f32 %v9454_v26, %v355_v15  ;;  %v394_v11 = vmul.f32 %v8123_v46, %v393_v23  ;;  %v2767_v48 = vadd.f32 %v2765_v13, %v8382_v38  ;;  %v4391_v2 = vmul.f32 %v7981_v49, %v4389_v54  ;;  %v8496_v25 = vld [vmem:[#allocation2 + $0x9] sm:$0xff]  ;;  %v9456_v26 = vld [vmem:[#allocation44_spill] sm:$0xff] }
 0x2ed   : > { %3970 = vrot.lane.b32.xlu0 %v3965_v52, %s6218_s30  ;;  %v4600_v19 = vadd.f32 %v9455_v58, %v4586_v7  ;;  %v8488_v52 = vld [vmem:[#allocation2 + $0x49] sm:$0xff]  ;;  %v3191_v15 = vmul.f32 %v8491_v10, %v3190_v51  ;;  %v4587_v38 = vadd.f32 %v4585_v24, %v4581_v57  ;;  %v375_v49 = vmul.f32 %v8496_v25, %v373_v33 }
 0x2ee   : > { %v2169_v20 = vpop.permute.xlu1 %2168  ;;  %v3984_v18 = vmul.f32 %v8488_v52, %v3983_v62  ;;  %v396_v54 = vadd.f32 %v394_v11, %v390_v28  ;;  %v4604_v7 = vmul.f32 %v8488_v52, %v4603_v3  ;;  %v4429_v24 = vstv %s8451_s28  ;;  %v9457_v28 = vld [vmem:[#allocation17_spill] sm:$0xff]  ;;  %s8802_s28 = sld [smem:[#allocation7 + $0x8a]] }
 0x2ef   : > { %v8486_v31 = vadd.f32 %v2169_v20, %v2160_v29  ;;  %v2776_v35 = vpop.permute.xlu0 %2775  ;;  %v3172_v29 = vmul.f32 %v8496_v25, %v3170_v21  ;;  %v3193_v57 = vadd.f32 %v3191_v15, %v3187_v1  ;;  %v4601_v20 = vadd.f32 %v9456_v26, %v4587_v38  ;;  %v9458_v38 = vld [vmem:[#allocation48_spill] sm:$0xff] }
 0x2f0   : > { %v8501_v13 = vadd.f32 %v2776_v35, %v2767_v48  ;;  %4396 = vrot.lane.b32.xlu1 %v4391_v2, %s6218_s30  ;;  %v377_v33 = vadd.f32 %v375_v49, %v371_v22  ;;  %v410_v11 = vadd.f32 %v9457_v28, %v396_v54  ;;  %v4410_v2 = vmul.f32 %v8417_v0, %v4409_v59  ;;  %v8531_v54 = vld [vmem:[#allocation2 + $0x19] sm:$0xff] }
 0x2f1   : > { %3988 = vrot.lane.b32.xlu0 %v3984_v18, %s6218_s30  ;;  %v4606_v58 = vadd.f32 %v4604_v7, %v4600_v19  ;;  %v8521_v18 = vld [vmem:[#allocation2 + $0x51] sm:$0xff]  ;;  %v2159_v15 = vmul.f32 %v8142_v43, %v2157_v36  ;;  %v414_v19 = vmul.f32 %v8531_v54, %v413_v14  ;;  %v9459_v36 = vld [vmem:[#allocation41_spill] sm:$0xff] }
 0x2f2   : > { %v3202_v48 = vpop.permute.xlu1 %3201  ;;  %v3985_v1 = vmul.f32 %v8521_v18, %v3983_v62  ;;  %v4605_v22 = vmul.f32 %v8521_v18, %v4603_v3  ;;  %v391_v49 = vadd.f32 %v9458_v38, %v377_v33  ;;  %v2766_v62 = vmul.f32 %v8256_v6, %v2764_v32 }
 0x2f3   : > { %v8517_v35 = vadd.f32 %v3202_v48, %v3193_v57  ;;  %v8519_v21 = vpop.permute.xlu0 %466  ;;  %v4620_v7 = vadd.f32 %v9459_v36, %v4606_v58  ;;  %v395_v3 = vmul.f32 %v8148_v5, %v393_v23  ;;  %v3188_v57 = vadd.f32 %v3184_v34, %v3172_v29  ;;  %v8562_v58 = vld [vmem:[#allocation2 + $0xa] sm:$0xff] }
 0x2f4   : > { %4414 = vrot.lane.b32.xlu1 %v4410_v2, %s6218_s30  ;;  %v2161_v26 = vadd.f32 %v2159_v15, %v8431_v30  ;;  %v4607_v33 = vadd.f32 %v4605_v22, %v4601_v20  ;;  %v416_v28 = vadd.f32 %v414_v19, %v410_v11  ;;  %v2768_v48 = vadd.f32 %v2766_v62, %v8442_v8  ;;  %v9460_v11 = vld [vmem:[#allocation49_spill] sm:$0xff] }
 0x2f5   : > { %3990 = vrot.lane.b32.xlu0 %v3985_v1, %s6218_s30  ;;  %v4411_v2 = vmul.f32 %v8434_v56, %v4409_v59  ;;  %v4624_v23 = vmul.f32 %v8127_v63, %v4623_v39  ;;  %v4430_v30 = vmul.f32 %v8037_v12, %v4429_v24  ;;  %v3192_v20 = vmul.f32 %v8562_v58, %v3190_v51  ;;  %v9461_v62 = vld [vmem:[#allocation61_spill] sm:$0xff] }
 0x2f6   : > { %v2171_v32 = vpop.permute.xlu1 %2170  ;;  %v4621_v8 = vadd.f32 %v9460_v11, %v4607_v33  ;;  %v397_v1 = vadd.f32 %v395_v3, %v391_v49  ;;  %v430_v59 = vadd.f32 %v8229_v55, %v416_v28  ;;  %v4625_v51 = vmul.f32 %v8142_v43, %v4623_v39  ;;  %v8587_v39 = vld [vmem:[#allocation2 + $0x21] sm:$0xff] }
 0x2f7   : > { %v8559_v34 = vadd.f32 %v2171_v32, %v2161_v26  ;;  %v2778_v29 = vpop.permute.xlu0 %2777  ;;  %v4626_v22 = vadd.f32 %v4624_v23, %v4620_v7  ;;  %v3194_v12 = vadd.f32 %v3192_v20, %v3188_v57  ;;  %v434_v55 = vmul.f32 %v8239_v4, %v433_v9  ;;  %v9462_v32 = vld [vmem:[#allocation64_spill] sm:$0xff] }
 0x2f8   : > { %v8569_v15 = vadd.f32 %v2778_v29, %v2768_v48  ;;  %4416 = vrot.lane.b32.xlu1 %v4411_v2, %s6218_s30  ;;  %v411_v38 = vadd.f32 %v8175_v40, %v397_v1  ;;  %v4431_v19 = vmul.f32 %v8059_v41, %v4429_v24  ;;  %v4449_v57 = vstv %s8525_s0  ;;  %s8818_s0 = sld [smem:[#allocation7 + $0x2e]] }
 0x2f9   : > { %4434 = vrot.lane.b32.xlu0 %v4430_v30, %s6218_s30  ;;  %v4640_v36 = vadd.f32 %v9461_v62, %v4626_v22  ;;  %v4627_v26 = vadd.f32 %v4625_v51, %v4621_v8  ;;  %v415_v40 = vmul.f32 %v8587_v39, %v413_v14  ;;  %v436_v33 = vadd.f32 %v434_v55, %v430_v59 }
 0x2fa   : > { %v3204_v49 = vpop.permute.xlu1 %3203  ;;  %v2784_v41 = vstv %s8540_s2  ;;  %v453_v24 = vstv %s8546_s23  ;;  %v3210_v28 = vstv %s8550_s4  ;;  %v4450_v30 = vmul.f32 %v8488_v52, %v4449_v57  ;;  %s8821_s2 = sld [smem:[#allocation7 + $0xaa]]  ;;  %s8823_s23 = sld [smem:[#allocation7 + $0x27]] }
 0x2fb   : > { %v3208_v7 = vadd.f32 %v3204_v49, %v3194_v12  ;;  %v675_v3 = vpop.permute.xlu0 %674  ;;  %v4641_v48 = vadd.f32 %v9462_v32, %v4627_v26  ;;  %v417_v2 = vadd.f32 %v415_v40, %v411_v38  ;;  %v450_v23 = vadd.f32 %v8338_v50, %v436_v33  ;;  %s8845_s4 = sld [smem:[#allocation7 + $0x83]] }
 0x2fc   : > { %5612 = vmatprep.mubr.msk.f32.mxu0 %vm678_vm9, %v675_v3  ;;  %4436 = vrot.lane.b32.xlu1 %v4431_v19, %s6218_s30  ;;  %v2785_v20 = vmul.f32 %v8417_v0, %v2784_v41  ;;  %v454_v8 = vmul.f32 %v8417_v0, %v453_v24  ;;  %v3211_v1 = vmul.f32 %v8531_v54, %v3210_v28  ;;  %v4469_v59 = vstv %s8572_s1  ;;  %s8853_s1 = sld [smem:[#allocation7 + $0x8e]] }
 0x2fd   : > { %4644 = vrot.lane.b32.xlu0 %v4640_v36, %s6218_s30  ;;  %v431_v11 = vadd.f32 %v8278_v45, %v417_v2  ;;  %v9463_v50 = vmov 1.0|1.0   ;;  %v435_v45 = vmul.f32 %v8256_v6, %v433_v9  ;;  %v4451_v49 = vmul.f32 %v8521_v18, %v4449_v57 }
 0x2fe   : > { %v677_v14 = vpop.permute.xlu1 %676  ;;  %v2787_v12 = vadd.f32 %v2785_v20, %v8501_v13  ;;  %v456_v51 = vadd.f32 %v454_v8, %v450_v23  ;;  %v3213_v55 = vadd.f32 %v3211_v1, %v8517_v35  ;;  %v473_v19 = vstv %s8584_s21  ;;  %v9465_v1 = vld [vmem:[#allocation26_spill] sm:$0xff]  ;;  %s8866_s21 = sld [smem:[#allocation7 + $0xb]] }
 0x2ff   : > { %v485_v29 = vpop.permute.xlu0 %484  ;;  %5613 = vmatmul.mubr.msk.f32.vlgmr.msra.gmra.mrb[0].mxu0 %vm678_vm9, %v677_v14  ;;  %v4470_v13 = vmul.f32 %v8127_v63, %v4469_v59  ;;  %v437_v3 = vadd.f32 %v435_v45, %v431_v11  ;;  %v2786_v9 = vmul.f32 %v8434_v56, %v2784_v41  ;;  %v1531_v33 = vstv %s8595_s10  ;;  %s8878_s10 = sld [smem:[#allocation7 + $0xa3]] }
 0x300   : > { %4646 = vrot.lane.b32.xlu1 %v4641_v48, %s6218_s30  ;;  %5807 = vmatpush3.bf16.msk.msra.mxu0 %vm7027_vm8, %v9463_v50  ;;  %v470_v26 = vadd.f32 %v8461_v47, %v456_v51  ;;  %v474_v57 = vmul.f32 %v8320_v16, %v473_v19  ;;  %v4471_v47 = vmul.f32 %v8142_v43, %v4469_v59  ;;  %v493_v20 = vstv %s8615_s19  ;;  %v8656_v51 = vld [vmem:[#allocation2 + $0x1] sm:$0xff]  ;;  %s8883_s19 = sld [smem:[#allocation7 + $0xae]] }
 0x301   : > { %4454 = vrot.lane.b32.xlu0 %v4450_v30, %s6218_s30  ;;  %v451_v35 = vadd.f32 %v8404_v53, %v437_v3  ;;  %v2788_v63 = vadd.f32 %v2786_v9, %v8569_v15  ;;  %v3212_v2 = vmul.f32 %v8587_v39, %v3210_v28  ;;  %v455_v41 = vmul.f32 %v8434_v56, %v453_v24 }
 0x302   : > { %v2796_v38 = vpop.permute.xlu1 %2795  ;;  %v476_v23 = vadd.f32 %v474_v57, %v470_v26  ;;  %v1532_v53 = vmul.f32 %v8093_v27, %v1531_v33  ;;  %v1551_v11 = vstv %s8617_s20  ;;  %v494_v45 = vmul.f32 %v8488_v52, %v493_v20  ;;  %v9466_v26 = vld [vmem:[#allocation23_spill] sm:$0xff]  ;;  %s8889_s20 = sld [smem:[#allocation7 + $0x2b]] }
 0x303   : > { %v8625_v62 = vadd.f32 %v2796_v38, %v2787_v12  ;;  %v3222_v36 = vpop.permute.xlu0 %3221  ;;  %v3214_v30 = vadd.f32 %v3212_v2, %v3208_v7  ;;  %v457_v15 = vadd.f32 %v455_v41, %v451_v35  ;;  %v1552_v27 = vmul.f32 %v8656_v51, %v1551_v11  ;;  %v9467_v35 = vld [vmem:[#allocation21_spill] sm:$0xff] }
 0x304   : > { %v8629_v40 = vadd.f32 %v3222_v36, %v3213_v55  ;;  %4456 = vrot.lane.b32.xlu1 %v4451_v49, %s6218_s30  ;;  %v490_v8 = vadd.f32 %v485_v29, %v476_v23  ;;  %v1548_v28 = vadd.f32 %v9465_v1, %v1532_v53  ;;  %v475_v7 = vmul.f32 %v8349_v42, %v473_v19 }
 0x305   : > { %4474 = vrot.lane.b32.xlu0 %v4470_v13, %s6218_s30  ;;  %v471_v24 = vadd.f32 %v8519_v21, %v457_v15  ;;  %v1533_v36 = vmul.f32 %v8116_v37, %v1531_v33  ;;  %v1571_v13 = vstv %s8640_s29  ;;  %v1553_v2 = vmul.f32 %v8496_v25, %v1551_v11  ;;  %s8903_s29 = sld [smem:[#allocation7 + $0x87]] }
 0x306   : > { %v487_v32 = vpop.permute.xlu1 %486  ;;  %v496_v38 = vadd.f32 %v494_v45, %v490_v8  ;;  %v1554_v55 = vadd.f32 %v1552_v27, %v1548_v28  ;;  %v1572_v19 = vmul.f32 %v8123_v46, %v1571_v13  ;;  %v495_v37 = vmul.f32 %v8521_v18, %v493_v20 }
 0x307   : > { %v2798_v48 = vpop.permute.xlu0 %2797  ;;  %v477_v21 = vadd.f32 %v475_v7, %v471_v24  ;;  %v1549_v57 = vadd.f32 %v9467_v35, %v1533_v36  ;;  %v1573_v11 = vmul.f32 %v8148_v5, %v1571_v13  ;;  %v1611_v7 = vstv %s8675_s6  ;;  %s8949_s6 = sld [smem:[#allocation7 + $0xa7]] }
 0x308   : > { %v8643_v14 = vadd.f32 %v2798_v48, %v2788_v63  ;;  %4476 = vrot.lane.b32.xlu1 %v4471_v47, %s6218_s30  ;;  %s8659_s30 = sld [smem:[#allocation7 + $0x25]]  ;;  %v1568_v9 = vadd.f32 %v9466_v26, %v1554_v55  ;;  %v1612_v5 = vmul.f32 %v8239_v4, %v1611_v7  ;;  %v1631_v35 = vstv %s8685_s9  ;;  %s8968_s9 = sld [smem:[#allocation7 + $0x2f]] }
 0x309   : > { %v491_v63 = vadd.f32 %v487_v32, %v477_v21  ;;  %v1555_v41 = vadd.f32 %v1553_v2, %v1549_v57  ;;  %v1632_v4 = vmul.f32 %v8417_v0, %v1631_v35 }
 0x30a   : > { %v3224_v43 = vpop.permute.xlu1 %3223  ;;  %v1574_v33 = vadd.f32 %v1572_v19, %v1568_v9 }
 0x30b   : > { %v8650_v59 = vadd.f32 %v3224_v43, %v3214_v30  ;;  %v8652_v12 = vpop.permute.xlu0 %3005  ;;  %v497_v32 = vadd.f32 %v495_v37, %v491_v63  ;;  %v9468_v30 = vld [vmem:[#allocation29_spill] sm:$0xff]  ;;  %v9469_v43 = vld [vmem:[#allocation24_spill] sm:$0xff]  ;;  %v9472_v63 = vld [vmem:[#allocation39_spill] sm:$0xff] }
 0x30c   : > { %v1588_v15 = vadd.f32 %v9468_v30, %v1574_v33  ;;  %v1569_v46 = vadd.f32 %v9469_v43, %v1555_v41  ;;  %v9473_v37 = vld [vmem:[#allocation42_spill] sm:$0xff]  ;;  %v1613_v30 = vmul.f32 %v8256_v6, %v1611_v7  ;;  %v1651_v43 = vstv %s8698_s8  ;;  %s8979_s8 = sld [smem:[#allocation7 + $0x8b]] }
 0x30d   : > { %v9474_v41 = vld [vmem:[#allocation30_spill] sm:$0xff] }
 0x30e   : > { %v8662_v29 = vpop.permute.xlu1 %3007  ;;  %v1591_v23 = vstv %s8659_s30  ;;  %v1575_v27 = vadd.f32 %v1573_v11, %v1569_v46  ;;  %v9480_v7 = vld [vmem:[#allocation46_spill] sm:$0xff]  ;;  %s8944_s30 = sld [smem:[#allocation7 + $0xf]] }
 0x30f   : > { %v505_v49 = vpop.permute.xlu0 %504  ;;  %v1592_v28 = vmul.f32 %v8531_v54, %v1591_v23 }
 0x310   : > { %v510_v3 = vadd.f32 %v505_v49, %v496_v38  ;;  %v9470_v38 = vld [vmem:[#allocation31_spill] sm:$0xff]  ;;  %v9471_v49 = vld [vmem:[#allocation54_spill] sm:$0xff] }
 0x311   : > { %v1594_v24 = vadd.f32 %v1592_v28, %v1588_v15  ;;  %v1589_v36 = vadd.f32 %v9471_v49, %v1575_v27  ;;  %v9477_v27 = vld [vmem:[#allocation33_spill] sm:$0xff] }
 0x312   : > { %5619 = vmatprep.mubr.msk.f32.mxu0 %vm678_vm9, %v510_v3  ;;  %v8669_v47 = vpop.permute.xlu1 %2815  ;;  %v1593_v3 = vmul.f32 %v8587_v39, %v1591_v23 }
 0x313   : > { %v8672_v48 = vpop.permute.xlu0 %3241  ;;  %v1608_v55 = vadd.f32 %v9470_v38, %v1594_v24  ;;  %v9476_v24 = vld [vmem:[#allocation65_spill] sm:$0xff]  ;;  %v8725_v38 = vadd.s32 24, %v9474_v41 }
 0x314   : > { %v1595_v9 = vadd.f32 %v1593_v3, %v1589_v36  ;;  %vm341_vm11 = vcmp.eq.s32.totalorder %v9477_v27, %v9476_v24  ;;  %v3877_v27 = vstv %s8791_s22  ;;  %s5110_s22 = sshll.u32 %s6381_s5, 7 }
 0x315   : > { %v1614_v26 = vadd.f32 %v1612_v5, %v1608_v55  ;;  %9478 = vst [vmem:[#allocation60_spill] sm:$0xff] %v8725_v38  ;;  %v9479_v55 = vld [vmem:[#allocation53_spill] sm:$0xff]  ;;  %v1652_v5 = vmul.f32 %v8320_v16, %v1651_v43  ;;  %vm343_vm13 = vcmp.eq.s32.totalorder %v8725_v38, %v9476_v24 }
 0x316   : > { %v8679_v53 = vpop.permute.xlu1 %3848  ;;  %v1609_v33 = vadd.f32 %v9473_v37, %v1595_v9 }
 0x317   : > { %v507_v8 = vpop.permute.xlu0 %506  ;;  %v1628_v19 = vadd.f32 %v9472_v63, %v1614_v26  ;;  %v9481_v26 = vmov 0.0   ;;  %v1633_v63 = vmul.f32 %v8434_v56, %v1631_v35  ;;  %v9485_v35 = vld [vmem:[#allocation62_spill] sm:$0xff] }
 0x318   : > { %v511_v1 = vadd.f32 %v507_v8, %v497_v32  ;;  %v8712_v32 = vadd.s32 16, %v9474_v41  ;;  %v1615_v28 = vadd.f32 %v1613_v30, %v1609_v33  ;;  %v8737_v9 = vsel %vm341_vm11, 1.0, %v9481_v26 }
 0x319   : > { %v1634_v8 = vadd.f32 %v1632_v4, %v1628_v19  ;;  %9482 = vst [vmem:[#allocation63_spill] sm:$0xff] %v8737_v9  ;;  %v1671_v30 = vstv %s8715_s26  ;;  %v3897_v41 = vstv %s8823_s23  ;;  %s9002_s26 = sld [smem:[#allocation7 + $0xab]]  ;;  %s5495_s23 = sshll.u32 %s6264_s16, 11 }
 0x31a   : > { %5620 = vmatmul.mubr.msk.f32.vlgmr.msra.gmra.mrb[0].mxu0 %vm678_vm9, %v511_v1  ;;  %v8688_v20 = vpop.permute.xlu1 %2817  ;;  %9475 = vst [vmem:[#allocation56_spill] sm:$0xff] %v8712_v32  ;;  %vm342_vm12 = vcmp.eq.s32.totalorder %v8712_v32, %v9476_v24  ;;  %v1629_v49 = vadd.f32 %v9480_v7, %v1615_v28  ;;  %v8761_v28 = vsel %vm343_vm13, 1.0, %v9481_v26  ;;  %v3250_v32 = vstv %s8802_s28  ;;  %s5298_s28 = sld [smem:[#allocation8 + $0x1]]  ;;  %s4990_s16 = scalar_lea.sflag [#allocation5], %s6381_s5 }
 0x31b   : > { %v8690_v45 = vpop.permute.xlu0 %3243  ;;  %v1648_v6 = vadd.f32 %v9479_v55, %v1634_v8  ;;  %v8741_v19 = vsel %vm342_vm12, 1.0, %v9481_v26  ;;  %9486 = vst [vmem:[#allocation68_spill] sm:$0xff] %v8761_v28  ;;  %v1672_v55 = vmul.f32 %v8488_v52, %v1671_v30  ;;  %v3270_v26 = vstv %s8821_s2  ;;  %s5484_s2 = sld [smem:[#allocation8 + $0x3]] }
 0x31c   : > { %9483 = vst [vmem:[#allocation66_spill] sm:$0xff] %v8741_v19  ;;  %v1635_v4 = vadd.f32 %v1633_v63, %v1629_v49  ;;  %v9488_v63 = vld [vmem:[#allocation47_spill] sm:$0xff] }
 0x31d   : > { %v1654_v33 = vadd.f32 %v1652_v5, %v1648_v6  ;;  %v1653_v6 = vmul.f32 %v8349_v42, %v1651_v43 }
 0x31e   : > { %v8695_v21 = vpop.permute.xlu1 %3850 }
 0x31f   : > { %v8700_v13 = vpop.permute.xlu0 %2835  ;;  %v1668_v8 = vadd.f32 %v9485_v35, %v1654_v33  ;;  %v9489_v35 = vld [vmem:[#allocation52_spill] sm:$0xff] }
 0x321   : > { %v1674_v49 = vadd.f32 %v1672_v55, %v1668_v8 }
 0x322   : > { %v8704_v57 = vpop.permute.xlu1 %3261 }
 0x323   : > { %v8707_v2 = vpop.permute.xlu0 %3868 }
 0x326   : > { %v8717_v23 = vpop.permute.xlu1 %2837  ;;  %v5635_v15 = vpop.f32.mrb[0].mxu1 }
 0x327   : > { %v8720_v46 = vpop.permute.xlu0 %3263  ;;  %v1316_v1 = vpop.f32.mrb[1].mxu1 }
 0x328   : > { %v5816_v11 = vpack.c.bf16 %v5635_v15, %v1316_v1 }
 0x32a   : > { %v8731_v36 = vpop.permute.xlu1 %3870  ;;  %5817 = vmatprep.subr.bf16.mxu1 %v5816_v11 }
 0x32b   : > { %v8734_v3 = vpop.permute.xlu0 %3281  ;;  %5819 = vmatpush3.bf16.msra.mxu1 %v5816_v11  ;;  %v9487_v11 = vld [vmem:[#allocation57_spill] sm:$0xff] }
 0x32c   : > { %5825 = vmatprep.subr.msk.bf16.mxu1 %vm7016_vm7, %v9463_v50  ;;  %v1649_v24 = vadd.f32 %v9487_v11, %v1635_v4  ;;  %v1688_v4 = vadd.f32 %v8146_v44, %v1674_v49  ;;  %v3837_v11 = vstv %s8749_s11  ;;  %v1673_v44 = vmul.f32 %v8521_v18, %v1671_v30  ;;  %s9019_s11 = sld [smem:[#allocation7 + $0x8f]] }
 0x32d   : > { %v3857_v49 = vstv %s8774_s17  ;;  %s1519_s17 = sld [smem:[#allocation8]] }
 0x32e   : > { %v8751_v15 = vpop.permute.xlu1 %3888  ;;  %5641 = vmatmul.mubr.msk.f32.vlgmr.msra.gmra.mrb[2].mxu1 %vm678_vm9, %v8737_v9  ;;  %v1655_v33 = vadd.f32 %v1653_v6, %v1649_v24  ;;  %v9490_v9 = vld [vmem:[#allocation51_spill] sm:$0xff]  ;;  %v3230_v6 = vstv %s8772_s7  ;;  %s9032_s7 = sld [smem:[#allocation7 + $0xaf]] }
 0x32f   : > { %v8756_v1 = vpop.permute.xlu0 %3283  ;;  %5643 = vmatprep.mubr.msk.f32.mxu1 %vm678_vm9, %v8741_v19  ;;  %5827 = vmatpush3.bf16.msk.msra.mxu1 %vm7016_vm7, %v9463_v50 }
 0x330   : > { %5829 = vmatprep.subr.msk.bf16.mxu1 %vm7027_vm8, %v9463_v50  ;;  %v1669_v43 = vadd.f32 %v9489_v35, %v1655_v33  ;;  %v8815_v35 = vld [vmem:[#allocation2 + $0x1a] sm:$0xff] }
 0x331   : > { %9491 = vst [vmem:[#allocation70_spill] sm:$0xff] %v8815_v35 }
 0x332   : > { %v8776_v7 = vpop.permute.xlu1 %3890  ;;  %5644 = vmatmul.mubr.msk.f32.gmra.mrb[4].mxu1 %vm678_vm9, %v8761_v28  ;;  %v1675_v55 = vadd.f32 %v1673_v44, %v1669_v43  ;;  %v3231_v28 = vmul.f32 %v8815_v35, %v3230_v6  ;;  %v3858_v43 = vmul.f32 %v8656_v51, %v3857_v49 }
 0x333   : > { %v8780_v5 = vpop.permute.xlu0 %3491  ;;  %5660 = vmatprep.mubr.msk.f32.mxu1 %vm678_vm9, %v9488_v63 }
 0x334   : > { %v1689_v30 = vadd.f32 %v8198_v60, %v1675_v55  ;;  %v3233_v60 = vadd.f32 %v3231_v28, %v8629_v40  ;;  %v6063_v55 = vld [vmem:[#allocation2 + $0x8] sm:$0xff] }
 0x335   : > { %v3839_v38 = vmul.f32 %v6063_v55, %v3837_v11 }
 0x336   : > { %v8787_v19 = vpop.permute.xlu1 %3493  ;;  %5661 = vmatmul.mubr.msk.f32.vlgmr.msra.gmra.mrb[6].mxu1 %vm678_vm9, %v9490_v9  ;;  %v6061_v9 = vld [vmem:[#allocation2] sm:$0xff]  ;;  %v3247_v40 = vadd.f32 %v8672_v48, %v3233_v60 }
 0x337   : > { %v8793_v8 = vpop.permute.xlu0 %3301  ;;  %5667 = vmatprep.mubr.msk.f32.mxu1 %vm678_vm9, %v1688_v4  ;;  %5831 = vmatpush3.bf16.msk.msra.mxu1 %vm7027_vm8, %v9463_v50  ;;  %v3838_v24 = vmul.f32 %v6061_v9, %v3837_v11  ;;  %v3251_v11 = vmul.f32 %v8417_v0, %v3250_v32 }
 0x338   : > { %5833 = vmatprep.subr.msk.bf16.mxu1 %vm7016_vm7, %v9463_v50 }
 0x339   : > { %v3854_v33 = vadd.f32 %v8679_v53, %v3838_v24  ;;  %v2804_v24 = vstv %s8800_s27  ;;  %s9121_s27 = scalar_lea.vmem [#allocation10], %s5110_s22 }
 0x33a   : > { %v8809_v63 = vpop.permute.xlu1 %3908 }
 0x33b   : > { %v8812_v4 = vpop.permute.xlu0 %4334  ;;  %v3860_v44 = vadd.f32 %v3858_v43, %v3854_v33  ;;  %v3855_v33 = vadd.f32 %v8695_v21, %v3839_v38  ;;  %v6064_v43 = vld [vmem:[#allocation2 + $0x18] sm:$0xff]  ;;  %v3859_v21 = vmul.f32 %v8496_v25, %v3857_v49  ;;  %v2824_v38 = vstv %s8818_s0  ;;  %s5391_s0 = sld [smem:[#allocation8 + $0x2]] }
 0x33c   : > { %v3878_v55 = vmul.f32 %v6064_v43, %v3877_v27 }
 0x33d   : > { %v3874_v28 = vadd.f32 %v8707_v2, %v3860_v44  ;;  %v3861_v43 = vadd.f32 %v3859_v21, %v3855_v33  ;;  %v8892_v33 = vld [vmem:[#allocation2 + $0x32] sm:$0xff] }
 0x33e   : > { %v8825_v53 = vpop.permute.xlu1 %3303  ;;  %5668 = vmatmul.mubr.msk.f32.vlgmr.msra.gmra.mrb[6].mxu1 %vm678_vm9, %v1689_v30 }
 0x33f   : > { %v8829_v9 = vpop.permute.xlu0 %3910  ;;  %5835 = vmatpush3.bf16.msk.msra.mxu1 %vm7016_vm7, %v9463_v50  ;;  %5674 = vmatprep.mubr.msk.f32.mxu1 %vm678_vm9, %v8309_v17  ;;  %v2805_v17 = vmul.f32 %v8320_v16, %v2804_v24  ;;  %v3880_v60 = vadd.f32 %v3878_v55, %v3874_v28  ;;  %v2825_v28 = vmul.f32 %v8488_v52, %v2824_v38  ;;  %v4323_v55 = vstv %s8845_s4  ;;  %s5003_s4 = sshll.u32 %s9121_s27, 4  ;;  %s9160_s4 = int_to_ptr.vmem [resolvable:$true] %s5003_s4 }
 0x340   : > { %5837 = vmatprep.subr.msk.bf16.mxu1 %vm7027_vm8, %v9463_v50 }
 0x341   : > { %v2807_v2 = vadd.f32 %v2805_v17, %v8625_v62  ;;  %v3252_v17 = vmul.f32 %v8434_v56, %v3250_v32 }
 0x342   : > { %v8847_v30 = vpop.permute.xlu1 %4336  ;;  %5675 = vmatmul.mubr.msk.f32.vlgmr.msra.gmra.mrb[8].mxu1 %vm678_vm9, %v8334_v61  ;;  %v8862_v61 = vld [vmem:[#allocation2 + $0x22] sm:$0xff] }
 0x343   : > { %v8855_v48 = vpop.permute.xlu0 %3321  ;;  %5681 = vmatprep.mubr.msk.f32.mxu1 %vm678_vm9, %v8486_v31  ;;  %5839 = vmatpush3.bf16.msk.msra.mxu1 %vm7027_vm8, %v9463_v50  ;;  %9492 = vst [vmem:[#allocation34_spill] sm:$0xff] %v8862_v61  ;;  %v3232_v16 = vmul.f32 %v8862_v61, %v3230_v6  ;;  %v3253_v31 = vadd.f32 %v3251_v11, %v3247_v40  ;;  %v6067_v11 = vld [vmem:[#allocation2 + $0x20] sm:$0xff] }
 0x344   : > { %5849 = vmatprep.subr.msk.bf16.mxu1 %vm7016_vm7, %v9463_v50  ;;  %v2821_v6 = vadd.f32 %v8669_v47, %v2807_v2  ;;  %v3894_v61 = vadd.f32 %v8751_v15, %v3880_v60  ;;  %v3875_v40 = vadd.f32 %v8731_v36, %v3861_v43  ;;  %v3271_v47 = vmul.f32 %v8892_v33, %v3270_v26 }
 0x345   : > { %v3234_v44 = vadd.f32 %v3232_v16, %v8650_v59  ;;  %v3267_v49 = vadd.f32 %v8704_v57, %v3253_v31  ;;  %v3898_v57 = vmul.f32 %v8531_v54, %v3897_v41  ;;  %v2806_v15 = vmul.f32 %v8349_v42, %v2804_v24 }
 0x346   : > { %v8876_v35 = vpop.permute.xlu1 %3928  ;;  %v2827_v16 = vadd.f32 %v2825_v28, %v2821_v6  ;;  %v3290_v2 = vstv %s8853_s1  ;;  %v4324_v43 = vmul.f32 %v8656_v51, %v4323_v55 }
 0x347   : > { %v8885_v62 = vpop.permute.xlu0 %4354  ;;  %v3248_v59 = vadd.f32 %v8690_v45, %v3234_v44  ;;  %v3879_v45 = vmul.f32 %v6067_v11, %v3877_v27  ;;  %v3273_v21 = vadd.f32 %v3271_v47, %v3267_v49  ;;  %v3900_v31 = vadd.f32 %v3898_v57, %v3894_v61 }
 0x348   : > { %v2808_v42 = vadd.f32 %v2806_v15, %v8643_v14  ;;  %v3917_v27 = vstv %s8866_s21  ;;  %v2841_v24 = vadd.f32 %v8700_v13, %v2827_v16  ;;  %v4343_v49 = vstv %s8878_s10  ;;  %s9158_s10 = scalar_lea.hbm %s9211_s3, %s5495_s23 }
 0x349   : > { %v3254_v32 = vadd.f32 %v3252_v17, %v3248_v59  ;;  %v3287_v61 = vadd.f32 %v8734_v3, %v3273_v21  ;;  %v3914_v44 = vadd.f32 %v8809_v63, %v3900_v31  ;;  %v3291_v13 = vmul.f32 %v8488_v52, %v3290_v2  ;;  %v6068_v63 = vld [vmem:[#allocation2 + $0x30] sm:$0xff] }
 0x34a   : > { %v8899_v36 = vpop.permute.xlu1 %3323  ;;  %5682 = vmatmul.mubr.msk.f32.vlgmr.msra.gmra.mrb[8].mxu1 %vm678_vm9, %v8559_v34  ;;  %v3881_v34 = vadd.f32 %v3879_v45, %v3875_v40  ;;  %v4340_v3 = vadd.f32 %v8812_v4, %v4324_v43  ;;  %v3310_v40 = vstv %s8883_s19  ;;  %v3918_v28 = vmul.f32 %v6068_v63, %v3917_v27  ;;  %s6135_s19 = scalar_lea.vmem %s9160_s4, 2048 }
 0x34b   : > { %v8906_v60 = vpop.permute.xlu0 %3930  ;;  %5851 = vmatpush3.bf16.msk.msra.mxu1 %vm7016_vm7, %v9463_v50  ;;  %5708 = vmatprep.mubr.msk.f32.mxu1 %vm678_vm9, %v8652_v12  ;;  %v2822_v12 = vadd.f32 %v8688_v20, %v2808_v42  ;;  %v3268_v14 = vadd.f32 %v8720_v46, %v3254_v32  ;;  %v2826_v20 = vmul.f32 %v8521_v18, %v2824_v38  ;;  %v8936_v46 = vld [vmem:[#allocation2 + $0x3a] sm:$0xff]  ;;  %v3937_v4 = vstv %s8889_s20  ;;  %p6136_p5 = scmp.ne.s32.totalorder %s9160_s4, %s6135_s19  ;;  %s6220_s20 = smov [#allocation10]  }
 0x34c   : > { %5853 = vmatprep.subr.msk.bf16.mxu1 %vm7027_vm8, %v9463_v50  ;;  %v3895_v6 = vadd.f32 %v8776_v7, %v3881_v34  ;;  %v3899_v7 = vmul.f32 %v8587_v39, %v3897_v41  ;;  %v3293_v47 = vadd.f32 %v3291_v13, %v3287_v61  ;;  %v4325_v57 = vmul.f32 %v8496_v25, %v4323_v55  ;;  %v8957_v34 = vld [vmem:[#allocation2 + $0x4a] sm:$0xff] }
 0x34d   : > { %v3920_v15 = vadd.f32 %v3918_v28, %v3914_v44  ;;  %v4344_v17 = vmul.f32 %v8491_v10, %v4343_v49  ;;  %v2828_v38 = vadd.f32 %v2826_v20, %v2822_v12  ;;  %v6071_v44 = vld [vmem:[#allocation2 + $0x38] sm:$0xff]  ;;  %v4383_v28 = vstv %s8949_s6  ;;  %p6137_p8 = pnand %p6136_p5, %p9505_p2 }
 0x34e   : > { %v4357_v59 = vpop.permute.xlu1 %4356  ;;  %5709 = vmatmul.mubr.msk.f32.vlgmr.msra.gmra.mrb[10].mxu1 %vm678_vm9, %v8662_v29  ;;  %v3272_v29 = vmul.f32 %v8936_v46, %v3270_v26  ;;  %v3901_v45 = vadd.f32 %v3899_v7, %v3895_v6  ;;  %v4363_v26 = vstv %s8903_s29  ;;  %v3307_v41 = vadd.f32 %v8793_v8, %v3293_v47  ;;  %v6072_v7 = vld [vmem:[#allocation2 + $0x48] sm:$0xff]  ;;  %s6139_s29 = sshll.u32 %s6220_s20, 4  ;;  %s6140_s29 = int_to_ptr.vmem [resolvable:$false] %s6139_s29 }
 0x34f   : > { %v3949_v51 = vpop.permute.xlu0 %3948  ;;  %5715 = vmatprep.mubr.msk.f32.mxu1 %vm678_vm9, %v2841_v24  ;;  %5855 = vmatpush3.bf16.msk.msra.mxu1 %vm7027_vm8, %v9463_v50  ;;  %v4341_v21 = vadd.f32 %v8847_v30, %v4325_v57  ;;  %v3934_v31 = vadd.f32 %v8876_v35, %v3920_v15  ;;  %v4346_v42 = vadd.f32 %v4344_v17, %v4340_v3  ;;  %p6138_p10 = pneg %p6137_p8  ;;  %p6142_p4 = scmp.lt.s32.totalorder %s9160_s4, %s6140_s29 }
 0x350   : > { %5857 = vmatprep.subr.msk.bf16.mxu1 %vm7016_vm7, %v9463_v50  ;;  %v3274_v11 = vadd.f32 %v3272_v29, %v3268_v14  ;;  %v2842_v25 = vadd.f32 %v8717_v23, %v2828_v38  ;;  %v3915_v55 = vadd.f32 %v8829_v9, %v3901_v45  ;;  %v3311_v24 = vmul.f32 %v8957_v34, %v3310_v40 }
 0x351   : > { %v4360_v61 = vadd.f32 %v8885_v62, %v4346_v42  ;;  %v4345_v8 = vmul.f32 %v8562_v58, %v4343_v49  ;;  %v3938_v30 = vmul.f32 %v8417_v0, %v3937_v4  ;;  %v3292_v35 = vmul.f32 %v8521_v18, %v3290_v2  ;;  %v9494_v42 = vld [vmem:[#allocation34_spill] sm:$0xff] }
 0x352   : > { %v4375_v16 = vpop.permute.xlu1 %4374  ;;  %v3288_v10 = vadd.f32 %v8756_v1, %v3274_v11  ;;  %v3919_v23 = vmul.f32 %v6071_v44, %v3917_v27  ;;  %v4364_v1 = vmul.f32 %v8531_v54, %v4363_v26  ;;  %v3313_v9 = vadd.f32 %v3311_v24, %v3307_v41 }
 0x353   : > { %v3951_v32 = vpop.permute.xlu0 %3950  ;;  %v4347_v12 = vadd.f32 %v4345_v8, %v4341_v21  ;;  %v3940_v14 = vadd.f32 %v3938_v30, %v3934_v31  ;;  %v3957_v54 = vstv %s8944_s30  ;;  %v4365_v29 = vmul.f32 %v8587_v39, %v4363_v26  ;;  %s6141_s30 = scalar_lea.vmem %s6140_s29, 4096 }
 0x354   : > { %v3294_v58 = vadd.f32 %v3292_v35, %v3288_v10  ;;  %v3921_v2 = vadd.f32 %v3919_v23, %v3915_v55  ;;  %v3327_v27 = vadd.f32 %v8855_v48, %v3313_v9  ;;  %v4366_v13 = vadd.f32 %v4364_v1, %v4360_v61  ;;  %v6074_v55 = vld [vmem:[#allocation2 + $0x50] sm:$0xff]  ;;  %p6143_p12 = scmp.lt.s32.totalorder %s6141_s30, %s6135_s19 }
 0x355   : > { %v4361_v6 = vadd.f32 %v4357_v59, %v4347_v12  ;;  %v3954_v49 = vadd.f32 %v3949_v51, %v3940_v14  ;;  %v3958_v47 = vmul.f32 %v6072_v7, %v3957_v54  ;;  %v9493_v51 = vld [vmem:[#allocation70_spill] sm:$0xff]  ;;  %v3977_v11 = vstv %s8968_s9 }
 0x356   : > { %v4377_v43 = vpop.permute.xlu1 %4376  ;;  %5716 = vmatmul.mubr.msk.f32.vlgmr.msra.gmra.mrb[10].mxu1 %vm678_vm9, %v2842_v25  ;;  %v3308_v3 = vadd.f32 %v8825_v53, %v3294_v58  ;;  %v3935_v63 = vadd.f32 %v8906_v60, %v3921_v2  ;;  %v4380_v20 = vadd.f32 %v4375_v16, %v4366_v13  ;;  %v8992_v53 = vld [vmem:[#allocation2 + $0x52] sm:$0xff]  ;;  %v4384_v57 = vmul.f32 %v9493_v51, %v4383_v28  ;;  %p6144_p0 = por %p6143_p12, %p6142_p4 }
 0x357   : > { %v4159_v62 = vpop.permute.xlu0 %4158  ;;  %5859 = vmatpush3.bf16.msk.msra.mxu1 %vm7016_vm7, %v9463_v50  ;;  %5722 = vmatprep.mubr.msk.f32.mxu1 %vm678_vm9, %v8780_v5  ;;  %v3312_v60 = vmul.f32 %v8992_v53, %v3310_v40  ;;  %v4367_v39 = vadd.f32 %v4365_v29, %v4361_v6  ;;  %v3960_v59 = vadd.f32 %v3958_v47, %v3954_v49  ;;  %v4403_v21 = vstv %s8979_s8 }
 0x358   : > { %5861 = vmatprep.subr.msk.bf16.mxu1 %vm7027_vm8, %v9463_v50  ;;  %v4386_v40 = vadd.f32 %v4384_v57, %v4380_v20  ;;  %v4385_v25 = vmul.f32 %v9494_v42, %v4383_v28  ;;  %v3978_v10 = vmul.f32 %v8488_v52, %v3977_v11  ;;  %v3959_v24 = vmul.f32 %v6074_v55, %v3957_v54  ;;  %v9501_v55 = vld [vmem:[#allocation67_spill] sm:$0xff]  ;;  %p6145_p7 = pnand %p6144_p0, %p6138_p10 }
 0x359   : > { %v3314_v15 = vadd.f32 %v3312_v60, %v3308_v3  ;;  %v4381_v45 = vadd.f32 %v4377_v43, %v4367_v39  ;;  %v4423_v43 = vstv %s9002_s26  ;;  %v4443_v28 = vstv %s9019_s11  ;;  %v9496_v39 = vld [vmem:[#allocation30_spill] sm:$0xff] }
 0x35a   : > { %v4161_v5 = vpop.permute.xlu1 %4160  ;;  %5723 = vmatmul.mubr.msk.f32.vlgmr.msra.gmra.mrb[12].mxu1 %vm678_vm9, %v8787_v19  ;;  %v3939_v19 = vmul.f32 %v8434_v56, %v3937_v4  ;;  %v4424_v2 = vmul.f32 %v8892_v33, %v4423_v43  ;;  %v4425_v3 = vmul.f32 %v8936_v46, %v4423_v43  ;;  %v4444_v7 = vmul.f32 %v8488_v52, %v4443_v28  ;;  %v9502_v43 = vld [vmem:[#allocation63_spill] sm:$0xff] }
 0x35b   : > { %v3969_v48 = vpop.permute.xlu0 %3968  ;;  %5729 = vmatprep.mubr.msk.f32.mxu1 %vm678_vm9, %v3327_v27  ;;  %5863 = vmatpush3.bf16.msk.msra.mxu1 %vm7027_vm8, %v9463_v50  ;;  %v3328_v4 = vadd.f32 %v8899_v36, %v3314_v15  ;;  %v4387_v8 = vadd.f32 %v4385_v25, %v4381_v45  ;;  %v4404_v36 = vmul.f32 %v8417_v0, %v4403_v21  ;;  %v4463_v47 = vstv %s9032_s7  ;;  %v9500_v25 = vld [vmem:[#allocation60_spill] sm:$0xff] }
 0x35c   : > { %5873 = vmatprep.subr.msk.bf16.mxu1 %vm7016_vm7, %v9463_v50  ;;  %v3941_v17 = vadd.f32 %v3939_v19, %v3935_v63  ;;  %v3974_v26 = vadd.f32 %v3969_v48, %v3960_v59  ;;  %v4405_v0 = vmul.f32 %v8434_v56, %v4403_v21  ;;  %v9495_v19 = vld [vmem:[#allocation59_spill] sm:$0xff]  ;;  %v4445_v37 = vmul.f32 %v8521_v18, %v4443_v28  ;;  %v9498_v21 = vld [vmem:[#allocation33_spill] sm:$0xff] }
 0x35d   : > { %vm327_vm14 = vcmp.eq.s32.totalorder %v9496_v39, %v9495_v19  ;;  %v9497_v51 = vmov 0.0   ;;  %v4464_v15 = vmul.f32 %v8957_v34, %v4463_v47  ;;  %vm328_vm15 = vcmp.eq.s32.totalorder %v9498_v21, %v9495_v19 }
 0x35e   : > { %v4395_v38 = vpop.permute.xlu1 %4394  ;;  %v3955_v41 = vadd.f32 %v3951_v32, %v3941_v17  ;;  %v3980_v30 = vadd.f32 %v3978_v10, %v3974_v26  ;;  %v9051_v57 = vsel %vm327_vm14, 1.0, %v9497_v51  ;;  %vm330_vm1 = vcmp.eq.s32.totalorder %v9500_v25, %v9495_v19 }
 0x35f   : > { %v3971_v16 = vpop.permute.xlu0 %3970  ;;  %v4400_v31 = vadd.f32 %v4395_v38, %v4386_v40  ;;  %5650 = vmatprep.mubr.msk.f32.mxu0 %vm678_vm9, %v9051_v57  ;;  %v5118_v10 = vsel %vm330_vm1, 1.0, %v9497_v51 }
 0x360   : > { %v3961_v32 = vadd.f32 %v3959_v24, %v3955_v41 }
 0x361   : > { %v4406_v1 = vadd.f32 %v4404_v36, %v4400_v31  ;;  %v9499_v31 = vld [vmem:[#allocation56_spill] sm:$0xff] }
 0x362   : > { %v4397_v61 = vpop.permute.xlu1 %4396  ;;  %5730 = vmatmul.mubr.msk.f32.vlgmr.msra.gmra.mrb[12].mxu1 %vm678_vm9, %v3328_v4  ;;  %v3975_v9 = vadd.f32 %v3971_v16, %v3961_v32  ;;  %vm329_vm0 = vcmp.eq.s32.totalorder %v9499_v31, %v9495_v19 }
 0x363   : > { %v3989_v35 = vpop.permute.xlu0 %3988  ;;  %5875 = vmatpush3.bf16.msk.msra.mxu1 %vm7016_vm7, %v9463_v50  ;;  %5756 = vmatprep.mubr.msk.f32.mxu1 %vm678_vm9, %v4159_v62  ;;  %v4401_v44 = vadd.f32 %v4397_v61, %v4387_v8  ;;  %v3979_v62 = vmul.f32 %v8521_v18, %v3977_v11  ;;  %v4465_v18 = vmul.f32 %v8992_v53, %v4463_v47  ;;  %v5116_v53 = vsel %vm328_vm15, 1.0, %v9497_v51 }
 0x364   : > { %5877 = vmatprep.subr.msk.bf16.mxu1 %vm7027_vm8, %v9463_v50  ;;  %v3994_v23 = vadd.f32 %v3989_v35, %v3980_v30  ;;  %v5117_v42 = vsel %vm329_vm0, 1.0, %v9497_v51 }
 0x365   : > { %v4407_v54 = vadd.f32 %v4405_v0, %v4401_v44  ;;  %v3981_v27 = vadd.f32 %v3979_v62, %v3975_v9  ;;  %v9503_v9 = vld [vmem:[#allocation66_spill] sm:$0xff] }
 0x366   : > { %v4415_v12 = vpop.permute.xlu1 %4414  ;;  %5757 = vmatmul.mubr.msk.f32.vlgmr.msra.gmra.mrb[14].mxu1 %vm678_vm9, %v4161_v5 }
 0x367   : > { %v4420_v14 = vadd.f32 %v4415_v12, %v4406_v1  ;;  %v3991_v58 = vpop.permute.xlu0 %3990  ;;  %5763 = vmatprep.mubr.msk.f32.mxu1 %vm678_vm9, %v3994_v23  ;;  %5879 = vmatpush3.bf16.msk.msra.mxu1 %vm7027_vm8, %v9463_v50 }
 0x368   : > { %5881 = vmatprep.subr.msk.bf16.mxu1 %vm7016_vm7, %v9463_v50  ;;  %v3995_v63 = vadd.f32 %v3991_v58, %v3981_v27 }
 0x369   : > { %v4426_v49 = vadd.f32 %v4424_v2, %v4420_v14  ;;  %v9504_v14 = vld [vmem:[#allocation68_spill] sm:$0xff] }
 0x36a   : > { %v4417_v6 = vpop.permute.xlu1 %4416 }
 0x36b   : > { %v4421_v56 = vadd.f32 %v4417_v6, %v4407_v54  ;;  %v4435_v13 = vpop.permute.xlu0 %4434 }
 0x36c   : > { %v4440_v20 = vadd.f32 %v4435_v13, %v4426_v49 }
 0x36d   : > { %v4427_v5 = vadd.f32 %v4425_v3, %v4421_v56 }
 0x36e   : > { %v4437_v33 = vpop.permute.xlu1 %4436  ;;  %5764 = vmatmul.mubr.msk.f32.vlgmr.msra.gmra.mrb[14].mxu1 %vm678_vm9, %v3995_v63  ;;  %v4446_v60 = vadd.f32 %v4444_v7, %v4440_v20 }
 0x36f   : > { %v4645_v29 = vpop.permute.xlu0 %4644  ;;  %5883 = vmatpush3.bf16.msk.msra.mxu1 %vm7016_vm7, %v9463_v50  ;;  %v4441_v46 = vadd.f32 %v4437_v33, %v4427_v5  ;;  %v1520_v5 = vstv %s1519_s17 }
 0x370   : > { %5770 = vmatprep.mubr.msk.f32.mxu1 %vm678_vm9, %v4645_v29  ;;  %5885 = vmatprep.subr.msk.bf16.mxu1 %vm7027_vm8, %v9463_v50 }
 0x371   : > { %v4447_v17 = vadd.f32 %v4445_v37, %v4441_v46 }
 0x372   : > { %v4647_v48 = vpop.permute.xlu1 %4646 }
 0x373   : > { %v4455_v59 = vpop.permute.xlu0 %4454  ;;  %5771 = vmatmul.mubr.msk.f32.vlgmr.msra.gmra.mrb[16].mxu1 %vm678_vm9, %v4647_v48 }
 0x374   : > { %v4460_v52 = vadd.f32 %v4455_v59, %v4446_v60  ;;  %5887 = vmatpush3.bf16.msk.msra.mxu1 %vm7027_vm8, %v9463_v50  ;;  %v2673_v59 = vstv %s5298_s28 }
 0x376   : > { %v4457_v38 = vpop.permute.xlu1 %4456  ;;  %v4466_v11 = vadd.f32 %v4464_v15, %v4460_v52 }
 0x377   : > { %v4461_v45 = vadd.f32 %v4457_v38, %v4447_v17  ;;  %v4475_v26 = vpop.permute.xlu0 %4474 }
 0x378   : > { %v4480_v40 = vadd.f32 %v4475_v26, %v4466_v11 }
 0x379   : > { %v4467_v16 = vadd.f32 %v4465_v18, %v4461_v45  ;;  %v3826_v45 = vstv %s5391_s0 }
 0x37a   : > { %5777 = vmatprep.mubr.msk.f32.mxu1 %vm678_vm9, %v4480_v40  ;;  %v4477_v4 = vpop.permute.xlu1 %4476 }
 0x37b   : > { %v4481_v34 = vadd.f32 %v4477_v4, %v4467_v16 }
 0x37d   : > { %5778 = vmatmul.mubr.msk.f32.vlgmr.msra.gmra.mrb[16].mxu1 %vm678_vm9, %v4481_v34 }
 0x3ed   : > { %v5621_v22 = vpop.f32.mrb[0].mxu0 }
 0x3ee   : > { %v830_v50 = vpop.f32.mrb[1].mxu0 }
 0x3ef   : > { %v5820_v41 = vpack.c.bf16 %v5621_v22, %v830_v50 }
 0x3f1   : > { %5821 = vmatprep.subr.bf16.mxu0 %v5820_v41 }
 0x3f2   : > { %5823 = vmatpush3.bf16.msra.mxu0 %v5820_v41  ;;  %v4979_v41 = vstv %s5484_s2 }
 0x3f5   : > { %5651 = vmatmul.mubr.msk.f32.vlgmr.msra.gmra.mrb[2].mxu0 %vm678_vm9, %v5116_v53 }
 0x3f6   : > { %5653 = vmatprep.mubr.msk.f32.mxu0 %vm678_vm9, %v5117_v42 }
 0x3f9   : > { %5654 = vmatmul.mubr.msk.f32.gmra.mrb[4].mxu0 %vm678_vm9, %v5118_v10 }
 0x3fa   : > { %5688 = vmatprep.mubr.msk.f32.mxu0 %vm678_vm9, %v9501_v55 }
 0x401   : > { %v5642_v24 = vpop.f32.mrb[2].mxu1 }
 0x402   : > { %v9076_v61 = vpop.f32.mrb[3].mxu1 }
 0x405   : > { %v9078_v8 = vpop.f32.mrb[4].mxu1 }
 0x406   : > { %v9080_v30 = vpop.f32.mrb[5].mxu1 }
 0x411   : > { %v5669_v35 = vpop.f32.mrb[6].mxu1 }
 0x412   : > { %v2007_v36 = vpop.f32.mrb[7].mxu1 }
 0x413   : > { %v5844_v32 = vpack.c.bf16 %v5669_v35, %v2007_v36 }
 0x41d   : > { %v5683_v44 = vpop.f32.mrb[8].mxu1 }
 0x41e   : > { %v2493_v23 = vpop.f32.mrb[9].mxu1 }
 0x41f   : > { %v5840_v1 = vpack.c.bf16 %v5683_v44, %v2493_v23 }
 0x421   : > { %5841 = vmatprep.subr.bf16.mxu0 %v5840_v1 }
 0x422   : > { %5843 = vmatpush3.bf16.msra.mxu0 %v5840_v1 }
 0x423   : > { %5845 = vmatprep.subr.bf16.mxu0 %v5844_v32 }
 0x425   : > { %5689 = vmatmul.mubr.msk.f32.vlgmr.msra.gmra.mrb[6].mxu0 %vm678_vm9, %v9502_v43 }
 0x426   : > { %5847 = vmatpush3.bf16.msra.mxu0 %v5844_v32  ;;  %5691 = vmatprep.mubr.msk.f32.mxu0 %vm678_vm9, %v9503_v9 }
 0x429   : > { %v5717_v12 = vpop.f32.mrb[10].mxu1  ;;  %5692 = vmatmul.mubr.msk.f32.gmra.mrb[8].mxu0 %vm678_vm9, %v9504_v14 }
 0x42a   : > { %v3160_v58 = vpop.f32.mrb[11].mxu1  ;;  %5698 = vmatprep.mubr.msk.f32.mxu0 %vm678_vm9, %v9051_v57 }
 0x42b   : > { %v5868_v0 = vpack.c.bf16 %v5717_v12, %v3160_v58 }
 0x42d   : > { %5699 = vmatmul.mubr.msk.f32.vlgmr.msra.gmra.mrb[6].mxu0 %vm678_vm9, %v5116_v53 }
 0x42e   : > { %5701 = vmatprep.mubr.msk.f32.mxu0 %vm678_vm9, %v5117_v42 }
 0x431   : > { %5702 = vmatmul.mubr.msk.f32.gmra.mrb[8].mxu0 %vm678_vm9, %v5118_v10 }
 0x432   : > { %5736 = vmatprep.mubr.msk.f32.mxu0 %vm678_vm9, %v9501_v55 }
 0x435   : > { %v5731_v62 = vpop.f32.mrb[12].mxu1 }
 0x436   : > { %v3646_v2 = vpop.f32.mrb[13].mxu1 }
 0x437   : > { %v5864_v54 = vpack.c.bf16 %v5731_v62, %v3646_v2 }
 0x439   : > { %5865 = vmatprep.subr.bf16.mxu0 %v5864_v54 }
 0x43a   : > { %5867 = vmatpush3.bf16.msra.mxu0 %v5864_v54 }
 0x43b   : > { %5869 = vmatprep.subr.bf16.mxu0 %v5868_v0 }
 0x43d   : > { %5737 = vmatmul.mubr.msk.f32.vlgmr.msra.gmra.mrb[10].mxu0 %vm678_vm9, %v9502_v43 }
 0x43e   : > { %5871 = vmatpush3.bf16.msra.mxu0 %v5868_v0  ;;  %5739 = vmatprep.mubr.msk.f32.mxu0 %vm678_vm9, %v9503_v9 }
 0x441   : > { %v5765_v27 = vpop.f32.mrb[14].mxu1  ;;  %5740 = vmatmul.mubr.msk.f32.gmra.mrb[12].mxu0 %vm678_vm9, %v9504_v14 }
 0x442   : > { %v4313_v6 = vpop.f32.mrb[15].mxu1  ;;  %5746 = vmatprep.mubr.msk.f32.mxu0 %vm678_vm9, %v9051_v57 }
 0x443   : > { %v5892_v49 = vpack.c.bf16 %v5765_v27, %v4313_v6 }
 0x445   : > { %5747 = vmatmul.mubr.msk.f32.vlgmr.msra.gmra.mrb[10].mxu0 %vm678_vm9, %v5116_v53 }
 0x446   : > { %5749 = vmatprep.mubr.msk.f32.mxu0 %vm678_vm9, %v5117_v42 }
 0x449   : > { %5750 = vmatmul.mubr.msk.f32.gmra.mrb[12].mxu0 %vm678_vm9, %v5118_v10 }
 0x44a   : > { %5784 = vmatprep.mubr.msk.f32.mxu0 %vm678_vm9, %v9501_v55 }
 0x450   : > { %v5779_v56 = vpop.f32.mrb[16].mxu1 }
 0x451   : > { %v4799_v13 = vpop.f32.mrb[17].mxu1 }
 0x452   : > { %v5888_v3 = vpack.c.bf16 %v5779_v56, %v4799_v13 }
 0x454   : > { %5889 = vmatprep.subr.bf16.mxu0 %v5888_v3 }
 0x455   : > { %5891 = vmatpush3.bf16.msra.mxu0 %v5888_v3 }
 0x456   : > { %5893 = vmatprep.subr.bf16.mxu0 %v5892_v49 }
 0x458   : > { %5785 = vmatmul.mubr.msk.f32.vlgmr.msra.gmra.mrb[14].mxu0 %vm678_vm9, %v9502_v43 }
 0x459   : > { %5895 = vmatpush3.bf16.msra.mxu0 %v5892_v49  ;;  %5787 = vmatprep.mubr.msk.f32.mxu0 %vm678_vm9, %v9503_v9 }
 0x45c   : > { %5788 = vmatmul.mubr.msk.f32.gmra.mrb[16].mxu0 %vm678_vm9, %v9504_v14 }
 0x45d   : > { %5794 = vmatprep.mubr.msk.f32.mxu0 %vm678_vm9, %v9051_v57 }
 0x460   : > { %5795 = vmatmul.mubr.msk.f32.vlgmr.msra.gmra.mrb[14].mxu0 %vm678_vm9, %v5116_v53 }
 0x461   : > { %5797 = vmatprep.mubr.msk.f32.mxu0 %vm678_vm9, %v5117_v42 }
 0x464   : > { %5798 = vmatmul.mubr.msk.f32.gmra.mrb[16].mxu0 %vm678_vm9, %v5118_v10 }
 0x4c8   : > { %v5652_v63 = vpop.f32.mrb[2].mxu0 }
 0x4c9   : > { %v1506_v28 = vadd.f32 %v5652_v63, %v5642_v24  ;;  %v1500_v20 = vpop.f32.mrb[3].mxu0 }
 0x4ca   : > { %v1501_v33 = vadd.f32 %v1500_v20, %v9076_v61 }
 0x4cb   : > { %v1522_v29 = vadd.f32 %v1520_v5, %v1506_v28 }
 0x4cc   : > { %v1521_v7 = vadd.f32 %v1520_v5, %v1501_v33  ;;  %v5655_v46 = vpop.f32.mrb[4].mxu0 }
 0x4cd   : > { %1527 = vst.msk [vmem:[%s9121_s27 + $0x8] sm:$0xff] %vm1525_vm2, %v1522_v29  ;;  %v1516_v47 = vadd.f32 %v5655_v46, %v9078_v8  ;;  %v1510_v48 = vpop.f32.mrb[5].mxu0 }
 0x4ce   : > { %1526 = vst.msk [vmem:[%s9121_s27] sm:$0xff] %vm1525_vm2, %v1521_v7  ;;  %v1511_v60 = vadd.f32 %v1510_v48, %v9080_v30 }
 0x4cf   : > { %v1524_v19 = vadd.f32 %v1520_v5, %v1516_v47 }
 0x4d0   : > { %v1523_v39 = vadd.f32 %v1520_v5, %v1511_v60 }
 0x4d1   : > { %1529 = vst.msk [vmem:[%s9121_s27 + $0x18] sm:$0xff] %vm1525_vm2, %v1524_v19 }
 0x4d2   : > { %1528 = vst.msk [vmem:[%s9121_s27 + $0x10] sm:$0xff] %vm1525_vm2, %v1523_v39 }
 0x500   : > { %v5700_v37 = vpop.f32.mrb[6].mxu0 }
 0x501   : > { %v2675_v51 = vadd.f32 %v5700_v37, %v2673_v59  ;;  %v2653_v57 = vpop.f32.mrb[7].mxu0 }
 0x502   : > { %v2674_v52 = vadd.f32 %v2673_v59, %v2653_v57 }
 0x503   : > { %5300 = vst.msk [vmem:[%s9121_s27 + $0x28] sm:$0xff] %vm1525_vm2, %v2675_v51 }
 0x504   : > { %5299 = vst.msk [vmem:[%s9121_s27 + $0x20] sm:$0xff] %vm1525_vm2, %v2674_v52  ;;  %v5703_v15 = vpop.f32.mrb[8].mxu0 }
 0x505   : > { %v2677_v17 = vadd.f32 %v5703_v15, %v2673_v59  ;;  %v2663_v38 = vpop.f32.mrb[9].mxu0 }
 0x506   : > { %v2676_v11 = vadd.f32 %v2673_v59, %v2663_v38 }
 0x507   : > { %5302 = vst.msk [vmem:[%s9121_s27 + $0x38] sm:$0xff] %vm1525_vm2, %v2677_v17 }
 0x508   : > { %5301 = vst.msk [vmem:[%s9121_s27 + $0x30] sm:$0xff] %vm1525_vm2, %v2676_v11 }
 0x518   : > { %v5748_v26 = vpop.f32.mrb[10].mxu0 }
 0x519   : > { %v3828_v18 = vadd.f32 %v5748_v26, %v3826_v45  ;;  %v3806_v40 = vpop.f32.mrb[11].mxu0 }
 0x51a   : > { %v3827_v16 = vadd.f32 %v3826_v45, %v3806_v40 }
 0x51b   : > { %5393 = vst.msk [vmem:[%s9121_s27 + $0x48] sm:$0xff] %vm1525_vm2, %v3828_v18 }
 0x51c   : > { %5392 = vst.msk [vmem:[%s9121_s27 + $0x40] sm:$0xff] %vm1525_vm2, %v3827_v16  ;;  %v5751_v4 = vpop.f32.mrb[12].mxu0 }
 0x51d   : > { %v3830_v34 = vadd.f32 %v5751_v4, %v3826_v45  ;;  %v3816_v22 = vpop.f32.mrb[13].mxu0 }
 0x51e   : > { %v3829_v50 = vadd.f32 %v3826_v45, %v3816_v22 }
 0x51f   : > { %5395 = vst.msk [vmem:[%s9121_s27 + $0x58] sm:$0xff] %vm1525_vm2, %v3830_v34 }
 0x520   : > { %5394 = vst.msk [vmem:[%s9121_s27 + $0x50] sm:$0xff] %vm1525_vm2, %v3829_v50 }
 0x533   : > { %v5796_v21 = vpop.f32.mrb[14].mxu0 }
 0x534   : > { %v4981_v31 = vadd.f32 %v5796_v21, %v4979_v41  ;;  %v4959_v53 = vpop.f32.mrb[15].mxu0 }
 0x535   : > { %v4980_v42 = vadd.f32 %v4979_v41, %v4959_v53 }
 0x536   : > { %5486 = vst.msk [vmem:[%s9121_s27 + $0x68] sm:$0xff] %vm1525_vm2, %v4981_v31 }
 0x537   : > { %5485 = vst.msk [vmem:[%s9121_s27 + $0x60] sm:$0xff] %vm1525_vm2, %v4980_v42  ;;  %v5799_v25 = vpop.f32.mrb[16].mxu0 }
 0x538   : > { %v4983_v10 = vadd.f32 %v5799_v25, %v4979_v41  ;;  %v4969_v55 = vpop.f32.mrb[17].mxu0 }
 0x539   : > { %v4982_v24 = vadd.f32 %v4979_v41, %v4969_v55 }
 0x53a   : > { %5488 = vst.msk [vmem:[%s9121_s27 + $0x78] sm:$0xff] %vm1525_vm2, %v4983_v10 }
 0x53b   : > { %5487 = vst.msk [vmem:[%s9121_s27 + $0x70] sm:$0xff] %vm1525_vm2, %v4982_v24 }
 0x53c   : > { %6148 = shalt.err (!%p6145_p7)
}
 0x53d   : > { %s6149_s6 = scalar_lea.hbm %s9158_s10, 2048  ;;  %s6153_s26 = scalar_lea.hbm %s9211_s3, 4096 }
 0x53e   : > { %p6150_p11 = scmp.ne.s32.totalorder %s9158_s10, %s6149_s6  ;;  %p6154_p3 = scmp.lt.u32.totalorder %s9158_s10, %s9211_s3 }
 0x53f   : > { %p6155_p9 = scmp.lt.u32.totalorder %s6153_s26, %s6149_s6  ;;  %p6157_p5 = scmp.lt.u32.totalorder %s6149_s6, %s9158_s10 }
 0x540   : > { %p6151_p13 = pnand %p6150_p11, %p9505_p2 }
 0x541   : > { %p6156_p1 = por %p6155_p9, %p6154_p3 }
 0x542   : > { %p6152_p6 = pneg %p6151_p13 }
 0x543   : > { %p6158_p8 = por %p6157_p5, %p6156_p1 }
 0x545   : > { %p6159_p10 = pnand %p6158_p8, %p6152_p6 }
 0x547   : > { %6162 = shalt.err (!%p6159_p10)
}
 0x548   : > { %s6221_s17 = smov 128   ;;  %s6222_s22 = smov 8  }
 0x549   : > { %5938 = dma.vmem_to_hbm [thread:$0]  (%p9505_p2), %s9160_s4, 2048, %s9158_s10, %s4990_s16, %s6221_s17, %s6221_s17, %s6222_s22  }
 0x54a PF: > { %s5018_s27 = sand.u32 1, %s6197_s12   ;;  %p9506_p4 = scmp.ne.s32.totalorder %s9255_s25, 0 }
 0x54b   : > { %p9507_p12 = scmp.ge.s32.totalorder %s6209_s15, 2  ;;  %s5019_s28 = scalar_lea.sflag [#allocation5], %s5018_s27 }
 0x54d   : > { %p5952_p0 = pnand %p9507_p12, %p9506_p4 }
 0x54f   : > { %6192 = dma.done.wait (!%p5952_p0), %s5019_s28, 2048  }
 0x550   : > { %6194 = vsyncadd (!%p5952_p0), %s5019_s28, 4294965248  ;;  %s9508_s0 = sld [smem:[#allocation15_spill]]  ;;  %p18_p7 = scmp.ge.s32.totalorder %s6268_s18, 4  }
 0x551   : > { %s9509_s12 = smov %s6201_s13  ;;  %s9510_s13 = smov %s6205_s14 }
 0x552   : > { %s9512_s15 = smov %s6268_s18  ;;  %20 = sbr.rel (!%p18_p7) target bundleno = 11 (0xb), region = 89 }
 0x556   : > { %s9511_s14 = smov %s9508_s0 }
 0x559   :  { %5024 = vsyncpa [#allocation4], 1 }
 0x55a   :  { %5026 = vsyncpa [#allocation4 + $0x1], 1 }
 0x55b   :  { %5027 = vsyncpa [#allocation5], 1 }
 0x55c   :  { %5029 = vsyncpa [#allocation5 + $0x1], 1 }
 0x55d   :  { %5030 = vsyncpa [#allocation6], 1 }
 0x55e   :  { %5032 = vsyncpa [#allocation6 + $0x1], 1 }
 0x55f   :  { %5033 = vsyncpa [#allocation9], 1 }

</bundles_post_ra>
